<compile_context>
chip_gen: v5e
topology: v5e:2x2
jax: 0.10.0
libtpu: 0.0.40
codegen_flags: <defaults>
</compile_context>

<pallas_src>
import functools
import math

import jax
import jax.numpy as jnp
from jax import lax
from jax.experimental import pallas as pl
from jax.experimental.pallas import tpu as pltpu

C_IN = 80                  # real channel count of the module
C_PAD = 128                # lane-dense padded channel count
N_CLASSES = 39
SE_MID = C_IN // 16        # SEBlock squeeze width (= 5), lane-padded to 128
CONV_DEFS = [(C_IN, 10, 5)] + [(C_IN, 3, 2)] * 4 + [(C_IN, 2, 2)] * 2
BN_EPS = 1e-5
GN_EPS = 1e-5

_COMPILER_PARAMS = pltpu.CompilerParams(
    dimension_semantics=("parallel",),      # batch axis -> v7x megacore
    vmem_limit_bytes=32 * 1024 * 1024,      # explicit; safe on v5e/v6e/v7x
)


def _gelu_exact(x):
    # PyTorch nn.GELU() default: exact erf formulation.
    return 0.5 * x * (1.0 + lax.erf(x * (1.0 / math.sqrt(2.0))))


def _fused_kernel(frames_ref, w0a_ref, w0b_ref, w_taps_ref,
                  bn_s_ref, bn_b_ref, gn_ref,
                  se_w1_ref, se_b1_ref, se_w2_ref, se_b2_ref,
                  fc_w_ref, fc_b_ref,
                  out_ref,
                  h0_ref, h1_ref, h2_ref, h3_ref, h4_ref, h5_ref,
                  *, lengths):
    """Whole IHC_Extract_2 conv stack + FC for ONE batch element."""
    l = lengths                                  # (l0, l1, ..., l6)
    h_refs = (h0_ref, h1_ref, h2_ref, h3_ref, h4_ref, h5_ref)

    def epilogue(h, si, with_group_norm):
        # folded BatchNorm1d (eval / running-stats form)
        h = h * bn_s_ref[si] + bn_b_ref[si]
        if with_group_norm:                      # Fp32GroupNorm(80, 80): per-channel over time
            mean = jnp.mean(h, axis=0, keepdims=True)
            var = jnp.mean(jnp.square(h - mean), axis=0, keepdims=True)
            h = (h - mean) * lax.rsqrt(var + GN_EPS)
            h = h * gn_ref[0] + gn_ref[1]
        h = _gelu_exact(h)
        # SEBlock: AdaptiveAvgPool1d(1) -> 1x1 conv -> ReLU -> 1x1 conv -> sigmoid -> rescale
        pooled = jnp.mean(h, axis=0, keepdims=True)                 # (1, 128) f32
        z = jnp.dot(pooled, se_w1_ref[si], preferred_element_type=jnp.float32)
        z = jnp.maximum(z + se_b1_ref[si], 0.0)
        s = jnp.dot(z, se_w2_ref[si], preferred_element_type=jnp.float32)
        s = jax.nn.sigmoid(s + se_b2_ref[si])
        return h * s

    # ---- stage 0: Conv1d(k=10, s=5) on the width-5 pre-framed input as two
    # K=640 bf16 MXU matmuls (taps 0-4 from frame i, taps 5-9 from frame i+1).
    xa = frames_ref[0, :l[0], :]                                     # (l0, 640) bf16
    xb = frames_ref[0, 1:l[0] + 1, :]
    h = jnp.dot(xa, w0a_ref[...], preferred_element_type=jnp.float32)
    h = h + jnp.dot(xb, w0b_ref[...], preferred_element_type=jnp.float32)
    h = epilogue(h, 0, True)
    h0_ref[...] = h                                                  # f32 VMEM scratch

    # ---- stages 1-6: taps are sublane-strided (stride=2) loads from the
    # previous stage's VMEM scratch; one (128,128) bf16 matmul per tap.
    tap = 0
    for st, k in enumerate((3, 3, 3, 3, 2, 2)):
        si = st + 1
        l_out = l[si]
        src = h_refs[st]
        acc = None
        for t in range(k):
            x_t = src[pl.ds(t, l_out, stride=2), :].astype(jnp.bfloat16)
            d = jnp.dot(x_t, w_taps_ref[tap + t],
                        preferred_element_type=jnp.float32)
            acc = d if acc is None else acc + d
        tap += k
        h = epilogue(acc, si, False)
        if si < 6:
            h_refs[si][...] = h

    # ---- final nn.Linear(80, n_classes), lane-padded to 128.
    y = jnp.dot(h.astype(jnp.bfloat16), fc_w_ref[...],
                preferred_element_type=jnp.float32) + fc_b_ref[0]
    out_ref[0] = y


def _full_spec(a):
    n = a.ndim
    return pl.BlockSpec(a.shape, lambda i, _n=n: (0,) * _n)


# ----------------------------------------------------------------------------
# Forward
# ----------------------------------------------------------------------------

def ihc_extract_2_forward(x_bct, params):
    """x_bct: (B, 80, T) IHC-feature tensor.  Returns (B, n_classes, T')."""
    b, c_in, t = x_bct.shape
    assert c_in == C_IN
    lens = [t]
    for (_, k, s) in CONV_DEFS:
        lens.append((lens[-1] - k) // s + 1)
    l0, l6 = lens[1], lens[7]

    # Boundary pass (one fused XLA op): bf16 cast -> NCW->NWC transpose ->
    # channel pad 80->128 -> width-5 framing for stage 0 (pure reshape when 5|T).
    x = jnp.transpose(x_bct.astype(jnp.bfloat16), (0, 2, 1))
    rows = 5 * max(-(-t // 5), l0 + 1)
    x = jnp.pad(x, ((0, 0), (0, rows - t), (0, C_PAD - C_IN)))
    frames = x.reshape(b, rows // 5, 5 * C_PAD)

    args = (frames, params["w0a"], params["w0b"], params["w_taps"],
            params["bn_scale"], params["bn_bias"], params["gn"],
            params["se_w1"], params["se_b1"], params["se_w2"], params["se_b2"],
            params["fc_w"], params["fc_b"])

    in_specs = ([pl.BlockSpec((1, frames.shape[1], frames.shape[2]),
                              lambda i: (i, 0, 0))]
                + [_full_spec(a) for a in args[1:]])

    kernel = functools.partial(_fused_kernel, lengths=tuple(lens[1:]))
    out = pl.pallas_call(
        kernel,
        grid=(b,),
        in_specs=in_specs,
        out_specs=pl.BlockSpec((1, l6, C_PAD), lambda i: (i, 0, 0)),
        out_shape=jax.ShapeDtypeStruct((b, l6, C_PAD), jnp.float32),
        scratch_shapes=[pltpu.VMEM((lens[i + 1], C_PAD), jnp.float32)
                        for i in range(6)],
        compiler_params=_COMPILER_PARAMS,
    )(*args)

    y = out[:, :, :N_CLASSES]                  # drop lane padding
    return jnp.transpose(y, (0, 2, 1))         # (B, n_classes, T')


# ----------------------------------------------------------------------------
# Parameter construction (random; the real checkpoint is external).
# All pads are exactly zero so lanes 80-127 stay zero through every stage.
# ----------------------------------------------------------------------------

def _pad_row(v, width=C_PAD):
    out = jnp.zeros((1, width), jnp.float32)
    return out.at[0, :v.shape[0]].set(v)


def _pad2(m, shape):
    out = jnp.zeros(shape, jnp.float32)
    return out.at[:m.shape[0], :m.shape[1]].set(m)


def init_params(key):
    w0a = w0b = gn = None
    w_taps, bn_s, bn_b = [], [], []
    se_w1, se_b1, se_w2, se_b2 = [], [], [], []
    for i, (dim, k, stride) in enumerate(CONV_DEFS):
        key, *sub = jax.random.split(key, 12)
        fan_in = C_IN * k
        # nn.init.kaiming_normal_ (fan_in, relu gain): std = sqrt(2 / fan_in)
        w = jax.random.normal(sub[0], (dim, C_IN, k), jnp.float32) * math.sqrt(2.0 / fan_in)
        # (C_out, C_in, K) -> (K, C_in_pad, C_out_pad), tap-major, zero-padded.
        wt = jnp.zeros((k, C_PAD, C_PAD), jnp.float32)
        wt = wt.at[:, :C_IN, :dim].set(jnp.transpose(w, (2, 1, 0))).astype(jnp.bfloat16)
        if i == 0:                              # k=10, s=5 -> two K=640 halves
            w0a = wt[:stride].reshape(stride * C_PAD, C_PAD)
            w0b = wt[stride:].reshape((k - stride) * C_PAD, C_PAD)
        else:                                   # per-tap (128, 128) matrices
            w_taps.append(wt)

        gamma = 1.0 + 0.1 * jax.random.normal(sub[1], (dim,), jnp.float32)
        beta = 0.1 * jax.random.normal(sub[2], (dim,), jnp.float32)
        rmean = 0.1 * jax.random.normal(sub[3], (dim,), jnp.float32)
        rvar = 1.0 + 0.1 * jax.random.uniform(sub[4], (dim,), jnp.float32)
        scale = gamma / jnp.sqrt(rvar + BN_EPS)
        bn_s.append(_pad_row(scale))
        bn_b.append(_pad_row(beta - rmean * scale))

        if i == 0:
            gn = jnp.concatenate(
                [_pad_row(1.0 + 0.1 * jax.random.normal(sub[5], (dim,), jnp.float32)),
                 _pad_row(0.1 * jax.random.normal(sub[6], (dim,), jnp.float32))],
                axis=0)                          # (2, 128): [gamma; beta]

        se_w1.append(_pad2(jax.random.normal(sub[7], (dim, SE_MID), jnp.float32)
                           / math.sqrt(dim), (C_PAD, C_PAD))[None])
        se_b1.append(_pad_row(0.1 * jax.random.normal(sub[8], (SE_MID,), jnp.float32)))
        se_w2.append(_pad2(jax.random.normal(sub[9], (SE_MID, dim), jnp.float32)
                           / math.sqrt(SE_MID), (C_PAD, C_PAD))[None])
        se_b2.append(_pad_row(0.1 * jax.random.normal(sub[10], (dim,), jnp.float32)))

    key, k1, k2 = jax.random.split(key, 3)
    bound = 1.0 / math.sqrt(C_IN)
    fc_w = jax.random.uniform(k1, (C_IN, N_CLASSES), jnp.float32,
                              minval=-bound, maxval=bound)
    fc_b = jax.random.uniform(k2, (N_CLASSES,), jnp.float32,
                              minval=-bound, maxval=bound)
    fc_w_pad = (jnp.zeros((C_PAD, C_PAD), jnp.float32)
                .at[:C_IN, :N_CLASSES].set(fc_w).astype(jnp.bfloat16))

    return dict(
        w0a=w0a, w0b=w0b, w_taps=jnp.concatenate(w_taps, axis=0),   # (16,128,128)
        bn_scale=jnp.concatenate(bn_s, 0), bn_bias=jnp.concatenate(bn_b, 0),
        gn=gn,
        se_w1=jnp.concatenate(se_w1, 0), se_b1=jnp.concatenate(se_b1, 0),
        se_w2=jnp.concatenate(se_w2, 0), se_b2=jnp.concatenate(se_b2, 0),
        fc_w=fc_w_pad, fc_b=_pad_row(fc_b))


if __name__ == "__main__":
    key = jax.random.PRNGKey(0)
    pkey, xkey = jax.random.split(key)
    params = init_params(pkey)

    B, T = 2, 1000
    x = jax.random.normal(xkey, (B, C_IN, T), jnp.float32)

    fwd = jax.jit(ihc_extract_2_forward)
    out = jax.block_until_ready(fwd(x, params))

    # expected downsampled length
    l = T
    for (_, k, s) in CONV_DEFS:
        l = (l - k) // s + 1
    assert out.shape == (B, N_CLASSES, l), out.shape
    assert bool(jnp.all(jnp.isfinite(out)))
    print("KERNEL_OK")
</pallas_src>

<mosaic_0001>
module attributes {stable_mosaic.version = 11 : i64} {
  func.func @_fused_kernel(%arg0: i32, %arg1: memref<1x200x640xbf16, #tpu.memory_space<vmem>>, %arg2: memref<640x128xbf16, #tpu.memory_space<vmem>>, %arg3: memref<640x128xbf16, #tpu.memory_space<vmem>>, %arg4: memref<16x128x128xbf16, #tpu.memory_space<vmem>>, %arg5: memref<7x128xf32, #tpu.memory_space<vmem>>, %arg6: memref<7x128xf32, #tpu.memory_space<vmem>>, %arg7: memref<2x128xf32, #tpu.memory_space<vmem>>, %arg8: memref<7x128x128xf32, #tpu.memory_space<vmem>>, %arg9: memref<7x128xf32, #tpu.memory_space<vmem>>, %arg10: memref<7x128x128xf32, #tpu.memory_space<vmem>>, %arg11: memref<7x128xf32, #tpu.memory_space<vmem>>, %arg12: memref<128x128xbf16, #tpu.memory_space<vmem>>, %arg13: memref<1x128xf32, #tpu.memory_space<vmem>>, %arg14: memref<1x2x128xf32, #tpu.memory_space<vmem>>, %arg15: memref<199x128xf32, #tpu.memory_space<vmem>>, %arg16: memref<99x128xf32, #tpu.memory_space<vmem>>, %arg17: memref<49x128xf32, #tpu.memory_space<vmem>>, %arg18: memref<24x128xf32, #tpu.memory_space<vmem>>, %arg19: memref<11x128xf32, #tpu.memory_space<vmem>>, %arg20: memref<5x128xf32, #tpu.memory_space<vmem>>) attributes {dimension_semantics = [#tpu.dimension_semantics<parallel>], iteration_bounds = array<i64: 2>, scalar_prefetch = 0 : i64, scratch_operands = 6 : i64, tpu.core_type = #tpu.core_type<tc>, window_params = [{transform_indices = @transform_0, window_bounds = array<i64: 1, 200, 640>}, {pipeline_mode = #tpu.pipeline_mode<synchronous>, transform_indices = @transform_1, window_bounds = array<i64: 640, 128>}, {pipeline_mode = #tpu.pipeline_mode<synchronous>, transform_indices = @transform_2, window_bounds = array<i64: 640, 128>}, {pipeline_mode = #tpu.pipeline_mode<synchronous>, transform_indices = @transform_3, window_bounds = array<i64: 16, 128, 128>}, {pipeline_mode = #tpu.pipeline_mode<synchronous>, transform_indices = @transform_4, window_bounds = array<i64: 7, 128>}, {pipeline_mode = #tpu.pipeline_mode<synchronous>, transform_indices = @transform_5, window_bounds = array<i64: 7, 128>}, {pipeline_mode = #tpu.pipeline_mode<synchronous>, transform_indices = @transform_6, window_bounds = array<i64: 2, 128>}, {pipeline_mode = #tpu.pipeline_mode<synchronous>, transform_indices = @transform_7, window_bounds = array<i64: 7, 128, 128>}, {pipeline_mode = #tpu.pipeline_mode<synchronous>, transform_indices = @transform_8, window_bounds = array<i64: 7, 128>}, {pipeline_mode = #tpu.pipeline_mode<synchronous>, transform_indices = @transform_9, window_bounds = array<i64: 7, 128, 128>}, {pipeline_mode = #tpu.pipeline_mode<synchronous>, transform_indices = @transform_10, window_bounds = array<i64: 7, 128>}, {pipeline_mode = #tpu.pipeline_mode<synchronous>, transform_indices = @transform_11, window_bounds = array<i64: 128, 128>}, {pipeline_mode = #tpu.pipeline_mode<synchronous>, transform_indices = @transform_12, window_bounds = array<i64: 1, 128>}, {transform_indices = @transform_13, window_bounds = array<i64: 1, 2, 128>}]} {
    %c0 = arith.constant 0 : index
    %c0_0 = arith.constant 0 : index
    %c0_1 = arith.constant 0 : index
    %0 = vector.load %arg1[%c0, %c0_0, %c0_1] : memref<1x200x640xbf16, #tpu.memory_space<vmem>>, vector<1x199x640xbf16>
    %1 = vector.shape_cast %0 : vector<1x199x640xbf16> to vector<199x640xbf16>
    %c0_2 = arith.constant 0 : index
    %c1 = arith.constant 1 : index
    %c0_3 = arith.constant 0 : index
    %2 = vector.load %arg1[%c0_2, %c1, %c0_3] : memref<1x200x640xbf16, #tpu.memory_space<vmem>>, vector<1x199x640xbf16>
    %3 = vector.shape_cast %2 : vector<1x199x640xbf16> to vector<199x640xbf16>
    %c0_4 = arith.constant 0 : index
    %c0_5 = arith.constant 0 : index
    %4 = vector.load %arg2[%c0_4, %c0_5] : memref<640x128xbf16, #tpu.memory_space<vmem>>, vector<640x128xbf16>
    %cst = arith.constant dense<0.000000e+00> : vector<199x128xf32>
    %5 = tpu.matmul %1, %4, %cst {dimension_numbers = #tpu.dot_dimension_numbers<[1], [0], [0], [1], [0, 0, 1, 1], [], []>} : vector<199x640xbf16>, vector<640x128xbf16>, vector<199x128xf32> -> vector<199x128xf32>
    %c0_6 = arith.constant 0 : index
    %c0_7 = arith.constant 0 : index
    %6 = vector.load %arg3[%c0_6, %c0_7] : memref<640x128xbf16, #tpu.memory_space<vmem>>, vector<640x128xbf16>
    %cst_8 = arith.constant dense<0.000000e+00> : vector<199x128xf32>
    %7 = tpu.matmul %3, %6, %cst_8 {dimension_numbers = #tpu.dot_dimension_numbers<[1], [0], [0], [1], [0, 0, 1, 1], [], []>} : vector<199x640xbf16>, vector<640x128xbf16>, vector<199x128xf32> -> vector<199x128xf32>
    %8 = arith.addf %5, %7 : vector<199x128xf32>
    %c0_9 = arith.constant 0 : index
    %c0_10 = arith.constant 0 : index
    %9 = vector.load %arg5[%c0_9, %c0_10] : memref<7x128xf32, #tpu.memory_space<vmem>>, vector<1x128xf32>
    %10 = vector.shape_cast %9 : vector<1x128xf32> to vector<128xf32>
    %11 = vector.shape_cast %10 : vector<128xf32> to vector<1x128xf32>
    %12 = vector.broadcast %11 : vector<1x128xf32> to vector<199x128xf32>
    %13 = arith.mulf %8, %12 : vector<199x128xf32>
    %c0_11 = arith.constant 0 : index
    %c0_12 = arith.constant 0 : index
    %14 = vector.load %arg6[%c0_11, %c0_12] : memref<7x128xf32, #tpu.memory_space<vmem>>, vector<1x128xf32>
    %15 = vector.shape_cast %14 : vector<1x128xf32> to vector<128xf32>
    %16 = vector.shape_cast %15 : vector<128xf32> to vector<1x128xf32>
    %17 = vector.broadcast %16 : vector<1x128xf32> to vector<199x128xf32>
    %18 = arith.addf %13, %17 : vector<199x128xf32>
    %cst_13 = arith.constant dense<0.000000e+00> : vector<128xf32>
    %19 = vector.multi_reduction <add>, %18, %cst_13 [0] : vector<199x128xf32> to vector<128xf32>
    %20 = vector.shape_cast %19 : vector<128xf32> to vector<1x128xf32>
    %cst_14 = arith.constant 1.990000e+02 : f32
    %21 = vector.broadcast %cst_14 : f32 to vector<1x128xf32>
    %22 = arith.divf %20, %21 : vector<1x128xf32>
    %23 = vector.broadcast %22 : vector<1x128xf32> to vector<199x128xf32>
    %24 = arith.subf %18, %23 : vector<199x128xf32>
    %25 = arith.mulf %24, %24 : vector<199x128xf32>
    %cst_15 = arith.constant dense<0.000000e+00> : vector<128xf32>
    %26 = vector.multi_reduction <add>, %25, %cst_15 [0] : vector<199x128xf32> to vector<128xf32>
    %27 = vector.shape_cast %26 : vector<128xf32> to vector<1x128xf32>
    %cst_16 = arith.constant 1.990000e+02 : f32
    %28 = vector.broadcast %cst_16 : f32 to vector<1x128xf32>
    %29 = arith.divf %27, %28 : vector<1x128xf32>
    %30 = vector.broadcast %22 : vector<1x128xf32> to vector<199x128xf32>
    %31 = arith.subf %18, %30 : vector<199x128xf32>
    %cst_17 = arith.constant 9.99999974E-6 : f32
    %32 = vector.broadcast %cst_17 : f32 to vector<1x128xf32>
    %33 = arith.addf %29, %32 : vector<1x128xf32>
    %34 = math.rsqrt %33 : vector<1x128xf32>
    %35 = vector.broadcast %34 : vector<1x128xf32> to vector<199x128xf32>
    %36 = arith.mulf %31, %35 : vector<199x128xf32>
    %c0_18 = arith.constant 0 : index
    %c0_19 = arith.constant 0 : index
    %37 = vector.load %arg7[%c0_18, %c0_19] : memref<2x128xf32, #tpu.memory_space<vmem>>, vector<1x128xf32>
    %38 = vector.shape_cast %37 : vector<1x128xf32> to vector<128xf32>
    %39 = vector.shape_cast %38 : vector<128xf32> to vector<1x128xf32>
    %40 = vector.broadcast %39 : vector<1x128xf32> to vector<199x128xf32>
    %41 = arith.mulf %36, %40 : vector<199x128xf32>
    %c1_20 = arith.constant 1 : index
    %c0_21 = arith.constant 0 : index
    %42 = vector.load %arg7[%c1_20, %c0_21] : memref<2x128xf32, #tpu.memory_space<vmem>>, vector<1x128xf32>
    %43 = vector.shape_cast %42 : vector<1x128xf32> to vector<128xf32>
    %44 = vector.shape_cast %43 : vector<128xf32> to vector<1x128xf32>
    %45 = vector.broadcast %44 : vector<1x128xf32> to vector<199x128xf32>
    %46 = arith.addf %41, %45 : vector<199x128xf32>
    %cst_22 = arith.constant 5.000000e-01 : f32
    %47 = vector.broadcast %cst_22 : f32 to vector<199x128xf32>
    %48 = arith.mulf %47, %46 : vector<199x128xf32>
    %cst_23 = arith.constant 0.707106769 : f32
    %49 = vector.broadcast %cst_23 : f32 to vector<199x128xf32>
    %50 = arith.mulf %46, %49 : vector<199x128xf32>
    %51 = math.erf %50 : vector<199x128xf32>
    %cst_24 = arith.constant 1.000000e+00 : f32
    %52 = vector.broadcast %cst_24 : f32 to vector<199x128xf32>
    %53 = arith.addf %52, %51 : vector<199x128xf32>
    %54 = arith.mulf %48, %53 : vector<199x128xf32>
    %cst_25 = arith.constant dense<0.000000e+00> : vector<128xf32>
    %55 = vector.multi_reduction <add>, %54, %cst_25 [0] : vector<199x128xf32> to vector<128xf32>
    %56 = vector.shape_cast %55 : vector<128xf32> to vector<1x128xf32>
    %cst_26 = arith.constant 1.990000e+02 : f32
    %57 = vector.broadcast %cst_26 : f32 to vector<1x128xf32>
    %58 = arith.divf %56, %57 : vector<1x128xf32>
    %c0_27 = arith.constant 0 : index
    %c0_28 = arith.constant 0 : index
    %c0_29 = arith.constant 0 : index
    %59 = vector.load %arg8[%c0_27, %c0_28, %c0_29] : memref<7x128x128xf32, #tpu.memory_space<vmem>>, vector<1x128x128xf32>
    %60 = vector.shape_cast %59 : vector<1x128x128xf32> to vector<128x128xf32>
    %cst_30 = arith.constant dense<0.000000e+00> : vector<1x128xf32>
    %61 = tpu.matmul %58, %60, %cst_30 {dimension_numbers = #tpu.dot_dimension_numbers<[1], [0], [0], [1], [0, 0, 1, 1], [], []>} : vector<1x128xf32>, vector<128x128xf32>, vector<1x128xf32> -> vector<1x128xf32>
    %c0_31 = arith.constant 0 : index
    %c0_32 = arith.constant 0 : index
    %62 = vector.load %arg9[%c0_31, %c0_32] : memref<7x128xf32, #tpu.memory_space<vmem>>, vector<1x128xf32>
    %63 = vector.shape_cast %62 : vector<1x128xf32> to vector<128xf32>
    %64 = vector.shape_cast %63 : vector<128xf32> to vector<1x128xf32>
    %65 = arith.addf %61, %64 : vector<1x128xf32>
    %cst_33 = arith.constant 0.000000e+00 : f32
    %66 = vector.broadcast %cst_33 : f32 to vector<1x128xf32>
    %67 = arith.maximumf %65, %66 : vector<1x128xf32>
    %c0_34 = arith.constant 0 : index
    %c0_35 = arith.constant 0 : index
    %c0_36 = arith.constant 0 : index
    %68 = vector.load %arg10[%c0_34, %c0_35, %c0_36] : memref<7x128x128xf32, #tpu.memory_space<vmem>>, vector<1x128x128xf32>
    %69 = vector.shape_cast %68 : vector<1x128x128xf32> to vector<128x128xf32>
    %cst_37 = arith.constant dense<0.000000e+00> : vector<1x128xf32>
    %70 = tpu.matmul %67, %69, %cst_37 {dimension_numbers = #tpu.dot_dimension_numbers<[1], [0], [0], [1], [0, 0, 1, 1], [], []>} : vector<1x128xf32>, vector<128x128xf32>, vector<1x128xf32> -> vector<1x128xf32>
    %c0_38 = arith.constant 0 : index
    %c0_39 = arith.constant 0 : index
    %71 = vector.load %arg11[%c0_38, %c0_39] : memref<7x128xf32, #tpu.memory_space<vmem>>, vector<1x128xf32>
    %72 = vector.shape_cast %71 : vector<1x128xf32> to vector<128xf32>
    %73 = vector.shape_cast %72 : vector<128xf32> to vector<1x128xf32>
    %74 = arith.addf %70, %73 : vector<1x128xf32>
    %75 = arith.negf %74 : vector<1x128xf32>
    %76 = math.exp %75 : vector<1x128xf32>
    %cst_40 = arith.constant 1.000000e+00 : f32
    %77 = vector.broadcast %cst_40 : f32 to vector<1x128xf32>
    %78 = arith.addf %77, %76 : vector<1x128xf32>
    %79 = arith.divf %77, %78 : vector<1x128xf32>
    %80 = vector.broadcast %79 : vector<1x128xf32> to vector<199x128xf32>
    %81 = arith.mulf %54, %80 : vector<199x128xf32>
    %c0_41 = arith.constant 0 : index
    %c0_42 = arith.constant 0 : index
    %82 = vector.load %arg15[%c0_41, %c0_42] : memref<199x128xf32, #tpu.memory_space<vmem>>, vector<199x128xf32>
    tpu.vector_store %arg15[%c0_41, %c0_42], %81 {strides = array<i32>} : memref<199x128xf32, #tpu.memory_space<vmem>>, vector<199x128xf32>,
    %c0_43 = arith.constant 0 : index
    %c0_44 = arith.constant 0 : index
    %83 = tpu.strided_load %arg15[%c0_43, %c0_44] {strides = array<i32: 2, 1>} : memref<199x128xf32, #tpu.memory_space<vmem>>, vector<99x128xf32>
    %84 = arith.truncf %83 : vector<99x128xf32> to vector<99x128xbf16>
    %c0_45 = arith.constant 0 : index
    %c0_46 = arith.constant 0 : index
    %c0_47 = arith.constant 0 : index
    %85 = vector.load %arg4[%c0_45, %c0_46, %c0_47] : memref<16x128x128xbf16, #tpu.memory_space<vmem>>, vector<1x128x128xbf16>
    %86 = vector.shape_cast %85 : vector<1x128x128xbf16> to vector<128x128xbf16>
    %cst_48 = arith.constant dense<0.000000e+00> : vector<99x128xf32>
    %87 = tpu.matmul %84, %86, %cst_48 {dimension_numbers = #tpu.dot_dimension_numbers<[1], [0], [0], [1], [0, 0, 1, 1], [], []>} : vector<99x128xbf16>, vector<128x128xbf16>, vector<99x128xf32> -> vector<99x128xf32>
    %c1_49 = arith.constant 1 : index
    %c0_50 = arith.constant 0 : index
    %88 = tpu.strided_load %arg15[%c1_49, %c0_50] {strides = array<i32: 2, 1>} : memref<199x128xf32, #tpu.memory_space<vmem>>, vector<99x128xf32>
    %89 = arith.truncf %88 : vector<99x128xf32> to vector<99x128xbf16>
    %c1_51 = arith.constant 1 : index
    %c0_52 = arith.constant 0 : index
    %c0_53 = arith.constant 0 : index
    %90 = vector.load %arg4[%c1_51, %c0_52, %c0_53] : memref<16x128x128xbf16, #tpu.memory_space<vmem>>, vector<1x128x128xbf16>
    %91 = vector.shape_cast %90 : vector<1x128x128xbf16> to vector<128x128xbf16>
    %cst_54 = arith.constant dense<0.000000e+00> : vector<99x128xf32>
    %92 = tpu.matmul %89, %91, %cst_54 {dimension_numbers = #tpu.dot_dimension_numbers<[1], [0], [0], [1], [0, 0, 1, 1], [], []>} : vector<99x128xbf16>, vector<128x128xbf16>, vector<99x128xf32> -> vector<99x128xf32>
    %93 = arith.addf %87, %92 : vector<99x128xf32>
    %c2 = arith.constant 2 : index
    %c0_55 = arith.constant 0 : index
    %94 = tpu.strided_load %arg15[%c2, %c0_55] {strides = array<i32: 2, 1>} : memref<199x128xf32, #tpu.memory_space<vmem>>, vector<99x128xf32>
    %95 = arith.truncf %94 : vector<99x128xf32> to vector<99x128xbf16>
    %c2_56 = arith.constant 2 : index
    %c0_57 = arith.constant 0 : index
    %c0_58 = arith.constant 0 : index
    %96 = vector.load %arg4[%c2_56, %c0_57, %c0_58] : memref<16x128x128xbf16, #tpu.memory_space<vmem>>, vector<1x128x128xbf16>
    %97 = vector.shape_cast %96 : vector<1x128x128xbf16> to vector<128x128xbf16>
    %cst_59 = arith.constant dense<0.000000e+00> : vector<99x128xf32>
    %98 = tpu.matmul %95, %97, %cst_59 {dimension_numbers = #tpu.dot_dimension_numbers<[1], [0], [0], [1], [0, 0, 1, 1], [], []>} : vector<99x128xbf16>, vector<128x128xbf16>, vector<99x128xf32> -> vector<99x128xf32>
    %99 = arith.addf %93, %98 : vector<99x128xf32>
    %c1_60 = arith.constant 1 : index
    %c0_61 = arith.constant 0 : index
    %100 = vector.load %arg5[%c1_60, %c0_61] : memref<7x128xf32, #tpu.memory_space<vmem>>, vector<1x128xf32>
    %101 = vector.shape_cast %100 : vector<1x128xf32> to vector<128xf32>
    %102 = vector.shape_cast %101 : vector<128xf32> to vector<1x128xf32>
    %103 = vector.broadcast %102 : vector<1x128xf32> to vector<99x128xf32>
    %104 = arith.mulf %99, %103 : vector<99x128xf32>
    %c1_62 = arith.constant 1 : index
    %c0_63 = arith.constant 0 : index
    %105 = vector.load %arg6[%c1_62, %c0_63] : memref<7x128xf32, #tpu.memory_space<vmem>>, vector<1x128xf32>
    %106 = vector.shape_cast %105 : vector<1x128xf32> to vector<128xf32>
    %107 = vector.shape_cast %106 : vector<128xf32> to vector<1x128xf32>
    %108 = vector.broadcast %107 : vector<1x128xf32> to vector<99x128xf32>
    %109 = arith.addf %104, %108 : vector<99x128xf32>
    %cst_64 = arith.constant 5.000000e-01 : f32
    %110 = vector.broadcast %cst_64 : f32 to vector<99x128xf32>
    %111 = arith.mulf %110, %109 : vector<99x128xf32>
    %cst_65 = arith.constant 0.707106769 : f32
    %112 = vector.broadcast %cst_65 : f32 to vector<99x128xf32>
    %113 = arith.mulf %109, %112 : vector<99x128xf32>
    %114 = math.erf %113 : vector<99x128xf32>
    %cst_66 = arith.constant 1.000000e+00 : f32
    %115 = vector.broadcast %cst_66 : f32 to vector<99x128xf32>
    %116 = arith.addf %115, %114 : vector<99x128xf32>
    %117 = arith.mulf %111, %116 : vector<99x128xf32>
    %cst_67 = arith.constant dense<0.000000e+00> : vector<128xf32>
    %118 = vector.multi_reduction <add>, %117, %cst_67 [0] : vector<99x128xf32> to vector<128xf32>
    %119 = vector.shape_cast %118 : vector<128xf32> to vector<1x128xf32>
    %cst_68 = arith.constant 9.900000e+01 : f32
    %120 = vector.broadcast %cst_68 : f32 to vector<1x128xf32>
    %121 = arith.divf %119, %120 : vector<1x128xf32>
    %c1_69 = arith.constant 1 : index
    %c0_70 = arith.constant 0 : index
    %c0_71 = arith.constant 0 : index
    %122 = vector.load %arg8[%c1_69, %c0_70, %c0_71] : memref<7x128x128xf32, #tpu.memory_space<vmem>>, vector<1x128x128xf32>
    %123 = vector.shape_cast %122 : vector<1x128x128xf32> to vector<128x128xf32>
    %cst_72 = arith.constant dense<0.000000e+00> : vector<1x128xf32>
    %124 = tpu.matmul %121, %123, %cst_72 {dimension_numbers = #tpu.dot_dimension_numbers<[1], [0], [0], [1], [0, 0, 1, 1], [], []>} : vector<1x128xf32>, vector<128x128xf32>, vector<1x128xf32> -> vector<1x128xf32>
    %c1_73 = arith.constant 1 : index
    %c0_74 = arith.constant 0 : index
    %125 = vector.load %arg9[%c1_73, %c0_74] : memref<7x128xf32, #tpu.memory_space<vmem>>, vector<1x128xf32>
    %126 = vector.shape_cast %125 : vector<1x128xf32> to vector<128xf32>
    %127 = vector.shape_cast %126 : vector<128xf32> to vector<1x128xf32>
    %128 = arith.addf %124, %127 : vector<1x128xf32>
    %cst_75 = arith.constant 0.000000e+00 : f32
    %129 = vector.broadcast %cst_75 : f32 to vector<1x128xf32>
    %130 = arith.maximumf %128, %129 : vector<1x128xf32>
    %c1_76 = arith.constant 1 : index
    %c0_77 = arith.constant 0 : index
    %c0_78 = arith.constant 0 : index
    %131 = vector.load %arg10[%c1_76, %c0_77, %c0_78] : memref<7x128x128xf32, #tpu.memory_space<vmem>>, vector<1x128x128xf32>
    %132 = vector.shape_cast %131 : vector<1x128x128xf32> to vector<128x128xf32>
    %cst_79 = arith.constant dense<0.000000e+00> : vector<1x128xf32>
    %133 = tpu.matmul %130, %132, %cst_79 {dimension_numbers = #tpu.dot_dimension_numbers<[1], [0], [0], [1], [0, 0, 1, 1], [], []>} : vector<1x128xf32>, vector<128x128xf32>, vector<1x128xf32> -> vector<1x128xf32>
    %c1_80 = arith.constant 1 : index
    %c0_81 = arith.constant 0 : index
    %134 = vector.load %arg11[%c1_80, %c0_81] : memref<7x128xf32, #tpu.memory_space<vmem>>, vector<1x128xf32>
    %135 = vector.shape_cast %134 : vector<1x128xf32> to vector<128xf32>
    %136 = vector.shape_cast %135 : vector<128xf32> to vector<1x128xf32>
    %137 = arith.addf %133, %136 : vector<1x128xf32>
    %138 = arith.negf %137 : vector<1x128xf32>
    %139 = math.exp %138 : vector<1x128xf32>
    %cst_82 = arith.constant 1.000000e+00 : f32
    %140 = vector.broadcast %cst_82 : f32 to vector<1x128xf32>
    %141 = arith.addf %140, %139 : vector<1x128xf32>
    %142 = arith.divf %140, %141 : vector<1x128xf32>
    %143 = vector.broadcast %142 : vector<1x128xf32> to vector<99x128xf32>
    %144 = arith.mulf %117, %143 : vector<99x128xf32>
    %c0_83 = arith.constant 0 : index
    %c0_84 = arith.constant 0 : index
    %145 = vector.load %arg16[%c0_83, %c0_84] : memref<99x128xf32, #tpu.memory_space<vmem>>, vector<99x128xf32>
    tpu.vector_store %arg16[%c0_83, %c0_84], %144 {strides = array<i32>} : memref<99x128xf32, #tpu.memory_space<vmem>>, vector<99x128xf32>,
    %c0_85 = arith.constant 0 : index
    %c0_86 = arith.constant 0 : index
    %146 = tpu.strided_load %arg16[%c0_85, %c0_86] {strides = array<i32: 2, 1>} : memref<99x128xf32, #tpu.memory_space<vmem>>, vector<49x128xf32>
    %147 = arith.truncf %146 : vector<49x128xf32> to vector<49x128xbf16>
    %c3 = arith.constant 3 : index
    %c0_87 = arith.constant 0 : index
    %c0_88 = arith.constant 0 : index
    %148 = vector.load %arg4[%c3, %c0_87, %c0_88] : memref<16x128x128xbf16, #tpu.memory_space<vmem>>, vector<1x128x128xbf16>
    %149 = vector.shape_cast %148 : vector<1x128x128xbf16> to vector<128x128xbf16>
    %cst_89 = arith.constant dense<0.000000e+00> : vector<49x128xf32>
    %150 = tpu.matmul %147, %149, %cst_89 {dimension_numbers = #tpu.dot_dimension_numbers<[1], [0], [0], [1], [0, 0, 1, 1], [], []>} : vector<49x128xbf16>, vector<128x128xbf16>, vector<49x128xf32> -> vector<49x128xf32>
    %c1_90 = arith.constant 1 : index
    %c0_91 = arith.constant 0 : index
    %151 = tpu.strided_load %arg16[%c1_90, %c0_91] {strides = array<i32: 2, 1>} : memref<99x128xf32, #tpu.memory_space<vmem>>, vector<49x128xf32>
    %152 = arith.truncf %151 : vector<49x128xf32> to vector<49x128xbf16>
    %c4 = arith.constant 4 : index
    %c0_92 = arith.constant 0 : index
    %c0_93 = arith.constant 0 : index
    %153 = vector.load %arg4[%c4, %c0_92, %c0_93] : memref<16x128x128xbf16, #tpu.memory_space<vmem>>, vector<1x128x128xbf16>
    %154 = vector.shape_cast %153 : vector<1x128x128xbf16> to vector<128x128xbf16>
    %cst_94 = arith.constant dense<0.000000e+00> : vector<49x128xf32>
    %155 = tpu.matmul %152, %154, %cst_94 {dimension_numbers = #tpu.dot_dimension_numbers<[1], [0], [0], [1], [0, 0, 1, 1], [], []>} : vector<49x128xbf16>, vector<128x128xbf16>, vector<49x128xf32> -> vector<49x128xf32>
    %156 = arith.addf %150, %155 : vector<49x128xf32>
    %c2_95 = arith.constant 2 : index
    %c0_96 = arith.constant 0 : index
    %157 = tpu.strided_load %arg16[%c2_95, %c0_96] {strides = array<i32: 2, 1>} : memref<99x128xf32, #tpu.memory_space<vmem>>, vector<49x128xf32>
    %158 = arith.truncf %157 : vector<49x128xf32> to vector<49x128xbf16>
    %c5 = arith.constant 5 : index
    %c0_97 = arith.constant 0 : index
    %c0_98 = arith.constant 0 : index
    %159 = vector.load %arg4[%c5, %c0_97, %c0_98] : memref<16x128x128xbf16, #tpu.memory_space<vmem>>, vector<1x128x128xbf16>
    %160 = vector.shape_cast %159 : vector<1x128x128xbf16> to vector<128x128xbf16>
    %cst_99 = arith.constant dense<0.000000e+00> : vector<49x128xf32>
    %161 = tpu.matmul %158, %160, %cst_99 {dimension_numbers = #tpu.dot_dimension_numbers<[1], [0], [0], [1], [0, 0, 1, 1], [], []>} : vector<49x128xbf16>, vector<128x128xbf16>, vector<49x128xf32> -> vector<49x128xf32>
    %162 = arith.addf %156, %161 : vector<49x128xf32>
    %c2_100 = arith.constant 2 : index
    %c0_101 = arith.constant 0 : index
    %163 = vector.load %arg5[%c2_100, %c0_101] : memref<7x128xf32, #tpu.memory_space<vmem>>, vector<1x128xf32>
    %164 = vector.shape_cast %163 : vector<1x128xf32> to vector<128xf32>
    %165 = vector.shape_cast %164 : vector<128xf32> to vector<1x128xf32>
    %166 = vector.broadcast %165 : vector<1x128xf32> to vector<49x128xf32>
    %167 = arith.mulf %162, %166 : vector<49x128xf32>
    %c2_102 = arith.constant 2 : index
    %c0_103 = arith.constant 0 : index
    %168 = vector.load %arg6[%c2_102, %c0_103] : memref<7x128xf32, #tpu.memory_space<vmem>>, vector<1x128xf32>
    %169 = vector.shape_cast %168 : vector<1x128xf32> to vector<128xf32>
    %170 = vector.shape_cast %169 : vector<128xf32> to vector<1x128xf32>
    %171 = vector.broadcast %170 : vector<1x128xf32> to vector<49x128xf32>
    %172 = arith.addf %167, %171 : vector<49x128xf32>
    %cst_104 = arith.constant 5.000000e-01 : f32
    %173 = vector.broadcast %cst_104 : f32 to vector<49x128xf32>
    %174 = arith.mulf %173, %172 : vector<49x128xf32>
    %cst_105 = arith.constant 0.707106769 : f32
    %175 = vector.broadcast %cst_105 : f32 to vector<49x128xf32>
    %176 = arith.mulf %172, %175 : vector<49x128xf32>
    %177 = math.erf %176 : vector<49x128xf32>
    %cst_106 = arith.constant 1.000000e+00 : f32
    %178 = vector.broadcast %cst_106 : f32 to vector<49x128xf32>
    %179 = arith.addf %178, %177 : vector<49x128xf32>
    %180 = arith.mulf %174, %179 : vector<49x128xf32>
    %cst_107 = arith.constant dense<0.000000e+00> : vector<128xf32>
    %181 = vector.multi_reduction <add>, %180, %cst_107 [0] : vector<49x128xf32> to vector<128xf32>
    %182 = vector.shape_cast %181 : vector<128xf32> to vector<1x128xf32>
    %cst_108 = arith.constant 4.900000e+01 : f32
    %183 = vector.broadcast %cst_108 : f32 to vector<1x128xf32>
    %184 = arith.divf %182, %183 : vector<1x128xf32>
    %c2_109 = arith.constant 2 : index
    %c0_110 = arith.constant 0 : index
    %c0_111 = arith.constant 0 : index
    %185 = vector.load %arg8[%c2_109, %c0_110, %c0_111] : memref<7x128x128xf32, #tpu.memory_space<vmem>>, vector<1x128x128xf32>
    %186 = vector.shape_cast %185 : vector<1x128x128xf32> to vector<128x128xf32>
    %cst_112 = arith.constant dense<0.000000e+00> : vector<1x128xf32>
    %187 = tpu.matmul %184, %186, %cst_112 {dimension_numbers = #tpu.dot_dimension_numbers<[1], [0], [0], [1], [0, 0, 1, 1], [], []>} : vector<1x128xf32>, vector<128x128xf32>, vector<1x128xf32> -> vector<1x128xf32>
    %c2_113 = arith.constant 2 : index
    %c0_114 = arith.constant 0 : index
    %188 = vector.load %arg9[%c2_113, %c0_114] : memref<7x128xf32, #tpu.memory_space<vmem>>, vector<1x128xf32>
    %189 = vector.shape_cast %188 : vector<1x128xf32> to vector<128xf32>
    %190 = vector.shape_cast %189 : vector<128xf32> to vector<1x128xf32>
    %191 = arith.addf %187, %190 : vector<1x128xf32>
    %cst_115 = arith.constant 0.000000e+00 : f32
    %192 = vector.broadcast %cst_115 : f32 to vector<1x128xf32>
    %193 = arith.maximumf %191, %192 : vector<1x128xf32>
    %c2_116 = arith.constant 2 : index
    %c0_117 = arith.constant 0 : index
    %c0_118 = arith.constant 0 : index
    %194 = vector.load %arg10[%c2_116, %c0_117, %c0_118] : memref<7x128x128xf32, #tpu.memory_space<vmem>>, vector<1x128x128xf32>
    %195 = vector.shape_cast %194 : vector<1x128x128xf32> to vector<128x128xf32>
    %cst_119 = arith.constant dense<0.000000e+00> : vector<1x128xf32>
    %196 = tpu.matmul %193, %195, %cst_119 {dimension_numbers = #tpu.dot_dimension_numbers<[1], [0], [0], [1], [0, 0, 1, 1], [], []>} : vector<1x128xf32>, vector<128x128xf32>, vector<1x128xf32> -> vector<1x128xf32>
    %c2_120 = arith.constant 2 : index
    %c0_121 = arith.constant 0 : index
    %197 = vector.load %arg11[%c2_120, %c0_121] : memref<7x128xf32, #tpu.memory_space<vmem>>, vector<1x128xf32>
    %198 = vector.shape_cast %197 : vector<1x128xf32> to vector<128xf32>
    %199 = vector.shape_cast %198 : vector<128xf32> to vector<1x128xf32>
    %200 = arith.addf %196, %199 : vector<1x128xf32>
    %201 = arith.negf %200 : vector<1x128xf32>
    %202 = math.exp %201 : vector<1x128xf32>
    %cst_122 = arith.constant 1.000000e+00 : f32
    %203 = vector.broadcast %cst_122 : f32 to vector<1x128xf32>
    %204 = arith.addf %203, %202 : vector<1x128xf32>
    %205 = arith.divf %203, %204 : vector<1x128xf32>
    %206 = vector.broadcast %205 : vector<1x128xf32> to vector<49x128xf32>
    %207 = arith.mulf %180, %206 : vector<49x128xf32>
    %c0_123 = arith.constant 0 : index
    %c0_124 = arith.constant 0 : index
    %208 = vector.load %arg17[%c0_123, %c0_124] : memref<49x128xf32, #tpu.memory_space<vmem>>, vector<49x128xf32>
    tpu.vector_store %arg17[%c0_123, %c0_124], %207 {strides = array<i32>} : memref<49x128xf32, #tpu.memory_space<vmem>>, vector<49x128xf32>,
    %c0_125 = arith.constant 0 : index
    %c0_126 = arith.constant 0 : index
    %209 = tpu.strided_load %arg17[%c0_125, %c0_126] {strides = array<i32: 2, 1>} : memref<49x128xf32, #tpu.memory_space<vmem>>, vector<24x128xf32>
    %210 = arith.truncf %209 : vector<24x128xf32> to vector<24x128xbf16>
    %c6 = arith.constant 6 : index
    %c0_127 = arith.constant 0 : index
    %c0_128 = arith.constant 0 : index
    %211 = vector.load %arg4[%c6, %c0_127, %c0_128] : memref<16x128x128xbf16, #tpu.memory_space<vmem>>, vector<1x128x128xbf16>
    %212 = vector.shape_cast %211 : vector<1x128x128xbf16> to vector<128x128xbf16>
    %cst_129 = arith.constant dense<0.000000e+00> : vector<24x128xf32>
    %213 = tpu.matmul %210, %212, %cst_129 {dimension_numbers = #tpu.dot_dimension_numbers<[1], [0], [0], [1], [0, 0, 1, 1], [], []>} : vector<24x128xbf16>, vector<128x128xbf16>, vector<24x128xf32> -> vector<24x128xf32>
    %c1_130 = arith.constant 1 : index
    %c0_131 = arith.constant 0 : index
    %214 = tpu.strided_load %arg17[%c1_130, %c0_131] {strides = array<i32: 2, 1>} : memref<49x128xf32, #tpu.memory_space<vmem>>, vector<24x128xf32>
    %215 = arith.truncf %214 : vector<24x128xf32> to vector<24x128xbf16>
    %c7 = arith.constant 7 : index
    %c0_132 = arith.constant 0 : index
    %c0_133 = arith.constant 0 : index
    %216 = vector.load %arg4[%c7, %c0_132, %c0_133] : memref<16x128x128xbf16, #tpu.memory_space<vmem>>, vector<1x128x128xbf16>
    %217 = vector.shape_cast %216 : vector<1x128x128xbf16> to vector<128x128xbf16>
    %cst_134 = arith.constant dense<0.000000e+00> : vector<24x128xf32>
    %218 = tpu.matmul %215, %217, %cst_134 {dimension_numbers = #tpu.dot_dimension_numbers<[1], [0], [0], [1], [0, 0, 1, 1], [], []>} : vector<24x128xbf16>, vector<128x128xbf16>, vector<24x128xf32> -> vector<24x128xf32>
    %219 = arith.addf %213, %218 : vector<24x128xf32>
    %c2_135 = arith.constant 2 : index
    %c0_136 = arith.constant 0 : index
    %220 = tpu.strided_load %arg17[%c2_135, %c0_136] {strides = array<i32: 2, 1>} : memref<49x128xf32, #tpu.memory_space<vmem>>, vector<24x128xf32>
    %221 = arith.truncf %220 : vector<24x128xf32> to vector<24x128xbf16>
    %c8 = arith.constant 8 : index
    %c0_137 = arith.constant 0 : index
    %c0_138 = arith.constant 0 : index
    %222 = vector.load %arg4[%c8, %c0_137, %c0_138] : memref<16x128x128xbf16, #tpu.memory_space<vmem>>, vector<1x128x128xbf16>
    %223 = vector.shape_cast %222 : vector<1x128x128xbf16> to vector<128x128xbf16>
    %cst_139 = arith.constant dense<0.000000e+00> : vector<24x128xf32>
    %224 = tpu.matmul %221, %223, %cst_139 {dimension_numbers = #tpu.dot_dimension_numbers<[1], [0], [0], [1], [0, 0, 1, 1], [], []>} : vector<24x128xbf16>, vector<128x128xbf16>, vector<24x128xf32> -> vector<24x128xf32>
    %225 = arith.addf %219, %224 : vector<24x128xf32>
    %c3_140 = arith.constant 3 : index
    %c0_141 = arith.constant 0 : index
    %226 = vector.load %arg5[%c3_140, %c0_141] : memref<7x128xf32, #tpu.memory_space<vmem>>, vector<1x128xf32>
    %227 = vector.shape_cast %226 : vector<1x128xf32> to vector<128xf32>
    %228 = vector.shape_cast %227 : vector<128xf32> to vector<1x128xf32>
    %229 = vector.broadcast %228 : vector<1x128xf32> to vector<24x128xf32>
    %230 = arith.mulf %225, %229 : vector<24x128xf32>
    %c3_142 = arith.constant 3 : index
    %c0_143 = arith.constant 0 : index
    %231 = vector.load %arg6[%c3_142, %c0_143] : memref<7x128xf32, #tpu.memory_space<vmem>>, vector<1x128xf32>
    %232 = vector.shape_cast %231 : vector<1x128xf32> to vector<128xf32>
    %233 = vector.shape_cast %232 : vector<128xf32> to vector<1x128xf32>
    %234 = vector.broadcast %233 : vector<1x128xf32> to vector<24x128xf32>
    %235 = arith.addf %230, %234 : vector<24x128xf32>
    %cst_144 = arith.constant 5.000000e-01 : f32
    %236 = vector.broadcast %cst_144 : f32 to vector<24x128xf32>
    %237 = arith.mulf %236, %235 : vector<24x128xf32>
    %cst_145 = arith.constant 0.707106769 : f32
    %238 = vector.broadcast %cst_145 : f32 to vector<24x128xf32>
    %239 = arith.mulf %235, %238 : vector<24x128xf32>
    %240 = math.erf %239 : vector<24x128xf32>
    %cst_146 = arith.constant 1.000000e+00 : f32
    %241 = vector.broadcast %cst_146 : f32 to vector<24x128xf32>
    %242 = arith.addf %241, %240 : vector<24x128xf32>
    %243 = arith.mulf %237, %242 : vector<24x128xf32>
    %cst_147 = arith.constant dense<0.000000e+00> : vector<128xf32>
    %244 = vector.multi_reduction <add>, %243, %cst_147 [0] : vector<24x128xf32> to vector<128xf32>
    %245 = vector.shape_cast %244 : vector<128xf32> to vector<1x128xf32>
    %cst_148 = arith.constant 2.400000e+01 : f32
    %246 = vector.broadcast %cst_148 : f32 to vector<1x128xf32>
    %247 = arith.divf %245, %246 : vector<1x128xf32>
    %c3_149 = arith.constant 3 : index
    %c0_150 = arith.constant 0 : index
    %c0_151 = arith.constant 0 : index
    %248 = vector.load %arg8[%c3_149, %c0_150, %c0_151] : memref<7x128x128xf32, #tpu.memory_space<vmem>>, vector<1x128x128xf32>
    %249 = vector.shape_cast %248 : vector<1x128x128xf32> to vector<128x128xf32>
    %cst_152 = arith.constant dense<0.000000e+00> : vector<1x128xf32>
    %250 = tpu.matmul %247, %249, %cst_152 {dimension_numbers = #tpu.dot_dimension_numbers<[1], [0], [0], [1], [0, 0, 1, 1], [], []>} : vector<1x128xf32>, vector<128x128xf32>, vector<1x128xf32> -> vector<1x128xf32>
    %c3_153 = arith.constant 3 : index
    %c0_154 = arith.constant 0 : index
    %251 = vector.load %arg9[%c3_153, %c0_154] : memref<7x128xf32, #tpu.memory_space<vmem>>, vector<1x128xf32>
    %252 = vector.shape_cast %251 : vector<1x128xf32> to vector<128xf32>
    %253 = vector.shape_cast %252 : vector<128xf32> to vector<1x128xf32>
    %254 = arith.addf %250, %253 : vector<1x128xf32>
    %cst_155 = arith.constant 0.000000e+00 : f32
    %255 = vector.broadcast %cst_155 : f32 to vector<1x128xf32>
    %256 = arith.maximumf %254, %255 : vector<1x128xf32>
    %c3_156 = arith.constant 3 : index
    %c0_157 = arith.constant 0 : index
    %c0_158 = arith.constant 0 : index
    %257 = vector.load %arg10[%c3_156, %c0_157, %c0_158] : memref<7x128x128xf32, #tpu.memory_space<vmem>>, vector<1x128x128xf32>
    %258 = vector.shape_cast %257 : vector<1x128x128xf32> to vector<128x128xf32>
    %cst_159 = arith.constant dense<0.000000e+00> : vector<1x128xf32>
    %259 = tpu.matmul %256, %258, %cst_159 {dimension_numbers = #tpu.dot_dimension_numbers<[1], [0], [0], [1], [0, 0, 1, 1], [], []>} : vector<1x128xf32>, vector<128x128xf32>, vector<1x128xf32> -> vector<1x128xf32>
    %c3_160 = arith.constant 3 : index
    %c0_161 = arith.constant 0 : index
    %260 = vector.load %arg11[%c3_160, %c0_161] : memref<7x128xf32, #tpu.memory_space<vmem>>, vector<1x128xf32>
    %261 = vector.shape_cast %260 : vector<1x128xf32> to vector<128xf32>
    %262 = vector.shape_cast %261 : vector<128xf32> to vector<1x128xf32>
    %263 = arith.addf %259, %262 : vector<1x128xf32>
    %264 = arith.negf %263 : vector<1x128xf32>
    %265 = math.exp %264 : vector<1x128xf32>
    %cst_162 = arith.constant 1.000000e+00 : f32
    %266 = vector.broadcast %cst_162 : f32 to vector<1x128xf32>
    %267 = arith.addf %266, %265 : vector<1x128xf32>
    %268 = arith.divf %266, %267 : vector<1x128xf32>
    %269 = vector.broadcast %268 : vector<1x128xf32> to vector<24x128xf32>
    %270 = arith.mulf %243, %269 : vector<24x128xf32>
    %c0_163 = arith.constant 0 : index
    %c0_164 = arith.constant 0 : index
    %271 = vector.load %arg18[%c0_163, %c0_164] : memref<24x128xf32, #tpu.memory_space<vmem>>, vector<24x128xf32>
    tpu.vector_store %arg18[%c0_163, %c0_164], %270 {strides = array<i32>} : memref<24x128xf32, #tpu.memory_space<vmem>>, vector<24x128xf32>,
    %c0_165 = arith.constant 0 : index
    %c0_166 = arith.constant 0 : index
    %272 = tpu.strided_load %arg18[%c0_165, %c0_166] {strides = array<i32: 2, 1>} : memref<24x128xf32, #tpu.memory_space<vmem>>, vector<11x128xf32>
    %273 = arith.truncf %272 : vector<11x128xf32> to vector<11x128xbf16>
    %c9 = arith.constant 9 : index
    %c0_167 = arith.constant 0 : index
    %c0_168 = arith.constant 0 : index
    %274 = vector.load %arg4[%c9, %c0_167, %c0_168] : memref<16x128x128xbf16, #tpu.memory_space<vmem>>, vector<1x128x128xbf16>
    %275 = vector.shape_cast %274 : vector<1x128x128xbf16> to vector<128x128xbf16>
    %cst_169 = arith.constant dense<0.000000e+00> : vector<11x128xf32>
    %276 = tpu.matmul %273, %275, %cst_169 {dimension_numbers = #tpu.dot_dimension_numbers<[1], [0], [0], [1], [0, 0, 1, 1], [], []>} : vector<11x128xbf16>, vector<128x128xbf16>, vector<11x128xf32> -> vector<11x128xf32>
    %c1_170 = arith.constant 1 : index
    %c0_171 = arith.constant 0 : index
    %277 = tpu.strided_load %arg18[%c1_170, %c0_171] {strides = array<i32: 2, 1>} : memref<24x128xf32, #tpu.memory_space<vmem>>, vector<11x128xf32>
    %278 = arith.truncf %277 : vector<11x128xf32> to vector<11x128xbf16>
    %c10 = arith.constant 10 : index
    %c0_172 = arith.constant 0 : index
    %c0_173 = arith.constant 0 : index
    %279 = vector.load %arg4[%c10, %c0_172, %c0_173] : memref<16x128x128xbf16, #tpu.memory_space<vmem>>, vector<1x128x128xbf16>
    %280 = vector.shape_cast %279 : vector<1x128x128xbf16> to vector<128x128xbf16>
    %cst_174 = arith.constant dense<0.000000e+00> : vector<11x128xf32>
    %281 = tpu.matmul %278, %280, %cst_174 {dimension_numbers = #tpu.dot_dimension_numbers<[1], [0], [0], [1], [0, 0, 1, 1], [], []>} : vector<11x128xbf16>, vector<128x128xbf16>, vector<11x128xf32> -> vector<11x128xf32>
    %282 = arith.addf %276, %281 : vector<11x128xf32>
    %c2_175 = arith.constant 2 : index
    %c0_176 = arith.constant 0 : index
    %283 = tpu.strided_load %arg18[%c2_175, %c0_176] {strides = array<i32: 2, 1>} : memref<24x128xf32, #tpu.memory_space<vmem>>, vector<11x128xf32>
    %284 = arith.truncf %283 : vector<11x128xf32> to vector<11x128xbf16>
    %c11 = arith.constant 11 : index
    %c0_177 = arith.constant 0 : index
    %c0_178 = arith.constant 0 : index
    %285 = vector.load %arg4[%c11, %c0_177, %c0_178] : memref<16x128x128xbf16, #tpu.memory_space<vmem>>, vector<1x128x128xbf16>
    %286 = vector.shape_cast %285 : vector<1x128x128xbf16> to vector<128x128xbf16>
    %cst_179 = arith.constant dense<0.000000e+00> : vector<11x128xf32>
    %287 = tpu.matmul %284, %286, %cst_179 {dimension_numbers = #tpu.dot_dimension_numbers<[1], [0], [0], [1], [0, 0, 1, 1], [], []>} : vector<11x128xbf16>, vector<128x128xbf16>, vector<11x128xf32> -> vector<11x128xf32>
    %288 = arith.addf %282, %287 : vector<11x128xf32>
    %c4_180 = arith.constant 4 : index
    %c0_181 = arith.constant 0 : index
    %289 = vector.load %arg5[%c4_180, %c0_181] : memref<7x128xf32, #tpu.memory_space<vmem>>, vector<1x128xf32>
    %290 = vector.shape_cast %289 : vector<1x128xf32> to vector<128xf32>
    %291 = vector.shape_cast %290 : vector<128xf32> to vector<1x128xf32>
    %292 = vector.broadcast %291 : vector<1x128xf32> to vector<11x128xf32>
    %293 = arith.mulf %288, %292 : vector<11x128xf32>
    %c4_182 = arith.constant 4 : index
    %c0_183 = arith.constant 0 : index
    %294 = vector.load %arg6[%c4_182, %c0_183] : memref<7x128xf32, #tpu.memory_space<vmem>>, vector<1x128xf32>
    %295 = vector.shape_cast %294 : vector<1x128xf32> to vector<128xf32>
    %296 = vector.shape_cast %295 : vector<128xf32> to vector<1x128xf32>
    %297 = vector.broadcast %296 : vector<1x128xf32> to vector<11x128xf32>
    %298 = arith.addf %293, %297 : vector<11x128xf32>
    %cst_184 = arith.constant 5.000000e-01 : f32
    %299 = vector.broadcast %cst_184 : f32 to vector<11x128xf32>
    %300 = arith.mulf %299, %298 : vector<11x128xf32>
    %cst_185 = arith.constant 0.707106769 : f32
    %301 = vector.broadcast %cst_185 : f32 to vector<11x128xf32>
    %302 = arith.mulf %298, %301 : vector<11x128xf32>
    %303 = math.erf %302 : vector<11x128xf32>
    %cst_186 = arith.constant 1.000000e+00 : f32
    %304 = vector.broadcast %cst_186 : f32 to vector<11x128xf32>
    %305 = arith.addf %304, %303 : vector<11x128xf32>
    %306 = arith.mulf %300, %305 : vector<11x128xf32>
    %cst_187 = arith.constant dense<0.000000e+00> : vector<128xf32>
    %307 = vector.multi_reduction <add>, %306, %cst_187 [0] : vector<11x128xf32> to vector<128xf32>
    %308 = vector.shape_cast %307 : vector<128xf32> to vector<1x128xf32>
    %cst_188 = arith.constant 1.100000e+01 : f32
    %309 = vector.broadcast %cst_188 : f32 to vector<1x128xf32>
    %310 = arith.divf %308, %309 : vector<1x128xf32>
    %c4_189 = arith.constant 4 : index
    %c0_190 = arith.constant 0 : index
    %c0_191 = arith.constant 0 : index
    %311 = vector.load %arg8[%c4_189, %c0_190, %c0_191] : memref<7x128x128xf32, #tpu.memory_space<vmem>>, vector<1x128x128xf32>
    %312 = vector.shape_cast %311 : vector<1x128x128xf32> to vector<128x128xf32>
    %cst_192 = arith.constant dense<0.000000e+00> : vector<1x128xf32>
    %313 = tpu.matmul %310, %312, %cst_192 {dimension_numbers = #tpu.dot_dimension_numbers<[1], [0], [0], [1], [0, 0, 1, 1], [], []>} : vector<1x128xf32>, vector<128x128xf32>, vector<1x128xf32> -> vector<1x128xf32>
    %c4_193 = arith.constant 4 : index
    %c0_194 = arith.constant 0 : index
    %314 = vector.load %arg9[%c4_193, %c0_194] : memref<7x128xf32, #tpu.memory_space<vmem>>, vector<1x128xf32>
    %315 = vector.shape_cast %314 : vector<1x128xf32> to vector<128xf32>
    %316 = vector.shape_cast %315 : vector<128xf32> to vector<1x128xf32>
    %317 = arith.addf %313, %316 : vector<1x128xf32>
    %cst_195 = arith.constant 0.000000e+00 : f32
    %318 = vector.broadcast %cst_195 : f32 to vector<1x128xf32>
    %319 = arith.maximumf %317, %318 : vector<1x128xf32>
    %c4_196 = arith.constant 4 : index
    %c0_197 = arith.constant 0 : index
    %c0_198 = arith.constant 0 : index
    %320 = vector.load %arg10[%c4_196, %c0_197, %c0_198] : memref<7x128x128xf32, #tpu.memory_space<vmem>>, vector<1x128x128xf32>
    %321 = vector.shape_cast %320 : vector<1x128x128xf32> to vector<128x128xf32>
    %cst_199 = arith.constant dense<0.000000e+00> : vector<1x128xf32>
    %322 = tpu.matmul %319, %321, %cst_199 {dimension_numbers = #tpu.dot_dimension_numbers<[1], [0], [0], [1], [0, 0, 1, 1], [], []>} : vector<1x128xf32>, vector<128x128xf32>, vector<1x128xf32> -> vector<1x128xf32>
    %c4_200 = arith.constant 4 : index
    %c0_201 = arith.constant 0 : index
    %323 = vector.load %arg11[%c4_200, %c0_201] : memref<7x128xf32, #tpu.memory_space<vmem>>, vector<1x128xf32>
    %324 = vector.shape_cast %323 : vector<1x128xf32> to vector<128xf32>
    %325 = vector.shape_cast %324 : vector<128xf32> to vector<1x128xf32>
    %326 = arith.addf %322, %325 : vector<1x128xf32>
    %327 = arith.negf %326 : vector<1x128xf32>
    %328 = math.exp %327 : vector<1x128xf32>
    %cst_202 = arith.constant 1.000000e+00 : f32
    %329 = vector.broadcast %cst_202 : f32 to vector<1x128xf32>
    %330 = arith.addf %329, %328 : vector<1x128xf32>
    %331 = arith.divf %329, %330 : vector<1x128xf32>
    %332 = vector.broadcast %331 : vector<1x128xf32> to vector<11x128xf32>
    %333 = arith.mulf %306, %332 : vector<11x128xf32>
    %c0_203 = arith.constant 0 : index
    %c0_204 = arith.constant 0 : index
    %334 = vector.load %arg19[%c0_203, %c0_204] : memref<11x128xf32, #tpu.memory_space<vmem>>, vector<11x128xf32>
    tpu.vector_store %arg19[%c0_203, %c0_204], %333 {strides = array<i32>} : memref<11x128xf32, #tpu.memory_space<vmem>>, vector<11x128xf32>,
    %c0_205 = arith.constant 0 : index
    %c0_206 = arith.constant 0 : index
    %335 = tpu.strided_load %arg19[%c0_205, %c0_206] {strides = array<i32: 2, 1>} : memref<11x128xf32, #tpu.memory_space<vmem>>, vector<5x128xf32>
    %336 = arith.truncf %335 : vector<5x128xf32> to vector<5x128xbf16>
    %c12 = arith.constant 12 : index
    %c0_207 = arith.constant 0 : index
    %c0_208 = arith.constant 0 : index
    %337 = vector.load %arg4[%c12, %c0_207, %c0_208] : memref<16x128x128xbf16, #tpu.memory_space<vmem>>, vector<1x128x128xbf16>
    %338 = vector.shape_cast %337 : vector<1x128x128xbf16> to vector<128x128xbf16>
    %cst_209 = arith.constant dense<0.000000e+00> : vector<5x128xf32>
    %339 = tpu.matmul %336, %338, %cst_209 {dimension_numbers = #tpu.dot_dimension_numbers<[1], [0], [0], [1], [0, 0, 1, 1], [], []>} : vector<5x128xbf16>, vector<128x128xbf16>, vector<5x128xf32> -> vector<5x128xf32>
    %c1_210 = arith.constant 1 : index
    %c0_211 = arith.constant 0 : index
    %340 = tpu.strided_load %arg19[%c1_210, %c0_211] {strides = array<i32: 2, 1>} : memref<11x128xf32, #tpu.memory_space<vmem>>, vector<5x128xf32>
    %341 = arith.truncf %340 : vector<5x128xf32> to vector<5x128xbf16>
    %c13 = arith.constant 13 : index
    %c0_212 = arith.constant 0 : index
    %c0_213 = arith.constant 0 : index
    %342 = vector.load %arg4[%c13, %c0_212, %c0_213] : memref<16x128x128xbf16, #tpu.memory_space<vmem>>, vector<1x128x128xbf16>
    %343 = vector.shape_cast %342 : vector<1x128x128xbf16> to vector<128x128xbf16>
    %cst_214 = arith.constant dense<0.000000e+00> : vector<5x128xf32>
    %344 = tpu.matmul %341, %343, %cst_214 {dimension_numbers = #tpu.dot_dimension_numbers<[1], [0], [0], [1], [0, 0, 1, 1], [], []>} : vector<5x128xbf16>, vector<128x128xbf16>, vector<5x128xf32> -> vector<5x128xf32>
    %345 = arith.addf %339, %344 : vector<5x128xf32>
    %c5_215 = arith.constant 5 : index
    %c0_216 = arith.constant 0 : index
    %346 = vector.load %arg5[%c5_215, %c0_216] : memref<7x128xf32, #tpu.memory_space<vmem>>, vector<1x128xf32>
    %347 = vector.shape_cast %346 : vector<1x128xf32> to vector<128xf32>
    %348 = vector.shape_cast %347 : vector<128xf32> to vector<1x128xf32>
    %349 = vector.broadcast %348 : vector<1x128xf32> to vector<5x128xf32>
    %350 = arith.mulf %345, %349 : vector<5x128xf32>
    %c5_217 = arith.constant 5 : index
    %c0_218 = arith.constant 0 : index
    %351 = vector.load %arg6[%c5_217, %c0_218] : memref<7x128xf32, #tpu.memory_space<vmem>>, vector<1x128xf32>
    %352 = vector.shape_cast %351 : vector<1x128xf32> to vector<128xf32>
    %353 = vector.shape_cast %352 : vector<128xf32> to vector<1x128xf32>
    %354 = vector.broadcast %353 : vector<1x128xf32> to vector<5x128xf32>
    %355 = arith.addf %350, %354 : vector<5x128xf32>
    %cst_219 = arith.constant 5.000000e-01 : f32
    %356 = vector.broadcast %cst_219 : f32 to vector<5x128xf32>
    %357 = arith.mulf %356, %355 : vector<5x128xf32>
    %cst_220 = arith.constant 0.707106769 : f32
    %358 = vector.broadcast %cst_220 : f32 to vector<5x128xf32>
    %359 = arith.mulf %355, %358 : vector<5x128xf32>
    %360 = math.erf %359 : vector<5x128xf32>
    %cst_221 = arith.constant 1.000000e+00 : f32
    %361 = vector.broadcast %cst_221 : f32 to vector<5x128xf32>
    %362 = arith.addf %361, %360 : vector<5x128xf32>
    %363 = arith.mulf %357, %362 : vector<5x128xf32>
    %cst_222 = arith.constant dense<0.000000e+00> : vector<128xf32>
    %364 = vector.multi_reduction <add>, %363, %cst_222 [0] : vector<5x128xf32> to vector<128xf32>
    %365 = vector.shape_cast %364 : vector<128xf32> to vector<1x128xf32>
    %cst_223 = arith.constant 5.000000e+00 : f32
    %366 = vector.broadcast %cst_223 : f32 to vector<1x128xf32>
    %367 = arith.divf %365, %366 : vector<1x128xf32>
    %c5_224 = arith.constant 5 : index
    %c0_225 = arith.constant 0 : index
    %c0_226 = arith.constant 0 : index
    %368 = vector.load %arg8[%c5_224, %c0_225, %c0_226] : memref<7x128x128xf32, #tpu.memory_space<vmem>>, vector<1x128x128xf32>
    %369 = vector.shape_cast %368 : vector<1x128x128xf32> to vector<128x128xf32>
    %cst_227 = arith.constant dense<0.000000e+00> : vector<1x128xf32>
    %370 = tpu.matmul %367, %369, %cst_227 {dimension_numbers = #tpu.dot_dimension_numbers<[1], [0], [0], [1], [0, 0, 1, 1], [], []>} : vector<1x128xf32>, vector<128x128xf32>, vector<1x128xf32> -> vector<1x128xf32>
    %c5_228 = arith.constant 5 : index
    %c0_229 = arith.constant 0 : index
    %371 = vector.load %arg9[%c5_228, %c0_229] : memref<7x128xf32, #tpu.memory_space<vmem>>, vector<1x128xf32>
    %372 = vector.shape_cast %371 : vector<1x128xf32> to vector<128xf32>
    %373 = vector.shape_cast %372 : vector<128xf32> to vector<1x128xf32>
    %374 = arith.addf %370, %373 : vector<1x128xf32>
    %cst_230 = arith.constant 0.000000e+00 : f32
    %375 = vector.broadcast %cst_230 : f32 to vector<1x128xf32>
    %376 = arith.maximumf %374, %375 : vector<1x128xf32>
    %c5_231 = arith.constant 5 : index
    %c0_232 = arith.constant 0 : index
    %c0_233 = arith.constant 0 : index
    %377 = vector.load %arg10[%c5_231, %c0_232, %c0_233] : memref<7x128x128xf32, #tpu.memory_space<vmem>>, vector<1x128x128xf32>
    %378 = vector.shape_cast %377 : vector<1x128x128xf32> to vector<128x128xf32>
    %cst_234 = arith.constant dense<0.000000e+00> : vector<1x128xf32>
    %379 = tpu.matmul %376, %378, %cst_234 {dimension_numbers = #tpu.dot_dimension_numbers<[1], [0], [0], [1], [0, 0, 1, 1], [], []>} : vector<1x128xf32>, vector<128x128xf32>, vector<1x128xf32> -> vector<1x128xf32>
    %c5_235 = arith.constant 5 : index
    %c0_236 = arith.constant 0 : index
    %380 = vector.load %arg11[%c5_235, %c0_236] : memref<7x128xf32, #tpu.memory_space<vmem>>, vector<1x128xf32>
    %381 = vector.shape_cast %380 : vector<1x128xf32> to vector<128xf32>
    %382 = vector.shape_cast %381 : vector<128xf32> to vector<1x128xf32>
    %383 = arith.addf %379, %382 : vector<1x128xf32>
    %384 = arith.negf %383 : vector<1x128xf32>
    %385 = math.exp %384 : vector<1x128xf32>
    %cst_237 = arith.constant 1.000000e+00 : f32
    %386 = vector.broadcast %cst_237 : f32 to vector<1x128xf32>
    %387 = arith.addf %386, %385 : vector<1x128xf32>
    %388 = arith.divf %386, %387 : vector<1x128xf32>
    %389 = vector.broadcast %388 : vector<1x128xf32> to vector<5x128xf32>
    %390 = arith.mulf %363, %389 : vector<5x128xf32>
    %c0_238 = arith.constant 0 : index
    %c0_239 = arith.constant 0 : index
    %391 = vector.load %arg20[%c0_238, %c0_239] : memref<5x128xf32, #tpu.memory_space<vmem>>, vector<5x128xf32>
    tpu.vector_store %arg20[%c0_238, %c0_239], %390 {strides = array<i32>} : memref<5x128xf32, #tpu.memory_space<vmem>>, vector<5x128xf32>,
    %c0_240 = arith.constant 0 : index
    %c0_241 = arith.constant 0 : index
    %392 = tpu.strided_load %arg20[%c0_240, %c0_241] {strides = array<i32: 2, 1>} : memref<5x128xf32, #tpu.memory_space<vmem>>, vector<2x128xf32>
    %393 = arith.truncf %392 : vector<2x128xf32> to vector<2x128xbf16>
    %c14 = arith.constant 14 : index
    %c0_242 = arith.constant 0 : index
    %c0_243 = arith.constant 0 : index
    %394 = vector.load %arg4[%c14, %c0_242, %c0_243] : memref<16x128x128xbf16, #tpu.memory_space<vmem>>, vector<1x128x128xbf16>
    %395 = vector.shape_cast %394 : vector<1x128x128xbf16> to vector<128x128xbf16>
    %cst_244 = arith.constant dense<0.000000e+00> : vector<2x128xf32>
    %396 = tpu.matmul %393, %395, %cst_244 {dimension_numbers = #tpu.dot_dimension_numbers<[1], [0], [0], [1], [0, 0, 1, 1], [], []>} : vector<2x128xbf16>, vector<128x128xbf16>, vector<2x128xf32> -> vector<2x128xf32>
    %c1_245 = arith.constant 1 : index
    %c0_246 = arith.constant 0 : index
    %397 = tpu.strided_load %arg20[%c1_245, %c0_246] {strides = array<i32: 2, 1>} : memref<5x128xf32, #tpu.memory_space<vmem>>, vector<2x128xf32>
    %398 = arith.truncf %397 : vector<2x128xf32> to vector<2x128xbf16>
    %c15 = arith.constant 15 : index
    %c0_247 = arith.constant 0 : index
    %c0_248 = arith.constant 0 : index
    %399 = vector.load %arg4[%c15, %c0_247, %c0_248] : memref<16x128x128xbf16, #tpu.memory_space<vmem>>, vector<1x128x128xbf16>
    %400 = vector.shape_cast %399 : vector<1x128x128xbf16> to vector<128x128xbf16>
    %cst_249 = arith.constant dense<0.000000e+00> : vector<2x128xf32>
    %401 = tpu.matmul %398, %400, %cst_249 {dimension_numbers = #tpu.dot_dimension_numbers<[1], [0], [0], [1], [0, 0, 1, 1], [], []>} : vector<2x128xbf16>, vector<128x128xbf16>, vector<2x128xf32> -> vector<2x128xf32>
    %402 = arith.addf %396, %401 : vector<2x128xf32>
    %c6_250 = arith.constant 6 : index
    %c0_251 = arith.constant 0 : index
    %403 = vector.load %arg5[%c6_250, %c0_251] : memref<7x128xf32, #tpu.memory_space<vmem>>, vector<1x128xf32>
    %404 = vector.shape_cast %403 : vector<1x128xf32> to vector<128xf32>
    %405 = vector.shape_cast %404 : vector<128xf32> to vector<1x128xf32>
    %406 = vector.broadcast %405 : vector<1x128xf32> to vector<2x128xf32>
    %407 = arith.mulf %402, %406 : vector<2x128xf32>
    %c6_252 = arith.constant 6 : index
    %c0_253 = arith.constant 0 : index
    %408 = vector.load %arg6[%c6_252, %c0_253] : memref<7x128xf32, #tpu.memory_space<vmem>>, vector<1x128xf32>
    %409 = vector.shape_cast %408 : vector<1x128xf32> to vector<128xf32>
    %410 = vector.shape_cast %409 : vector<128xf32> to vector<1x128xf32>
    %411 = vector.broadcast %410 : vector<1x128xf32> to vector<2x128xf32>
    %412 = arith.addf %407, %411 : vector<2x128xf32>
    %cst_254 = arith.constant 5.000000e-01 : f32
    %413 = vector.broadcast %cst_254 : f32 to vector<2x128xf32>
    %414 = arith.mulf %413, %412 : vector<2x128xf32>
    %cst_255 = arith.constant 0.707106769 : f32
    %415 = vector.broadcast %cst_255 : f32 to vector<2x128xf32>
    %416 = arith.mulf %412, %415 : vector<2x128xf32>
    %417 = math.erf %416 : vector<2x128xf32>
    %cst_256 = arith.constant 1.000000e+00 : f32
    %418 = vector.broadcast %cst_256 : f32 to vector<2x128xf32>
    %419 = arith.addf %418, %417 : vector<2x128xf32>
    %420 = arith.mulf %414, %419 : vector<2x128xf32>
    %cst_257 = arith.constant dense<0.000000e+00> : vector<128xf32>
    %421 = vector.multi_reduction <add>, %420, %cst_257 [0] : vector<2x128xf32> to vector<128xf32>
    %422 = vector.shape_cast %421 : vector<128xf32> to vector<1x128xf32>
    %cst_258 = arith.constant 2.000000e+00 : f32
    %423 = vector.broadcast %cst_258 : f32 to vector<1x128xf32>
    %424 = arith.divf %422, %423 : vector<1x128xf32>
    %c6_259 = arith.constant 6 : index
    %c0_260 = arith.constant 0 : index
    %c0_261 = arith.constant 0 : index
    %425 = vector.load %arg8[%c6_259, %c0_260, %c0_261] : memref<7x128x128xf32, #tpu.memory_space<vmem>>, vector<1x128x128xf32>
    %426 = vector.shape_cast %425 : vector<1x128x128xf32> to vector<128x128xf32>
    %cst_262 = arith.constant dense<0.000000e+00> : vector<1x128xf32>
    %427 = tpu.matmul %424, %426, %cst_262 {dimension_numbers = #tpu.dot_dimension_numbers<[1], [0], [0], [1], [0, 0, 1, 1], [], []>} : vector<1x128xf32>, vector<128x128xf32>, vector<1x128xf32> -> vector<1x128xf32>
    %c6_263 = arith.constant 6 : index
    %c0_264 = arith.constant 0 : index
    %428 = vector.load %arg9[%c6_263, %c0_264] : memref<7x128xf32, #tpu.memory_space<vmem>>, vector<1x128xf32>
    %429 = vector.shape_cast %428 : vector<1x128xf32> to vector<128xf32>
    %430 = vector.shape_cast %429 : vector<128xf32> to vector<1x128xf32>
    %431 = arith.addf %427, %430 : vector<1x128xf32>
    %cst_265 = arith.constant 0.000000e+00 : f32
    %432 = vector.broadcast %cst_265 : f32 to vector<1x128xf32>
    %433 = arith.maximumf %431, %432 : vector<1x128xf32>
    %c6_266 = arith.constant 6 : index
    %c0_267 = arith.constant 0 : index
    %c0_268 = arith.constant 0 : index
    %434 = vector.load %arg10[%c6_266, %c0_267, %c0_268] : memref<7x128x128xf32, #tpu.memory_space<vmem>>, vector<1x128x128xf32>
    %435 = vector.shape_cast %434 : vector<1x128x128xf32> to vector<128x128xf32>
    %cst_269 = arith.constant dense<0.000000e+00> : vector<1x128xf32>
    %436 = tpu.matmul %433, %435, %cst_269 {dimension_numbers = #tpu.dot_dimension_numbers<[1], [0], [0], [1], [0, 0, 1, 1], [], []>} : vector<1x128xf32>, vector<128x128xf32>, vector<1x128xf32> -> vector<1x128xf32>
    %c6_270 = arith.constant 6 : index
    %c0_271 = arith.constant 0 : index
    %437 = vector.load %arg11[%c6_270, %c0_271] : memref<7x128xf32, #tpu.memory_space<vmem>>, vector<1x128xf32>
    %438 = vector.shape_cast %437 : vector<1x128xf32> to vector<128xf32>
    %439 = vector.shape_cast %438 : vector<128xf32> to vector<1x128xf32>
    %440 = arith.addf %436, %439 : vector<1x128xf32>
    %441 = arith.negf %440 : vector<1x128xf32>
    %442 = math.exp %441 : vector<1x128xf32>
    %cst_272 = arith.constant 1.000000e+00 : f32
    %443 = vector.broadcast %cst_272 : f32 to vector<1x128xf32>
    %444 = arith.addf %443, %442 : vector<1x128xf32>
    %445 = arith.divf %443, %444 : vector<1x128xf32>
    %446 = vector.broadcast %445 : vector<1x128xf32> to vector<2x128xf32>
    %447 = arith.mulf %420, %446 : vector<2x128xf32>
    %448 = arith.truncf %447 : vector<2x128xf32> to vector<2x128xbf16>
    %c0_273 = arith.constant 0 : index
    %c0_274 = arith.constant 0 : index
    %449 = vector.load %arg12[%c0_273, %c0_274] : memref<128x128xbf16, #tpu.memory_space<vmem>>, vector<128x128xbf16>
    %cst_275 = arith.constant dense<0.000000e+00> : vector<2x128xf32>
    %450 = tpu.matmul %448, %449, %cst_275 {dimension_numbers = #tpu.dot_dimension_numbers<[1], [0], [0], [1], [0, 0, 1, 1], [], []>} : vector<2x128xbf16>, vector<128x128xbf16>, vector<2x128xf32> -> vector<2x128xf32>
    %c0_276 = arith.constant 0 : index
    %c0_277 = arith.constant 0 : index
    %451 = vector.load %arg13[%c0_276, %c0_277] : memref<1x128xf32, #tpu.memory_space<vmem>>, vector<1x128xf32>
    %452 = vector.shape_cast %451 : vector<1x128xf32> to vector<128xf32>
    %453 = vector.shape_cast %452 : vector<128xf32> to vector<1x128xf32>
    %454 = vector.broadcast %453 : vector<1x128xf32> to vector<2x128xf32>
    %455 = arith.addf %450, %454 : vector<2x128xf32>
    %c0_278 = arith.constant 0 : index
    %c0_279 = arith.constant 0 : index
    %c0_280 = arith.constant 0 : index
    %456 = vector.load %arg14[%c0_278, %c0_279, %c0_280] : memref<1x2x128xf32, #tpu.memory_space<vmem>>, vector<1x2x128xf32>
    %457 = vector.shape_cast %456 : vector<1x2x128xf32> to vector<2x128xf32>
    %458 = vector.shape_cast %455 : vector<2x128xf32> to vector<1x2x128xf32>
    tpu.vector_store %arg14[%c0_278, %c0_279, %c0_280], %458 {strides = array<i32>} : memref<1x2x128xf32, #tpu.memory_space<vmem>>, vector<1x2x128xf32>,
    return
  }
  func.func @transform_0(%arg0: i32) -> (i32, i32, i32) {
    %c0_i32 = arith.constant 0 : i32
    %c0_i32_0 = arith.constant 0 : i32
    %c0_i32_1 = arith.constant 0 : i32
    return %arg0, %c0_i32, %c0_i32_0 : i32, i32, i32
  }
  func.func @transform_1(%arg0: i32) -> (i32, i32) {
    %c0_i32 = arith.constant 0 : i32
    %c0_i32_0 = arith.constant 0 : i32
    %c0_i32_1 = arith.constant 0 : i32
    return %c0_i32, %c0_i32_0 : i32, i32
  }
  func.func @transform_2(%arg0: i32) -> (i32, i32) {
    %c0_i32 = arith.constant 0 : i32
    %c0_i32_0 = arith.constant 0 : i32
    %c0_i32_1 = arith.constant 0 : i32
    return %c0_i32, %c0_i32_0 : i32, i32
  }
  func.func @transform_3(%arg0: i32) -> (i32, i32, i32) {
    %c0_i32 = arith.constant 0 : i32
    %c0_i32_0 = arith.constant 0 : i32
    %c0_i32_1 = arith.constant 0 : i32
    %c0_i32_2 = arith.constant 0 : i32
    return %c0_i32, %c0_i32_0, %c0_i32_1 : i32, i32, i32
  }
  func.func @transform_4(%arg0: i32) -> (i32, i32) {
    %c0_i32 = arith.constant 0 : i32
    %c0_i32_0 = arith.constant 0 : i32
    %c0_i32_1 = arith.constant 0 : i32
    return %c0_i32, %c0_i32_0 : i32, i32
  }
  func.func @transform_5(%arg0: i32) -> (i32, i32) {
    %c0_i32 = arith.constant 0 : i32
    %c0_i32_0 = arith.constant 0 : i32
    %c0_i32_1 = arith.constant 0 : i32
    return %c0_i32, %c0_i32_0 : i32, i32
  }
  func.func @transform_6(%arg0: i32) -> (i32, i32) {
    %c0_i32 = arith.constant 0 : i32
    %c0_i32_0 = arith.constant 0 : i32
    %c0_i32_1 = arith.constant 0 : i32
    return %c0_i32, %c0_i32_0 : i32, i32
  }
  func.func @transform_7(%arg0: i32) -> (i32, i32, i32) {
    %c0_i32 = arith.constant 0 : i32
    %c0_i32_0 = arith.constant 0 : i32
    %c0_i32_1 = arith.constant 0 : i32
    %c0_i32_2 = arith.constant 0 : i32
    return %c0_i32, %c0_i32_0, %c0_i32_1 : i32, i32, i32
  }
  func.func @transform_8(%arg0: i32) -> (i32, i32) {
    %c0_i32 = arith.constant 0 : i32
    %c0_i32_0 = arith.constant 0 : i32
    %c0_i32_1 = arith.constant 0 : i32
    return %c0_i32, %c0_i32_0 : i32, i32
  }
  func.func @transform_9(%arg0: i32) -> (i32, i32, i32) {
    %c0_i32 = arith.constant 0 : i32
    %c0_i32_0 = arith.constant 0 : i32
    %c0_i32_1 = arith.constant 0 : i32
    %c0_i32_2 = arith.constant 0 : i32
    return %c0_i32, %c0_i32_0, %c0_i32_1 : i32, i32, i32
  }
  func.func @transform_10(%arg0: i32) -> (i32, i32) {
    %c0_i32 = arith.constant 0 : i32
    %c0_i32_0 = arith.constant 0 : i32
    %c0_i32_1 = arith.constant 0 : i32
    return %c0_i32, %c0_i32_0 : i32, i32
  }
  func.func @transform_11(%arg0: i32) -> (i32, i32) {
    %c0_i32 = arith.constant 0 : i32
    %c0_i32_0 = arith.constant 0 : i32
    %c0_i32_1 = arith.constant 0 : i32
    return %c0_i32, %c0_i32_0 : i32, i32
  }
  func.func @transform_12(%arg0: i32) -> (i32, i32) {
    %c0_i32 = arith.constant 0 : i32
    %c0_i32_0 = arith.constant 0 : i32
    %c0_i32_1 = arith.constant 0 : i32
    return %c0_i32, %c0_i32_0 : i32, i32
  }
  func.func @transform_13(%arg0: i32) -> (i32, i32, i32) {
    %c0_i32 = arith.constant 0 : i32
    %c0_i32_0 = arith.constant 0 : i32
    %c0_i32_1 = arith.constant 0 : i32
    return %arg0, %c0_i32, %c0_i32_0 : i32, i32, i32
  }
}

</mosaic_0001>

<bundles_post_ra>
// kernel: ihc_extract_2_forward.1
= control target key start
LH: loop header
LB: loop body
LE: loop exit
PB: predicated region body
PF: predicated region fallthrough
CT: control target
= control target key end

     0   :  { %s10258_s25 = smov 0   ;;  %s15664_s0 = inlined_call_operand.vmem [shape: bf16[2,200,640], index: 0, kind: input, shape index: {}]   ;;  %s15665_s1 = inlined_call_operand.vmem [shape: bf16[640,128], index: 1, kind: input, shape index: {}]   ;;  %s15666_s2 = inlined_call_operand.vmem [shape: bf16[640,128], index: 2, kind: input, shape index: {}]   ;;  %s15667_s3 = inlined_call_operand.vmem [shape: bf16[16,128,128], index: 3, kind: input, shape index: {}]   ;;  %s15668_s4 = inlined_call_operand.vmem [shape: f32[7,128], index: 4, kind: input, shape index: {}]   ;;  %s15669_s5 = inlined_call_operand.vmem [shape: f32[7,128], index: 5, kind: input, shape index: {}]   ;;  %s15670_s6 = inlined_call_operand.vmem [shape: f32[2,128], index: 6, kind: input, shape index: {}]   ;;  %s15671_s7 = inlined_call_operand.vmem [shape: f32[7,128,128], index: 7, kind: input, shape index: {}]   ;;  %s15672_s8 = inlined_call_operand.vmem [shape: f32[7,128], index: 8, kind: input, shape index: {}]   ;;  %s15673_s9 = inlined_call_operand.vmem [shape: f32[7,128,128], index: 9, kind: input, shape index: {}]   ;;  %s15674_s10 = inlined_call_operand.vmem [shape: f32[7,128], index: 10, kind: input, shape index: {}]   ;;  %s15675_s11 = inlined_call_operand.vmem [shape: bf16[128,128], index: 11, kind: input, shape index: {}]   ;;  %s15676_s12 = inlined_call_operand.vmem [shape: f32[1,128], index: 12, kind: input, shape index: {}]   ;;  %s15677_s13 = inlined_call_operand.vmem [shape: f32[2,2,128], index: 13, kind: output, shape index: {}]  }
   0x1 LB: > { %s8112_s26 = sadd.s32 4294967295, %s10179_s25   ;;  %p8116_p0 = scmp.ge.s32.totalorder %s10179_s25, 1  ;;  %s10179_s25 = sphi %s10258_s25, %s23_s25  }
   0x2   : > { %p387_p1 = scmp.lt.s32.totalorder %s10179_s25, 3 }
   0x4   : > { %p388_p2 = pnand %p8116_p0, %p387_p1 }
   0x6   : > { %391 = sbr.rel (%p388_p2) target bundleno = 5039 (0x13af), region = 72 }
   0xb   : > { %v9823_v0 = vld [vmem:[%s15666_s2 + $0x38] sm:$0xff]  ;;  %p430_p3 = scmp.lt.s32.totalorder %s8112_s26, 1  ;;  %v9822_v4 = vld [vmem:[%s15666_s2 + $0x30] sm:$0xff]  ;;  %v9821_v8 = vld [vmem:[%s15666_s2 + $0x28] sm:$0xff]  ;;  %vm939_vm0 = vsmask.f32 7424 }
   0xc   : > { %v9831_v1 = vld [vmem:[%s15666_s2 + $0x78] sm:$0xff]  ;;  %1760 = vmatpush.bf16.msra.mxu0 %v9823_v0  ;;  %v9830_v5 = vld [vmem:[%s15666_s2 + $0x70] sm:$0xff]  ;;  %v9829_v9 = vld [vmem:[%s15666_s2 + $0x68] sm:$0xff]  ;;  %vm2872_vm1 = vcmask 1046528  }
   0xd   : > { %v9839_v2 = vld [vmem:[%s15666_s2 + $0xb8] sm:$0xff]  ;;  %1833 = vmatpush.bf16.msra.mxu1 %v9831_v1  ;;  %s15982_s26 = smov (!%p430_p3, %s8112_s26), 1  ;;  %v9838_v6 = vld [vmem:[%s15666_s2 + $0xb0] sm:$0xff]  ;;  %v9837_v10 = vld [vmem:[%s15666_s2 + $0xa8] sm:$0xff] }
   0xe   : > { %v9847_v3 = vld [vmem:[%s15666_s2 + $0xf8] sm:$0xff]  ;;  %1906 = vmatpush.bf16.msra.mxu2 %v9839_v2  ;;  %v9846_v7 = vld [vmem:[%s15666_s2 + $0xf0] sm:$0xff]  ;;  %s9992_s28 = smul.u32 500, %s15982_s26  ;;  %v9845_v11 = vld [vmem:[%s15666_s2 + $0xe8] sm:$0xff] }
   0xf   : > { %1979 = vmatpush.bf16.msra.mxu3 %v9847_v3  ;;  %v9820_v12 = vld [vmem:[%s15666_s2 + $0x20] sm:$0xff]  ;;  %v9819_v18 = vld [vmem:[%s15666_s2 + $0x18] sm:$0xff]  ;;  %v9818_v41 = vld [vmem:[%s15666_s2 + $0x10] sm:$0xff] }
  0x10   : > { %1761 = vmatpush.bf16.msra.mxu0 %v9822_v4  ;;  %s10308_s22 = scalar_lea.vmem %s15664_s0, %s9992_s28  ;;  %v9828_v13 = vld [vmem:[%s15666_s2 + $0x60] sm:$0xff]  ;;  %v9827_v19 = vld [vmem:[%s15666_s2 + $0x58] sm:$0xff]  ;;  %v9826_v42 = vld [vmem:[%s15666_s2 + $0x50] sm:$0xff] }
  0x11   : > { %1834 = vmatpush.bf16.msra.mxu1 %v9830_v5  ;;  %v8121_v14 = vld [vmem:[%s10308_s22] sm:$0xf]  ;;  %v9718_v17 = vld [vmem:[%s10308_s22 + $0x10] sm:$0xf0]  ;;  %v9716_v20 = vld [vmem:[%s10308_s22 + $0x4] sm:$0xf] }
  0x12   : > { %1907 = vmatpush.bf16.msra.mxu2 %v9838_v6  ;;  %v9836_v15 = vld [vmem:[%s15666_s2 + $0xa0] sm:$0xff]  ;;  %v8123_v21 = vld [vmem:[%s10308_s22 + $0x14] sm:$0xf0]  ;;  %v8141_v24 = vld [vmem:[%s10308_s22 + $0x28] sm:$0xf]  ;;  %v10339_v25 = vor.u32 %v9718_v17, %v8121_v14 }
  0x13   : > { %1980 = vmatpush.bf16.msra.mxu3 %v9846_v7  ;;  %v9844_v16 = vld [vmem:[%s15666_s2 + $0xe0] sm:$0xff]  ;;  %v9835_v22 = vld [vmem:[%s15666_s2 + $0x98] sm:$0xff]  ;;  %v8129_v26 = vld [vmem:[%s10308_s22 + $0x8] sm:$0xf]  ;;  %v10346_v31 = vor.u32 %v9716_v20, %v8123_v21 }
  0x14   : > { %1762 = vmatpush.bf16.msra.mxu0 %v9821_v8  ;;  %v9843_v23 = vld [vmem:[%s15666_s2 + $0xd8] sm:$0xff]  ;;  %v9721_v29 = vld [vmem:[%s10308_s22 + $0x2c] sm:$0xf]  ;;  %v8143_v30 = vld [vmem:[%s10308_s22 + $0x3c] sm:$0xf0]  ;;  %v943_v38 = vshll.u32 %v10339_v25, 16 }
  0x15   : > { %1835 = vmatpush.bf16.msra.mxu1 %v9829_v9  ;;  %v9719_v27 = vld [vmem:[%s10308_s22 + $0x18] sm:$0xf0]  ;;  %v8149_v32 = vld [vmem:[%s10308_s22 + $0x30] sm:$0xf]  ;;  %v9724_v33 = vld [vmem:[%s10308_s22 + $0x40] sm:$0xf0]  ;;  %v10366_v43 = vor.u32 %v9721_v29, %v8143_v30 }
  0x16   : > { %1908 = vmatpush.bf16.msra.mxu2 %v9837_v10  ;;  %v9723_v28 = vld [vmem:[%s10308_s22 + $0x38] sm:$0xf0]  ;;  %v10350_v34 = vor.u32 %v9719_v27, %v8129_v26  ;;  %v9717_v35 = vld [vmem:[%s10308_s22 + $0xc] sm:$0xf]  ;;  %v8131_v36 = vld [vmem:[%s10308_s22 + $0x1c] sm:$0xf0]  ;;  %v10369_v45 = vor.u32 %v9724_v33, %v8149_v32 }
  0x17   : > { %1981 = vmatpush.bf16.msra.mxu3 %v9845_v11  ;;  %v10354_v37 = vor.u32 %v9723_v28, %v8141_v24  ;;  %v9722_v39 = vld [vmem:[%s10308_s22 + $0x34] sm:$0xf]  ;;  %v10358_v40 = vor.u32 %v9717_v35, %v8131_v36  ;;  %v955_v44 = vshll.u32 %v10346_v31, 16  ;;  %v8151_v46 = vld [vmem:[%s10308_s22 + $0x44] sm:$0xf0]  ;;  %v941_v52 = vshrl.u32 %v10339_v25, 16 }
  0x18   : > { %1763 = vmatpush.bf16.msra.mxu0 %v9820_v12  ;;  %v9834_v47 = vld [vmem:[%s15666_s2 + $0x90] sm:$0xff]  ;;  %v967_v49 = vshll.u32 %v10350_v34, 16  ;;  %v10379_v50 = vor.u32 %v9722_v39, %v8151_v46  ;;  %v945_v53 = vrot.slane %v943_v38, 1  ;;  %v953_v55 = vshrl.u32 %v10346_v31, 16  ;;  %v9817_v56 = vld [vmem:[%s15666_s2 + $0x8] sm:$0xff]  ;;  %v9816_v4 = vld [vmem:[%s15666_s2] sm:$0xff] }
  0x19   : > { %1836 = vmatpush.bf16.msra.mxu1 %v9828_v13  ;;  %15709 = vst [vmem:[#allocation8_spill] sm:$0xff] %v10358_v40  ;;  %v9842_v48 = vld [vmem:[%s15666_s2 + $0xd0] sm:$0xff]  ;;  %v979_v51 = vshll.u32 %v10358_v40, 16  ;;  %v948_v54 = vshll.u32 %v10354_v37, 16  ;;  %v9825_v57 = vld [vmem:[%s15666_s2 + $0x48] sm:$0xff]  ;;  %v957_v58 = vrot.slane %v955_v44, 1 }
  0x1a   : > { %1909 = vmatpush.bf16.msra.mxu2 %v9836_v15  ;;  %15710 = vst [vmem:[#allocation9_spill] sm:$0xff] %v10379_v50  ;;  %v960_v59 = vshll.u32 %v10366_v43, 16  ;;  %v965_v60 = vshrl.u32 %v10350_v34, 16  ;;  %v972_v61 = vshll.u32 %v10369_v45, 16  ;;  %v9833_v62 = vld [vmem:[%s15666_s2 + $0x88] sm:$0xff]  ;;  %v969_v0 = vrot.slane %v967_v49, 1 }
  0x1b   : > { %1982 = vmatpush.bf16.msra.mxu3 %v9844_v16  ;;  %v9841_v63 = vld [vmem:[%s15666_s2 + $0xc8] sm:$0xff]  ;;  %v977_v1 = vshrl.u32 %v10358_v40, 16  ;;  %v981_v2 = vrot.slane %v979_v51, 1  ;;  %v984_v3 = vshll.u32 %v10379_v50, 16  ;;  %v9824_v5 = vld [vmem:[%s15666_s2 + $0x40] sm:$0xff]  ;;  %v946_v6 = vor.u32 %v945_v53, %v941_v52  ;;  %v9855_v16 = vld [vmem:[%s15666_s2 + $0x138] sm:$0xff] }
  0x1c   : > { %1764 = vmatpush.bf16.msra.mxu0 %v9819_v18  ;;  %v950_v7 = vrot.slane %v948_v54, 1  ;;  %v958_v8 = vor.u32 %v957_v58, %v953_v55  ;;  %v962_v9 = vrot.slane %v960_v59, 1  ;;  %v9832_v10 = vld [vmem:[%s15666_s2 + $0x80] sm:$0xff]  ;;  %v970_v12 = vor.u32 %v969_v0, %v965_v60  ;;  %v9783_v17 = vld [vmem:[%s15665_s1 + $0x38] sm:$0xff]  ;;  %v8161_v18 = vld [vmem:[%s10308_s22 + $0x50] sm:$0xf] }
  0x1d   : > { %1837 = vmatpush.bf16.msra.mxu1 %v9827_v19  ;;  %v9840_v11 = vld [vmem:[%s15666_s2 + $0xc0] sm:$0xff]  ;;  %v974_v13 = vrot.slane %v972_v61, 1  ;;  %v982_v14 = vor.u32 %v981_v2, %v977_v1  ;;  %v986_v15 = vrot.slane %v984_v3, 1  ;;  %v9726_v20 = vld [vmem:[%s10308_s22 + $0x54] sm:$0xf]  ;;  %v1008_v44 = vshrl.u32 %v10366_v43, 16 }
  0x1e   : > { %1910 = vmatpush.bf16.msra.mxu2 %v9835_v22  ;;  %v9728_v19 = vld [vmem:[%s10308_s22 + $0x60] sm:$0xf0]  ;;  %v8163_v21 = vld [vmem:[%s10308_s22 + $0x64] sm:$0xf0]  ;;  %v951_v22 = vsel %vm939_vm0, %v946_v6, %v950_v7  ;;  %v8169_v24 = vld [vmem:[%s10308_s22 + $0x58] sm:$0xf] }
  0x1f   : > { %1983 = vmatpush.bf16.msra.mxu3 %v9843_v23  ;;  %v963_v23 = vsel %vm939_vm0, %v958_v8, %v962_v9  ;;  %v9729_v26 = vld [vmem:[%s10308_s22 + $0x68] sm:$0xf0]  ;;  %v9727_v27 = vld [vmem:[%s10308_s22 + $0x5c] sm:$0xf]  ;;  %v8171_v28 = vld [vmem:[%s10308_s22 + $0x6c] sm:$0xf0]  ;;  %v975_v29 = vsel %vm939_vm0, %v970_v12, %v974_v13  ;;  %v987_v30 = vsel %vm939_vm0, %v982_v14, %v986_v15  ;;  %v10438_v35 = vor.u32 %v9728_v19, %v8161_v18 }
  0x20   : > { %1765 = vmatpush.bf16.msra.mxu0 %v9818_v41  ;;  %v9854_v32 = vld [vmem:[%s15666_s2 + $0x130] sm:$0xff]  ;;  %v10440_v36 = vor.u32 %v9726_v20, %v8163_v21  ;;  %v10442_v38 = vor.u32 %v9729_v26, %v8169_v24  ;;  %v10444_v39 = vor.u32 %v9727_v27, %v8171_v28  ;;  %v1000_v41 = vshrl.u32 %v10354_v37, 16  ;;  %v9731_v2 = vld [vmem:[%s10308_s22 + $0x7c] sm:$0xf]  ;;  %v9732_v6 = vld [vmem:[%s10308_s22 + $0x84] sm:$0xf] }
  0x21   : > { %1838 = vmatpush.bf16.msra.mxu1 %v9826_v42  ;;  %v9782_v33 = vld [vmem:[%s15665_s1 + $0x30] sm:$0xff]  ;;  %v1004_v42 = vshll.u32 %v10438_v35, 16  ;;  %v1024_v49 = vshrl.u32 %v10379_v50, 16  ;;  %v1010_v54 = vor.u32 %v1008_v44, %v962_v9  ;;  %v1040_v14 = vshrl.u32 %v10438_v35, 16  ;;  %v511_v40 = vld [vmem:[%s10308_s22 + $0x1e0] sm:$0xff] }
  0x22   : > { %1911 = vmatpush.bf16.msra.mxu2 %v9834_v47  ;;  %15711 = vst [vmem:[#allocation10_spill] sm:$0xff] %v10444_v39  ;;  %v1012_v46 = vshll.u32 %v10440_v36, 16  ;;  %v1016_v47 = vshrl.u32 %v10369_v45, 16  ;;  %v1028_v51 = vshll.u32 %v10444_v39, 16  ;;  %v1002_v52 = vor.u32 %v1000_v41, %v950_v7  ;;  %v8183_v3 = vld [vmem:[%s10308_s22 + $0x8c] sm:$0xf0] }
  0x23   : > { %1984 = vmatpush.bf16.msra.mxu3 %v9842_v48  ;;  %v1020_v48 = vshll.u32 %v10442_v38, 16  ;;  %v1006_v53 = vrot.slane %v1004_v42, 1  ;;  %v1026_v58 = vor.u32 %v1024_v49, %v986_v15  ;;  %v8191_v7 = vld [vmem:[%s10308_s22 + $0x94] sm:$0xf0]  ;;  %v10468_v9 = vor.u32 %v9731_v2, %v8183_v3  ;;  %v8201_v41 = vld [vmem:[%s10308_s22 + $0xa0] sm:$0xf] }
  0x24   : > { %1766 = vmatpush.bf16.msra.mxu0 %v9817_v56  ;;  %v1014_v55 = vrot.slane %v1012_v46, 1  ;;  %v1018_v56 = vor.u32 %v1016_v47, %v974_v13  ;;  %v1030_v59 = vrot.slane %v1028_v51, 1  ;;  %v10478_v13 = vor.u32 %v9732_v6, %v8191_v7  ;;  %v9738_v42 = vld [vmem:[%s10308_s22 + $0xb0] sm:$0xf0]  ;;  %v9736_v47 = vld [vmem:[%s10308_s22 + $0xa4] sm:$0xf] }
  0x25   : > { %1839 = vmatpush.bf16.msra.mxu1 %v9825_v57  ;;  %v1022_v57 = vrot.slane %v1020_v48, 1  ;;  %v1007_v60 = vsel %vm939_vm0, %v1002_v52, %v1006_v53  ;;  %v1056_v18 = vshrl.u32 %v10442_v38, 16  ;;  %v1064_v20 = vshrl.u32 %v10444_v39, 16  ;;  %v8203_v48 = vld [vmem:[%s10308_s22 + $0xb4] sm:$0xf0] }
  0x26   : > { %1912 = vmatpush.bf16.msra.mxu2 %v9833_v62  ;;  %v1015_v61 = vsel %vm939_vm0, %v1010_v54, %v1014_v55  ;;  %v8181_v62 = vld [vmem:[%s10308_s22 + $0x78] sm:$0xf]  ;;  %v1031_v1 = vsel %vm939_vm0, %v1026_v58, %v1030_v59  ;;  %15712 = vst [vmem:[#allocation11_spill] sm:$0xff] %v10478_v13  ;;  %v1068_v21 = vshll.u32 %v10478_v13, 16  ;;  %v8209_v49 = vld [vmem:[%s10308_s22 + $0xa8] sm:$0xf]  ;;  %v10500_v54 = vor.u32 %v9738_v42, %v8201_v41 }
  0x27   : > { %1985 = vmatpush.bf16.msra.mxu3 %v9841_v63  ;;  %v9733_v63 = vld [vmem:[%s10308_s22 + $0x88] sm:$0xf0]  ;;  %v1023_v0 = vsel %vm939_vm0, %v1018_v56, %v1022_v57  ;;  %v1058_v27 = vor.u32 %v1056_v18, %v1022_v57  ;;  %v9739_v51 = vld [vmem:[%s10308_s22 + $0xb8] sm:$0xf0]  ;;  %v9852_v56 = vld [vmem:[%s15666_s2 + $0x120] sm:$0xff] }
  0x28   : > { %1767 = vmatpush.bf16.msra.mxu0 %v9816_v4  ;;  %v8189_v4 = vld [vmem:[%s10308_s22 + $0x80] sm:$0xf]  ;;  %v10466_v8 = vor.u32 %v9733_v63, %v8181_v62  ;;  %v9737_v52 = vld [vmem:[%s10308_s22 + $0xac] sm:$0xf]  ;;  %v10507_v57 = vor.u32 %v9739_v51, %v8209_v49  ;;  %v9743_v18 = vld [vmem:[%s10308_s22 + $0xd8] sm:$0xf0] }
  0x29   : > { %1840 = vmatpush.bf16.msra.mxu1 %v9824_v5  ;;  %v9734_v5 = vld [vmem:[%s10308_s22 + $0x90] sm:$0xf0]  ;;  %v1120_v41 = vshrl.u32 %v10500_v54, 16 }
  0x2a   : > { %1913 = vmatpush.bf16.msra.mxu2 %v9832_v10  ;;  %v9853_v10 = vld [vmem:[%s15666_s2 + $0x128] sm:$0xff]  ;;  %v10476_v12 = vor.u32 %v9734_v5, %v8189_v4  ;;  %v1044_v15 = vshll.u32 %v10466_v8, 16 }
  0x2b   : > { %1986 = vmatpush.bf16.msra.mxu3 %v9840_v11  ;;  %1768 = vmatmul.bf16.vlgmr.msra.gmra.mxu0 %v951_v22  ;;  %v9781_v11 = vld [vmem:[%s15665_s1 + $0x28] sm:$0xff]  ;;  %v1042_v22 = vor.u32 %v1040_v14, %v1006_v53  ;;  %v8211_v53 = vld [vmem:[%s10308_s22 + $0xbc] sm:$0xf0] }
  0x2c   : > { %2052 = vmatpush.bf16.msrb.mxu0 %v9855_v16  ;;  %1841 = vmatmul.bf16.vlgmr.msra.gmra.mxu1 %v963_v23  ;;  %v1048_v16 = vshrl.u32 %v10440_v36, 16  ;;  %v1060_v19 = vshll.u32 %v10476_v12, 16  ;;  %v1046_v23 = vrot.slane %v1044_v15, 1  ;;  %v10509_v58 = vor.u32 %v9737_v52, %v8211_v53 }
  0x2d   : > { %2430 = vmatpush.bf16.msrb.mxu1 %v9783_v17  ;;  %1914 = vmatmul.bf16.vlgmr.msra.gmra.mxu2 %v975_v29  ;;  %v1052_v17 = vshll.u32 %v10468_v9, 16  ;;  %v1066_v29 = vor.u32 %v1064_v20, %v1030_v59  ;;  %v1080_v59 = vshrl.u32 %v10466_v8, 16  ;;  %v1096_v63 = vshrl.u32 %v10476_v12, 16 }
  0x2e   : > { %1987 = vmatmul.bf16.vlgmr.msra.gmra.mxu3 %v987_v30  ;;  %v1050_v24 = vor.u32 %v1048_v16, %v1014_v55  ;;  %v1062_v28 = vrot.slane %v1060_v19, 1  ;;  %v1070_v30 = vrot.slane %v1068_v21, 1  ;;  %v10502_v55 = vor.u32 %v9736_v47, %v8203_v48  ;;  %15713 = vst [vmem:[#allocation12_spill] sm:$0xff] %v10509_v58  ;;  %v9741_v21 = vld [vmem:[%s10308_s22 + $0xcc] sm:$0xf] }
  0x2f   : > { %v1054_v26 = vrot.slane %v1052_v17, 1  ;;  %v1108_v2 = vshll.u32 %v10509_v58, 16  ;;  %v1082_v3 = vor.u32 %v1080_v59, %v1046_v23  ;;  %v8221_v17 = vld [vmem:[%s10308_s22 + $0xc8] sm:$0xf]  ;;  %v1136_v47 = vshrl.u32 %v10507_v57, 16 }
  0x30   : > { %2053 = vmatpush.bf16.msrb.mxu0 %v9854_v32  ;;  %v1047_v32 = vsel %vm939_vm0, %v1042_v22, %v1046_v23  ;;  %v1063_v44 = vsel %vm939_vm0, %v1058_v27, %v1062_v28  ;;  %v1071_v46 = vsel %vm939_vm0, %v1066_v29, %v1070_v30  ;;  %v1092_v62 = vshll.u32 %v10502_v55, 16  ;;  %v8223_v22 = vld [vmem:[%s10308_s22 + $0xdc] sm:$0xf0]  ;;  %v8229_v23 = vld [vmem:[%s10308_s22 + $0xd0] sm:$0xf] }
  0x31   : > { %2431 = vmatpush.bf16.msrb.mxu1 %v9782_v33  ;;  %v1055_v33 = vsel %vm939_vm0, %v1050_v24, %v1054_v26  ;;  %v1098_v7 = vor.u32 %v1096_v63, %v1062_v28  ;;  %v1110_v14 = vrot.slane %v1108_v2, 1  ;;  %v9744_v24 = vld [vmem:[%s10308_s22 + $0xe0] sm:$0xf0]  ;;  %v8231_v27 = vld [vmem:[%s10308_s22 + $0xe4] sm:$0xf0]  ;;  %v10531_v28 = vor.u32 %v9743_v18, %v8221_v17  ;;  %v9851_v18 = vld [vmem:[%s15666_s2 + $0x118] sm:$0xff] }
  0x32   : > { %v1094_v6 = vrot.slane %v1092_v62, 1  ;;  %v10533_v29 = vor.u32 %v9741_v21, %v8223_v22  ;;  %v1144_v49 = vshrl.u32 %v10509_v58, 16  ;;  %v8241_v2 = vld [vmem:[%s10308_s22 + $0xf0] sm:$0xf] }
  0x33   : > { %v1124_v42 = vshll.u32 %v10531_v28, 16  ;;  %v8251_v17 = vld [vmem:[%s10308_s22 + $0x10c] sm:$0xf0]  ;;  %v1160_v22 = vshrl.u32 %v10531_v28, 16 }
  0x34   : > { %2054 = vmatpush.bf16.msrb.mxu0 %v9853_v10  ;;  %v1146_v62 = vor.u32 %v1144_v49, %v1110_v14 }
  0x35   : > { %2432 = vmatpush.bf16.msrb.mxu1 %v9781_v11  ;;  %v1126_v53 = vrot.slane %v1124_v42, 1 }
  0x38   : > { %2055 = vmatpush.bf16.msrb.mxu0 %v9852_v56 }
  0x3b   : > { %1773 = vmatmul.bf16.gmra.mxu0 %v1007_v60  ;;  %v1084_v60 = vshll.u32 %v10500_v54, 16 }
  0x3c   : > { %1846 = vmatmul.bf16.gmra.mxu1 %v1015_v61  ;;  %v1088_v61 = vshrl.u32 %v10468_v9, 16  ;;  %2056 = vmatpush.bf16.msrb.mxu0 %v9851_v18 }
  0x3d   : > { %1919 = vmatmul.bf16.gmra.mxu2 %v1023_v0  ;;  %v1100_v0 = vshll.u32 %v10507_v57, 16  ;;  %v1086_v4 = vrot.slane %v1084_v60, 1 }
  0x3e   : > { %1992 = vmatmul.bf16.gmra.mxu3 %v1031_v1  ;;  %v1104_v1 = vshrl.u32 %v10478_v13, 16  ;;  %v1090_v5 = vor.u32 %v1088_v61, %v1054_v26  ;;  %v9742_v26 = vld [vmem:[%s10308_s22 + $0xd4] sm:$0xf]  ;;  %v8351_v13 = vld [vmem:[%s10308_s22 + $0x1d4] sm:$0xf0] }
  0x3f   : > { %v1102_v10 = vrot.slane %v1100_v0, 1  ;;  %v1087_v15 = vsel %vm939_vm0, %v1082_v3, %v1086_v4  ;;  %v1122_v52 = vor.u32 %v1120_v41, %v1086_v4  ;;  %v9748_v3 = vld [vmem:[%s10308_s22 + $0x100] sm:$0xf0] }
  0x40   : > { %v1106_v11 = vor.u32 %v1104_v1, %v1070_v30  ;;  %v1095_v16 = vsel %vm939_vm0, %v1090_v5, %v1094_v6  ;;  %v9780_v30 = vld [vmem:[%s15665_s1 + $0x20] sm:$0xff] }
  0x41   : > { %v1103_v19 = vsel %vm939_vm0, %v1098_v7, %v1102_v10  ;;  %2433 = vmatpush.bf16.msrb.mxu1 %v9780_v30  ;;  %v1138_v60 = vor.u32 %v1136_v47, %v1102_v10  ;;  %v1127_v0 = vsel %vm939_vm0, %v1122_v52, %v1126_v53  ;;  %v9746_v7 = vld [vmem:[%s10308_s22 + $0xf4] sm:$0xf]  ;;  %v10562_v10 = vor.u32 %v9748_v3, %v8241_v2  ;;  %v9751_v3 = vld [vmem:[%s10308_s22 + $0x11c] sm:$0xf] }
  0x42   : > { %v1111_v20 = vsel %vm939_vm0, %v1106_v11, %v1110_v14  ;;  %v8243_v11 = vld [vmem:[%s10308_s22 + $0x104] sm:$0xf0] }
  0x43   : > { %v10564_v14 = vor.u32 %v9746_v7, %v8243_v11  ;;  %v9752_v7 = vld [vmem:[%s10308_s22 + $0x124] sm:$0xf]  ;;  %v8271_v11 = vld [vmem:[%s10308_s22 + $0x134] sm:$0xf0] }
  0x45   : > { %v1208_v18 = vshrl.u32 %v10564_v14, 16 }
  0x4b   : > { %1778 = vmatmul.bf16.gmra.mxu0 %v1047_v32  ;;  %v10538_v32 = vor.u32 %v9744_v24, %v8229_v23  ;;  %v1164_v23 = vshll.u32 %v10562_v10, 16  ;;  %v1168_v24 = vshrl.u32 %v10533_v29, 16 }
  0x4c   : > { %1851 = vmatmul.bf16.gmra.mxu1 %v1055_v33  ;;  %v10540_v33 = vor.u32 %v9742_v26, %v8231_v27  ;;  %v1172_v26 = vshll.u32 %v10564_v14, 16 }
  0x4d   : > { %1924 = vmatmul.bf16.gmra.mxu2 %v1063_v44  ;;  %v1128_v44 = vshrl.u32 %v10502_v55, 16  ;;  %v1140_v48 = vshll.u32 %v10538_v32, 16  ;;  %v1176_v27 = vshrl.u32 %v10538_v32, 16 }
  0x4e   : > { %1997 = vmatmul.bf16.gmra.mxu3 %v1071_v46  ;;  %15714 = vst [vmem:[#allocation13_spill] sm:$0xff] %v10540_v33  ;;  %v1132_v46 = vshll.u32 %v10533_v29, 16  ;;  %v1148_v51 = vshll.u32 %v10540_v33, 16  ;;  %v1184_v41 = vshrl.u32 %v10540_v33, 16 }
  0x4f   : > { %v1130_v56 = vor.u32 %v1128_v44, %v1094_v6  ;;  %v1142_v61 = vrot.slane %v1140_v48, 1  ;;  %v8249_v6 = vld [vmem:[%s10308_s22 + $0xf8] sm:$0xf]  ;;  %v1162_v44 = vor.u32 %v1160_v22, %v1126_v53  ;;  %v1174_v48 = vrot.slane %v1172_v26, 1 }
  0x50   : > { %v1134_v59 = vrot.slane %v1132_v46, 1  ;;  %v1150_v63 = vrot.slane %v1148_v51, 1  ;;  %v1166_v46 = vrot.slane %v1164_v23, 1 }
  0x51   : > { %v1143_v5 = vsel %vm939_vm0, %v1138_v60, %v1142_v61  ;;  %v1178_v49 = vor.u32 %v1176_v27, %v1142_v61 }
  0x52   : > { %v1135_v1 = vsel %vm939_vm0, %v1130_v56, %v1134_v59  ;;  %v1151_v4 = vsel %vm939_vm0, %v1146_v62, %v1150_v63  ;;  %v1170_v47 = vor.u32 %v1168_v24, %v1134_v59  ;;  %v1186_v52 = vor.u32 %v1184_v41, %v1150_v63  ;;  %v8269_v59 = vld [vmem:[%s10308_s22 + $0x120] sm:$0xf] }
  0x53   : > { %v1167_v60 = vsel %vm939_vm0, %v1162_v44, %v1166_v46  ;;  %v1210_v41 = vor.u32 %v1208_v18, %v1174_v48 }
  0x54   : > { %v1175_v62 = vsel %vm939_vm0, %v1170_v47, %v1174_v48  ;;  %v8289_v48 = vld [vmem:[%s10308_s22 + $0x148] sm:$0xf] }
  0x5b   : > { %1783 = vmatmul.bf16.gmra.mxu0 %v1087_v15  ;;  %v9749_v15 = vld [vmem:[%s10308_s22 + $0x108] sm:$0xf0] }
  0x5c   : > { %1856 = vmatmul.bf16.gmra.mxu1 %v1095_v16  ;;  %v9747_v16 = vld [vmem:[%s10308_s22 + $0xfc] sm:$0xf] }
  0x5d   : > { %1929 = vmatmul.bf16.gmra.mxu2 %v1103_v19  ;;  %v9779_v19 = vld [vmem:[%s15665_s1 + $0x18] sm:$0xff]  ;;  %v10574_v21 = vor.u32 %v9747_v16, %v8251_v17  ;;  %v1200_v16 = vshrl.u32 %v10562_v10, 16 }
  0x5e   : > { %2002 = vmatmul.bf16.gmra.mxu3 %v1111_v20  ;;  %v10572_v20 = vor.u32 %v9749_v15, %v8249_v6  ;;  %2434 = vmatpush.bf16.msrb.mxu1 %v9779_v19  ;;  %v10602_v15 = vor.u32 %v9752_v7, %v8271_v11  ;;  %v9850_v7 = vld [vmem:[%s15666_s2 + $0x110] sm:$0xff] }
  0x5f   : > { %15715 = vst [vmem:[#allocation14_spill] sm:$0xff] %v10574_v21  ;;  %v1188_v42 = vshll.u32 %v10574_v21, 16  ;;  %v1224_v24 = vshrl.u32 %v10574_v21, 16  ;;  %v1202_v27 = vor.u32 %v1200_v16, %v1166_v46  ;;  %2057 = vmatpush.bf16.msrb.mxu0 %v9850_v7  ;;  %v8303_v7 = vld [vmem:[%s10308_s22 + $0x17c] sm:$0xf0] }
  0x60   : > { %v1180_v30 = vshll.u32 %v10572_v20, 16  ;;  %15716 = vst [vmem:[#allocation15_spill] sm:$0xff] %v10602_v15  ;;  %v1216_v22 = vshrl.u32 %v10572_v20, 16  ;;  %v1228_v26 = vshll.u32 %v10602_v15, 16 }
  0x61   : > { %v1190_v56 = vrot.slane %v1188_v42, 1 }
  0x62   : > { %v1182_v51 = vrot.slane %v1180_v30, 1 }
  0x63   : > { %v1191_v53 = vsel %vm939_vm0, %v1186_v52, %v1190_v56  ;;  %v1230_v52 = vrot.slane %v1228_v26, 1 }
  0x64   : > { %v1183_v2 = vsel %vm939_vm0, %v1178_v49, %v1182_v51  ;;  %v1218_v44 = vor.u32 %v1216_v22, %v1182_v51  ;;  %v1226_v49 = vor.u32 %v1224_v24, %v1190_v56 }
  0x66   : > { %v1231_v46 = vsel %vm939_vm0, %v1226_v49, %v1230_v52 }
  0x6b   : > { %1788 = vmatmul.bf16.gmra.mxu0 %v1127_v0  ;;  %v8261_v0 = vld [vmem:[%s10308_s22 + $0x118] sm:$0xf] }
  0x6c   : > { %1861 = vmatmul.bf16.gmra.mxu1 %v1135_v1  ;;  %v9753_v1 = vld [vmem:[%s10308_s22 + $0x128] sm:$0xf0] }
  0x6d   : > { %1934 = vmatmul.bf16.gmra.mxu2 %v1143_v5  ;;  %v8263_v5 = vld [vmem:[%s10308_s22 + $0x12c] sm:$0xf0]  ;;  %v10596_v61 = vor.u32 %v9753_v1, %v8261_v0  ;;  %v8281_v0 = vld [vmem:[%s10308_s22 + $0x140] sm:$0xf]  ;;  %v9758_v1 = vld [vmem:[%s10308_s22 + $0x150] sm:$0xf0] }
  0x6e   : > { %2007 = vmatmul.bf16.gmra.mxu3 %v1151_v4  ;;  %v9754_v4 = vld [vmem:[%s10308_s22 + $0x130] sm:$0xf0]  ;;  %v10598_v63 = vor.u32 %v9751_v3, %v8263_v5  ;;  %v8283_v3 = vld [vmem:[%s10308_s22 + $0x154] sm:$0xf0]  ;;  %v9759_v5 = vld [vmem:[%s10308_s22 + $0x158] sm:$0xf0]  ;;  %v10624_v51 = vor.u32 %v9758_v1, %v8281_v0 }
  0x6f   : > { %v10600_v6 = vor.u32 %v9754_v4, %v8269_v59  ;;  %v1204_v17 = vshll.u32 %v10596_v61, 16  ;;  %v9757_v59 = vld [vmem:[%s10308_s22 + $0x14c] sm:$0xf]  ;;  %v8291_v4 = vld [vmem:[%s10308_s22 + $0x15c] sm:$0xf0]  ;;  %v10631_v11 = vor.u32 %v9759_v5, %v8289_v48 }
  0x70   : > { %v1212_v19 = vshll.u32 %v10598_v63, 16  ;;  %v10633_v16 = vor.u32 %v9757_v59, %v8291_v4  ;;  %v1244_v18 = vshll.u32 %v10624_v51, 16  ;;  %v8301_v48 = vld [vmem:[%s10308_s22 + $0x168] sm:$0xf]  ;;  %v9763_v5 = vld [vmem:[%s10308_s22 + $0x178] sm:$0xf0] }
  0x71   : > { %v1220_v23 = vshll.u32 %v10600_v6, 16  ;;  %v1206_v30 = vrot.slane %v1204_v17, 1  ;;  %v1240_v17 = vshrl.u32 %v10596_v61, 16  ;;  %v1256_v24 = vshrl.u32 %v10600_v6, 16  ;;  %v9761_v4 = vld [vmem:[%s10308_s22 + $0x16c] sm:$0xf] }
  0x72   : > { %v1214_v42 = vrot.slane %v1212_v19, 1  ;;  %15717 = vst [vmem:[#allocation16_spill] sm:$0xff] %v10633_v16  ;;  %v1248_v19 = vshrl.u32 %v10598_v63, 16  ;;  %v1260_v26 = vshll.u32 %v10631_v11, 16  ;;  %v1246_v49 = vrot.slane %v1244_v18, 1 }
  0x73   : > { %v1222_v47 = vrot.slane %v1220_v23, 1  ;;  %v9778_v23 = vld [vmem:[%s15665_s1 + $0x10] sm:$0xff] }
  0x74   : > { %2435 = vmatpush.bf16.msrb.mxu1 %v9778_v23  ;;  %v1262_v1 = vrot.slane %v1260_v26, 1  ;;  %v9762_v18 = vld [vmem:[%s10308_s22 + $0x174] sm:$0xf] }
  0x75   : > { %v1258_v0 = vor.u32 %v1256_v24, %v1222_v47  ;;  %v1280_v24 = vshrl.u32 %v10624_v51, 16 }
  0x77   : > { %v1263_v59 = vsel %vm939_vm0, %v1258_v0, %v1262_v1  ;;  %v1304_v0 = vshrl.u32 %v10633_v16, 16 }
  0x7b   : > { %1793 = vmatmul.bf16.gmra.mxu0 %v1167_v60  ;;  %v1207_v60 = vsel %vm939_vm0, %v1202_v27, %v1206_v30  ;;  %v1264_v27 = vshrl.u32 %v10602_v15, 16 }
  0x7c   : > { %1866 = vmatmul.bf16.gmra.mxu1 %v1175_v62  ;;  %v1215_v62 = vsel %vm939_vm0, %v1210_v41, %v1214_v42  ;;  %v1268_v41 = vshll.u32 %v10633_v16, 16 }
  0x7d   : > { %1939 = vmatmul.bf16.gmra.mxu2 %v1183_v2  ;;  %v1223_v2 = vsel %vm939_vm0, %v1218_v44, %v1222_v47  ;;  %v1242_v44 = vor.u32 %v1240_v17, %v1206_v30  ;;  %v9764_v17 = vld [vmem:[%s10308_s22 + $0x180] sm:$0xf0]  ;;  %v10658_v47 = vor.u32 %v9763_v5, %v8301_v48 }
  0x7e   : > { %2012 = vmatmul.bf16.gmra.mxu3 %v1191_v53  ;;  %v9756_v53 = vld [vmem:[%s10308_s22 + $0x144] sm:$0xf] }
  0x7f   : > { %v10626_v56 = vor.u32 %v9756_v53, %v8283_v3  ;;  %v1247_v53 = vsel %vm939_vm0, %v1242_v44, %v1246_v49  ;;  %v1284_v26 = vshll.u32 %v10658_v47, 16  ;;  %v1296_v44 = vshrl.u32 %v10631_v11, 16 }
  0x81   : > { %v1252_v22 = vshll.u32 %v10626_v56, 16 }
  0x8b   : > { %1798 = vmatmul.bf16.gmra.mxu0 %v1207_v60  ;;  %v1250_v60 = vor.u32 %v1248_v19, %v1214_v42  ;;  %v8309_v42 = vld [vmem:[%s10308_s22 + $0x170] sm:$0xf]  ;;  %v8311_v19 = vld [vmem:[%s10308_s22 + $0x184] sm:$0xf0] }
  0x8c   : > { %1871 = vmatmul.bf16.gmra.mxu1 %v1215_v62  ;;  %v1254_v62 = vrot.slane %v1252_v22, 1  ;;  %v10662_v22 = vor.u32 %v9764_v17, %v8309_v42  ;;  %v10664_v23 = vor.u32 %v9762_v18, %v8311_v19  ;;  %v8321_v42 = vld [vmem:[%s10308_s22 + $0x190] sm:$0xf] }
  0x8d   : > { %1944 = vmatmul.bf16.gmra.mxu2 %v1223_v2  ;;  %v1266_v2 = vor.u32 %v1264_v27, %v1230_v52  ;;  %v10660_v52 = vor.u32 %v9761_v4, %v8303_v7  ;;  %v1288_v27 = vshrl.u32 %v10626_v56, 16 }
  0x8e   : > { %2017 = vmatmul.bf16.gmra.mxu3 %v1231_v46  ;;  %v1270_v46 = vrot.slane %v1268_v41, 1  ;;  %v1255_v3 = vsel %vm939_vm0, %v1250_v60, %v1254_v62  ;;  %15718 = vst [vmem:[#allocation17_spill] sm:$0xff] %v10664_v23  ;;  %v1300_v60 = vshll.u32 %v10662_v22, 16 }
  0x8f   : > { %v1292_v41 = vshll.u32 %v10660_v52, 16  ;;  %v1290_v48 = vor.u32 %v1288_v27, %v1254_v62  ;;  %v9849_v62 = vld [vmem:[%s15666_s2 + $0x108] sm:$0xff] }
  0x90   : > { %v1271_v30 = vsel %vm939_vm0, %v1266_v2, %v1270_v46  ;;  %v1308_v2 = vshll.u32 %v10664_v23, 16  ;;  %v1306_v4 = vor.u32 %v1304_v0, %v1270_v46  ;;  %v8323_v27 = vld [vmem:[%s10308_s22 + $0x1a4] sm:$0xf0]  ;;  %v8331_v0 = vld [vmem:[%s10308_s22 + $0x1ac] sm:$0xf0]  ;;  %2058 = vmatpush.bf16.msrb.mxu0 %v9849_v62  ;;  %v1320_v62 = vshrl.u32 %v10658_v47, 16 }
  0x91   : > { %v1294_v5 = vrot.slane %v1292_v41, 1  ;;  %v8329_v41 = vld [vmem:[%s10308_s22 + $0x198] sm:$0xf] }
  0x92   : > { %v1310_v7 = vrot.slane %v1308_v2, 1  ;;  %v9777_v2 = vld [vmem:[%s15665_s1 + $0x8] sm:$0xff] }
  0x93   : > { %v1295_v16 = vsel %vm939_vm0, %v1290_v48, %v1294_v5  ;;  %2436 = vmatpush.bf16.msrb.mxu1 %v9777_v2 }
  0x94   : > { %v1311_v46 = vsel %vm939_vm0, %v1306_v4, %v1310_v7 }
  0x9b   : > { %1803 = vmatmul.bf16.gmra.mxu0 %v1247_v53  ;;  %v1282_v53 = vor.u32 %v1280_v24, %v1246_v49  ;;  %v9768_v49 = vld [vmem:[%s10308_s22 + $0x1a0] sm:$0xf0]  ;;  %v9766_v24 = vld [vmem:[%s10308_s22 + $0x194] sm:$0xf] }
  0x9c   : > { %1876 = vmatmul.bf16.gmra.mxu1 %v1255_v3  ;;  %v1286_v3 = vrot.slane %v1284_v26, 1  ;;  %v10694_v48 = vor.u32 %v9766_v24, %v8323_v27  ;;  %v1336_v24 = vshrl.u32 %v10662_v22, 16  ;;  %v1344_v27 = vshrl.u32 %v10664_v23, 16 }
  0x9d   : > { %1949 = vmatmul.bf16.gmra.mxu2 %v1263_v59  ;;  %v1298_v59 = vor.u32 %v1296_v44, %v1262_v1  ;;  %v9769_v44 = vld [vmem:[%s10308_s22 + $0x1a8] sm:$0xf0] }
  0x9e   : > { %2022 = vmatmul.bf16.gmra.mxu3 %v1271_v30  ;;  %v1302_v30 = vrot.slane %v1300_v60, 1  ;;  %v1287_v19 = vsel %vm939_vm0, %v1282_v53, %v1286_v3  ;;  %v9767_v60 = vld [vmem:[%s10308_s22 + $0x19c] sm:$0xf]  ;;  %v10692_v53 = vor.u32 %v9768_v49, %v8321_v42  ;;  %15720 = vst [vmem:[#allocation19_spill] sm:$0xff] %v10694_v48  ;;  %v1328_v42 = vshrl.u32 %v10660_v52, 16 }
  0x9f   : > { %v10698_v4 = vor.u32 %v9767_v60, %v8331_v0  ;;  %v1332_v49 = vshll.u32 %v10694_v48, 16  ;;  %v1322_v60 = vor.u32 %v1320_v62, %v1286_v3  ;;  %v1346_v58 = vor.u32 %v1344_v27, %v1310_v7  ;;  %v8341_v62 = vld [vmem:[%s10308_s22 + $0x1b8] sm:$0xf]  ;;  %v8349_v27 = vld [vmem:[%s10308_s22 + $0x1c0] sm:$0xf] }
  0xa0   : > { %v1303_v26 = vsel %vm939_vm0, %v1298_v59, %v1302_v30  ;;  %15719 = vst [vmem:[#allocation18_spill] sm:$0xff] %v10692_v53  ;;  %v10696_v59 = vor.u32 %v9769_v44, %v8329_v41  ;;  %v1324_v15 = vshll.u32 %v10692_v53, 16  ;;  %v1330_v0 = vor.u32 %v1328_v42, %v1294_v5  ;;  %v9771_v42 = vld [vmem:[%s10308_s22 + $0x1bc] sm:$0xf] }
  0xa1   : > { %15722 = vst [vmem:[#allocation21_spill] sm:$0xff] %v10698_v4  ;;  %v1348_v41 = vshll.u32 %v10698_v4, 16  ;;  %v1334_v2 = vrot.slane %v1332_v49, 1 }
  0xa2   : > { %15721 = vst [vmem:[#allocation20_spill] sm:$0xff] %v10696_v59 }
  0xa3   : > { %v1335_v5 = vsel %vm939_vm0, %v1330_v0, %v1334_v2  ;;  %v9791_v0 = vld [vmem:[%s15665_s1 + $0x78] sm:$0xff] }
  0xa4   : > { %2503 = vmatpush.bf16.msrb.mxu2 %v9791_v0 }
  0xa8   : > { %v1769_v17 = vpop.f32.mrf.mxu0 }
  0xa9   : > { %v1842_v18 = vpop.f32.mrf.mxu1 }
  0xaa   : > { %v1843_v1 = vadd.f32 %v1842_v18, %v1769_v17 }
  0xab   : > { %1808 = vmatmul.bf16.gmra.mxu0 %v1287_v19 }
  0xac   : > { %1881 = vmatmul.bf16.gmra.mxu1 %v1295_v16 }
  0xad   : > { %1954 = vmatmul.bf16.gmra.mxu2 %v1303_v26 }
  0xae   : > { %2027 = vmatmul.bf16.gmra.mxu3 %v1311_v46  ;;  %v1340_v46 = vshll.u32 %v10696_v59, 16 }
  0xb0   : > { %v1915_v17 = vpop.f32.mrf.mxu2  ;;  %v1771_v19 = vpop.f32.mrf.mxu0  ;;  %v1342_v33 = vrot.slane %v1340_v46, 1  ;;  %v8343_v46 = vld [vmem:[%s10308_s22 + $0x1cc] sm:$0xf0] }
  0xb1   : > { %v1988_v18 = vpop.f32.mrf.mxu3  ;;  %v1916_v21 = vadd.f32 %v1915_v17, %v1843_v1  ;;  %v1844_v16 = vpop.f32.mrf.mxu1  ;;  %v1326_v1 = vrot.slane %v1324_v15, 1  ;;  %v1338_v17 = vor.u32 %v1336_v24, %v1302_v30  ;;  %v9773_v30 = vld [vmem:[%s10308_s22 + $0x1c8] sm:$0xf0] }
  0xb2   : > { %v1845_v26 = vadd.f32 %v1844_v16, %v1771_v19  ;;  %v10710_v19 = vrot.slane %v1348_v41, 1  ;;  %v9774_v41 = vld [vmem:[%s10308_s22 + $0x1d0] sm:$0xf0] }
  0xb3   : > { %v10708_v44 = vadd.f32 %v1988_v18, %v1916_v21  ;;  %v1327_v15 = vsel %vm939_vm0, %v1322_v60, %v1326_v1  ;;  %v1343_v7 = vsel %vm939_vm0, %v1338_v17, %v1342_v33  ;;  %v10727_v60 = vor.u32 %v9773_v30, %v8341_v62  ;;  %v9790_v30 = vld [vmem:[%s15665_s1 + $0x70] sm:$0xff] }
  0xb4   : > { %v1351_v24 = vsel %vm939_vm0, %v1346_v58, %v10710_v19  ;;  %v10732_v17 = vor.u32 %v9771_v42, %v8343_v46  ;;  %v10734_v58 = vor.u32 %v9774_v41, %v8349_v27  ;;  %v1368_v62 = vshrl.u32 %v10694_v48, 16  ;;  %2504 = vmatpush.bf16.msrb.mxu2 %v9790_v30 }
  0xb5   : > { %15723 = vst [vmem:[#allocation22_spill] sm:$0xff] %v10727_v60  ;;  %v1376_v46 = vshrl.u32 %v10696_v59, 16 }
  0xb6   : > { %15724 = vst [vmem:[#allocation23_spill] sm:$0xff] %v10732_v17  ;;  %v1380_v27 = vshll.u32 %v10734_v58, 16  ;;  %v1370_v39 = vor.u32 %v1368_v62, %v1334_v2  ;;  %v9788_v62 = vld [vmem:[%s15665_s1 + $0x60] sm:$0xff] }
  0xb7   : > { %15725 = vst [vmem:[#allocation24_spill] sm:$0xff] %v10734_v58 }
  0xb8   : > { %v1917_v16 = vpop.f32.mrf.mxu2  ;;  %v1774_v18 = vpop.f32.mrf.mxu0  ;;  %v10770_v50 = vrot.slane %v1380_v27, 1 }
  0xb9   : > { %v1990_v23 = vpop.f32.mrf.mxu3  ;;  %v1918_v21 = vadd.f32 %v1917_v16, %v1845_v26  ;;  %v1847_v3 = vpop.f32.mrf.mxu1  ;;  %v9772_v16 = vld [vmem:[%s10308_s22 + $0x1c4] sm:$0xf] }
  0xba   : > { %v1848_v49 = vadd.f32 %v1847_v3, %v1774_v18  ;;  %v10736_v18 = vor.u32 %v9772_v16, %v8351_v13  ;;  %v1384_v16 = vshrl.u32 %v10698_v4, 16 }
  0xbb   : > { %v10723_v26 = vadd.f32 %v1990_v23, %v1918_v21  ;;  %1813 = vmatmul.bf16.gmra.mxu0 %v1327_v15  ;;  %v9799_v23 = vld [vmem:[%s15665_s1 + $0xb8] sm:$0xff]  ;;  %v1360_v15 = vshrl.u32 %v10692_v53, 16 }
  0xbc   : > { %1886 = vmatmul.bf16.gmra.mxu1 %v1335_v5  ;;  %15726 = vst [vmem:[#allocation25_spill] sm:$0xff] %v10736_v18  ;;  %v1364_v5 = vshll.u32 %v10727_v60, 16  ;;  %2576 = vmatpush.bf16.msrb.mxu3 %v9799_v23  ;;  %v1388_v0 = vshll.u32 %v10736_v18, 16  ;;  %v9798_v23 = vld [vmem:[%s15665_s1 + $0xb0] sm:$0xff]  ;;  %v1386_v59 = vor.u32 %v1384_v16, %v10710_v19 }
  0xbd   : > { %1959 = vmatmul.bf16.gmra.mxu2 %v1343_v7  ;;  %v1362_v30 = vor.u32 %v1360_v15, %v1326_v1  ;;  %v9797_v1 = vld [vmem:[%s15665_s1 + $0xa8] sm:$0xff] }
  0xbe   : > { %2032 = vmatmul.bf16.gmra.mxu3 %v1351_v24  ;;  %v1372_v24 = vshll.u32 %v10732_v17, 16  ;;  %v10766_v4 = vrot.slane %v1364_v5, 1  ;;  %v1390_v48 = vrot.slane %v1388_v0, 1  ;;  %v512_v15 = vld [vmem:[%s10308_s22 + $0x1e8] sm:$0xff]  ;;  %v870_v0 = vunpack.c.h.b16 %v511_v40 }
  0xc0   : > { %v1920_v21 = vpop.f32.mrf.mxu2  ;;  %v1776_v42 = vpop.f32.mrf.mxu0  ;;  %2577 = vmatpush.bf16.msrb.mxu3 %v9798_v23  ;;  %v1367_v2 = vsel %vm939_vm0, %v1362_v30, %v10766_v4  ;;  %v872_v30 = vunpack.c.h.b16 %v512_v15 }
  0xc1   : > { %v1993_v3 = vpop.f32.mrf.mxu3  ;;  %v1921_v13 = vadd.f32 %v1920_v21, %v1848_v49  ;;  %v1849_v7 = vpop.f32.mrf.mxu1  ;;  %v9848_v21 = vld [vmem:[%s15666_s2 + $0x100] sm:$0xff] }
  0xc2   : > { %v1850_v41 = vadd.f32 %v1849_v7, %v1776_v42  ;;  %v9776_v42 = vld [vmem:[%s15665_s1] sm:$0xff]  ;;  %v9789_v7 = vld [vmem:[%s15665_s1 + $0x68] sm:$0xff]  ;;  %2059 = vmatpush.bf16.msrb.mxu0 %v9848_v21 }
  0xc3   : > { %v10755_v49 = vadd.f32 %v1993_v3, %v1921_v13  ;;  %v10768_v3 = vrot.slane %v1372_v24, 1  ;;  %v1378_v13 = vor.u32 %v1376_v46, %v1342_v33  ;;  %2437 = vmatpush.bf16.msrb.mxu1 %v9776_v42  ;;  %2505 = vmatpush.bf16.msrb.mxu2 %v9789_v7  ;;  %v869_v33 = vunpack.c.l.b16 %v511_v40  ;;  %v9787_v40 = vld [vmem:[%s15665_s1 + $0x58] sm:$0xff] }
  0xc4   : > { %2578 = vmatpush.bf16.msrb.mxu3 %v9797_v1  ;;  %v1391_v42 = vsel %vm939_vm0, %v1386_v59, %v1390_v48  ;;  %v871_v7 = vunpack.c.l.b16 %v512_v15  ;;  %v9796_v1 = vld [vmem:[%s15665_s1 + $0xa0] sm:$0xff]  ;;  %v9795_v15 = vld [vmem:[%s15665_s1 + $0x98] sm:$0xff] }
  0xc5   : > { %v1375_v27 = vsel %vm939_vm0, %v1370_v39, %v10768_v3  ;;  %v1383_v16 = vsel %vm939_vm0, %v1378_v13, %v10770_v50  ;;  %v10798_v39 = vpack.c.b16 %v870_v0, %v870_v0  ;;  %v10802_v13 = vpack.c.b16 %v872_v30, %v872_v30 }
  0xc6   : > { %v10800_v59 = vpack.c.b16 %v871_v7, %v871_v7 }
  0xc7   : > { %2506 = vmatpush.bf16.msrb.mxu2 %v9788_v62  ;;  %15728 = vst [vmem:[#allocation27_spill] sm:$0xff] %v10802_v13  ;;  %v1412_v0 = vshll.u32 %v10798_v39, 16 }
  0xc8   : > { %v1922_v5 = vpop.f32.mrf.mxu2  ;;  %v1779_v19 = vpop.f32.mrf.mxu0  ;;  %15727 = vst [vmem:[#allocation26_spill] sm:$0xff] %v10800_v59  ;;  %2579 = vmatpush.bf16.msrb.mxu3 %v9796_v1  ;;  %v1420_v30 = vshll.u32 %v10800_v59, 16  ;;  %v1424_v1 = vshrl.u32 %v10736_v18, 16 }
  0xc9   : > { %v1995_v23 = vpop.f32.mrf.mxu3  ;;  %v1923_v24 = vadd.f32 %v1922_v5, %v1850_v41  ;;  %v1852_v46 = vpop.f32.mrf.mxu1  ;;  %v10793_v5 = vpack.c.b16 %v869_v33, %v869_v33  ;;  %v1400_v33 = vshrl.u32 %v10727_v60, 16  ;;  %v1414_v18 = vrot.slane %v1412_v0, 1 }
  0xca   : > { %v1853_v21 = vadd.f32 %v1852_v46, %v1779_v19 }
  0xcb   : > { %v10791_v41 = vadd.f32 %v1995_v23, %v1923_v24  ;;  %1818 = vmatmul.bf16.gmra.mxu0 %v1367_v2  ;;  %2507 = vmatpush.bf16.msrb.mxu2 %v9787_v40  ;;  %v1404_v62 = vshll.u32 %v10793_v5, 16  ;;  %v9786_v24 = vld [vmem:[%s15665_s1 + $0x50] sm:$0xff]  ;;  %v1428_v40 = vshll.u32 %v10802_v13, 16 }
  0xcc   : > { %1891 = vmatmul.bf16.gmra.mxu1 %v1375_v27  ;;  %2580 = vmatpush.bf16.msrb.mxu3 %v9795_v15  ;;  %v1422_v15 = vrot.slane %v1420_v30, 1 }
  0xcd   : > { %1964 = vmatmul.bf16.gmra.mxu2 %v1383_v16  ;;  %v1408_v16 = vshrl.u32 %v10732_v17, 16  ;;  %v9785_v17 = vld [vmem:[%s15665_s1 + $0x48] sm:$0xff]  ;;  %v1430_v53 = vrot.slane %v1428_v40, 1 }
  0xce   : > { %2037 = vmatmul.bf16.gmra.mxu3 %v1391_v42  ;;  %v1416_v42 = vshrl.u32 %v10734_v58, 16 }
  0xcf   : > { %2508 = vmatpush.bf16.msrb.mxu2 %v9786_v24  ;;  %v1410_v58 = vor.u32 %v1408_v16, %v10768_v3  ;;  %v1426_v24 = vor.u32 %v1424_v1, %v1390_v48 }
  0xd0   : > { %v1925_v23 = vpop.f32.mrf.mxu2  ;;  %v1781_v46 = vpop.f32.mrf.mxu0  ;;  %v1418_v60 = vor.u32 %v1416_v42, %v10770_v50  ;;  %v9792_v42 = vld [vmem:[%s15665_s1 + $0x80] sm:$0xff] }
  0xd1   : > { %v1998_v2 = vpop.f32.mrf.mxu3  ;;  %v1926_v19 = vadd.f32 %v1925_v23, %v1853_v21  ;;  %v1854_v27 = vpop.f32.mrf.mxu1  ;;  %v9794_v21 = vld [vmem:[%s15665_s1 + $0x90] sm:$0xff]  ;;  %v1415_v48 = vsel %vm939_vm0, %v1410_v58, %v1414_v18  ;;  %v1431_v0 = vsel %vm939_vm0, %v1426_v24, %v1430_v53  ;;  %v9807_v58 = vld [vmem:[%s15665_s1 + $0xf8] sm:$0xff] }
  0xd2   : > { %v1855_v7 = vadd.f32 %v1854_v27, %v1781_v46  ;;  %v1402_v46 = vor.u32 %v1400_v33, %v10766_v4  ;;  %v1406_v27 = vrot.slane %v1404_v62, 1  ;;  %2581 = vmatpush.bf16.msrb.mxu3 %v9794_v21  ;;  %v9784_v4 = vld [vmem:[%s15665_s1 + $0x40] sm:$0xff]  ;;  %2649 = vmatpush.bf16.msra.mxu0 %v9807_v58 }
  0xd3   : > { %v10821_v23 = vadd.f32 %v1998_v2, %v1926_v19  ;;  %2509 = vmatpush.bf16.msrb.mxu2 %v9785_v17  ;;  %v9793_v2 = vld [vmem:[%s15665_s1 + $0x88] sm:$0xff]  ;;  %v1423_v17 = vsel %vm939_vm0, %v1418_v60, %v1422_v15  ;;  %v9815_v60 = vld [vmem:[%s15665_s1 + $0x138] sm:$0xff] }
  0xd4   : > { %v1407_v50 = vsel %vm939_vm0, %v1402_v46, %v1406_v27  ;;  %2722 = vmatpush.bf16.msra.mxu1 %v9815_v60 }
  0xd5   : > { %15729 = vst [vmem:[#allocation28_spill] sm:$0xff] %v10821_v23 }
  0xd6   : > { %2582 = vmatpush.bf16.msrb.mxu3 %v9793_v2  ;;  %v1440_v2 = vshrl.u32 %v10793_v5, 16 }
  0xd7   : > { %2510 = vmatpush.bf16.msrb.mxu2 %v9784_v4  ;;  %v1446_v4 = vshrl.u32 %v10800_v59, 16 }
  0xd8   : > { %v1927_v19 = vpop.f32.mrf.mxu2  ;;  %v1784_v3 = vpop.f32.mrf.mxu0 }
  0xd9   : > { %v2000_v23 = vpop.f32.mrf.mxu3  ;;  %v1928_v33 = vadd.f32 %v1927_v19, %v1855_v7  ;;  %v1857_v62 = vpop.f32.mrf.mxu1  ;;  %v1443_v19 = vshrl.u32 %v10798_v39, 16  ;;  %v1448_v60 = vor.u32 %v1446_v4, %v1422_v15 }
  0xda   : > { %v1858_v16 = vadd.f32 %v1857_v62, %v1784_v3  ;;  %2583 = vmatpush.bf16.msrb.mxu3 %v9792_v42  ;;  %v8137_v3 = vld [vmem:[%s10308_s22 + $0x10] sm:$0xf]  ;;  %v9720_v62 = vld [vmem:[%s10308_s22 + $0x20] sm:$0xf0] }
  0xdb   : > { %v10842_v30 = vadd.f32 %v2000_v23, %v1928_v33  ;;  %1823 = vmatmul.bf16.gmra.mxu0 %v1407_v50  ;;  %v1449_v33 = vshrl.u32 %v10802_v13, 16 }
  0xdc   : > { %1896 = vmatmul.bf16.gmra.mxu1 %v1415_v48 }
  0xdd   : > { %1969 = vmatmul.bf16.gmra.mxu2 %v1423_v17  ;;  %v1445_v17 = vor.u32 %v1443_v19, %v1414_v18 }
  0xde   : > { %2042 = vmatmul.bf16.gmra.mxu3 %v1431_v0 }
  0xe0   : > { %v1930_v7 = vpop.f32.mrf.mxu2  ;;  %v1786_v21 = vpop.f32.mrf.mxu0 }
  0xe1   : > { %v2003_v1 = vpop.f32.mrf.mxu3  ;;  %v1931_v40 = vadd.f32 %v1930_v7, %v1858_v16  ;;  %v1859_v23 = vpop.f32.mrf.mxu1  ;;  %v1442_v16 = vor.u32 %v1440_v2, %v1406_v27  ;;  %v1451_v7 = vor.u32 %v1449_v33, %v1430_v53 }
  0xe2   : > { %v1860_v46 = vadd.f32 %v1859_v23, %v1786_v21  ;;  %v8157_v21 = vld [vmem:[%s10308_s22 + $0x38] sm:$0xf]  ;;  %v9725_v23 = vld [vmem:[%s10308_s22 + $0x48] sm:$0xf0] }
  0xe3   : > { %v10850_v24 = vadd.f32 %v2003_v1, %v1931_v40  ;;  %v10858_v1 = vor.u32 %v9720_v62, %v8137_v3  ;;  %v10864_v13 = vor.u32 %v9725_v23, %v8157_v21  ;;  %v8177_v23 = vld [vmem:[%s10308_s22 + $0x60] sm:$0xf] }
  0xe5   : > { %v991_v18 = vshll.u32 %v10858_v1, 16  ;;  %v989_v19 = vshrl.u32 %v10858_v1, 16  ;;  %v996_v33 = vshll.u32 %v10864_v13, 16 }
  0xe7   : > { %v993_v4 = vrot.slane %v991_v18, 1  ;;  %v9730_v18 = vld [vmem:[%s10308_s22 + $0x70] sm:$0xf0] }
  0xe8   : > { %v1932_v50 = vpop.f32.mrf.mxu2  ;;  %v1789_v42 = vpop.f32.mrf.mxu0 }
  0xe9   : > { %v2005_v48 = vpop.f32.mrf.mxu3  ;;  %v1933_v0 = vadd.f32 %v1932_v50, %v1860_v46  ;;  %v1862_v58 = vpop.f32.mrf.mxu1  ;;  %v9806_v50 = vld [vmem:[%s15665_s1 + $0xf0] sm:$0xff] }
  0xea   : > { %v1863_v40 = vadd.f32 %v1862_v58, %v1789_v42  ;;  %2650 = vmatpush.bf16.msra.mxu0 %v9806_v50 }
  0xeb   : > { %v10862_v59 = vadd.f32 %v2005_v48, %v1933_v0  ;;  %1828 = vmatmul.bf16.gmra.mxu0 %v1442_v16  ;;  %v994_v48 = vor.u32 %v993_v4, %v989_v19  ;;  %v998_v16 = vrot.slane %v996_v33, 1  ;;  %v1032_v33 = vshrl.u32 %v10864_v13, 16 }
  0xec   : > { %1901 = vmatmul.bf16.gmra.mxu1 %v1445_v17 }
  0xed   : > { %1974 = vmatmul.bf16.gmra.mxu2 %v1448_v60 }
  0xee   : > { %2047 = vmatmul.bf16.gmra.mxu3 %v1451_v7  ;;  %v999_v7 = vsel %vm939_vm0, %v994_v48, %v998_v16 }
  0xf0   : > { %v1935_v27 = vpop.f32.mrf.mxu2  ;;  %v1791_v15 = vpop.f32.mrf.mxu0 }
  0xf1   : > { %v2008_v46 = vpop.f32.mrf.mxu3  ;;  %v1936_v2 = vadd.f32 %v1935_v27, %v1863_v40  ;;  %v1864_v53 = vpop.f32.mrf.mxu1  ;;  %v9814_v40 = vld [vmem:[%s15665_s1 + $0x130] sm:$0xff] }
  0xf2   : > { %v1865_v3 = vadd.f32 %v1864_v53, %v1791_v15  ;;  %2723 = vmatpush.bf16.msra.mxu1 %v9814_v40  ;;  %v8197_v40 = vld [vmem:[%s10308_s22 + $0x88] sm:$0xf] }
  0xf3   : > { %v10869_v62 = vadd.f32 %v2008_v46, %v1936_v2  ;;  %v10885_v46 = vor.u32 %v9730_v18, %v8177_v23 }
  0xf8   : > { %v1937_v17 = vpop.f32.mrf.mxu2  ;;  %v1794_v58 = vpop.f32.mrf.mxu0 }
  0xf9   : > { %v2010_v0 = vpop.f32.mrf.mxu3  ;;  %v1938_v42 = vadd.f32 %v1937_v17, %v1865_v3  ;;  %v1867_v60 = vpop.f32.mrf.mxu1  ;;  %v1036_v3 = vshll.u32 %v10885_v46, 16 }
  0xfa   : > { %v1868_v21 = vadd.f32 %v1867_v60, %v1794_v58 }
  0xfb   : > { %v10880_v27 = vadd.f32 %v2010_v0, %v1938_v42  ;;  %2060 = vmatmul.bf16.vlgmr.msrb.gmra.mxu0 %v999_v7 }
  0xfc   : > { %2438 = vmatmul.bf16.vlgmr.msrb.gmra.mxu1 %v10339_v25  ;;  %v1034_v25 = vor.u32 %v1032_v33, %v998_v16 }
  0xfd   : > { %2511 = vmatmul.bf16.vlgmr.msrb.gmra.mxu2 %v10346_v31  ;;  %v1038_v31 = vrot.slane %v1036_v3, 1 }
  0xfe   : > { %2584 = vmatmul.bf16.vlgmr.msrb.gmra.mxu3 %v10350_v34 }
  0xff   : > { %v1039_v60 = vsel %vm939_vm0, %v1034_v25, %v1038_v31 }
 0x100   : > { %v1940_v2 = vpop.f32.mrf.mxu2  ;;  %v1796_v19 = vpop.f32.mrf.mxu0 }
 0x101   : > { %v2013_v15 = vpop.f32.mrf.mxu3  ;;  %v1941_v53 = vadd.f32 %v1940_v2, %v1868_v21  ;;  %v1869_v4 = vpop.f32.mrf.mxu1  ;;  %v9735_v21 = vld [vmem:[%s10308_s22 + $0x98] sm:$0xf0] }
 0x102   : > { %v1870_v50 = vadd.f32 %v1869_v4, %v1796_v19  ;;  %v10899_v16 = vor.u32 %v9735_v21, %v8197_v40  ;;  %v1072_v4 = vshrl.u32 %v10885_v46, 16  ;;  %v8217_v40 = vld [vmem:[%s10308_s22 + $0xb0] sm:$0xf]  ;;  %v9740_v21 = vld [vmem:[%s10308_s22 + $0xc0] sm:$0xf0] }
 0x103   : > { %v10889_v48 = vadd.f32 %v2013_v15, %v1941_v53 }
 0x104   : > { %v1076_v33 = vshll.u32 %v10899_v16, 16 }
 0x106   : > { %v1078_v25 = vrot.slane %v1076_v33, 1  ;;  %v1112_v33 = vshrl.u32 %v10899_v16, 16 }
 0x108   : > { %v1942_v17 = vpop.f32.mrf.mxu2  ;;  %v1799_v42 = vpop.f32.mrf.mxu0 }
 0x109   : > { %v2015_v34 = vpop.f32.mrf.mxu3  ;;  %v1943_v0 = vadd.f32 %v1942_v17, %v1870_v50  ;;  %v1872_v58 = vpop.f32.mrf.mxu1  ;;  %v1074_v50 = vor.u32 %v1072_v4, %v1038_v31  ;;  %v10919_v31 = vor.u32 %v9740_v21, %v8217_v40  ;;  %v9804_v21 = vld [vmem:[%s15665_s1 + $0xe0] sm:$0xff] }
 0x10a   : > { %v1873_v7 = vadd.f32 %v1872_v58, %v1799_v42 }
 0x10b   : > { %v10894_v23 = vadd.f32 %v2015_v34, %v1943_v0  ;;  %2065 = vmatmul.bf16.gmra.mxu0 %v1039_v60  ;;  %v1079_v60 = vsel %vm939_vm0, %v1074_v50, %v1078_v25 }
 0x10c   : > { %2443 = vmatmul.bf16.gmra.mxu1 %v10354_v37  ;;  %v9805_v37 = vld [vmem:[%s15665_s1 + $0xe8] sm:$0xff] }
 0x10d   : > { %2516 = vmatmul.bf16.gmra.mxu2 %v10366_v43  ;;  %2651 = vmatpush.bf16.msra.mxu0 %v9805_v37  ;;  %v1116_v37 = vshll.u32 %v10919_v31, 16 }
 0x10e   : > { %2589 = vmatmul.bf16.gmra.mxu3 %v10369_v45  ;;  %v9813_v45 = vld [vmem:[%s15665_s1 + $0x128] sm:$0xff] }
 0x10f   : > { %2724 = vmatpush.bf16.msra.mxu1 %v9813_v45 }
 0x110   : > { %v1945_v18 = vpop.f32.mrf.mxu2  ;;  %v1801_v53 = vpop.f32.mrf.mxu0 }
 0x111   : > { %v2018_v2 = vpop.f32.mrf.mxu3  ;;  %v1946_v15 = vadd.f32 %v1945_v18, %v1873_v7  ;;  %v1874_v19 = vpop.f32.mrf.mxu1  ;;  %2652 = vmatpush.bf16.msra.mxu0 %v9804_v21 }
 0x112   : > { %v1875_v43 = vadd.f32 %v1874_v19, %v1801_v53 }
 0x113   : > { %v10906_v3 = vadd.f32 %v2018_v2, %v1946_v15 }
 0x118   : > { %v1947_v17 = vpop.f32.mrf.mxu2  ;;  %v1804_v42 = vpop.f32.mrf.mxu0 }
 0x119   : > { %v2020_v34 = vpop.f32.mrf.mxu3  ;;  %v1948_v0 = vadd.f32 %v1947_v17, %v1875_v43  ;;  %v1877_v58 = vpop.f32.mrf.mxu1 }
 0x11a   : > { %v1878_v7 = vadd.f32 %v1877_v58, %v1804_v42 }
 0x11b   : > { %v10914_v18 = vadd.f32 %v2020_v34, %v1948_v0  ;;  %2070 = vmatmul.bf16.gmra.mxu0 %v1079_v60  ;;  %v8237_v60 = vld [vmem:[%s10308_s22 + $0xd8] sm:$0xf] }
 0x11c   : > { %2448 = vmatmul.bf16.gmra.mxu1 %v10438_v35  ;;  %v1114_v35 = vor.u32 %v1112_v33, %v1078_v25 }
 0x11d   : > { %2521 = vmatmul.bf16.gmra.mxu2 %v10440_v36  ;;  %v1118_v36 = vrot.slane %v1116_v37, 1 }
 0x11e   : > { %2594 = vmatmul.bf16.gmra.mxu3 %v10442_v38 }
 0x11f   : > { %v1119_v42 = vsel %vm939_vm0, %v1114_v35, %v1118_v36 }
 0x120   : > { %v1950_v2 = vpop.f32.mrf.mxu2  ;;  %v1806_v19 = vpop.f32.mrf.mxu0 }
 0x121   : > { %v2023_v15 = vpop.f32.mrf.mxu3  ;;  %v1951_v53 = vadd.f32 %v1950_v2, %v1878_v7  ;;  %v1879_v4 = vpop.f32.mrf.mxu1  ;;  %v9745_v7 = vld [vmem:[%s10308_s22 + $0xe8] sm:$0xf0]  ;;  %v9812_v2 = vld [vmem:[%s15665_s1 + $0x120] sm:$0xff] }
 0x122   : > { %v1880_v43 = vadd.f32 %v1879_v4, %v1806_v19  ;;  %v10936_v25 = vor.u32 %v9745_v7, %v8237_v60  ;;  %2725 = vmatpush.bf16.msra.mxu1 %v9812_v2  ;;  %v8257_v60 = vld [vmem:[%s10308_s22 + $0x100] sm:$0xf]  ;;  %v9750_v7 = vld [vmem:[%s10308_s22 + $0x110] sm:$0xf0] }
 0x123   : > { %v10923_v45 = vadd.f32 %v2023_v15, %v1951_v53 }
 0x128   : > { %v1952_v50 = vpop.f32.mrf.mxu2  ;;  %v1809_v34 = vpop.f32.mrf.mxu0 }
 0x129   : > { %v2025_v38 = vpop.f32.mrf.mxu3  ;;  %v1953_v17 = vadd.f32 %v1952_v50, %v1880_v43  ;;  %v1882_v0 = vpop.f32.mrf.mxu1 }
 0x12a   : > { %v1883_v58 = vadd.f32 %v1882_v0, %v1809_v34 }
 0x12b   : > { %v10928_v40 = vadd.f32 %v2025_v38, %v1953_v17  ;;  %2075 = vmatmul.bf16.gmra.mxu0 %v1119_v42 }
 0x12c   : > { %2453 = vmatmul.bf16.gmra.mxu1 %v10466_v8  ;;  %v1152_v8 = vshrl.u32 %v10919_v31, 16 }
 0x12d   : > { %2526 = vmatmul.bf16.gmra.mxu2 %v10468_v9  ;;  %v1156_v9 = vshll.u32 %v10936_v25, 16 }
 0x12e   : > { %2599 = vmatmul.bf16.gmra.mxu3 %v10476_v12  ;;  %v1154_v43 = vor.u32 %v1152_v8, %v1118_v36  ;;  %v10953_v36 = vor.u32 %v9750_v7, %v8257_v60  ;;  %v8277_v60 = vld [vmem:[%s10308_s22 + $0x128] sm:$0xf]  ;;  %v9755_v7 = vld [vmem:[%s10308_s22 + $0x138] sm:$0xf0] }
 0x12f   : > { %v1158_v35 = vrot.slane %v1156_v9, 1 }
 0x130   : > { %v1955_v15 = vpop.f32.mrf.mxu2  ;;  %v1811_v4 = vpop.f32.mrf.mxu0  ;;  %v1196_v8 = vshll.u32 %v10953_v36, 16 }
 0x131   : > { %v2028_v53 = vpop.f32.mrf.mxu3  ;;  %v1956_v19 = vadd.f32 %v1955_v15, %v1883_v58  ;;  %v1884_v33 = vpop.f32.mrf.mxu1  ;;  %v1159_v42 = vsel %vm939_vm0, %v1154_v43, %v1158_v35 }
 0x132   : > { %v1885_v12 = vadd.f32 %v1884_v33, %v1811_v4  ;;  %v1192_v33 = vshrl.u32 %v10936_v25, 16  ;;  %v1198_v43 = vrot.slane %v1196_v8, 1  ;;  %v1232_v8 = vshrl.u32 %v10953_v36, 16 }
 0x133   : > { %v10943_v37 = vadd.f32 %v2028_v53, %v1956_v19 }
 0x138   : > { %v1957_v50 = vpop.f32.mrf.mxu2  ;;  %v1814_v34 = vpop.f32.mrf.mxu0 }
 0x139   : > { %v2030_v38 = vpop.f32.mrf.mxu3  ;;  %v1958_v17 = vadd.f32 %v1957_v50, %v1885_v12  ;;  %v1887_v0 = vpop.f32.mrf.mxu1 }
 0x13a   : > { %v1888_v58 = vadd.f32 %v1887_v0, %v1814_v34 }
 0x13b   : > { %v10948_v21 = vadd.f32 %v2030_v38, %v1958_v17  ;;  %2080 = vmatmul.bf16.gmra.mxu0 %v1159_v42 }
 0x13c   : > { %2458 = vmatmul.bf16.gmra.mxu1 %v10500_v54  ;;  %v9803_v54 = vld [vmem:[%s15665_s1 + $0xd8] sm:$0xff] }
 0x13d   : > { %2531 = vmatmul.bf16.gmra.mxu2 %v10502_v55  ;;  %v9811_v55 = vld [vmem:[%s15665_s1 + $0x118] sm:$0xff]  ;;  %2653 = vmatpush.bf16.msra.mxu0 %v9803_v54 }
 0x13e   : > { %2604 = vmatmul.bf16.gmra.mxu3 %v10507_v57  ;;  %v1194_v57 = vor.u32 %v1192_v33, %v1158_v35  ;;  %2726 = vmatpush.bf16.msra.mxu1 %v9811_v55  ;;  %v10973_v35 = vor.u32 %v9755_v7, %v8277_v60  ;;  %v9802_v7 = vld [vmem:[%s15665_s1 + $0xd0] sm:$0xff] }
 0x140   : > { %v1960_v2 = vpop.f32.mrf.mxu2  ;;  %v1816_v19 = vpop.f32.mrf.mxu0  ;;  %v1199_v42 = vsel %vm939_vm0, %v1194_v57, %v1198_v43 }
 0x141   : > { %v2033_v15 = vpop.f32.mrf.mxu3  ;;  %v1961_v53 = vadd.f32 %v1960_v2, %v1888_v58  ;;  %v1889_v4 = vpop.f32.mrf.mxu1  ;;  %2654 = vmatpush.bf16.msra.mxu0 %v9802_v7 }
 0x142   : > { %v1890_v9 = vadd.f32 %v1889_v4, %v1816_v19 }
 0x143   : > { %v10957_v12 = vadd.f32 %v2033_v15, %v1961_v53 }
 0x148   : > { %v1962_v50 = vpop.f32.mrf.mxu2  ;;  %v1819_v34 = vpop.f32.mrf.mxu0 }
 0x149   : > { %v2035_v38 = vpop.f32.mrf.mxu3  ;;  %v1963_v17 = vadd.f32 %v1962_v50, %v1890_v9  ;;  %v1892_v0 = vpop.f32.mrf.mxu1  ;;  %v1236_v9 = vshll.u32 %v10973_v35, 16 }
 0x14a   : > { %v1893_v58 = vadd.f32 %v1892_v0, %v1819_v34 }
 0x14b   : > { %v10968_v2 = vadd.f32 %v2035_v38, %v1963_v17  ;;  %2085 = vmatmul.bf16.gmra.mxu0 %v1199_v42  ;;  %v8297_v42 = vld [vmem:[%s10308_s22 + $0x150] sm:$0xf] }
 0x14c   : > { %2463 = vmatmul.bf16.gmra.mxu1 %v10531_v28  ;;  %v1234_v28 = vor.u32 %v1232_v8, %v1198_v43  ;;  %v1272_v8 = vshrl.u32 %v10973_v35, 16 }
 0x14d   : > { %2536 = vmatmul.bf16.gmra.mxu2 %v10533_v29  ;;  %v1238_v29 = vrot.slane %v1236_v9, 1 }
 0x14e   : > { %2609 = vmatmul.bf16.gmra.mxu3 %v10538_v32 }
 0x14f   : > { %v1239_v34 = vsel %vm939_vm0, %v1234_v28, %v1238_v29 }
 0x150   : > { %v1965_v15 = vpop.f32.mrf.mxu2  ;;  %v1821_v4 = vpop.f32.mrf.mxu0 }
 0x151   : > { %v2038_v53 = vpop.f32.mrf.mxu3  ;;  %v1966_v19 = vadd.f32 %v1965_v15, %v1893_v58  ;;  %v1894_v33 = vpop.f32.mrf.mxu1  ;;  %v9760_v58 = vld [vmem:[%s10308_s22 + $0x160] sm:$0xf0] }
 0x152   : > { %v1895_v54 = vadd.f32 %v1894_v33, %v1821_v4  ;;  %v10987_v43 = vor.u32 %v9760_v58, %v8297_v42  ;;  %v8317_v42 = vld [vmem:[%s10308_s22 + $0x178] sm:$0xf]  ;;  %v9765_v58 = vld [vmem:[%s10308_s22 + $0x188] sm:$0xf0] }
 0x153   : > { %v10977_v55 = vadd.f32 %v2038_v53, %v1966_v19 }
 0x158   : > { %v1967_v57 = vpop.f32.mrf.mxu2  ;;  %v1824_v38 = vpop.f32.mrf.mxu0 }
 0x159   : > { %v2040_v32 = vpop.f32.mrf.mxu3  ;;  %v1968_v50 = vadd.f32 %v1967_v57, %v1895_v54  ;;  %v1897_v17 = vpop.f32.mrf.mxu1  ;;  %v1274_v54 = vor.u32 %v1272_v8, %v1238_v29  ;;  %v11007_v29 = vor.u32 %v9765_v58, %v8317_v42  ;;  %v1312_v8 = vshrl.u32 %v10987_v43, 16 }
 0x15a   : > { %v1898_v0 = vadd.f32 %v1897_v17, %v1824_v38 }
 0x15b   : > { %v10982_v60 = vadd.f32 %v2040_v32, %v1968_v50  ;;  %2090 = vmatmul.bf16.gmra.mxu0 %v1239_v34 }
 0x15c   : > { %2468 = vmatmul.bf16.gmra.mxu1 %v10562_v10  ;;  %v1276_v10 = vshll.u32 %v10987_v43, 16 }
 0x15d   : > { %2541 = vmatmul.bf16.gmra.mxu2 %v10564_v14  ;;  %v9810_v14 = vld [vmem:[%s15665_s1 + $0x110] sm:$0xff] }
 0x15e   : > { %2614 = vmatmul.bf16.gmra.mxu3 %v10572_v20  ;;  %2727 = vmatpush.bf16.msra.mxu1 %v9810_v14  ;;  %v1278_v28 = vrot.slane %v1276_v10, 1  ;;  %v1316_v10 = vshll.u32 %v11007_v29, 16 }
 0x160   : > { %v1970_v15 = vpop.f32.mrf.mxu2  ;;  %v1826_v4 = vpop.f32.mrf.mxu0  ;;  %v1279_v34 = vsel %vm939_vm0, %v1274_v54, %v1278_v28 }
 0x161   : > { %v2043_v53 = vpop.f32.mrf.mxu3  ;;  %v1971_v19 = vadd.f32 %v1970_v15, %v1898_v0  ;;  %v1899_v33 = vpop.f32.mrf.mxu1 }
 0x162   : > { %v1900_v20 = vadd.f32 %v1899_v33, %v1826_v4 }
 0x163   : > { %v10997_v9 = vadd.f32 %v2043_v53, %v1971_v19 }
 0x168   : > { %v1972_v57 = vpop.f32.mrf.mxu2  ;;  %v1829_v38 = vpop.f32.mrf.mxu0 }
 0x169   : > { %v2045_v32 = vpop.f32.mrf.mxu3  ;;  %v1973_v50 = vadd.f32 %v1972_v57, %v1900_v20  ;;  %v1902_v17 = vpop.f32.mrf.mxu1  ;;  %v1318_v20 = vrot.slane %v1316_v10, 1 }
 0x16a   : > { %v1903_v0 = vadd.f32 %v1902_v17, %v1829_v38  ;;  %v8337_v17 = vld [vmem:[%s10308_s22 + $0x1a0] sm:$0xf] }
 0x16b   : > { %v11002_v7 = vadd.f32 %v2045_v32, %v1973_v50  ;;  %2095 = vmatmul.bf16.gmra.mxu0 %v1279_v34  ;;  %v9801_v50 = vld [vmem:[%s15665_s1 + $0xc8] sm:$0xff]  ;;  %v9770_v34 = vld [vmem:[%s10308_s22 + $0x1b0] sm:$0xf0] }
 0x16c   : > { %2473 = vmatmul.bf16.gmra.mxu1 %v10596_v61  ;;  %v1314_v61 = vor.u32 %v1312_v8, %v1278_v28  ;;  %2655 = vmatpush.bf16.msra.mxu0 %v9801_v50  ;;  %v9809_v28 = vld [vmem:[%s15665_s1 + $0x108] sm:$0xff]  ;;  %v11026_v42 = vor.u32 %v9770_v34, %v8337_v17  ;;  %v9775_v17 = vld [vmem:[%s10308_s22 + $0x1d8] sm:$0xf0] }
 0x16d   : > { %2546 = vmatmul.bf16.gmra.mxu2 %v10598_v63  ;;  %2728 = vmatpush.bf16.msra.mxu1 %v9809_v28 }
 0x16e   : > { %2619 = vmatmul.bf16.gmra.mxu3 %v10600_v6  ;;  %v1319_v32 = vsel %vm939_vm0, %v1314_v61, %v1318_v20 }
 0x170   : > { %v1975_v15 = vpop.f32.mrf.mxu2  ;;  %v1831_v4 = vpop.f32.mrf.mxu0 }
 0x171   : > { %v2048_v53 = vpop.f32.mrf.mxu3  ;;  %v1976_v19 = vadd.f32 %v1975_v15, %v1903_v0  ;;  %v1904_v33 = vpop.f32.mrf.mxu1  ;;  %v1356_v4 = vshll.u32 %v11026_v42, 16 }
 0x173   : > { %v11011_v14 = vadd.f32 %v2048_v53, %v1976_v19  ;;  %v1358_v10 = vrot.slane %v1356_v4, 1  ;;  %v513_v4 = vld [vmem:[%s10308_s22 + $0x1f0] sm:$0xf] }
 0x178   : > { %v1977_v63 = vpop.f32.mrf.mxu2  ;;  %v2061_v6 = vpop.f32.mrf.mxu0 }
 0x179   : > { %v2050_v54 = vpop.f32.mrf.mxu3  ;;  %v2439_v57 = vpop.f32.mrf.mxu1  ;;  %v2062_v38 = vadd.f32 %v2061_v6, %v10708_v44 }
 0x17b   : > { %v2440_v0 = vadd.f32 %v2439_v57, %v2062_v38  ;;  %2100 = vmatmul.bf16.gmra.mxu0 %v1319_v32  ;;  %v8357_v38 = vld [vmem:[%s10308_s22 + $0x1c8] sm:$0xf]  ;;  %s8118_s22 = sshll.u32 %s15982_s26, 1 }
 0x17c   : > { %2478 = vmatmul.bf16.gmra.mxu1 %v10624_v51  ;;  %v1352_v51 = vshrl.u32 %v11007_v29, 16  ;;  %s438_s23 = scalar_lea.vmem %s15677_s13, %s8118_s22 }
 0x17d   : > { %2551 = vmatmul.bf16.gmra.mxu2 %v10626_v56 }
 0x17e   : > { %2624 = vmatmul.bf16.gmra.mxu3 %v10631_v11  ;;  %v1354_v11 = vor.u32 %v1352_v51, %v1318_v20 }
 0x180   : > { %v2512_v58 = vpop.f32.mrf.mxu2  ;;  %v2063_v53 = vpop.f32.mrf.mxu0  ;;  %v1359_v32 = vsel %vm939_vm0, %v1354_v11, %v1358_v10 }
 0x181   : > { %v2585_v44 = vpop.f32.mrf.mxu3  ;;  %v2513_v15 = vadd.f32 %v2512_v58, %v2440_v0  ;;  %v2441_v19 = vpop.f32.mrf.mxu1  ;;  %v2064_v33 = vadd.f32 %v2063_v53, %v10723_v26  ;;  %v11044_v26 = vor.u32 %v9775_v17, %v8357_v38  ;;  %v15732_v38 = vld [vmem:[#allocation19_spill] sm:$0xff]  ;;  %v15733_v17 = vld [vmem:[#allocation20_spill] sm:$0xff] }
 0x183   : > { %v11031_v8 = vadd.f32 %v2585_v44, %v2513_v15  ;;  %v2442_v56 = vadd.f32 %v2441_v19, %v2064_v33  ;;  %v1392_v44 = vshrl.u32 %v11026_v42, 16  ;;  %v1396_v15 = vshll.u32 %v11044_v26, 16 }
 0x185   : > { %v1394_v19 = vor.u32 %v1392_v44, %v1358_v10  ;;  %v1398_v51 = vrot.slane %v1396_v15, 1  ;;  %v15731_v10 = vld [vmem:[#allocation18_spill] sm:$0xff] }
 0x188   : > { %v2514_v61 = vpop.f32.mrf.mxu2  ;;  %v2066_v6 = vpop.f32.mrf.mxu0 }
 0x189   : > { %v2587_v63 = vpop.f32.mrf.mxu3  ;;  %v2515_v54 = vadd.f32 %v2514_v61, %v2442_v56  ;;  %v2444_v57 = vpop.f32.mrf.mxu1  ;;  %v2067_v50 = vadd.f32 %v2066_v6, %v10755_v49  ;;  %v15730_v6 = vld [vmem:[#allocation28_spill] sm:$0xff] }
 0x18b   : > { %v11037_v34 = vadd.f32 %v2587_v63, %v2515_v54  ;;  %v11039_v0 = vadd.f32 %v2444_v57, %v2067_v50  ;;  %2105 = vmatmul.bf16.gmra.mxu0 %v1359_v32  ;;  %v873_v54 = vunpack.c.l.b16 %v513_v4 }
 0x18c   : > { %2483 = vmatmul.bf16.gmra.mxu1 %v10658_v47 }
 0x18d   : > { %2556 = vmatmul.bf16.gmra.mxu2 %v10660_v52  ;;  %v9800_v52 = vld [vmem:[%s15665_s1 + $0xc0] sm:$0xff] }
 0x18e   : > { %2629 = vmatmul.bf16.gmra.mxu3 %v10662_v22  ;;  %v9808_v22 = vld [vmem:[%s15665_s1 + $0x100] sm:$0xff]  ;;  %2656 = vmatpush.bf16.msra.mxu0 %v9800_v52 }
 0x18f   : > { %2729 = vmatpush.bf16.msra.mxu1 %v9808_v22 }
 0x190   : > { %v11046_v20 = vpop.f32.mrf.mxu2  ;;  %v2068_v49 = vpop.f32.mrf.mxu0 }
 0x191   : > { %v11048_v28 = vpop.f32.mrf.mxu3  ;;  %v2446_v58 = vpop.f32.mrf.mxu1  ;;  %v2069_v53 = vadd.f32 %v2068_v49, %v10791_v41  ;;  %v1399_v41 = vsel %vm939_vm0, %v1394_v19, %v1398_v51  ;;  %v11069_v49 = vpack.c.b16 %v873_v54, %v873_v54 }
 0x193   : > { %v2447_v47 = vadd.f32 %v2446_v58, %v2069_v53  ;;  %v1436_v52 = vshll.u32 %v11069_v49, 16 }
 0x198   : > { %v2519_v33 = vpop.f32.mrf.mxu2  ;;  %v2071_v61 = vpop.f32.mrf.mxu0 }
 0x199   : > { %v2592_v56 = vpop.f32.mrf.mxu3  ;;  %v2520_v11 = vadd.f32 %v2519_v33, %v2447_v47  ;;  %v2449_v63 = vpop.f32.mrf.mxu1  ;;  %v2072_v57 = vadd.f32 %v2071_v61, %v15730_v6  ;;  %v1432_v47 = vshrl.u32 %v11044_v26, 16  ;;  %v1438_v33 = vrot.slane %v1436_v52, 1 }
 0x19b   : > { %v11062_v32 = vadd.f32 %v2592_v56, %v2520_v11  ;;  %v11064_v50 = vadd.f32 %v2449_v63, %v2072_v57  ;;  %2110 = vmatmul.bf16.gmra.mxu0 %v1399_v41  ;;  %v1434_v4 = vor.u32 %v1432_v47, %v1398_v51  ;;  %v15736_v51 = vld [vmem:[#allocation24_spill] sm:$0xff] }
 0x19c   : > { %2488 = vmatmul.bf16.gmra.mxu1 %v15731_v10 }
 0x19d   : > { %2561 = vmatmul.bf16.gmra.mxu2 %v15732_v38  ;;  %v1439_v54 = vsel %vm939_vm0, %v1434_v4, %v1438_v33  ;;  %v15734_v38 = vld [vmem:[#allocation22_spill] sm:$0xff] }
 0x19e   : > { %2634 = vmatmul.bf16.gmra.mxu3 %v15733_v17 }
 0x1a0   : > { %v11071_v58 = vpop.f32.mrf.mxu2  ;;  %v2073_v15 = vpop.f32.mrf.mxu0 }
 0x1a1   : > { %v11073_v44 = vpop.f32.mrf.mxu3  ;;  %v2451_v53 = vpop.f32.mrf.mxu1  ;;  %v2074_v22 = vadd.f32 %v2073_v15, %v10842_v30  ;;  %v15735_v30 = vld [vmem:[#allocation23_spill] sm:$0xff] }
 0x1a3   : > { %v2452_v19 = vadd.f32 %v2451_v53, %v2074_v22  ;;  %v1452_v22 = vshrl.u32 %v11069_v49, 16 }
 0x1a8   : > { %v2524_v56 = vpop.f32.mrf.mxu2  ;;  %v2076_v63 = vpop.f32.mrf.mxu0 }
 0x1a9   : > { %v2597_v11 = vpop.f32.mrf.mxu3  ;;  %v2525_v61 = vadd.f32 %v2524_v56, %v2452_v19  ;;  %v2454_v41 = vpop.f32.mrf.mxu1  ;;  %v2077_v6 = vadd.f32 %v2076_v63, %v10850_v24  ;;  %v1454_v56 = vor.u32 %v1452_v22, %v1438_v33 }
 0x1ab   : > { %v11080_v57 = vadd.f32 %v2597_v11, %v2525_v61  ;;  %v11082_v10 = vadd.f32 %v2454_v41, %v2077_v6  ;;  %2115 = vmatmul.bf16.gmra.mxu0 %v1439_v54 }
 0x1ac   : > { %2493 = vmatmul.bf16.gmra.mxu1 %v15734_v38 }
 0x1ad   : > { %2566 = vmatmul.bf16.gmra.mxu2 %v15735_v30 }
 0x1ae   : > { %2639 = vmatmul.bf16.gmra.mxu3 %v15736_v51 }
 0x1b0   : > { %v11087_v17 = vpop.f32.mrf.mxu2  ;;  %v2078_v53 = vpop.f32.mrf.mxu0 }
 0x1b1   : > { %v11089_v15 = vpop.f32.mrf.mxu3  ;;  %v2456_v47 = vpop.f32.mrf.mxu1  ;;  %v2079_v52 = vadd.f32 %v2078_v53, %v10862_v59  ;;  %v15737_v59 = vld [vmem:[#allocation26_spill] sm:$0xff] }
 0x1b3   : > { %v2457_v24 = vadd.f32 %v2456_v47, %v2079_v52 }
 0x1b8   : > { %v2529_v19 = vpop.f32.mrf.mxu2  ;;  %v2081_v61 = vpop.f32.mrf.mxu0 }
 0x1b9   : > { %v2602_v4 = vpop.f32.mrf.mxu3  ;;  %v2530_v11 = vadd.f32 %v2529_v19, %v2457_v24  ;;  %v2459_v63 = vpop.f32.mrf.mxu1  ;;  %v2082_v41 = vadd.f32 %v2081_v61, %v10869_v62 }
 0x1bb   : > { %v11094_v54 = vadd.f32 %v2602_v4, %v2530_v11  ;;  %v11096_v6 = vadd.f32 %v2459_v63, %v2082_v41  ;;  %2120 = vmatmul.bf16.gmra.mxu0 %v1454_v56  ;;  %v15738_v56 = vld [vmem:[#allocation8_spill] sm:$0xff] }
 0x1bc   : > { %2498 = vmatmul.bf16.gmra.mxu1 %v10793_v5 }
 0x1bd   : > { %2571 = vmatmul.bf16.gmra.mxu2 %v10798_v39 }
 0x1be   : > { %2644 = vmatmul.bf16.gmra.mxu3 %v15737_v59 }
 0x1c0   : > { %v11101_v38 = vpop.f32.mrf.mxu2  ;;  %v2083_v33 = vpop.f32.mrf.mxu0 }
 0x1c1   : > { %v11103_v30 = vpop.f32.mrf.mxu3  ;;  %v2461_v51 = vpop.f32.mrf.mxu1  ;;  %v2084_v53 = vadd.f32 %v2083_v33, %v10880_v27 }
 0x1c3   : > { %v2462_v62 = vadd.f32 %v2461_v51, %v2084_v53 }
 0x1c8   : > { %v2534_v47 = vpop.f32.mrf.mxu2  ;;  %v2086_v22 = vpop.f32.mrf.mxu0 }
 0x1c9   : > { %v2607_v52 = vpop.f32.mrf.mxu3  ;;  %v2535_v24 = vadd.f32 %v2534_v47, %v2462_v62  ;;  %v2464_v19 = vpop.f32.mrf.mxu1  ;;  %v2087_v5 = vadd.f32 %v2086_v22, %v10889_v48 }
 0x1cb   : > { %v11107_v4 = vadd.f32 %v2607_v52, %v2535_v24  ;;  %v11109_v39 = vadd.f32 %v2464_v19, %v2087_v5  ;;  %2657 = vmatmul.bf16.vlgmr.msra.gmra.mxu0 %v15738_v56 }
 0x1cc   : > { %2730 = vmatmul.bf16.vlgmr.msra.gmra.mxu1 %v10858_v1  ;;  %v15739_v1 = vld [vmem:[#allocation9_spill] sm:$0xff] }
 0x1d0   : > { %v11113_v11 = vpop.f32.mrf.mxu2  ;;  %v2088_v27 = vpop.f32.mrf.mxu0 }
 0x1d1   : > { %v11115_v61 = vpop.f32.mrf.mxu3  ;;  %v2466_v63 = vpop.f32.mrf.mxu1  ;;  %v2089_v41 = vadd.f32 %v2088_v27, %v10894_v23 }
 0x1d3   : > { %v2467_v59 = vadd.f32 %v2466_v63, %v2089_v41 }
 0x1d8   : > { %v2539_v33 = vpop.f32.mrf.mxu2  ;;  %v2091_v53 = vpop.f32.mrf.mxu0 }
 0x1d9   : > { %v2612_v51 = vpop.f32.mrf.mxu3  ;;  %v2540_v48 = vadd.f32 %v2539_v33, %v2467_v59  ;;  %v2469_v62 = vpop.f32.mrf.mxu1  ;;  %v2092_v47 = vadd.f32 %v2091_v53, %v10906_v3 }
 0x1db   : > { %v11119_v52 = vadd.f32 %v2612_v51, %v2540_v48  ;;  %v11121_v24 = vadd.f32 %v2469_v62, %v2092_v47  ;;  %2662 = vmatmul.bf16.gmra.mxu0 %v15739_v1 }
 0x1dc   : > { %2735 = vmatmul.bf16.gmra.mxu1 %v10864_v13  ;;  %v15740_v13 = vld [vmem:[#allocation10_spill] sm:$0xff] }
 0x1e0   : > { %v11125_v22 = vpop.f32.mrf.mxu2  ;;  %v2093_v23 = vpop.f32.mrf.mxu0 }
 0x1e1   : > { %v11127_v19 = vpop.f32.mrf.mxu3  ;;  %v2471_v5 = vpop.f32.mrf.mxu1  ;;  %v2094_v56 = vadd.f32 %v2093_v23, %v10914_v18 }
 0x1e3   : > { %v2472_v27 = vadd.f32 %v2471_v5, %v2094_v56 }
 0x1e8   : > { %v2544_v63 = vpop.f32.mrf.mxu2  ;;  %v2096_v59 = vpop.f32.mrf.mxu0 }
 0x1e9   : > { %v2617_v41 = vpop.f32.mrf.mxu3  ;;  %v2545_v3 = vadd.f32 %v2544_v63, %v2472_v27  ;;  %v2474_v33 = vpop.f32.mrf.mxu1  ;;  %v2097_v51 = vadd.f32 %v2096_v59, %v10923_v45 }
 0x1eb   : > { %v11131_v48 = vadd.f32 %v2617_v41, %v2545_v3  ;;  %v11133_v53 = vadd.f32 %v2474_v33, %v2097_v51  ;;  %2667 = vmatmul.bf16.gmra.mxu0 %v15740_v13 }
 0x1ec   : > { %2740 = vmatmul.bf16.gmra.mxu1 %v10885_v46  ;;  %v15741_v46 = vld [vmem:[#allocation11_spill] sm:$0xff] }
 0x1f0   : > { %v11137_v62 = vpop.f32.mrf.mxu2  ;;  %v2098_v18 = vpop.f32.mrf.mxu0 }
 0x1f1   : > { %v11139_v47 = vpop.f32.mrf.mxu3  ;;  %v2476_v1 = vpop.f32.mrf.mxu1  ;;  %v2099_v23 = vadd.f32 %v2098_v18, %v10928_v40 }
 0x1f3   : > { %v2477_v5 = vadd.f32 %v2476_v1, %v2099_v23 }
 0x1f8   : > { %v2549_v56 = vpop.f32.mrf.mxu2  ;;  %v2101_v63 = vpop.f32.mrf.mxu0 }
 0x1f9   : > { %v2622_v27 = vpop.f32.mrf.mxu3  ;;  %v2550_v45 = vadd.f32 %v2549_v56, %v2477_v5  ;;  %v2479_v41 = vpop.f32.mrf.mxu1  ;;  %v2102_v3 = vadd.f32 %v2101_v63, %v10943_v37 }
 0x1fb   : > { %v11143_v59 = vadd.f32 %v2622_v27, %v2550_v45  ;;  %v11145_v33 = vadd.f32 %v2479_v41, %v2102_v3  ;;  %2672 = vmatmul.bf16.gmra.mxu0 %v15741_v46 }
 0x1fc   : > { %2745 = vmatmul.bf16.gmra.mxu1 %v10899_v16  ;;  %v15744_v16 = vld [vmem:[#allocation12_spill] sm:$0xff] }
 0x200   : > { %v11149_v51 = vpop.f32.mrf.mxu2  ;;  %v2103_v40 = vpop.f32.mrf.mxu0 }
 0x201   : > { %v11151_v13 = vpop.f32.mrf.mxu3  ;;  %v2481_v18 = vpop.f32.mrf.mxu1  ;;  %v2104_v1 = vadd.f32 %v2103_v40, %v10948_v21 }
 0x203   : > { %v2482_v23 = vadd.f32 %v2481_v18, %v2104_v1 }
 0x208   : > { %v2554_v5 = vpop.f32.mrf.mxu2  ;;  %v2106_v27 = vpop.f32.mrf.mxu0 }
 0x209   : > { %v11154_v56 = vpop.f32.mrf.mxu3  ;;  %v11156_v37 = vadd.f32 %v2554_v5, %v2482_v23  ;;  %v2484_v45 = vpop.f32.mrf.mxu1  ;;  %v2107_v63 = vadd.f32 %v2106_v27, %v10957_v12 }
 0x20a   : > { %15742 = vst [vmem:[#allocation28_spill] sm:$0xff] %v11154_v56 }
 0x20b   : > { %15743 = vst [vmem:[#allocation18_spill] sm:$0xff] %v11156_v37  ;;  %v11159_v41 = vadd.f32 %v2484_v45, %v2107_v63  ;;  %2677 = vmatmul.bf16.gmra.mxu0 %v15744_v16 }
 0x20c   : > { %2750 = vmatmul.bf16.gmra.mxu1 %v10919_v31  ;;  %v15746_v31 = vld [vmem:[#allocation13_spill] sm:$0xff] }
 0x210   : > { %v11163_v3 = vpop.f32.mrf.mxu2  ;;  %v2108_v21 = vpop.f32.mrf.mxu0 }
 0x211   : > { %v11165_v46 = vpop.f32.mrf.mxu3  ;;  %v2486_v40 = vpop.f32.mrf.mxu1  ;;  %v2109_v18 = vadd.f32 %v2108_v21, %v10968_v2 }
 0x212   : > { %15745 = vst [vmem:[#allocation19_spill] sm:$0xff] %v11165_v46 }
 0x213   : > { %v2487_v1 = vadd.f32 %v2486_v40, %v2109_v18 }
 0x218   : > { %v2559_v23 = vpop.f32.mrf.mxu2  ;;  %v2111_v37 = vpop.f32.mrf.mxu0 }
 0x219   : > { %v2632_v5 = vpop.f32.mrf.mxu3  ;;  %v2560_v56 = vadd.f32 %v2559_v23, %v2487_v1  ;;  %v2489_v12 = vpop.f32.mrf.mxu1  ;;  %v2112_v27 = vadd.f32 %v2111_v37, %v10977_v55 }
 0x21b   : > { %v11169_v45 = vadd.f32 %v2632_v5, %v2560_v56  ;;  %v11171_v63 = vadd.f32 %v2489_v12, %v2112_v27  ;;  %2682 = vmatmul.bf16.gmra.mxu0 %v15746_v31 }
 0x21c   : > { %2755 = vmatmul.bf16.gmra.mxu1 %v10936_v25  ;;  %v15748_v25 = vld [vmem:[#allocation14_spill] sm:$0xff] }
 0x220   : > { %v11175_v16 = vpop.f32.mrf.mxu2  ;;  %v2113_v2 = vpop.f32.mrf.mxu0 }
 0x221   : > { %v11177_v46 = vpop.f32.mrf.mxu3  ;;  %v2491_v21 = vpop.f32.mrf.mxu1  ;;  %v2114_v40 = vadd.f32 %v2113_v2, %v10982_v60 }
 0x222   : > { %15747 = vst [vmem:[#allocation20_spill] sm:$0xff] %v11177_v46 }
 0x223   : > { %v2492_v18 = vadd.f32 %v2491_v21, %v2114_v40 }
 0x228   : > { %v2564_v1 = vpop.f32.mrf.mxu2  ;;  %v2116_v56 = vpop.f32.mrf.mxu0 }
 0x229   : > { %v2637_v23 = vpop.f32.mrf.mxu3  ;;  %v2565_v55 = vadd.f32 %v2564_v1, %v2492_v18  ;;  %v2494_v37 = vpop.f32.mrf.mxu1  ;;  %v2117_v5 = vadd.f32 %v2116_v56, %v10997_v9 }
 0x22b   : > { %v11181_v12 = vadd.f32 %v2637_v23, %v2565_v55  ;;  %v11183_v27 = vadd.f32 %v2494_v37, %v2117_v5  ;;  %2687 = vmatmul.bf16.gmra.mxu0 %v15748_v25 }
 0x22c   : > { %2760 = vmatmul.bf16.gmra.mxu1 %v10953_v36  ;;  %v15750_v36 = vld [vmem:[#allocation15_spill] sm:$0xff] }
 0x230   : > { %v11187_v31 = vpop.f32.mrf.mxu2  ;;  %v2118_v60 = vpop.f32.mrf.mxu0 }
 0x231   : > { %v11189_v46 = vpop.f32.mrf.mxu3  ;;  %v2496_v2 = vpop.f32.mrf.mxu1  ;;  %v2119_v21 = vadd.f32 %v2118_v60, %v11002_v7 }
 0x232   : > { %15749 = vst [vmem:[#allocation22_spill] sm:$0xff] %v11189_v46 }
 0x233   : > { %v2497_v40 = vadd.f32 %v2496_v2, %v2119_v21 }
 0x238   : > { %v2569_v18 = vpop.f32.mrf.mxu2  ;;  %v2121_v23 = vpop.f32.mrf.mxu0 }
 0x239   : > { %v2642_v1 = vpop.f32.mrf.mxu3  ;;  %v2570_v9 = vadd.f32 %v2569_v18, %v2497_v40  ;;  %v2499_v55 = vpop.f32.mrf.mxu1  ;;  %v2122_v56 = vadd.f32 %v2121_v23, %v11011_v14 }
 0x23b   : > { %v11193_v37 = vadd.f32 %v2642_v1, %v2570_v9  ;;  %v11195_v5 = vadd.f32 %v2499_v55, %v2122_v56  ;;  %2692 = vmatmul.bf16.gmra.mxu0 %v15750_v36  ;;  %v15751_v9 = vld [vmem:[#allocation16_spill] sm:$0xff]  ;;  %v2518_v36 = vadd.f32 %v11046_v20, %v11039_v0 }
 0x23c   : > { %2765 = vmatmul.bf16.gmra.mxu1 %v10973_v35  ;;  %v11209_v35 = vld [vmem:[%s15668_s4] ss:$0 sm:$0xff] }
 0x240   : > { %v11199_v25 = vpop.f32.mrf.mxu2  ;;  %v2123_v7 = vpop.f32.mrf.mxu0 }
 0x241   : > { %v11201_v46 = vpop.f32.mrf.mxu3  ;;  %v2501_v60 = vpop.f32.mrf.mxu1 }
 0x248   : > { %v2574_v2 = vpop.f32.mrf.mxu2  ;;  %v2658_v40 = vpop.f32.mrf.mxu0 }
 0x249   : > { %v2647_v21 = vpop.f32.mrf.mxu3  ;;  %v2731_v18 = vpop.f32.mrf.mxu1  ;;  %v2659_v14 = vadd.f32 %v2658_v40, %v11031_v8  ;;  %v11218_v8 = vld [vmem:[%s15669_s5] ss:$0 sm:$0xff]  ;;  %v2591_v2 = vadd.f32 %v11048_v28, %v2518_v36 }
 0x24b   : > { %v2732_v1 = vadd.f32 %v2731_v18, %v2659_v14  ;;  %2697 = vmatmul.bf16.gmra.mxu0 %v15751_v9 }
 0x24c   : > { %2770 = vmatmul.bf16.gmra.mxu1 %v10987_v43 }
 0x24d   : > { %v2797_v7 = vmul.f32 %v11209_v35, %v2732_v1  ;;  %v15752_v1 = vld [vmem:[#allocation17_spill] sm:$0xff] }
 0x24f   : > { %v11223_v21 = vadd.f32 %v11218_v8, %v2797_v7  ;;  %v2523_v7 = vadd.f32 %v11071_v58, %v11064_v50 }
 0x250   : > { %v2660_v23 = vpop.f32.mrf.mxu0 }
 0x251   : > { %v2733_v55 = vpop.f32.mrf.mxu1  ;;  %v2661_v56 = vadd.f32 %v2660_v23, %v11037_v34 }
 0x253   : > { %v2734_v43 = vadd.f32 %v2733_v55, %v2661_v56 }
 0x255   : > { %v2798_v60 = vmul.f32 %v11209_v35, %v2734_v43 }
 0x257   : > { %v11226_v34 = vadd.f32 %v11218_v8, %v2798_v60 }
 0x258   : > { %v2663_v40 = vpop.f32.mrf.mxu0 }
 0x259   : > { %v2736_v0 = vpop.f32.mrf.mxu1  ;;  %v2849_v20 = vadd.f32 %v11226_v34, %v11223_v21  ;;  %v2664_v18 = vadd.f32 %v2663_v40, %v2591_v2  ;;  %v2596_v2 = vadd.f32 %v11073_v44, %v2523_v7 }
 0x25b   : > { %v2737_v14 = vadd.f32 %v2736_v0, %v2664_v18  ;;  %2702 = vmatmul.bf16.gmra.mxu0 %v15752_v1 }
 0x25c   : > { %2775 = vmatmul.bf16.gmra.mxu1 %v11007_v29 }
 0x25d   : > { %v2799_v9 = vmul.f32 %v11209_v35, %v2737_v14 }
 0x25f   : > { %v11234_v28 = vadd.f32 %v11218_v8, %v2799_v9 }
 0x260   : > { %v2665_v23 = vpop.f32.mrf.mxu0 }
 0x261   : > { %v2738_v55 = vpop.f32.mrf.mxu1  ;;  %v2850_v56 = vadd.f32 %v2849_v20, %v11234_v28  ;;  %v2666_v36 = vadd.f32 %v2665_v23, %v11062_v32  ;;  %v15753_v20 = vld [vmem:[#allocation21_spill] sm:$0xff] }
 0x263   : > { %v2739_v43 = vadd.f32 %v2738_v55, %v2666_v36  ;;  %v2528_v55 = vadd.f32 %v11087_v17, %v11082_v10 }
 0x265   : > { %v2800_v60 = vmul.f32 %v11209_v35, %v2739_v43  ;;  %v2601_v7 = vadd.f32 %v11089_v15, %v2528_v55 }
 0x267   : > { %v11243_v29 = vadd.f32 %v11218_v8, %v2800_v60 }
 0x268   : > { %v2668_v40 = vpop.f32.mrf.mxu0 }
 0x269   : > { %v2741_v0 = vpop.f32.mrf.mxu1  ;;  %v2851_v18 = vadd.f32 %v2850_v56, %v11243_v29  ;;  %v2669_v14 = vadd.f32 %v2668_v40, %v2596_v2 }
 0x26b   : > { %v2742_v1 = vadd.f32 %v2741_v0, %v2669_v14  ;;  %2707 = vmatmul.bf16.gmra.mxu0 %v15753_v20  ;;  %v2533_v20 = vadd.f32 %v11101_v38, %v11096_v6 }
 0x26c   : > { %2780 = vmatmul.bf16.gmra.mxu1 %v11026_v42 }
 0x26d   : > { %v2801_v32 = vmul.f32 %v11209_v35, %v2742_v1 }
 0x26f   : > { %v11250_v50 = vadd.f32 %v11218_v8, %v2801_v32 }
 0x270   : > { %v2670_v58 = vpop.f32.mrf.mxu0 }
 0x271   : > { %v2743_v44 = vpop.f32.mrf.mxu1  ;;  %v2852_v9 = vadd.f32 %v2851_v18, %v11250_v50  ;;  %v2671_v23 = vadd.f32 %v2670_v58, %v11080_v57  ;;  %v15754_v18 = vld [vmem:[#allocation25_spill] sm:$0xff] }
 0x273   : > { %v2744_v56 = vadd.f32 %v2743_v44, %v2671_v23  ;;  %v2606_v44 = vadd.f32 %v11103_v30, %v2533_v20 }
 0x275   : > { %v2802_v36 = vmul.f32 %v11209_v35, %v2744_v56 }
 0x277   : > { %v11259_v42 = vadd.f32 %v11218_v8, %v2802_v36 }
 0x278   : > { %v2673_v43 = vpop.f32.mrf.mxu0 }
 0x279   : > { %v2746_v60 = vpop.f32.mrf.mxu1  ;;  %v2853_v2 = vadd.f32 %v2852_v9, %v11259_v42  ;;  %v2674_v40 = vadd.f32 %v2673_v43, %v2601_v7  ;;  %v15755_v7 = vld [vmem:[#allocation27_spill] sm:$0xff] }
 0x27b   : > { %v2747_v0 = vadd.f32 %v2746_v60, %v2674_v40  ;;  %2712 = vmatmul.bf16.gmra.mxu0 %v15754_v18 }
 0x27c   : > { %2785 = vmatmul.bf16.gmra.mxu1 %v11044_v26 }
 0x27d   : > { %v2803_v57 = vmul.f32 %v11209_v35, %v2747_v0 }
 0x27f   : > { %v11266_v10 = vadd.f32 %v11218_v8, %v2803_v57 }
 0x280   : > { %v2675_v17 = vpop.f32.mrf.mxu0 }
 0x281   : > { %v2748_v15 = vpop.f32.mrf.mxu1  ;;  %v2854_v14 = vadd.f32 %v2853_v2, %v11266_v10  ;;  %v2676_v1 = vadd.f32 %v2675_v17, %v11094_v54  ;;  %v2538_v2 = vadd.f32 %v11113_v11, %v11109_v39 }
 0x283   : > { %v2749_v32 = vadd.f32 %v2748_v15, %v2676_v1  ;;  %v2611_v18 = vadd.f32 %v11115_v61, %v2538_v2 }
 0x285   : > { %v2804_v58 = vmul.f32 %v11209_v35, %v2749_v32 }
 0x287   : > { %v11275_v26 = vadd.f32 %v11218_v8, %v2804_v58  ;;  %v2543_v58 = vadd.f32 %v11125_v22, %v11121_v24 }
 0x288   : > { %v2678_v9 = vpop.f32.mrf.mxu0 }
 0x289   : > { %v2751_v23 = vpop.f32.mrf.mxu1  ;;  %v2855_v55 = vadd.f32 %v2854_v14, %v11275_v26  ;;  %v2679_v56 = vadd.f32 %v2678_v9, %v2606_v44 }
 0x28b   : > { %v2752_v36 = vadd.f32 %v2751_v23, %v2679_v56  ;;  %2717 = vmatmul.bf16.gmra.mxu0 %v15755_v7  ;;  %v2616_v23 = vadd.f32 %v11127_v19, %v2543_v58 }
 0x28c   : > { %2790 = vmatmul.bf16.gmra.mxu1 %v11069_v49 }
 0x28d   : > { %v2805_v54 = vmul.f32 %v11209_v35, %v2752_v36 }
 0x28f   : > { %v11282_v6 = vadd.f32 %v11218_v8, %v2805_v54 }
 0x290   : > { %v2680_v38 = vpop.f32.mrf.mxu0 }
 0x291   : > { %v2753_v30 = vpop.f32.mrf.mxu1  ;;  %v2856_v43 = vadd.f32 %v2855_v55, %v11282_v6  ;;  %v2681_v60 = vadd.f32 %v2680_v38, %v11107_v4 }
 0x293   : > { %v2754_v40 = vadd.f32 %v2753_v30, %v2681_v60  ;;  %v2548_v60 = vadd.f32 %v11137_v62, %v11133_v53 }
 0x295   : > { %v2806_v0 = vmul.f32 %v11209_v35, %v2754_v40 }
 0x297   : > { %v11291_v49 = vadd.f32 %v11218_v8, %v2806_v0  ;;  %v2621_v0 = vadd.f32 %v11139_v47, %v2548_v60 }
 0x298   : > { %v2683_v57 = vpop.f32.mrf.mxu0 }
 0x299   : > { %v2756_v17 = vpop.f32.mrf.mxu1  ;;  %v2857_v15 = vadd.f32 %v2856_v43, %v11291_v49  ;;  %v2684_v14 = vadd.f32 %v2683_v57, %v2611_v18 }
 0x29b   : > { %v2757_v1 = vadd.f32 %v2756_v17, %v2684_v14 }
 0x29d   : > { %v2807_v20 = vmul.f32 %v11209_v35, %v2757_v1 }
 0x29f   : > { %v11296_v4 = vadd.f32 %v11218_v8, %v2807_v20 }
 0x2a0   : > { %v2685_v39 = vpop.f32.mrf.mxu0 }
 0x2a1   : > { %v2758_v11 = vpop.f32.mrf.mxu1  ;;  %v2858_v32 = vadd.f32 %v2857_v15, %v11296_v4  ;;  %v2686_v61 = vadd.f32 %v2685_v39, %v11119_v52 }
 0x2a3   : > { %v2759_v44 = vadd.f32 %v2758_v11, %v2686_v61  ;;  %v2553_v11 = vadd.f32 %v11149_v51, %v11145_v33 }
 0x2a5   : > { %v2808_v9 = vmul.f32 %v11209_v35, %v2759_v44  ;;  %v2626_v58 = vadd.f32 %v11151_v13, %v2553_v11 }
 0x2a7   : > { %v11305_v55 = vadd.f32 %v11218_v8, %v2808_v9 }
 0x2a8   : > { %v2688_v56 = vpop.f32.mrf.mxu0 }
 0x2a9   : > { %v2761_v36 = vpop.f32.mrf.mxu1  ;;  %v2859_v7 = vadd.f32 %v2858_v32, %v11305_v55  ;;  %v2689_v54 = vadd.f32 %v2688_v56, %v2616_v23 }
 0x2ab   : > { %v2762_v38 = vadd.f32 %v2761_v36, %v2689_v54 }
 0x2ad   : > { %v2809_v30 = vmul.f32 %v11209_v35, %v2762_v38  ;;  %v15757_v38 = vld [vmem:[#allocation28_spill] sm:$0xff] }
 0x2af   : > { %v11310_v52 = vadd.f32 %v11218_v8, %v2809_v30 }
 0x2b0   : > { %v2690_v24 = vpop.f32.mrf.mxu0 }
 0x2b1   : > { %v2763_v22 = vpop.f32.mrf.mxu1  ;;  %v2860_v43 = vadd.f32 %v2859_v7, %v11310_v52  ;;  %v2691_v19 = vadd.f32 %v2690_v24, %v11131_v48 }
 0x2b3   : > { %v2764_v2 = vadd.f32 %v2763_v22, %v2691_v19 }
 0x2b5   : > { %v2810_v40 = vmul.f32 %v11209_v35, %v2764_v2  ;;  %v15758_v2 = vld [vmem:[#allocation19_spill] sm:$0xff] }
 0x2b7   : > { %v11319_v18 = vadd.f32 %v11218_v8, %v2810_v40 }
 0x2b8   : > { %v2693_v57 = vpop.f32.mrf.mxu0 }
 0x2b9   : > { %v2766_v17 = vpop.f32.mrf.mxu1  ;;  %v2861_v15 = vadd.f32 %v2860_v43, %v11319_v18  ;;  %v2694_v14 = vadd.f32 %v2693_v57, %v2621_v0  ;;  %v2558_v43 = vadd.f32 %v11163_v3, %v11159_v41 }
 0x2bb   : > { %v2767_v1 = vadd.f32 %v2766_v17, %v2694_v14  ;;  %v2631_v40 = vadd.f32 %v15758_v2, %v2558_v43 }
 0x2bd   : > { %v2811_v20 = vmul.f32 %v11209_v35, %v2767_v1 }
 0x2bf   : > { %v11324_v48 = vadd.f32 %v11218_v8, %v2811_v20 }
 0x2c0   : > { %v2695_v53 = vpop.f32.mrf.mxu0 }
 0x2c1   : > { %v2768_v62 = vpop.f32.mrf.mxu1  ;;  %v2862_v39 = vadd.f32 %v2861_v15, %v11324_v48  ;;  %v2696_v47 = vadd.f32 %v2695_v53, %v11143_v59  ;;  %v15756_v59 = vld [vmem:[#allocation18_spill] sm:$0xff] }
 0x2c2   : > { %v2628_v30 = vadd.f32 %v15757_v38, %v15756_v59 }
 0x2c3   : > { %v2769_v32 = vadd.f32 %v2768_v62, %v2696_v47  ;;  %v2563_v47 = vadd.f32 %v11175_v16, %v11171_v63 }
 0x2c5   : > { %v2812_v61 = vmul.f32 %v11209_v35, %v2769_v32 }
 0x2c7   : > { %v11333_v44 = vadd.f32 %v11218_v8, %v2812_v61  ;;  %v15759_v61 = vld [vmem:[#allocation20_spill] sm:$0xff] }
 0x2c8   : > { %v2698_v9 = vpop.f32.mrf.mxu0 }
 0x2c9   : > { %v2771_v23 = vpop.f32.mrf.mxu1  ;;  %v2863_v56 = vadd.f32 %v2862_v39, %v11333_v44  ;;  %v2699_v36 = vadd.f32 %v2698_v9, %v2626_v58  ;;  %v2636_v58 = vadd.f32 %v15759_v61, %v2563_v47 }
 0x2cb   : > { %v2772_v7 = vadd.f32 %v2771_v23, %v2699_v36 }
 0x2cd   : > { %v2813_v54 = vmul.f32 %v11209_v35, %v2772_v7 }
 0x2cf   : > { %v11340_v33 = vadd.f32 %v11218_v8, %v2813_v54 }
 0x2d0   : > { %v2700_v51 = vpop.f32.mrf.mxu0 }
 0x2d1   : > { %v2773_v24 = vpop.f32.mrf.mxu1  ;;  %v2864_v13 = vadd.f32 %v2863_v56, %v11340_v33  ;;  %v2701_v22 = vadd.f32 %v2700_v51, %v2628_v30  ;;  %v2568_v51 = vadd.f32 %v11187_v31, %v11183_v27 }
 0x2d3   : > { %v2774_v19 = vadd.f32 %v2773_v24, %v2701_v22  ;;  %v15760_v22 = vld [vmem:[#allocation22_spill] sm:$0xff] }
 0x2d4   : > { %v2641_v43 = vadd.f32 %v15760_v22, %v2568_v51 }
 0x2d5   : > { %v2814_v60 = vmul.f32 %v11209_v35, %v2774_v19 }
 0x2d7   : > { %v11348_v0 = vadd.f32 %v11218_v8, %v2814_v60 }
 0x2d8   : > { %v2703_v57 = vpop.f32.mrf.mxu0 }
 0x2d9   : > { %v2776_v17 = vpop.f32.mrf.mxu1  ;;  %v2865_v15 = vadd.f32 %v2864_v13, %v11348_v0  ;;  %v2704_v14 = vadd.f32 %v2703_v57, %v2631_v40 }
 0x2db   : > { %v2777_v1 = vadd.f32 %v2776_v17, %v2704_v14 }
 0x2dd   : > { %v2815_v20 = vmul.f32 %v11209_v35, %v2777_v1 }
 0x2df   : > { %v11353_v53 = vadd.f32 %v11218_v8, %v2815_v20  ;;  %v2573_v20 = vadd.f32 %v11199_v25, %v11195_v5 }
 0x2e0   : > { %v2705_v41 = vpop.f32.mrf.mxu0 }
 0x2e1   : > { %v2778_v3 = vpop.f32.mrf.mxu1  ;;  %v2866_v62 = vadd.f32 %v2865_v15, %v11353_v53  ;;  %v2706_v39 = vadd.f32 %v2705_v41, %v11169_v45 }
 0x2e3   : > { %v2779_v11 = vadd.f32 %v2778_v3, %v2706_v39  ;;  %v10181_v3 = vmov 199.0   ;;  %v2646_v39 = vadd.f32 %v11201_v46, %v2573_v20 }
 0x2e4   : > { %10025 = vrcp.f32 %v10181_v3 }
 0x2e5   : > { %v2816_v32 = vmul.f32 %v11209_v35, %v2779_v11 }
 0x2e7   : > { %v11362_v9 = vadd.f32 %v11218_v8, %v2816_v32 }
 0x2e8   : > { %v2708_v23 = vpop.f32.mrf.mxu0 }
 0x2e9   : > { %v2781_v56 = vpop.f32.mrf.mxu1  ;;  %v2867_v36 = vadd.f32 %v2866_v62, %v11362_v9  ;;  %v2709_v7 = vadd.f32 %v2708_v23, %v2636_v58 }
 0x2ea   : > { %v10026_v23 = vpop.eup %10025 }
 0x2eb   : > { %v2782_v54 = vadd.f32 %v2781_v56, %v2709_v7  ;;  %vm2886_vm2 = vweird.f32 %v10026_v23 }
 0x2ed   : > { %v2817_v59 = vmul.f32 %v11209_v35, %v2782_v54 }
 0x2ef   : > { %v11367_v45 = vadd.f32 %v11218_v8, %v2817_v59 }
 0x2f0   : > { %v2710_v63 = vpop.f32.mrf.mxu0 }
 0x2f1   : > { %v2783_v16 = vpop.f32.mrf.mxu1  ;;  %v2868_v38 = vadd.f32 %v2867_v36, %v11367_v45  ;;  %v2711_v30 = vadd.f32 %v2710_v63, %v11181_v12  ;;  %v2882_v36 = vmul.f32 199.0, %v10026_v23 }
 0x2f3   : > { %v2784_v24 = vadd.f32 %v2783_v16, %v2711_v30  ;;  %v2883_v59 = vsub.f32 1.0, %v2882_v36 }
 0x2f5   : > { %v2818_v13 = vmul.f32 %v11209_v35, %v2784_v24  ;;  %v2884_v16 = vmul.f32 %v10026_v23, %v2883_v59 }
 0x2f7   : > { %v11376_v19 = vadd.f32 %v11218_v8, %v2818_v13  ;;  %v2885_v51 = vadd.f32 %v10026_v23, %v2884_v16 }
 0x2f8   : > { %v2713_v60 = vpop.f32.mrf.mxu0 }
 0x2f9   : > { %v2786_v2 = vpop.f32.mrf.mxu1  ;;  %v2869_v40 = vadd.f32 %v2868_v38, %v11376_v19  ;;  %v2714_v57 = vadd.f32 %v2713_v60, %v2641_v43  ;;  %v11390_v22 = vsel %vm2886_vm2, %v10026_v23, %v2885_v51 }
 0x2fa   : > { %15761 = vst [vmem:[#allocation23_spill] sm:$0xff] %v11390_v22 }
 0x2fb   : > { %v2787_v17 = vadd.f32 %v2786_v2, %v2714_v57 }
 0x2fd   : > { %v2819_v15 = vmul.f32 %v11209_v35, %v2787_v17 }
 0x2ff   : > { %v2846_v12 = vadd.f32 %v11218_v8, %v2819_v15 }
 0x300   : > { %v2715_v14 = vpop.f32.mrf.mxu0 }
 0x301   : > { %v2788_v27 = vpop.f32.mrf.mxu1  ;;  %v2870_v31 = vadd.f32 %v2869_v40, %v2846_v12  ;;  %v2716_v1 = vadd.f32 %v2715_v14, %v11193_v37 }
 0x303   : > { %v2789_v41 = vadd.f32 %v2788_v27, %v2716_v1 }
 0x305   : > { %v2820_v62 = vmul.f32 %v11209_v35, %v2789_v41 }
 0x307   : > { %v2847_v47 = vadd.f32 %v11218_v8, %v2820_v62 }
 0x308   : > { %v2718_v11 = vpop.f32.mrf.mxu0 }
 0x309   : > { %v2791_v32 = vpop.f32.mrf.mxu1  ;;  %v2871_v61 = vadd.f32 %v2870_v31, %v2847_v47  ;;  %v2719_v58 = vadd.f32 %v2718_v11, %v2646_v39 }
 0x30b   : > { %v2792_v56 = vadd.f32 %v2791_v32, %v2719_v58 }
 0x30d   : > { %v2821_v37 = vmul.f32 %v11209_v35, %v2792_v56 }
 0x30f   : > { %v2848_v5 = vadd.f32 %v11218_v8, %v2821_v37 }
 0x310   : > { %v2720_v25 = vpop.f32.mrf.mxu0 }
 0x311   : > { %v2793_v7 = vpop.f32.mrf.mxu1  ;;  %v2873_v54 = vsel %vm2872_vm1, %v2848_v5, 0.0 }
 0x312   : > { %v2874_v46 = vadd.f32 %v2873_v54, %v2871_v61 }
 0x314   : > { %v2875_v63 = vrot.slane %v2874_v46, 4 }
 0x316   : > { %v2876_v38 = vadd.f32 %v2875_v63, %v2874_v46 }
 0x318   : > { %v2877_v30 = vrot.slane %v2876_v38, 2 }
 0x31a   : > { %v2878_v24 = vadd.f32 %v2877_v30, %v2876_v38 }
 0x31c   : > { %v2879_v13 = vrot.slane %v2878_v24, 1 }
 0x31e   : > { %v2880_v35 = vadd.f32 %v2879_v13, %v2878_v24 }
 0x320   : > { %v2888_v43 = vmul.f32 %v11390_v22, %v2880_v35 }
 0x322   : > { %v11394_v8 = vsub.f32 %v11223_v21, %v2888_v43  ;;  %v11397_v60 = vsub.f32 %v11226_v34, %v2888_v43  ;;  %v11400_v2 = vsub.f32 %v11234_v28, %v2888_v43  ;;  %v11403_v40 = vsub.f32 %v11243_v29, %v2888_v43 }
 0x323   : > { %v11406_v57 = vsub.f32 %v11250_v50, %v2888_v43  ;;  %v11409_v17 = vsub.f32 %v11259_v42, %v2888_v43  ;;  %v11412_v15 = vsub.f32 %v11266_v10, %v2888_v43  ;;  %v11415_v21 = vsub.f32 %v11275_v26, %v2888_v43 }
 0x324   : > { %v11418_v34 = vsub.f32 %v11282_v6, %v2888_v43  ;;  %v11421_v28 = vsub.f32 %v11291_v49, %v2888_v43  ;;  %v11424_v29 = vsub.f32 %v11296_v4, %v2888_v43  ;;  %v11427_v50 = vsub.f32 %v11305_v55, %v2888_v43 }
 0x325   : > { %v11430_v42 = vsub.f32 %v11310_v52, %v2888_v43  ;;  %v11433_v10 = vsub.f32 %v11319_v18, %v2888_v43  ;;  %v11436_v26 = vsub.f32 %v11324_v48, %v2888_v43  ;;  %v11439_v6 = vsub.f32 %v11333_v44, %v2888_v43 }
 0x326   : > { %v11442_v49 = vsub.f32 %v11340_v33, %v2888_v43  ;;  %v11445_v4 = vsub.f32 %v11348_v0, %v2888_v43  ;;  %v11448_v55 = vsub.f32 %v11353_v53, %v2888_v43  ;;  %v11451_v52 = vsub.f32 %v11362_v9, %v2888_v43 }
 0x327   : > { %v11454_v18 = vsub.f32 %v11367_v45, %v2888_v43  ;;  %v11457_v48 = vsub.f32 %v11376_v19, %v2888_v43  ;;  %v11459_v44 = vsub.f32 %v2846_v12, %v2888_v43  ;;  %v11461_v14 = vsub.f32 %v2847_v47, %v2888_v43 }
 0x328   : > { %v11463_v33 = vsub.f32 %v2848_v5, %v2888_v43  ;;  %v2914_v0 = vmul.f32 %v11394_v8, %v11394_v8  ;;  %v2915_v53 = vmul.f32 %v11397_v60, %v11397_v60  ;;  %v2916_v9 = vmul.f32 %v11400_v2, %v11400_v2 }
 0x329   : > { %v2917_v19 = vmul.f32 %v11403_v40, %v11403_v40  ;;  %v2918_v12 = vmul.f32 %v11406_v57, %v11406_v57  ;;  %v2919_v1 = vmul.f32 %v11409_v17, %v11409_v17  ;;  %v2920_v41 = vmul.f32 %v11412_v15, %v11412_v15 }
 0x32a   : > { %v2939_v45 = vadd.f32 %v2915_v53, %v2914_v0  ;;  %v2921_v62 = vmul.f32 %v11415_v21, %v11415_v21  ;;  %v2922_v47 = vmul.f32 %v11418_v34, %v11418_v34  ;;  %v2923_v32 = vmul.f32 %v11421_v28, %v11421_v28 }
 0x32b   : > { %v2924_v58 = vmul.f32 %v11424_v29, %v11424_v29  ;;  %v2925_v56 = vmul.f32 %v11427_v50, %v11427_v50  ;;  %v2926_v36 = vmul.f32 %v11430_v42, %v11430_v42  ;;  %v2927_v25 = vmul.f32 %v11433_v10, %v11433_v10 }
 0x32c   : > { %v2940_v27 = vadd.f32 %v2939_v45, %v2916_v9  ;;  %v2928_v54 = vmul.f32 %v11436_v26, %v11436_v26  ;;  %v2929_v46 = vmul.f32 %v11439_v6, %v11439_v6  ;;  %v2930_v16 = vmul.f32 %v11442_v49, %v11442_v49 }
 0x32d   : > { %v2931_v30 = vmul.f32 %v11445_v4, %v11445_v4  ;;  %v2932_v24 = vmul.f32 %v11448_v55, %v11448_v55  ;;  %v2933_v35 = vmul.f32 %v11451_v52, %v11451_v52  ;;  %v2934_v0 = vmul.f32 %v11454_v18, %v11454_v18 }
 0x32e   : > { %v2941_v31 = vadd.f32 %v2940_v27, %v2917_v19  ;;  %v2935_v9 = vmul.f32 %v11457_v48, %v11457_v48  ;;  %v2936_v19 = vmul.f32 %v11459_v44, %v11459_v44 }
 0x330   : > { %v2942_v20 = vadd.f32 %v2941_v31, %v2918_v12  ;;  %v2938_v12 = vmul.f32 %v11463_v33, %v11463_v33  ;;  %v2937_v31 = vmul.f32 %v11461_v14, %v11461_v14 }
 0x332   : > { %v2943_v3 = vadd.f32 %v2942_v20, %v2919_v1 }
 0x334   : > { %v2944_v39 = vadd.f32 %v2943_v3, %v2920_v41  ;;  %v2962_v41 = vsel %vm2872_vm1, %v2938_v12, 0.0 }
 0x336   : > { %v2945_v11 = vadd.f32 %v2944_v39, %v2921_v62 }
 0x338   : > { %v2946_v61 = vadd.f32 %v2945_v11, %v2922_v47 }
 0x33a   : > { %v2947_v23 = vadd.f32 %v2946_v61, %v2923_v32 }
 0x33c   : > { %v2948_v37 = vadd.f32 %v2947_v23, %v2924_v58 }
 0x33e   : > { %v2949_v5 = vadd.f32 %v2948_v37, %v2925_v56 }
 0x340   : > { %v2950_v7 = vadd.f32 %v2949_v5, %v2926_v36 }
 0x342   : > { %v2951_v59 = vadd.f32 %v2950_v7, %v2927_v25 }
 0x344   : > { %v2952_v63 = vadd.f32 %v2951_v59, %v2928_v54 }
 0x346   : > { %v2953_v38 = vadd.f32 %v2952_v63, %v2929_v46  ;;  %v11521_v46 = vld [vmem:[%s15670_s6] ss:$0 sm:$0xff] }
 0x348   : > { %v2954_v51 = vadd.f32 %v2953_v38, %v2930_v16  ;;  %v11528_v38 = vld [vmem:[%s15670_s6 + $0x1] ss:$0 sm:$0xff] }
 0x34a   : > { %v2955_v13 = vadd.f32 %v2954_v51, %v2931_v30 }
 0x34c   : > { %v2956_v43 = vadd.f32 %v2955_v13, %v2932_v24 }
 0x34e   : > { %v2957_v53 = vadd.f32 %v2956_v43, %v2933_v35 }
 0x350   : > { %v2958_v45 = vadd.f32 %v2957_v53, %v2934_v0 }
 0x352   : > { %v2959_v27 = vadd.f32 %v2958_v45, %v2935_v9 }
 0x354   : > { %v2960_v1 = vadd.f32 %v2959_v27, %v2936_v19 }
 0x356   : > { %v2961_v20 = vadd.f32 %v2960_v1, %v2937_v31 }
 0x358   : > { %v2963_v3 = vadd.f32 %v2962_v41, %v2961_v20 }
 0x35a   : > { %v2964_v62 = vrot.slane %v2963_v3, 4 }
 0x35c   : > { %v2965_v39 = vadd.f32 %v2964_v62, %v2963_v3 }
 0x35e   : > { %v2966_v47 = vrot.slane %v2965_v39, 2 }
 0x360   : > { %v2967_v11 = vadd.f32 %v2966_v47, %v2965_v39 }
 0x362   : > { %v2968_v32 = vrot.slane %v2967_v11, 1 }
 0x364   : > { %v2969_v61 = vadd.f32 %v2968_v32, %v2967_v11 }
 0x366   : > { %v2970_v58 = vmul.f32 %v2969_v61, %v11390_v22 }
 0x368   : > { %v2971_v23 = vadd.f32 1e-05, %v2970_v58 }
 0x36a   : > { %10027 = vrsqrt.f32 %v2971_v23  ;;  %vm2978_vm4 = vweird.f32 %v2971_v23 }
 0x370   : > { %v10028_v56 = vpop.eup %10027 }
 0x371   : > { %v2973_v37 = vmul.f32 %v10028_v56, %v2971_v23  ;;  %vm2979_vm3 = vweird.f32 %v10028_v56 }
 0x372   : > { %vm2980_vm5 = vmor %vm2978_vm4, %vm2979_vm3 }
 0x373   : > { %v2974_v36 = vmul.f32 %v10028_v56, %v2973_v37 }
 0x375   : > { %v2975_v5 = vmul.f32 0.5, %v2974_v36 }
 0x377   : > { %v2976_v25 = vsub.f32 1.5, %v2975_v5 }
 0x379   : > { %v2977_v7 = vmul.f32 %v10028_v56, %v2976_v25 }
 0x37b   : > { %v2981_v54 = vsel %vm2980_vm5, %v10028_v56, %v2977_v7 }
 0x37c   : > { %v2982_v59 = vmul.f32 %v2981_v54, %v11394_v8  ;;  %v2983_v63 = vmul.f32 %v2981_v54, %v11397_v60  ;;  %v2984_v30 = vmul.f32 %v2981_v54, %v11400_v2  ;;  %v2985_v24 = vmul.f32 %v2981_v54, %v11403_v40 }
 0x37d   : > { %v2986_v45 = vmul.f32 %v2981_v54, %v11406_v57  ;;  %v2987_v19 = vmul.f32 %v2981_v54, %v11409_v17  ;;  %v2988_v31 = vmul.f32 %v2981_v54, %v11412_v15  ;;  %v2989_v1 = vmul.f32 %v2981_v54, %v11415_v21 }
 0x37e   : > { %v3009_v16 = vmul.f32 %v11521_v46, %v2982_v59  ;;  %v3010_v51 = vmul.f32 %v11521_v46, %v2983_v63  ;;  %v3011_v13 = vmul.f32 %v11521_v46, %v2984_v30  ;;  %v3012_v43 = vmul.f32 %v11521_v46, %v2985_v24 }
 0x37f   : > { %v2990_v20 = vmul.f32 %v2981_v54, %v11418_v34  ;;  %v2991_v3 = vmul.f32 %v2981_v54, %v11421_v28  ;;  %v2992_v57 = vmul.f32 %v2981_v54, %v11424_v29  ;;  %v2993_v17 = vmul.f32 %v2981_v54, %v11427_v50 }
 0x380   : > { %v11533_v8 = vadd.f32 %v11528_v38, %v3009_v16  ;;  %v11538_v60 = vadd.f32 %v11528_v38, %v3010_v51  ;;  %v11545_v0 = vadd.f32 %v11528_v38, %v3011_v13  ;;  %v11553_v40 = vadd.f32 %v11528_v38, %v3012_v43 }
 0x381   : > { %v2994_v39 = vmul.f32 %v2981_v54, %v11430_v42  ;;  %v2995_v15 = vmul.f32 %v2981_v54, %v11433_v10  ;;  %v2996_v21 = vmul.f32 %v2981_v54, %v11436_v26  ;;  %v2997_v34 = vmul.f32 %v2981_v54, %v11439_v6 }
 0x382   : > { %v11541_v35 = vmul.f32 0.70710677, %v11533_v8  ;;  %v11548_v2 = vmul.f32 0.70710677, %v11538_v60  ;;  %v11556_v9 = vmul.f32 0.70710677, %v11545_v0  ;;  %v2998_v47 = vmul.f32 %v2981_v54, %v11442_v49 }
 0x383   : > { %v11568_v41 = vmul.f32 0.70710677, %v11553_v40  ;;  %v2999_v11 = vmul.f32 %v2981_v54, %v11445_v4  ;;  %v3000_v50 = vmul.f32 %v2981_v54, %v11448_v55  ;;  %v3001_v32 = vmul.f32 %v2981_v54, %v11451_v52 }
 0x384   : > { %v3111_v53 = vmul.f32 %v11541_v35, %v11541_v35  ;;  %v3151_v12 = vmul.f32 %v11548_v2, %v11548_v2  ;;  %v3191_v62 = vmul.f32 %v11556_v9, %v11556_v9  ;;  %v3002_v42 = vmul.f32 %v2981_v54, %v11454_v18 }
 0x385   : > { %v3231_v10 = vmul.f32 %v11568_v41, %v11568_v41  ;;  %v3003_v26 = vmul.f32 %v2981_v54, %v11457_v48  ;;  %v3004_v6 = vmul.f32 %v2981_v54, %v11459_v44  ;;  %v3005_v49 = vmul.f32 %v2981_v54, %v11461_v14 }
 0x386   : > { %v11560_v27 = vmin.f32 %v3111_v53, 16.0  ;;  %v11582_v29 = vmin.f32 %v3151_v12, 16.0  ;;  %v11592_v4 = vmin.f32 %v3191_v62, 16.0  ;;  %v3006_v61 = vmul.f32 %v2981_v54, %v11463_v33 }
 0x387   : > { %v3013_v58 = vmul.f32 %v11521_v46, %v2986_v45  ;;  %v3014_v55 = vmul.f32 %v11521_v46, %v2987_v19  ;;  %v3015_v52 = vmul.f32 %v11521_v46, %v2988_v31  ;;  %v3016_v18 = vmul.f32 %v11521_v46, %v2989_v1 }
 0x388   : > { %v3124_v28 = vmul.f32 3.8918573e-05, %v11560_v27  ;;  %v3017_v23 = vmul.f32 %v11521_v46, %v2990_v20  ;;  %v3164_v48 = vmul.f32 3.8918573e-05, %v11582_v29  ;;  %v3018_v44 = vmul.f32 %v11521_v46, %v2991_v3 }
 0x389   : > { %v3019_v14 = vmul.f32 %v11521_v46, %v2992_v57  ;;  %v3020_v37 = vmul.f32 %v11521_v46, %v2993_v17  ;;  %v11604_v33 = vmin.f32 %v3231_v10, 16.0  ;;  %v3021_v36 = vmul.f32 %v11521_v46, %v2994_v39 }
 0x38a   : > { %v3125_v56 = vadd.f32 0.001143296, %v3124_v28  ;;  %v3022_v5 = vmul.f32 %v11521_v46, %v2995_v15  ;;  %v3023_v25 = vmul.f32 %v11521_v46, %v2996_v21  ;;  %v3204_v7 = vmul.f32 3.8918573e-05, %v11592_v4 }
 0x38b   : > { %v3024_v54 = vmul.f32 %v11521_v46, %v2997_v34  ;;  %v3025_v59 = vmul.f32 %v11521_v46, %v2998_v47  ;;  %v3026_v63 = vmul.f32 %v11521_v46, %v2999_v11  ;;  %v3027_v16 = vmul.f32 %v11521_v46, %v3000_v50 }
 0x38c   : > { %v3028_v30 = vmul.f32 %v11521_v46, %v3001_v32  ;;  %v3029_v51 = vmul.f32 %v11521_v46, %v3002_v42  ;;  %v3126_v24 = vmul.f32 %v3125_v56, %v11560_v27  ;;  %v3165_v13 = vadd.f32 0.001143296, %v3164_v48 }
 0x38d   : > { %v3030_v43 = vmul.f32 %v11521_v46, %v3003_v26  ;;  %v3031_v53 = vmul.f32 %v11521_v46, %v3004_v6  ;;  %v3032_v45 = vmul.f32 %v11521_v46, %v3005_v49  ;;  %v3244_v19 = vmul.f32 3.8918573e-05, %v11604_v33 }
 0x38e   : > { %v3033_v12 = vmul.f32 %v11521_v46, %v3006_v61  ;;  %v3040_v31 = vadd.f32 %v11528_v38, %v3013_v58  ;;  %v11624_v1 = vadd.f32 %v11528_v38, %v3014_v55  ;;  %v3205_v20 = vadd.f32 0.001143296, %v3204_v7 }
 0x38f   : > { %v11627_v3 = vadd.f32 %v11528_v38, %v3015_v52  ;;  %v11630_v57 = vadd.f32 %v11528_v38, %v3016_v18  ;;  %v3113_v17 = vmul.f32 2.1237322e-06, %v11560_v27  ;;  %v3153_v62 = vmul.f32 2.1237322e-06, %v11582_v29 }
 0x390   : > { %v11635_v39 = vadd.f32 %v11528_v38, %v3017_v23  ;;  %v3127_v46 = vadd.f32 0.014752088, %v3126_v24  ;;  %v3166_v15 = vmul.f32 %v3165_v13, %v11582_v29  ;;  %v3193_v21 = vmul.f32 2.1237322e-06, %v11592_v4 }
 0x391   : > { %v11640_v34 = vadd.f32 %v11528_v38, %v3018_v44  ;;  %v11643_v47 = vadd.f32 %v11528_v38, %v3019_v14  ;;  %v11646_v11 = vadd.f32 %v11528_v38, %v3020_v37  ;;  %v3245_v28 = vadd.f32 0.001143296, %v3244_v19 }
 0x392   : > { %v11649_v50 = vadd.f32 %v11528_v38, %v3021_v36  ;;  %v11652_v32 = vadd.f32 %v11528_v38, %v3022_v5  ;;  %v11654_v42 = vmul.f32 0.70710677, %v3040_v31  ;;  %v3206_v10 = vmul.f32 %v3205_v20, %v11592_v4 }
 0x393   : > { %v11658_v26 = vadd.f32 %v11528_v38, %v3023_v25  ;;  %v11661_v6 = vadd.f32 %v11528_v38, %v3024_v54  ;;  %v3114_v49 = vadd.f32 0.00028619796, %v3113_v17  ;;  %v3154_v61 = vadd.f32 0.00028619796, %v3153_v62 }
 0x394   : > { %v11664_v58 = vadd.f32 %v11528_v38, %v3025_v59  ;;  %v3128_v55 = vmul.f32 %v3127_v46, %v11560_v27  ;;  %v3167_v52 = vadd.f32 0.014752088, %v3166_v15  ;;  %v3194_v18 = vadd.f32 0.00028619796, %v3193_v21 }
 0x395   : > { %v11668_v23 = vadd.f32 %v11528_v38, %v3026_v63  ;;  %v11671_v56 = vadd.f32 %v11528_v38, %v3027_v16  ;;  %v11674_v48 = vadd.f32 %v11528_v38, %v3028_v30  ;;  %v3246_v44 = vmul.f32 %v3245_v28, %v11604_v33 }
 0x396   : > { %v11678_v14 = vadd.f32 %v11528_v38, %v3029_v51  ;;  %v11681_v37 = vadd.f32 %v11528_v38, %v3030_v43  ;;  %v3207_v36 = vadd.f32 0.014752088, %v3206_v10  ;;  %v3271_v5 = vmul.f32 %v11654_v42, %v11654_v42 }
 0x397   : > { %15762 = vst [vmem:[#allocation24_spill] sm:$0xff] %v11671_v56  ;;  %v11686_v25 = vadd.f32 %v11528_v38, %v3031_v53  ;;  %v11689_v7 = vadd.f32 %v11528_v38, %v3032_v45  ;;  %v3115_v54 = vmul.f32 %v3114_v49, %v11560_v27  ;;  %v3155_v59 = vmul.f32 %v3154_v61, %v11582_v29 }
 0x398   : > { %15763 = vst [vmem:[#allocation26_spill] sm:$0xff] %v11674_v48  ;;  %v11694_v63 = vmul.f32 0.5, %v11533_v8  ;;  %v3129_v16 = vadd.f32 0.112945676, %v3128_v55  ;;  %v3168_v30 = vmul.f32 %v3167_v52, %v11582_v29  ;;  %v3195_v51 = vmul.f32 %v3194_v18, %v11592_v4 }
 0x399   : > { %15764 = vst [vmem:[#allocation8_spill] sm:$0xff] %v11678_v14  ;;  %v11699_v24 = vmul.f32 0.5, %v11538_v60  ;;  %v11702_v13 = vmul.f32 0.5, %v11545_v0  ;;  %v11705_v43 = vmul.f32 0.5, %v11553_v40  ;;  %v3247_v53 = vadd.f32 0.014752088, %v3246_v44 }
 0x39a   : > { %15765 = vst [vmem:[#allocation9_spill] sm:$0xff] %v11681_v37  ;;  %v11707_v45 = vmul.f32 0.5, %v3040_v31  ;;  %v11710_v8 = vmul.f32 0.5, %v11624_v1  ;;  %v3208_v19 = vmul.f32 %v3207_v36, %v11592_v4  ;;  %v11713_v20 = vmin.f32 %v3271_v5, 16.0 }
 0x39b   : > { %15766 = vst [vmem:[#allocation10_spill] sm:$0xff] %v11686_v25  ;;  %v11716_v17 = vadd.f32 %v11528_v38, %v3033_v12  ;;  %v3116_v60 = vadd.f32 0.0036580483, %v3115_v54  ;;  %v3156_v62 = vadd.f32 0.0036580483, %v3155_v59  ;;  %v11720_v40 = vmul.f32 0.5, %v11627_v3 }
 0x39c   : > { %15767 = vst [vmem:[#allocation11_spill] sm:$0xff] %v11689_v7  ;;  %v3233_v0 = vmul.f32 2.1237322e-06, %v11604_v33  ;;  %v3130_v31 = vmul.f32 %v3129_v16, %v11560_v27  ;;  %v3169_v46 = vadd.f32 0.112945676, %v3168_v30  ;;  %v11724_v21 = vmul.f32 0.5, %v11630_v57 }
 0x39d   : > { %15768 = vst [vmem:[#allocation12_spill] sm:$0xff] %v11694_v63  ;;  %v3196_v15 = vadd.f32 0.0036580483, %v3195_v51  ;;  %v11727_v28 = vmul.f32 0.5, %v11635_v39  ;;  %v11730_v38 = vmul.f32 0.5, %v11640_v34  ;;  %v3248_v12 = vmul.f32 %v3247_v53, %v11604_v33 }
 0x39e   : > { %15769 = vst [vmem:[#allocation13_spill] sm:$0xff] %v11699_v24  ;;  %v11734_v10 = vmul.f32 0.5, %v11643_v47  ;;  %v11737_v49 = vmul.f32 0.5, %v11646_v11  ;;  %v3209_v61 = vadd.f32 0.112945676, %v3208_v19  ;;  %v11741_v52 = vmul.f32 0.5, %v11649_v50 }
 0x39f   : > { %15770 = vst [vmem:[#allocation14_spill] sm:$0xff] %v11702_v13  ;;  %v3284_v55 = vmul.f32 3.8918573e-05, %v11713_v20  ;;  %v3117_v18 = vmul.f32 %v3116_v60, %v11560_v27  ;;  %v3157_v44 = vmul.f32 %v3156_v62, %v11582_v29  ;;  %v3234_v36 = vadd.f32 0.00028619796, %v3233_v0 }
 0x3a0   : > { %15771 = vst [vmem:[#allocation15_spill] sm:$0xff] %v11705_v43  ;;  %v11746_v5 = vmul.f32 0.70710677, %v11624_v1  ;;  %v3131_v54 = vadd.f32 0.4994258, %v3130_v31  ;;  %v3170_v59 = vmul.f32 %v3169_v46, %v11582_v29  ;;  %v3197_v16 = vmul.f32 %v3196_v15, %v11592_v4 }
 0x3a1   : > { %15772 = vst [vmem:[#allocation16_spill] sm:$0xff] %v11707_v45  ;;  %v11751_v30 = vmul.f32 0.5, %v11652_v32  ;;  %v11754_v51 = vmul.f32 0.5, %v11658_v26  ;;  %v11757_v53 = vmul.f32 0.70710677, %v11627_v3  ;;  %v11760_v60 = vmul.f32 0.5, %v11661_v6 }
 0x3a2   : > { %15773 = vst [vmem:[#allocation17_spill] sm:$0xff] %v11710_v8  ;;  %v3249_v19 = vadd.f32 0.112945676, %v3248_v12  ;;  %v11763_v1 = vmul.f32 0.5, %v11664_v58  ;;  %v3210_v62 = vmul.f32 %v3209_v61, %v11592_v4  ;;  %v3285_v0 = vadd.f32 0.001143296, %v3284_v55 }
 0x3a3   : > { %15774 = vst [vmem:[#allocation21_spill] sm:$0xff] %v11716_v17  ;;  %v11767_v31 = vmul.f32 0.70710677, %v11630_v57  ;;  %v3118_v46 = vadd.f32 0.05243302, %v3117_v18  ;;  %v3235_v22 = vmul.f32 %v3234_v36, %v11604_v33  ;;  %v3132_v3 = vmul.f32 %v3131_v54, %v11560_v27 }
 0x3a4   : > { %15775 = vst [vmem:[#allocation25_spill] sm:$0xff] %v11720_v40  ;;  %v3158_v15 = vadd.f32 0.05243302, %v3157_v44  ;;  %v3198_v12 = vadd.f32 0.05243302, %v3197_v16  ;;  %v3250_v57 = vmul.f32 %v3249_v19, %v11604_v33  ;;  %v3351_v55 = vmul.f32 %v11757_v53, %v11757_v53 }
 0x3a5   : > { %15776 = vst [vmem:[#allocation27_spill] sm:$0xff] %v11724_v21  ;;  %v11777_v61 = vmul.f32 0.70710677, %v11640_v34  ;;  %v11783_v18 = vmul.f32 0.70710677, %v11643_v47  ;;  %v3286_v54 = vmul.f32 %v3285_v0, %v11713_v20  ;;  %v3119_v34 = vmul.f32 %v3118_v46, %v11560_v27 }
 0x3a6   : > { %15777 = vst [vmem:[#allocation18_spill] sm:$0xff] %v11727_v28  ;;  %v11786_v44 = vmul.f32 0.70710677, %v11646_v11  ;;  %v3211_v36 = vadd.f32 0.4994258, %v3210_v62  ;;  %v11794_v19 = vadd.f32 1.0, %v3132_v3  ;;  %v3199_v47 = vmul.f32 %v3198_v12, %v11592_v4 }
 0x3a7   : > { %15778 = vst [vmem:[#allocation28_spill] sm:$0xff] %v11730_v38  ;;  %v3236_v16 = vadd.f32 0.0036580483, %v3235_v22  ;;  %v11801_v11 = vmul.f32 0.5, %v11668_v23  ;;  %v11804_v62 = vmul.f32 0.70710677, %v11652_v32 }
 0x3a8   : > { %15779 = vst [vmem:[#allocation19_spill] sm:$0xff] %v11734_v10  ;;  %v11806_v0 = vmin.f32 %v3351_v55, 16.0  ;;  %v11809_v46 = vmul.f32 0.70710677, %v11658_v26  ;;  %v11812_v22 = vmul.f32 0.70710677, %v11661_v6  ;;  %10029 = vrcp.f32 %v11794_v19 }
 0x3a9   : > { %15780 = vst [vmem:[#allocation20_spill] sm:$0xff] %v11737_v49  ;;  %v3120_v3 = vadd.f32 0.18741608, %v3119_v34  ;;  %v3237_v32 = vmul.f32 %v3236_v16, %v11604_v33  ;;  %v3200_v55 = vadd.f32 0.18741608, %v3199_v47  ;;  %vm3139_vm6 = vweird.f32 %v11794_v19 }
 0x3aa   : > { %15781 = vst [vmem:[#allocation22_spill] sm:$0xff] %v11741_v52  ;;  %v11824_v6 = vmul.f32 0.70710677, %v11668_v23  ;;  %v11832_v34 = vmul.f32 0.70710677, %v11674_v48 }
 0x3ab   : > { %15782 = vst [vmem:[#allocation29_spill] sm:$0xff] %v11751_v30  ;;  %v11774_v30 = vmul.f32 0.70710677, %v11635_v39  ;;  %v11790_v39 = vmul.f32 0.70710677, %v11649_v50  ;;  %v3201_v48 = vmul.f32 %v3200_v55, %v11592_v4 }
 0x3ac   : > { %15783 = vst [vmem:[#allocation30_spill] sm:$0xff] %v11754_v51  ;;  %v3171_v51 = vadd.f32 0.4994258, %v3170_v59  ;;  %v3159_v59 = vmul.f32 %v3158_v15, %v11582_v29  ;;  %v3251_v50 = vadd.f32 0.4994258, %v3250_v57 }
 0x3ad   : > { %15784 = vst [vmem:[#allocation31_spill] sm:$0xff] %v11760_v60  ;;  %v3311_v60 = vmul.f32 %v11746_v5, %v11746_v5  ;;  %v3287_v15 = vadd.f32 0.014752088, %v3286_v54  ;;  %v3364_v54 = vmul.f32 3.8918573e-05, %v11806_v0 }
 0x3ae   : > { %15785 = vst [vmem:[#allocation32_spill] sm:$0xff] %v11763_v1  ;;  %v3172_v1 = vmul.f32 %v3171_v51, %v11582_v29  ;;  %v3212_v51 = vmul.f32 %v3211_v36, %v11592_v4  ;;  %v3160_v12 = vadd.f32 0.18741608, %v3159_v59  ;;  %v11827_v36 = vmul.f32 0.70710677, %v11671_v56  ;;  %v11855_v10 = vpop.eup %10029 }
 0x3af   : > { %v11798_v52 = vmin.f32 %v3311_v60, 16.0  ;;  %15786 = vst [vmem:[#allocation33_spill] sm:$0xff] %v11801_v11  ;;  %v11816_v60 = vmul.f32 0.70710677, %v11664_v58  ;;  %v3252_v58 = vmul.f32 %v3251_v50, %v11604_v33  ;;  %v3288_v16 = vmul.f32 %v3287_v15, %v11713_v20 }
 0x3b0   : > { %v11820_v57 = vadd.f32 1.0, %v3172_v1  ;;  %v11834_v59 = vadd.f32 1.0, %v3212_v51  ;;  %v3273_v1 = vmul.f32 2.1237322e-06, %v11713_v20  ;;  %v11839_v47 = vmul.f32 0.70710677, %v11678_v14 }
 0x3b1   : > { %v3324_v26 = vmul.f32 3.8918573e-05, %v11798_v52  ;;  %v11842_v23 = vmul.f32 0.70710677, %v11681_v37  ;;  %v3121_v11 = vmul.f32 %v3120_v3, %v11560_v27  ;;  %v3161_v50 = vmul.f32 %v3160_v12, %v11582_v29 }
 0x3b2   : > { %10031 = vrcp.f32 %v11820_v57  ;;  %v3238_v51 = vadd.f32 0.05243302, %v3237_v32  ;;  %v11849_v49 = vmul.f32 0.70710677, %v11686_v25  ;;  %v11851_v15 = vadd.f32 1.0, %v3252_v58 }
 0x3b3   : > { %v3325_v56 = vadd.f32 0.001143296, %v3324_v26  ;;  %v3365_v14 = vadd.f32 0.001143296, %v3364_v54  ;;  %v3391_v37 = vmul.f32 %v11767_v31, %v11767_v31  ;;  %10033 = vrcp.f32 %v11834_v59 }
 0x3b4   : > { %15787 = vst [vmem:[#allocation34_spill] sm:$0xff] %v11849_v49  ;;  %v3274_v27 = vadd.f32 0.00028619796, %v3273_v1  ;;  %v3289_v29 = vadd.f32 0.112945676, %v3288_v16  ;;  %v3239_v58 = vmul.f32 %v3238_v51, %v11604_v33  ;;  %v3135_v25 = vmul.f32 %v11855_v10, %v11794_v19 }
 0x3b5   : > { %v3313_v3 = vmul.f32 2.1237322e-06, %v11798_v52  ;;  %v11860_v4 = vmul.f32 0.70710677, %v11689_v7  ;;  %v3122_v12 = vadd.f32 1.1283791, %v3121_v11  ;;  %v3326_v54 = vmul.f32 %v3325_v56, %v11798_v52 }
 0x3b6   : > { %v3162_v32 = vadd.f32 1.1283791, %v3161_v50  ;;  %v11863_v55 = vmul.f32 0.70710677, %v11716_v17  ;;  %v3202_v26 = vadd.f32 1.1283791, %v3201_v48  ;;  %10035 = vrcp.f32 %v11851_v15 }
 0x3b7   : > { %15788 = vst [vmem:[#allocation35_spill] sm:$0xff] %v11860_v4  ;;  %v3366_v1 = vmul.f32 %v3365_v14, %v11806_v0  ;;  %v11871_v16 = vmin.f32 %v3391_v37, 16.0  ;;  %v3145_v11 = vand.u32 2147483648, %v11794_v19  ;;  %v3275_v50 = vmul.f32 %v3274_v27, %v11713_v20 }
 0x3b8   : > { %15789 = vst [vmem:[#allocation36_spill] sm:$0xff] %v11863_v55  ;;  %v11873_v7 = vpop.eup %10031  ;;  %v3290_v48 = vmul.f32 %v3289_v29, %v11713_v20  ;;  %v3314_v51 = vadd.f32 0.00028619796, %v3313_v3  ;;  %v11879_v56 = vmul.f32 %v3122_v12, %v11541_v35  ;;  %v3143_v17 = vand.u32 2147483647, %v11794_v19 }
 0x3b9   : > { %v11883_v38 = vmul.f32 %v3162_v32, %v11548_v2  ;;  %v3183_v14 = vand.u32 2147483647, %v11820_v57  ;;  %v11886_v37 = vpop.eup %10033  ;;  %v3185_v28 = vand.u32 2147483648, %v11820_v57  ;;  %v11890_v21 = vmul.f32 %v3202_v26, %v11556_v9 }
 0x3ba   : > { %v3240_v27 = vadd.f32 0.18741608, %v3239_v58  ;;  %v3327_v29 = vadd.f32 0.014752088, %v3326_v54  ;;  %v3136_v3 = vsub.f32 1.0, %v3135_v25  ;;  %v3175_v35 = vmul.f32 %v11873_v7, %v11820_v57 }
 0x3bb   : > { %v3367_v12 = vadd.f32 0.014752088, %v3366_v1  ;;  %v3404_v40 = vmul.f32 3.8918573e-05, %v11871_v16  ;;  %v11895_v2 = vor.u32 1.1754944e-38, %v3145_v11  ;;  %v3315_v45 = vmul.f32 %v3314_v51, %v11798_v52 }
 0x3bc   : > { %v3276_v32 = vadd.f32 0.0036580483, %v3275_v50  ;;  %v3291_v8 = vadd.f32 0.4994258, %v3290_v48  ;;  %v11898_v43 = vpop.eup %10035  ;;  %v3215_v9 = vmul.f32 %v11886_v37, %v11834_v59  ;;  %v3225_v25 = vand.u32 2147483648, %v11834_v59 }
 0x3bd   : > { %v3353_v26 = vmul.f32 2.1237322e-06, %v11806_v0  ;;  %v3431_v58 = vmul.f32 %v11774_v30, %v11774_v30  ;;  %v11907_v54 = vor.u32 1.1754944e-38, %v3185_v28  ;;  %v3223_v1 = vand.u32 2147483647, %v11834_v59 }
 0x3be   : > { %v3241_v11 = vmul.f32 %v3240_v27, %v11604_v33  ;;  %v3328_v50 = vmul.f32 %v3327_v29, %v11798_v52  ;;  %v3137_v48 = vmul.f32 %v11855_v10, %v3136_v3  ;;  %v3176_v51 = vsub.f32 1.0, %v3175_v35 }
 0x3bf   : > { %v3368_v13 = vmul.f32 %v3367_v12, %v11806_v0  ;;  %v3405_v24 = vadd.f32 0.001143296, %v3404_v40  ;;  %v3255_v63 = vmul.f32 %v11898_v43, %v11851_v15  ;;  %v3277_v55 = vmul.f32 %v3276_v32, %v11713_v20 }
 0x3c0   : > { %v3292_v28 = vmul.f32 %v3291_v8, %v11713_v20  ;;  %v3316_v4 = vadd.f32 0.0036580483, %v3315_v45  ;;  %vm3179_vm7 = vweird.f32 %v11820_v57  ;;  %v3216_v49 = vsub.f32 1.0, %v3215_v9 }
 0x3c1   : > { %v11919_v33 = vor.u32 1.1754944e-38, %v3225_v25  ;;  %v3354_v27 = vadd.f32 0.00028619796, %v3353_v26  ;;  %v11921_v29 = vmin.f32 %v3431_v58, 16.0  ;;  %vm3140_vm8 = vweird.f32 %v11855_v10 }
 0x3c2   : > { %vm11924_vm9 = vcmp.eq.f32.partialorder %v3143_v17, 8.507059e+37  ;;  %vm3180_vm10 = vweird.f32 %v11873_v7  ;;  %v3242_v3 = vadd.f32 1.1283791, %v3241_v11  ;;  %v3329_v35 = vadd.f32 0.112945676, %v3328_v50  ;;  %vm11944_vm13 = vmor %vm3139_vm6, %vm3140_vm8 }
 0x3c3   : > { %v3138_v45 = vadd.f32 %v11855_v10, %v3137_v48  ;;  %v3177_v8 = vmul.f32 %v11873_v7, %v3176_v51  ;;  %vm3219_vm11 = vweird.f32 %v11834_v59  ;;  %v3369_v12 = vadd.f32 0.112945676, %v3368_v13  ;;  %vm11977_vm2 = vmor %vm3179_vm7, %vm3180_vm10 }
 0x3c4   : > { %v3406_v32 = vmul.f32 %v3405_v24, %v11871_v16  ;;  %v3256_v9 = vsub.f32 1.0, %v3255_v63  ;;  %v3278_v25 = vadd.f32 0.05243302, %v3277_v55  ;;  %v11933_v26 = vadd.f32 1.0, %v3292_v28 }
 0x3c5   : > { %v3317_v17 = vmul.f32 %v3316_v4, %v11798_v52  ;;  %v3217_v58 = vmul.f32 %v11886_v37, %v3216_v49  ;;  %vm3220_vm12 = vweird.f32 %v11886_v37  ;;  %v3355_v11 = vmul.f32 %v3354_v27, %v11806_v0 }
 0x3c6   : > { %v3444_v50 = vmul.f32 3.8918573e-05, %v11921_v29  ;;  %vm11948_vm14 = vcmp.eq.f32.partialorder %v3183_v14, 8.507059e+37  ;;  %v11953_v13 = vmul.f32 %v3242_v3, %v11568_v41  ;;  %vm3259_vm15 = vweird.f32 %v11851_v15  ;;  %vm11996_vm3 = vmor %vm3219_vm11, %vm3220_vm12 }
 0x3c7   : > { %v3330_v49 = vmul.f32 %v3329_v35, %v11798_v52  ;;  %v3471_v4 = vmul.f32 %v11777_v61, %v11777_v61  ;;  %v3142_v19 = vsel %vm11944_vm13, %v11855_v10, %v3138_v45  ;;  %v3178_v55 = vadd.f32 %v11873_v7, %v3177_v8 }
 0x3c8   : > { %vm11963_vm0 = vcmp.eq.f32.partialorder %v3223_v1, 8.507059e+37  ;;  %v3370_v41 = vmul.f32 %v3369_v12, %v11806_v0  ;;  %v3407_v48 = vadd.f32 0.014752088, %v3406_v32  ;;  %v3257_v51 = vmul.f32 %v11898_v43, %v3256_v9 }
 0x3c9   : > { %v3279_v28 = vmul.f32 %v3278_v25, %v11713_v20  ;;  %10037 = vrcp.f32 %v11933_v26  ;;  %v3318_v27 = vadd.f32 0.05243302, %v3317_v17  ;;  %v3218_v3 = vadd.f32 %v11886_v37, %v3217_v58 }
 0x3ca   : > { %v3263_v10 = vand.u32 2147483647, %v11851_v15  ;;  %v3356_v35 = vadd.f32 0.0036580483, %v3355_v11  ;;  %v3445_v45 = vadd.f32 0.001143296, %v3444_v50  ;;  %v3147_v25 = vsel %vm11924_vm9, %v11895_v2, %v3142_v19 }
 0x3cb   : > { %v3265_v8 = vand.u32 2147483648, %v11851_v15  ;;  %v3331_v12 = vadd.f32 0.4994258, %v3330_v49  ;;  %v3393_v32 = vmul.f32 2.1237322e-06, %v11871_v16  ;;  %v11983_v9 = vmin.f32 %v3471_v4, 16.0 }
 0x3cc   : > { %v3182_v17 = vsel %vm11977_vm2, %v11873_v7, %v3178_v55  ;;  %v3371_v57 = vadd.f32 0.4994258, %v3370_v41  ;;  %v3408_v58 = vmul.f32 %v3407_v48, %v11871_v16  ;;  %v3258_v50 = vadd.f32 %v11898_v43, %v3257_v51 }
 0x3cd   : > { %vm3260_vm4 = vweird.f32 %v11898_v43  ;;  %v3280_v2 = vadd.f32 0.18741608, %v3279_v28  ;;  %v3319_v40 = vmul.f32 %v3318_v27, %v11798_v52  ;;  %v3222_v7 = vsel %vm11996_vm3, %v11886_v37, %v3218_v3 }
 0x3ce   : > { %vm12006_vm5 = vcmp.eq.f32.partialorder %v3263_v10, 8.507059e+37  ;;  %v3357_v59 = vmul.f32 %v3356_v35, %v11806_v0  ;;  %v3446_v49 = vmul.f32 %v3445_v45, %v11921_v29  ;;  %v3266_v19 = vor.u32 1.1754944e-38, %v3265_v8  ;;  %vm12024_vm6 = vmor %vm3259_vm15, %vm3260_vm4 }
 0x3cf   : > { %v12012_v4 = vpop.eup %10037  ;;  %v3332_v55 = vmul.f32 %v3331_v12, %v11798_v52  ;;  %v3394_v41 = vadd.f32 0.00028619796, %v3393_v32  ;;  %v3484_v48 = vmul.f32 3.8918573e-05, %v11983_v9  ;;  %v12017_v51 = vmul.f32 %v3147_v25, %v11879_v56 }
 0x3d0   : > { %v3187_v37 = vsel %vm11948_vm14, %v11907_v54, %v3182_v17  ;;  %v3372_v27 = vmul.f32 %v3371_v57, %v11806_v0  ;;  %v3409_v3 = vadd.f32 0.112945676, %v3408_v58  ;;  %v3227_v10 = vsel %vm11963_vm0, %v11919_v33, %v3222_v7 }
 0x3d1   : > { %v3262_v56 = vsel %vm12024_vm6, %v11898_v43, %v3258_v50  ;;  %v3281_v63 = vmul.f32 %v3280_v2, %v11713_v20  ;;  %v3320_v54 = vadd.f32 0.18741608, %v3319_v40  ;;  %v3295_v15 = vmul.f32 %v12012_v4, %v11933_v26 }
 0x3d2   : > { %v3358_v35 = vadd.f32 0.05243302, %v3357_v59  ;;  %v3447_v45 = vadd.f32 0.014752088, %v3446_v49  ;;  %v3511_v1 = vmul.f32 %v11783_v18, %v11783_v18  ;;  %v12041_v8 = vmul.f32 %v3187_v37, %v11883_v38 }
 0x3d3   : > { %v12043_v14 = vadd.f32 1.0, %v3332_v55  ;;  %v3395_v33 = vmul.f32 %v3394_v41, %v11871_v16  ;;  %v3485_v12 = vadd.f32 0.001143296, %v3484_v48  ;;  %v12047_v20 = vadd.f32 1.0, %v3372_v27 }
 0x3d4   : > { %v3410_v32 = vmul.f32 %v3409_v3, %v11871_v16  ;;  %v3433_v25 = vmul.f32 2.1237322e-06, %v11921_v29  ;;  %v12052_v17 = vmul.f32 %v3227_v10, %v11890_v21  ;;  %v3267_v38 = vsel %vm12006_vm5, %v3266_v19, %v3262_v56 }
 0x3d5   : > { %v3282_v57 = vadd.f32 1.1283791, %v3281_v63  ;;  %v3321_v58 = vmul.f32 %v3320_v54, %v11798_v52  ;;  %v3296_v11 = vsub.f32 1.0, %v3295_v15  ;;  %v3359_v50 = vmul.f32 %v3358_v35, %v11806_v0 }
 0x3d6   : > { %v3448_v2 = vmul.f32 %v3447_v45, %v11921_v29  ;;  %v12059_v40 = vmin.f32 %v3511_v1, 16.0  ;;  %10039 = vrcp.f32 %v12043_v14  ;;  %v3396_v7 = vadd.f32 0.0036580483, %v3395_v33 }
 0x3d7   : > { %v3486_v59 = vmul.f32 %v3485_v12, %v11983_v9  ;;  %v3551_v21 = vmul.f32 %v11786_v44, %v11786_v44  ;;  %10041 = vrcp.f32 %v12047_v20  ;;  %v3411_v52 = vadd.f32 0.4994258, %v3410_v32 }
 0x3d8   : > { %v3434_v49 = vadd.f32 0.00028619796, %v3433_v25  ;;  %v12069_v55 = vmul.f32 %v3267_v38, %v11953_v13  ;;  %v12072_v41 = vmul.f32 %v3282_v57, %v11654_v42  ;;  %v3322_v48 = vadd.f32 1.1283791, %v3321_v58 }
 0x3d9   : > { %v3297_v37 = vmul.f32 %v12012_v4, %v3296_v11  ;;  %vm3299_vm7 = vweird.f32 %v11933_v26  ;;  %v3449_v28 = vadd.f32 0.112945676, %v3448_v2  ;;  %v3524_v27 = vmul.f32 3.8918573e-05, %v12059_v40 }
 0x3da   : > { %v3360_v3 = vadd.f32 0.18741608, %v3359_v50  ;;  %v3397_v10 = vmul.f32 %v3396_v7, %v11871_v16  ;;  %v3487_v56 = vadd.f32 0.014752088, %v3486_v59  ;;  %v12078_v63 = vmin.f32 %v3551_v21, 16.0 }
 0x3db   : > { %v3303_v13 = vand.u32 2147483647, %v11933_v26  ;;  %v3412_v54 = vmul.f32 %v3411_v52, %v11871_v16  ;;  %v3435_v42 = vmul.f32 %v3434_v49, %v11921_v29  ;;  %v3473_v15 = vmul.f32 2.1237322e-06, %v11983_v9 }
 0x3dc   : > { %v12084_v35 = vpop.eup %10039  ;;  %vm3300_vm8 = vweird.f32 %v12012_v4  ;;  %v3305_v1 = vand.u32 2147483648, %v11933_v26  ;;  %v12090_v33 = vmul.f32 %v3322_v48, %v11746_v5  ;;  %v3298_v32 = vadd.f32 %v12012_v4, %v3297_v37 }
 0x3dd   : > { %v12092_v12 = vpop.eup %10041  ;;  %v3450_v25 = vmul.f32 %v3449_v28, %v11921_v29  ;;  %v3525_v38 = vadd.f32 0.001143296, %v3524_v27  ;;  %v3591_v57 = vmul.f32 %v11790_v39, %v11790_v39  ;;  %v3361_v58 = vmul.f32 %v3360_v3, %v11806_v0  ;;  %vm12111_vm10 = vmor %vm3299_vm7, %vm3300_vm8 }
 0x3de   : > { %v3398_v11 = vadd.f32 0.05243302, %v3397_v10  ;;  %v3488_v50 = vmul.f32 %v3487_v56, %v11983_v9  ;;  %v3564_v2 = vmul.f32 3.8918573e-05, %v12078_v63  ;;  %vm12101_vm9 = vcmp.eq.f32.partialorder %v3303_v13, 8.507059e+37 }
 0x3df   : > { %v12105_v7 = vadd.f32 1.0, %v3412_v54  ;;  %v3436_v59 = vadd.f32 0.0036580483, %v3435_v42  ;;  %v3474_v21 = vadd.f32 0.00028619796, %v3473_v15  ;;  %v3306_v0 = vor.u32 1.1754944e-38, %v3305_v1 }
 0x3e0   : > { %v3335_v49 = vmul.f32 %v12084_v35, %v12043_v14  ;;  %v3345_v48 = vand.u32 2147483648, %v12043_v14  ;;  %v3375_v37 = vmul.f32 %v12092_v12, %v12047_v20  ;;  %v3302_v28 = vsel %vm12111_vm10, %v12012_v4, %v3298_v32 }
 0x3e1   : > { %v3451_v27 = vadd.f32 0.4994258, %v3450_v25  ;;  %v3526_v26 = vmul.f32 %v3525_v38, %v12059_v40  ;;  %v12124_v3 = vmin.f32 %v3591_v57, 16.0  ;;  %v3362_v10 = vadd.f32 1.1283791, %v3361_v58 }
 0x3e2   : > { %v3399_v56 = vmul.f32 %v3398_v11, %v11871_v16  ;;  %v3489_v13 = vadd.f32 0.112945676, %v3488_v50  ;;  %v3565_v54 = vadd.f32 0.001143296, %v3564_v2  ;;  %v3343_v42 = vand.u32 2147483647, %v12043_v14 }
 0x3e3   : > { %10043 = vrcp.f32 %v12105_v7  ;;  %v3437_v15 = vmul.f32 %v3436_v59, %v11921_v29  ;;  %v3475_v1 = vmul.f32 %v3474_v21, %v11983_v9  ;;  %v3307_v4 = vsel %vm12101_vm9, %v3306_v0, %v3302_v28 }
 0x3e4   : > { %v3336_v32 = vsub.f32 1.0, %v3335_v49  ;;  %v12133_v25 = vor.u32 1.1754944e-38, %v3345_v48  ;;  %v3376_v38 = vsub.f32 1.0, %v3375_v37  ;;  %vm3339_vm11 = vweird.f32 %v12043_v14 }
 0x3e5   : > { %v3452_v57 = vmul.f32 %v3451_v27, %v11921_v29  ;;  %v3513_v58 = vmul.f32 2.1237322e-06, %v12059_v40  ;;  %v3527_v11 = vadd.f32 0.014752088, %v3526_v26  ;;  %v3604_v50 = vmul.f32 3.8918573e-05, %v12124_v3 }
 0x3e6   : > { %v12140_v2 = vmul.f32 %v3362_v10, %v11757_v53  ;;  %v3400_v59 = vadd.f32 0.18741608, %v3399_v56  ;;  %v3490_v5 = vmul.f32 %v3489_v13, %v11983_v9  ;;  %v3566_v21 = vmul.f32 %v3565_v54, %v12078_v63 }
 0x3e7   : > { %vm3379_vm12 = vweird.f32 %v12047_v20  ;;  %v3383_v52 = vand.u32 2147483647, %v12047_v20  ;;  %v3438_v0 = vadd.f32 0.05243302, %v3437_v15  ;;  %v3476_v49 = vadd.f32 0.0036580483, %v3475_v1 }
 0x3e8   : > { %v12147_v48 = vmul.f32 %v3307_v4, %v12072_v41  ;;  %v3337_v37 = vmul.f32 %v12084_v35, %v3336_v32  ;;  %v3377_v28 = vmul.f32 %v12092_v12, %v3376_v38  ;;  %v3385_v53 = vand.u32 2147483648, %v12047_v20 }
 0x3e9   : > { %v12152_v27 = vpop.eup %10043  ;;  %v12154_v26 = vadd.f32 1.0, %v3452_v57  ;;  %v3514_v10 = vadd.f32 0.00028619796, %v3513_v58  ;;  %v3528_v56 = vmul.f32 %v3527_v11, %v12059_v40  ;;  %v3605_v13 = vadd.f32 0.001143296, %v3604_v50 }
 0x3ea   : > { %vm12157_vm13 = vcmp.eq.f32.partialorder %v3343_v42, 8.507059e+37  ;;  %v3401_v41 = vmul.f32 %v3400_v59, %v11871_v16  ;;  %v3491_v15 = vadd.f32 0.4994258, %v3490_v5  ;;  %v3567_v1 = vadd.f32 0.014752088, %v3566_v21 }
 0x3eb   : > { %v3631_v4 = vmul.f32 %v11804_v62, %v11804_v62  ;;  %vm3340_vm14 = vweird.f32 %v12084_v35  ;;  %vm3380_vm15 = vweird.f32 %v12092_v12  ;;  %v3439_v32 = vmul.f32 %v3438_v0, %v11921_v29 }
 0x3ec   : > { %v3477_v38 = vmul.f32 %v3476_v49, %v11983_v9  ;;  %v3338_v42 = vadd.f32 %v12084_v35, %v3337_v37  ;;  %v3378_v57 = vadd.f32 %v12092_v12, %v3377_v28  ;;  %v3415_v16 = vmul.f32 %v12152_v27, %v12105_v7  ;;  %vm12178_vm0 = vmor %vm3339_vm11, %vm3340_vm14 }
 0x3ed   : > { %v3553_v58 = vmul.f32 2.1237322e-06, %v12078_v63  ;;  %10045 = vrcp.f32 %v12154_v26  ;;  %v3515_v11 = vmul.f32 %v3514_v10, %v12059_v40  ;;  %v3529_v50 = vadd.f32 0.112945676, %v3528_v56  ;;  %vm12191_vm2 = vmor %vm3379_vm12, %vm3380_vm15 }
 0x3ee   : > { %v3606_v59 = vmul.f32 %v3605_v13, %v12124_v3  ;;  %v3402_v21 = vadd.f32 1.1283791, %v3401_v41  ;;  %v3492_v0 = vmul.f32 %v3491_v15, %v11983_v9  ;;  %v3568_v49 = vmul.f32 %v3567_v1, %v12078_v63 }
 0x3ef   : > { %v12184_v37 = vmin.f32 %v3631_v4, 16.0  ;;  %vm12195_vm3 = vcmp.eq.f32.partialorder %v3383_v52, 8.507059e+37  ;;  %v3386_v56 = vor.u32 1.1754944e-38, %v3385_v53  ;;  %v3478_v13 = vadd.f32 0.05243302, %v3477_v38 }
 0x3f0   : > { %v3342_v41 = vsel %vm12178_vm0, %v12084_v35, %v3338_v42  ;;  %v3382_v15 = vsel %vm12191_vm2, %v12092_v12, %v3378_v57  ;;  %v3440_v1 = vadd.f32 0.18741608, %v3439_v32  ;;  %v3554_v20 = vadd.f32 0.00028619796, %v3553_v58 }
 0x3f1   : > { %v3416_v4 = vsub.f32 1.0, %v3415_v16  ;;  %v3516_v28 = vadd.f32 0.0036580483, %v3515_v11  ;;  %v3530_v45 = vmul.f32 %v3529_v50, %v12059_v40  ;;  %v3607_v52 = vadd.f32 0.014752088, %v3606_v59 }
 0x3f2   : > { %v12207_v19 = vmul.f32 %v3402_v21, %v11767_v31  ;;  %v12209_v53 = vadd.f32 1.0, %v3492_v0  ;;  %v3569_v38 = vadd.f32 0.112945676, %v3568_v49  ;;  %v3644_v5 = vmul.f32 3.8918573e-05, %v12184_v37 }
 0x3f3   : > { %v12212_v35 = vpop.eup %10045  ;;  %v3347_v12 = vsel %vm12157_vm13, %v12133_v25, %v3342_v41  ;;  %vm3419_vm4 = vweird.f32 %v12105_v7  ;;  %v3423_v32 = vand.u32 2147483647, %v12105_v7  ;;  %v3479_v42 = vmul.f32 %v3478_v13, %v11983_v9 }
 0x3f4   : > { %v3671_v31 = vmul.f32 %v11809_v46, %v11809_v46  ;;  %v3387_v57 = vsel %vm12195_vm3, %v3386_v56, %v3382_v15  ;;  %v3425_v16 = vand.u32 2147483648, %v12105_v7  ;;  %v3441_v58 = vmul.f32 %v3440_v1, %v11921_v29 }
 0x3f5   : > { %v3555_v11 = vmul.f32 %v3554_v20, %v12078_v63  ;;  %v3417_v25 = vmul.f32 %v12152_v27, %v3416_v4  ;;  %v3517_v54 = vmul.f32 %v3516_v28, %v12059_v40  ;;  %v3531_v50 = vadd.f32 0.4994258, %v3530_v45 }
 0x3f6   : > { %v3608_v59 = vmul.f32 %v3607_v52, %v12124_v3  ;;  %v3455_v21 = vmul.f32 %v12212_v35, %v12154_v26  ;;  %10047 = vrcp.f32 %v12209_v53  ;;  %v3570_v0 = vmul.f32 %v3569_v38, %v12078_v63 }
 0x3f7   : > { %v3645_v49 = vadd.f32 0.001143296, %v3644_v5  ;;  %v12235_v10 = vmul.f32 %v3347_v12, %v12090_v33  ;;  %vm12237_vm5 = vcmp.eq.f32.partialorder %v3423_v32, 8.507059e+37  ;;  %v3480_v14 = vadd.f32 0.18741608, %v3479_v42 }
 0x3f8   : > { %v12241_v28 = vmin.f32 %v3671_v31, 16.0  ;;  %v12244_v45 = vmul.f32 %v3387_v57, %v12140_v2  ;;  %vm3420_vm6 = vweird.f32 %v12152_v27  ;;  %v3442_v56 = vadd.f32 1.1283791, %v3441_v58 }
 0x3f9   : > { %v3556_v13 = vadd.f32 0.0036580483, %v3555_v11  ;;  %v3418_v41 = vadd.f32 %v12152_v27, %v3417_v25  ;;  %v3532_v15 = vmul.f32 %v3531_v50, %v12059_v40  ;;  %v3593_v33 = vmul.f32 2.1237322e-06, %v12124_v3  ;;  %vm12261_vm7 = vmor %vm3419_vm4, %vm3420_vm6 }
 0x3fa   : > { %v3609_v1 = vadd.f32 0.112945676, %v3608_v59  ;;  %v3456_v20 = vsub.f32 1.0, %v3455_v21  ;;  %v3518_v4 = vadd.f32 0.05243302, %v3517_v54  ;;  %v3646_v38 = vmul.f32 %v3645_v49, %v12184_v37 }
 0x3fb   : > { %v3571_v52 = vadd.f32 0.4994258, %v3570_v0  ;;  %v3426_v2 = vor.u32 1.1754944e-38, %v3425_v16  ;;  %v3481_v12 = vmul.f32 %v3480_v14, %v11983_v9  ;;  %v3684_v32 = vmul.f32 3.8918573e-05, %v12241_v28 }
 0x3fc   : > { %v12254_v42 = vpop.eup %10047  ;;  %v12266_v58 = vmul.f32 %v3442_v56, %v11774_v30  ;;  %v3463_v16 = vand.u32 2147483647, %v12154_v26  ;;  %v3557_v9 = vmul.f32 %v3556_v13, %v12078_v63  ;;  %v3422_v11 = vsel %vm12261_vm7, %v12152_v27, %v3418_v41 }
 0x3fd   : > { %v12273_v25 = vadd.f32 1.0, %v3532_v15  ;;  %v3594_v54 = vadd.f32 0.00028619796, %v3593_v33  ;;  %v3610_v7 = vmul.f32 %v3609_v1, %v12124_v3  ;;  %v3457_v50 = vmul.f32 %v12212_v35, %v3456_v20 }
 0x3fe   : > { %v3519_v59 = vmul.f32 %v3518_v4, %v12059_v40  ;;  %v3572_v30 = vmul.f32 %v3571_v52, %v12078_v63  ;;  %v3647_v21 = vadd.f32 0.014752088, %v3646_v38  ;;  %v3465_v0 = vand.u32 2147483648, %v12154_v26 }
 0x3ff   : > { %v3482_v49 = vadd.f32 1.1283791, %v3481_v12  ;;  %v3495_v14 = vmul.f32 %v12254_v42, %v12209_v53  ;;  %v3685_v56 = vadd.f32 0.001143296, %v3684_v32  ;;  %v3427_v27 = vsel %vm12237_vm5, %v3426_v2, %v3422_v11 }
 0x400   : > { %vm3460_vm8 = vweird.f32 %v12212_v35  ;;  %v3558_v13 = vadd.f32 0.05243302, %v3557_v9  ;;  %v3711_v41 = vmul.f32 %v11812_v22, %v11812_v22  ;;  %10049 = vrcp.f32 %v12273_v25 }
 0x401   : > { %v3595_v15 = vmul.f32 %v3594_v54, %v12124_v3  ;;  %v3611_v33 = vadd.f32 0.4994258, %v3610_v7  ;;  %v3633_v1 = vmul.f32 2.1237322e-06, %v12184_v37  ;;  %v3458_v20 = vadd.f32 %v12212_v35, %v3457_v50 }
 0x402   : > { %v3520_v4 = vadd.f32 0.18741608, %v3519_v59  ;;  %v12291_v52 = vadd.f32 1.0, %v3572_v30  ;;  %v3648_v29 = vmul.f32 %v3647_v21, %v12184_v37  ;;  %v12295_v38 = vmul.f32 %v3427_v27, %v12207_v19 }
 0x403   : > { %vm3459_vm9 = vweird.f32 %v12154_v26  ;;  %v3496_v2 = vsub.f32 1.0, %v3495_v14  ;;  %v3686_v12 = vmul.f32 %v3685_v56, %v12241_v28  ;;  %vm12299_vm10 = vcmp.eq.f32.partialorder %v3463_v16, 8.507059e+37 }
 0x404   : > { %v3466_v57 = vor.u32 1.1754944e-38, %v3465_v0  ;;  %v3559_v9 = vmul.f32 %v3558_v13, %v12078_v63  ;;  %v12304_v11 = vmin.f32 %v3711_v41, 16.0  ;;  %vm12308_vm11 = vmor %vm3459_vm9, %vm3460_vm8  ;;  %v12313_v19 = vmul.f32 %v3482_v49, %v11777_v61 }
 0x405   : > { %v3596_v26 = vadd.f32 0.0036580483, %v3595_v15  ;;  %v3612_v16 = vmul.f32 %v3611_v33, %v12124_v3  ;;  %v3634_v7 = vadd.f32 0.00028619796, %v3633_v1  ;;  %v3462_v50 = vsel %vm12308_vm11, %v12212_v35, %v3458_v20 }
 0x406   : > { %v3521_v59 = vmul.f32 %v3520_v4, %v12059_v40  ;;  %10051 = vrcp.f32 %v12291_v52  ;;  %v3649_v30 = vadd.f32 0.112945676, %v3648_v29  ;;  %v12321_v21 = vpop.eup %10049  ;;  %v3497_v61 = vmul.f32 %v12254_v42, %v3496_v2 }
 0x407   : > { %v3687_v49 = vadd.f32 0.014752088, %v3686_v12  ;;  %v3751_v14 = vmul.f32 %v11816_v60, %v11816_v60  ;;  %vm3499_vm12 = vweird.f32 %v12209_v53  ;;  %v3503_v56 = vand.u32 2147483647, %v12209_v53 }
 0x408   : > { %v3560_v35 = vadd.f32 0.18741608, %v3559_v9  ;;  %v3724_v40 = vmul.f32 3.8918573e-05, %v12304_v11  ;;  %v3467_v27 = vsel %vm12299_vm10, %v3466_v57, %v3462_v50  ;;  %v3597_v13 = vmul.f32 %v3596_v26, %v12124_v3 }
 0x409   : > { %v12333_v41 = vadd.f32 1.0, %v3612_v16  ;;  %v3635_v15 = vmul.f32 %v3634_v7, %v12184_v37  ;;  %v3505_v33 = vand.u32 2147483648, %v12209_v53  ;;  %v3522_v1 = vadd.f32 1.1283791, %v3521_v59 }
 0x40a   : > { %v3535_v20 = vmul.f32 %v12321_v21, %v12273_v25  ;;  %v3650_v4 = vmul.f32 %v3649_v30, %v12184_v37  ;;  %v3498_v29 = vadd.f32 %v12254_v42, %v3497_v61  ;;  %vm3500_vm13 = vweird.f32 %v12254_v42 }
 0x40b   : > { %v3688_v2 = vmul.f32 %v3687_v49, %v12241_v28  ;;  %v12343_v12 = vmin.f32 %v3751_v14, 16.0  ;;  %v12348_v57 = vmul.f32 %v3467_v27, %v12266_v58  ;;  %vm12350_vm14 = vcmp.eq.f32.partialorder %v3503_v56, 8.507059e+37  ;;  %vm12359_vm15 = vmor %vm3499_vm12, %vm3500_vm13 }
 0x40c   : > { %v12345_v32 = vpop.eup %10051  ;;  %v3561_v54 = vmul.f32 %v3560_v35, %v12078_v63  ;;  %v3725_v26 = vadd.f32 0.001143296, %v3724_v40  ;;  %v3598_v16 = vadd.f32 0.05243302, %v3597_v13  ;;  %10053 = vrcp.f32 %v12333_v41 }
 0x40d   : > { %v3636_v7 = vadd.f32 0.0036580483, %v3635_v15  ;;  %v3673_v50 = vmul.f32 2.1237322e-06, %v12241_v28  ;;  %v3506_v58 = vor.u32 1.1754944e-38, %v3505_v33  ;;  %v12364_v30 = vmul.f32 %v3522_v1, %v11783_v18 }
 0x40e   : > { %v3536_v61 = vsub.f32 1.0, %v3535_v20  ;;  %v3651_v49 = vadd.f32 0.4994258, %v3650_v4  ;;  %v3502_v63 = vsel %vm12359_vm15, %v12254_v42, %v3498_v29  ;;  %v3575_v14 = vmul.f32 %v12345_v32, %v12291_v52 }
 0x40f   : > { %v3689_v56 = vadd.f32 0.112945676, %v3688_v2  ;;  %v3764_v53 = vmul.f32 3.8918573e-05, %v12343_v12  ;;  %v3545_v40 = vand.u32 2147483648, %v12273_v25  ;;  %v3726_v18 = vmul.f32 %v3725_v26, %v12304_v11 }
 0x410   : > { %v3562_v27 = vadd.f32 1.1283791, %v3561_v54  ;;  %v3543_v13 = vand.u32 2147483647, %v12273_v25  ;;  %v3599_v15 = vmul.f32 %v3598_v16, %v12124_v3  ;;  %v3637_v33 = vmul.f32 %v3636_v7, %v12184_v37 }
 0x411   : > { %v3674_v42 = vadd.f32 0.00028619796, %v3673_v50  ;;  %v3507_v1 = vsel %vm12350_vm14, %v3506_v58, %v3502_v63  ;;  %v3537_v20 = vmul.f32 %v12321_v21, %v3536_v61  ;;  %vm3539_vm0 = vweird.f32 %v12273_v25 }
 0x412   : > { %v3652_v4 = vmul.f32 %v3651_v49, %v12184_v37  ;;  %v12383_v29 = vpop.eup %10053  ;;  %v3576_v2 = vsub.f32 1.0, %v3575_v14  ;;  %v3690_v54 = vmul.f32 %v3689_v56, %v12241_v28  ;;  %v3713_v26 = vmul.f32 2.1237322e-06, %v12304_v11 }
 0x413   : > { %v3765_v16 = vadd.f32 0.001143296, %v3764_v53  ;;  %v3546_v59 = vor.u32 1.1754944e-38, %v3545_v40  ;;  %v12388_v7 = vmul.f32 %v3562_v27, %v11786_v44  ;;  %v3727_v9 = vadd.f32 0.014752088, %v3726_v18 }
 0x414   : > { %v3791_v50 = vmul.f32 %v11824_v6, %v11824_v6  ;;  %v12393_v58 = vmul.f32 %v3507_v1, %v12313_v19  ;;  %vm12395_vm2 = vcmp.eq.f32.partialorder %v3543_v13, 8.507059e+37  ;;  %v3600_v49 = vadd.f32 0.18741608, %v3599_v15 }
 0x415   : > { %v3638_v63 = vadd.f32 0.05243302, %v3637_v33  ;;  %v3675_v14 = vmul.f32 %v3674_v42, %v12241_v28  ;;  %v3538_v56 = vadd.f32 %v12321_v21, %v3537_v20  ;;  %vm3540_vm3 = vweird.f32 %v12321_v21 }
 0x416   : > { %v3615_v44 = vmul.f32 %v12383_v29, %v12333_v41  ;;  %v12404_v53 = vadd.f32 1.0, %v3652_v4  ;;  %v3577_v19 = vmul.f32 %v12345_v32, %v3576_v2  ;;  %v3691_v40 = vadd.f32 0.4994258, %v3690_v54  ;;  %vm12416_vm5 = vmor %vm3539_vm0, %vm3540_vm3 }
 0x417   : > { %v3714_v27 = vadd.f32 0.00028619796, %v3713_v26  ;;  %v3766_v18 = vmul.f32 %v3765_v16, %v12343_v12  ;;  %vm3579_vm4 = vweird.f32 %v12291_v52  ;;  %v3728_v13 = vmul.f32 %v3727_v9, %v12304_v11 }
 0x418   : > { %v12410_v15 = vmin.f32 %v3791_v50, 16.0  ;;  %v3831_v33 = vmul.f32 %v11827_v36, %v11827_v36  ;;  %vm3580_vm6 = vweird.f32 %v12345_v32  ;;  %v3583_v1 = vand.u32 2147483647, %v12291_v52 }
 0x419   : > { %v3639_v20 = vmul.f32 %v3638_v63, %v12184_v37  ;;  %v3676_v4 = vadd.f32 0.0036580483, %v3675_v14  ;;  %v3542_v2 = vsel %vm12416_vm5, %v12321_v21, %v3538_v56  ;;  %v3616_v54 = vsub.f32 1.0, %v3615_v44  ;;  %vm12444_vm7 = vmor %vm3579_vm4, %vm3580_vm6 }
 0x41a   : > { %10055 = vrcp.f32 %v12404_v53  ;;  %v3753_v25 = vmul.f32 2.1237322e-06, %v12343_v12  ;;  %v3578_v26 = vadd.f32 %v12345_v32, %v3577_v19  ;;  %v3692_v16 = vmul.f32 %v3691_v40, %v12241_v28 }
 0x41b   : > { %v3715_v9 = vmul.f32 %v3714_v27, %v12304_v11  ;;  %v3767_v50 = vadd.f32 0.014752088, %v3766_v18  ;;  %v3585_v35 = vand.u32 2147483648, %v12291_v52  ;;  %v3729_v63 = vadd.f32 0.112945676, %v3728_v13 }
 0x41c   : > { %v3804_v14 = vmul.f32 3.8918573e-05, %v12410_v15  ;;  %v12433_v0 = vmin.f32 %v3831_v33, 16.0  ;;  %v3601_v56 = vmul.f32 %v3600_v49, %v12124_v3  ;;  %v3640_v44 = vadd.f32 0.18741608, %v3639_v20 }
 0x41d   : > { %v3677_v42 = vmul.f32 %v3676_v4, %v12241_v28  ;;  %v3547_v19 = vsel %vm12395_vm2, %v3546_v59, %v3542_v2  ;;  %vm12448_vm8 = vcmp.eq.f32.partialorder %v3583_v1, 8.507059e+37  ;;  %v3617_v3 = vmul.f32 %v12383_v29, %v3616_v54 }
 0x41e   : > { %v3754_v49 = vadd.f32 0.00028619796, %v3753_v25  ;;  %v3582_v61 = vsel %vm12444_vm7, %v12345_v32, %v3578_v26  ;;  %v12456_v59 = vadd.f32 1.0, %v3692_v16  ;;  %v3716_v18 = vadd.f32 0.0036580483, %v3715_v9 }
 0x41f   : > { %v3768_v52 = vmul.f32 %v3767_v50, %v12343_v12  ;;  %v3586_v33 = vor.u32 1.1754944e-38, %v3585_v35  ;;  %v3730_v1 = vmul.f32 %v3729_v63, %v12304_v11  ;;  %v3805_v20 = vadd.f32 0.001143296, %v3804_v14 }
 0x420   : > { %v12459_v13 = vpop.eup %10055  ;;  %v3844_v4 = vmul.f32 3.8918573e-05, %v12433_v0  ;;  %v12464_v2 = vmul.f32 %v3547_v19, %v12364_v30  ;;  %v3602_v54 = vadd.f32 1.1283791, %v3601_v56  ;;  %v3641_v25 = vmul.f32 %v3640_v44, %v12184_v37 }
 0x421   : > { %v3678_v32 = vadd.f32 0.05243302, %v3677_v42  ;;  %v3587_v26 = vsel %vm12448_vm8, %v3586_v33, %v3582_v61  ;;  %v3618_v16 = vadd.f32 %v12383_v29, %v3617_v3  ;;  %vm3620_vm9 = vweird.f32 %v12383_v29 }
 0x422   : > { %v3755_v35 = vmul.f32 %v3754_v49, %v12343_v12  ;;  %v3655_v9 = vmul.f32 %v12459_v13, %v12404_v53  ;;  %10057 = vrcp.f32 %v12456_v59  ;;  %v3717_v30 = vmul.f32 %v3716_v18, %v12304_v11 }
 0x423   : > { %v3769_v50 = vadd.f32 0.112945676, %v3768_v52  ;;  %v3625_v37 = vand.u32 2147483648, %v12333_v41  ;;  %v3731_v63 = vadd.f32 0.4994258, %v3730_v1  ;;  %v3806_v14 = vmul.f32 %v3805_v20, %v12410_v15 }
 0x424   : > { %v3845_v56 = vadd.f32 0.001143296, %v3844_v4  ;;  %vm3619_vm10 = vweird.f32 %v12333_v41  ;;  %v3623_v44 = vand.u32 2147483647, %v12333_v41  ;;  %v3642_v42 = vadd.f32 1.1283791, %v3641_v25 }
 0x425   : > { %v3679_v19 = vmul.f32 %v3678_v32, %v12241_v28  ;;  %v12482_v40 = vmul.f32 %v3587_v26, %v12388_v7  ;;  %v3603_v27 = vmul.f32 %v3602_v54, %v11790_v39  ;;  %vm12487_vm11 = vmor %vm3619_vm10, %vm3620_vm9  ;;  %v3756_v49 = vadd.f32 0.0036580483, %v3755_v35 }
 0x426   : > { %v3871_v61 = vmul.f32 %v11832_v34, %v11832_v34  ;;  %v3622_v41 = vsel %vm12487_vm11, %v12383_v29, %v3618_v16  ;;  %v3656_v18 = vsub.f32 1.0, %v3655_v9  ;;  %v3718_v52 = vadd.f32 0.05243302, %v3717_v30 }
 0x427   : > { %v3770_v7 = vmul.f32 %v3769_v50, %v12343_v12  ;;  %v3626_v33 = vor.u32 1.1754944e-38, %v3625_v37  ;;  %v3732_v39 = vmul.f32 %v3731_v63, %v12304_v11  ;;  %v3807_v1 = vadd.f32 0.014752088, %v3806_v14 }
 0x428   : > { %v3846_v20 = vmul.f32 %v3845_v56, %v12433_v0  ;;  %v12499_v4 = vpop.eup %10057  ;;  %vm3624_vm12 = vcmp.eq.f32.partialorder %v3623_v44, 8.507059e+37  ;;  %v12503_v25 = vmul.f32 %v3642_v42, %v11804_v62  ;;  %v3680_v32 = vadd.f32 0.18741608, %v3679_v19 }
 0x429   : > { %v3627_v29 = vsel %vm3624_vm12, %v3626_v33, %v3622_v41  ;;  %v3757_v26 = vmul.f32 %v3756_v49, %v12343_v12  ;;  %v3793_v16 = vmul.f32 2.1237322e-06, %v12410_v15  ;;  %v12507_v35 = vmin.f32 %v3871_v61, 16.0 }
 0x42a   : > { %v3657_v30 = vmul.f32 %v12459_v13, %v3656_v18  ;;  %v3719_v50 = vmul.f32 %v3718_v52, %v12304_v11  ;;  %v3771_v37 = vadd.f32 0.4994258, %v3770_v7  ;;  %v3695_v63 = vmul.f32 %v12499_v4, %v12456_v59 }
 0x42b   : > { %v12514_v62 = vadd.f32 1.0, %v3732_v39  ;;  %v3808_v14 = vmul.f32 %v3807_v1, %v12410_v15  ;;  %v3847_v56 = vadd.f32 0.014752088, %v3846_v20  ;;  %v12517_v44 = vmul.f32 %v3627_v29, %v3603_v27 }
 0x42c   : > { %v3663_v42 = vand.u32 2147483647, %v12404_v53  ;;  %v3665_v19 = vand.u32 2147483648, %v12404_v53  ;;  %v3681_v3 = vmul.f32 %v3680_v32, %v12241_v28  ;;  %vm3660_vm13 = vweird.f32 %v12459_v13 }
 0x42d   : > { %v3758_v49 = vadd.f32 0.05243302, %v3757_v26  ;;  %v3794_v61 = vadd.f32 0.00028619796, %v3793_v16  ;;  %v3884_v41 = vmul.f32 3.8918573e-05, %v12507_v35  ;;  %v3658_v18 = vadd.f32 %v12459_v13, %v3657_v30 }
 0x42e   : > { %v3720_v52 = vadd.f32 0.18741608, %v3719_v50  ;;  %v3772_v7 = vmul.f32 %v3771_v37, %v12343_v12  ;;  %v3833_v27 = vmul.f32 2.1237322e-06, %v12433_v0  ;;  %v3696_v33 = vsub.f32 1.0, %v3695_v63 }
 0x42f   : > { %10059 = vrcp.f32 %v12514_v62  ;;  %v3809_v39 = vadd.f32 0.112945676, %v3808_v14  ;;  %v3848_v1 = vmul.f32 %v3847_v56, %v12433_v0  ;;  %vm3659_vm14 = vweird.f32 %v12404_v53  ;;  %v15849_v56 = vld [vmem:[#allocation35_spill] sm:$0xff] }
 0x430   : > { %vm12530_vm15 = vcmp.eq.f32.partialorder %v3663_v42, 8.507059e+37  ;;  %v3682_v20 = vadd.f32 1.1283791, %v3681_v3  ;;  %v3911_v32 = vmul.f32 %v11839_v47, %v11839_v47  ;;  %vm12538_vm0 = vmor %vm3659_vm14, %vm3660_vm13  ;;  %v3666_v26 = vor.u32 1.1754944e-38, %v3665_v19 }
 0x431   : > { %v3759_v16 = vmul.f32 %v3758_v49, %v12343_v12  ;;  %v3795_v30 = vmul.f32 %v3794_v61, %v12410_v15  ;;  %v3885_v53 = vadd.f32 0.001143296, %v3884_v41  ;;  %v3662_v50 = vsel %vm12538_vm0, %v12459_v13, %v3658_v18 }
 0x432   : > { %v3721_v37 = vmul.f32 %v3720_v52, %v12304_v11  ;;  %v12548_v63 = vadd.f32 1.0, %v3772_v7  ;;  %v3834_v14 = vadd.f32 0.00028619796, %v3833_v27  ;;  %v3697_v42 = vmul.f32 %v12499_v4, %v3696_v33 }
 0x433   : > { %v3810_v19 = vmul.f32 %v3809_v39, %v12410_v15  ;;  %v3849_v3 = vadd.f32 0.112945676, %v3848_v1  ;;  %v3683_v49 = vmul.f32 %v3682_v20, %v11809_v46  ;;  %v3703_v61 = vand.u32 2147483647, %v12456_v59 }
 0x434   : > { %v3705_v41 = vand.u32 2147483648, %v12456_v59  ;;  %v12556_v29 = vmin.f32 %v3911_v32, 16.0  ;;  %v3667_v11 = vsel %vm12530_vm15, %v3666_v26, %v3662_v50  ;;  %v3760_v18 = vadd.f32 0.18741608, %v3759_v16 }
 0x435   : > { %v12558_v13 = vpop.eup %10059  ;;  %v3796_v52 = vadd.f32 0.0036580483, %v3795_v30  ;;  %v3886_v7 = vmul.f32 %v3885_v53, %v12507_v35  ;;  %v3722_v27 = vadd.f32 1.1283791, %v3721_v37  ;;  %10061 = vrcp.f32 %v12548_v63 }
 0x436   : > { %v3835_v46 = vmul.f32 %v3834_v14, %v12433_v0  ;;  %v3951_v33 = vmul.f32 %v11842_v23, %v11842_v23  ;;  %v3698_v39 = vadd.f32 %v12499_v4, %v3697_v42  ;;  %vm3700_vm2 = vweird.f32 %v12499_v4 }
 0x437   : > { %v3811_v1 = vadd.f32 0.4994258, %v3810_v19  ;;  %v3850_v28 = vmul.f32 %v3849_v3, %v12433_v0  ;;  %v12571_v20 = vmul.f32 %v3667_v11, %v12503_v25  ;;  %vm3699_vm3 = vweird.f32 %v12456_v59 }
 0x438   : > { %v3735_v32 = vmul.f32 %v12558_v13, %v12514_v62  ;;  %v3924_v26 = vmul.f32 3.8918573e-05, %v12556_v29  ;;  %vm12577_vm4 = vcmp.eq.f32.partialorder %v3703_v61, 8.507059e+37  ;;  %v3761_v30 = vmul.f32 %v3760_v18, %v12343_v12  ;;  %vm12583_vm5 = vmor %vm3699_vm3, %vm3700_vm2 }
 0x439   : > { %v3797_v53 = vmul.f32 %v3796_v52, %v12410_v15  ;;  %v3887_v50 = vadd.f32 0.014752088, %v3886_v7  ;;  %v3706_v25 = vor.u32 1.1754944e-38, %v3705_v41  ;;  %v12588_v59 = vmul.f32 %v3722_v27, %v11812_v22 }
 0x43a   : > { %v3836_v14 = vadd.f32 0.0036580483, %v3835_v46  ;;  %v12590_v42 = vmin.f32 %v3951_v33, 16.0  ;;  %v3702_v19 = vsel %vm12583_vm5, %v12499_v4, %v3698_v39  ;;  %v3812_v12 = vmul.f32 %v3811_v1, %v12410_v15 }
 0x43b   : > { %v3851_v3 = vadd.f32 0.4994258, %v3850_v28  ;;  %v3873_v61 = vmul.f32 2.1237322e-06, %v12507_v35  ;;  %v12597_v11 = vpop.eup %10061  ;;  %v3736_v41 = vsub.f32 1.0, %v3735_v32  ;;  %v3745_v22 = vand.u32 2147483648, %v12514_v62 }
 0x43c   : > { %v3925_v52 = vadd.f32 0.001143296, %v3924_v26  ;;  %v3743_v7 = vand.u32 2147483647, %v12514_v62  ;;  %v3762_v27 = vadd.f32 1.1283791, %v3761_v30  ;;  %v3888_v33 = vmul.f32 %v3887_v50, %v12507_v35 }
 0x43d   : > { %v3798_v46 = vadd.f32 0.05243302, %v3797_v53  ;;  %v3707_v4 = vsel %vm12577_vm4, %v3706_v25, %v3702_v19  ;;  %v3837_v39 = vmul.f32 %v3836_v14, %v12433_v0  ;;  %v3964_v1 = vmul.f32 3.8918573e-05, %v12590_v42  ;;  %v15848_v28 = vld [vmem:[#allocation34_spill] sm:$0xff] }
 0x43e   : > { %v3991_v37 = vmul.f32 %v15848_v28, %v15848_v28  ;;  %v3775_v32 = vmul.f32 %v12597_v11, %v12548_v63  ;;  %v12611_v26 = vadd.f32 1.0, %v3812_v12  ;;  %v3852_v30 = vmul.f32 %v3851_v3, %v12433_v0 }
 0x43f   : > { %v3874_v53 = vadd.f32 0.00028619796, %v3873_v61  ;;  %v3737_v50 = vmul.f32 %v12558_v13, %v3736_v41  ;;  %vm3739_vm6 = vweird.f32 %v12514_v62  ;;  %v3746_v16 = vor.u32 1.1754944e-38, %v3745_v22 }
 0x440   : > { %v3926_v25 = vmul.f32 %v3925_v52, %v12556_v29  ;;  %v12618_v14 = vmul.f32 %v3762_v27, %v11816_v60  ;;  %v3799_v19 = vmul.f32 %v3798_v46, %v12410_v15  ;;  %v3889_v18 = vadd.f32 0.112945676, %v3888_v33 }
 0x441   : > { %v4031_v12 = vmul.f32 %v15849_v56, %v15849_v56  ;;  %v12623_v9 = vmul.f32 %v3707_v4, %v3683_v49  ;;  %vm12625_vm7 = vcmp.eq.f32.partialorder %v3743_v7, 8.507059e+37  ;;  %v3838_v61 = vadd.f32 0.05243302, %v3837_v39 }
 0x442   : > { %v3965_v41 = vadd.f32 0.001143296, %v3964_v1  ;;  %v12629_v22 = vmin.f32 %v3991_v37, 16.0  ;;  %v3776_v52 = vsub.f32 1.0, %v3775_v32  ;;  %10063 = vrcp.f32 %v12611_v26 }
 0x443   : > { %v12632_v60 = vadd.f32 1.0, %v3852_v30  ;;  %v3875_v27 = vmul.f32 %v3874_v53, %v12507_v35  ;;  %v3738_v46 = vadd.f32 %v12558_v13, %v3737_v50  ;;  %vm3740_vm8 = vweird.f32 %v12558_v13 }
 0x444   : > { %v3913_v49 = vmul.f32 2.1237322e-06, %v12556_v29  ;;  %v3927_v7 = vadd.f32 0.014752088, %v3926_v25  ;;  %vm3779_vm9 = vweird.f32 %v12548_v63  ;;  %v3800_v33 = vadd.f32 0.18741608, %v3799_v19  ;;  %vm12648_vm10 = vmor %vm3739_vm6, %vm3740_vm8 }
 0x445   : > { %v3890_v4 = vmul.f32 %v3889_v18, %v12507_v35  ;;  %v12640_v39 = vmin.f32 %v4031_v12, 16.0  ;;  %v3783_v1 = vand.u32 2147483647, %v12548_v63  ;;  %v3785_v37 = vand.u32 2147483648, %v12548_v63 }
 0x446   : > { %v3966_v32 = vmul.f32 %v3965_v41, %v12590_v42  ;;  %v4004_v30 = vmul.f32 3.8918573e-05, %v12629_v22  ;;  %v3777_v50 = vmul.f32 %v12597_v11, %v3776_v52  ;;  %v3839_v18 = vmul.f32 %v3838_v61, %v12433_v0 }
 0x447   : > { %10065 = vrcp.f32 %v12632_v60  ;;  %v3876_v25 = vadd.f32 0.0036580483, %v3875_v27  ;;  %v3742_v12 = vsel %vm12648_vm10, %v12558_v13, %v3738_v46  ;;  %v3914_v41 = vadd.f32 0.00028619796, %v3913_v49  ;;  %v15856_v46 = vld [vmem:[#allocation36_spill] sm:$0xff] }
 0x448   : > { %v3928_v62 = vmul.f32 %v3927_v7, %v12556_v29  ;;  %v12660_v54 = vpop.eup %10063  ;;  %v3801_v21 = vmul.f32 %v3800_v33, %v12410_v15  ;;  %v3891_v31 = vadd.f32 0.4994258, %v3890_v4  ;;  %v3953_v52 = vmul.f32 2.1237322e-06, %v12590_v42 }
 0x449   : > { %v4044_v61 = vmul.f32 3.8918573e-05, %v12640_v39  ;;  %vm3780_vm11 = vweird.f32 %v12597_v11  ;;  %vm12666_vm12 = vcmp.eq.f32.partialorder %v3783_v1, 8.507059e+37  ;;  %v3967_v53 = vadd.f32 0.014752088, %v3966_v32 }
 0x44a   : > { %v4005_v13 = vadd.f32 0.001143296, %v4004_v30  ;;  %v4071_v49 = vmul.f32 %v15856_v46, %v15856_v46  ;;  %v3747_v7 = vsel %vm12625_vm7, %v3746_v16, %v3742_v12  ;;  %v3778_v15 = vadd.f32 %v12597_v11, %v3777_v50  ;;  %vm12689_vm13 = vmor %vm3779_vm9, %vm3780_vm11 }
 0x44b   : > { %v3840_v33 = vadd.f32 0.18741608, %v3839_v18  ;;  %v3877_v4 = vmul.f32 %v3876_v25, %v12507_v35  ;;  %v3786_v19 = vor.u32 1.1754944e-38, %v3785_v37  ;;  %v3815_v1 = vmul.f32 %v12660_v54, %v12611_v26 }
 0x44c   : > { %v3915_v5 = vmul.f32 %v3914_v41, %v12556_v29  ;;  %v3929_v24 = vadd.f32 0.112945676, %v3928_v62  ;;  %v3802_v30 = vadd.f32 1.1283791, %v3801_v21  ;;  %v3892_v43 = vmul.f32 %v3891_v31, %v12507_v35 }
 0x44d   : > { %v12679_v32 = vpop.eup %10065  ;;  %v3954_v46 = vadd.f32 0.00028619796, %v3953_v52  ;;  %v4045_v3 = vadd.f32 0.001143296, %v4044_v61  ;;  %v12683_v16 = vmul.f32 %v3747_v7, %v12588_v59  ;;  %v3968_v50 = vmul.f32 %v3967_v53, %v12590_v42 }
 0x44e   : > { %v4006_v18 = vmul.f32 %v4005_v13, %v12629_v22  ;;  %v12695_v21 = vmin.f32 %v4071_v49, 16.0  ;;  %v3782_v31 = vsel %vm12689_vm13, %v12597_v11, %v3778_v15  ;;  %v3823_v59 = vand.u32 2147483647, %v12611_v26 }
 0x44f   : > { %v3841_v25 = vmul.f32 %v3840_v33, %v12433_v0  ;;  %v3878_v12 = vadd.f32 0.05243302, %v3877_v4  ;;  %v3816_v63 = vsub.f32 1.0, %v3815_v1  ;;  %v3855_v41 = vmul.f32 %v12679_v32, %v12632_v60 }
 0x450   : > { %v3916_v62 = vadd.f32 0.0036580483, %v3915_v5  ;;  %v3930_v52 = vmul.f32 %v3929_v24, %v12556_v29  ;;  %v3825_v61 = vand.u32 2147483648, %v12611_v26  ;;  %v12706_v53 = vadd.f32 1.0, %v3892_v43 }
 0x451   : > { %v3955_v13 = vmul.f32 %v3954_v46, %v12590_v42  ;;  %v4046_v11 = vmul.f32 %v4045_v3, %v12640_v39  ;;  %v12711_v49 = vmul.f32 %v3802_v30, %v11824_v6  ;;  %v3969_v0 = vadd.f32 0.112945676, %v3968_v50 }
 0x452   : > { %v4007_v7 = vadd.f32 0.014752088, %v4006_v18  ;;  %v4084_v15 = vmul.f32 3.8918573e-05, %v12695_v21  ;;  %v8694_v33 = vclamps-f32 %v12683_v16, 1.0  ;;  %v3787_v24 = vsel %vm12666_vm12, %v3786_v19, %v3782_v31 }
 0x453   : > { %v3842_v5 = vadd.f32 1.1283791, %v3841_v25  ;;  %v3879_v43 = vmul.f32 %v3878_v12, %v12507_v35  ;;  %v3817_v4 = vmul.f32 %v12660_v54, %v3816_v63  ;;  %v3856_v46 = vsub.f32 1.0, %v3855_v41 }
 0x454   : > { %v3917_v1 = vmul.f32 %v3916_v62, %v12556_v29  ;;  %v3931_v3 = vadd.f32 0.4994258, %v3930_v52  ;;  %vm3819_vm14 = vweird.f32 %v12611_v26  ;;  %v3956_v6 = vadd.f32 0.0036580483, %v3955_v13 }
 0x455   : > { %v3993_v30 = vmul.f32 2.1237322e-06, %v12629_v22  ;;  %v4047_v37 = vadd.f32 0.014752088, %v4046_v11  ;;  %vm12722_vm15 = vcmp.eq.f32.partialorder %v3823_v59, 8.507059e+37  ;;  %10067 = vrcp.f32 %v12706_v53 }
 0x456   : > { %v3970_v19 = vmul.f32 %v3969_v0, %v12590_v42  ;;  %v4008_v27 = vmul.f32 %v4007_v7, %v12629_v22  ;;  %v4085_v18 = vadd.f32 0.001143296, %v4084_v15  ;;  %v12730_v31 = vmul.f32 %v3787_v24, %v12618_v14 }
 0x457   : > { %vm3820_vm0 = vweird.f32 %v12660_v54  ;;  %v3826_v25 = vor.u32 1.1754944e-38, %v3825_v61  ;;  %v3880_v12 = vadd.f32 0.18741608, %v3879_v43  ;;  %v3818_v63 = vadd.f32 %v12660_v54, %v3817_v4 }
 0x458   : > { %v3918_v59 = vadd.f32 0.05243302, %v3917_v1  ;;  %v3932_v41 = vmul.f32 %v3931_v3, %v12556_v29  ;;  %v4086_v62 = vmul.f32 %v4085_v18, %v12695_v21  ;;  %v12737_v52 = vmul.f32 %v3842_v5, %v11827_v36  ;;  %vm12747_vm2 = vmor %vm3819_vm14, %vm3820_vm0 }
 0x459   : > { %v3957_v13 = vmul.f32 %v3956_v6, %v12590_v42  ;;  %v3994_v11 = vadd.f32 0.00028619796, %v3993_v30  ;;  %v4048_v14 = vmul.f32 %v4047_v37, %v12640_v39  ;;  %v3857_v0 = vmul.f32 %v12679_v32, %v3856_v46 }
 0x45a   : > { %v3971_v7 = vadd.f32 0.4994258, %v3970_v19  ;;  %v4009_v61 = vadd.f32 0.112945676, %v4008_v27  ;;  %v4087_v15 = vadd.f32 0.014752088, %v4086_v62  ;;  %v3881_v5 = vmul.f32 %v3880_v12, %v12507_v35 }
 0x45b   : > { %v8695_v24 = vclamps-f32 %v12730_v31, 1.0  ;;  %v3863_v36 = vand.u32 2147483647, %v12632_v60  ;;  %v4033_v4 = vmul.f32 2.1237322e-06, %v12640_v39  ;;  %v12754_v46 = vpop.eup %10067  ;;  %v3822_v1 = vsel %vm12747_vm2, %v12660_v54, %v3818_v63 }
 0x45c   : > { %v3919_v3 = vmul.f32 %v3918_v59, %v12556_v29  ;;  %v12760_v6 = vadd.f32 1.0, %v3932_v41  ;;  %v4088_v26 = vmul.f32 %v4087_v15, %v12695_v21  ;;  %vm3860_vm3 = vweird.f32 %v12679_v32 }
 0x45d   : > { %v3958_v30 = vadd.f32 0.05243302, %v3957_v13  ;;  %v3995_v37 = vmul.f32 %v3994_v11, %v12629_v22  ;;  %v4049_v35 = vadd.f32 0.112945676, %v4048_v14  ;;  %v3858_v19 = vadd.f32 %v12679_v32, %v3857_v0 }
 0x45e   : > { %v3972_v27 = vmul.f32 %v3971_v7, %v12590_v42  ;;  %v4010_v18 = vmul.f32 %v4009_v61, %v12629_v22  ;;  %v4089_v12 = vadd.f32 0.112945676, %v4088_v26  ;;  %v3827_v54 = vsel %vm12722_vm15, %v3826_v25, %v3822_v1 }
 0x45f   : > { %v3865_v63 = vand.u32 2147483648, %v12632_v60  ;;  %v3895_v59 = vmul.f32 %v12754_v46, %v12706_v53  ;;  %v4034_v41 = vadd.f32 0.00028619796, %v4033_v4  ;;  %vm3859_vm4 = vweird.f32 %v12632_v60 }
 0x460   : > { %v3882_v62 = vadd.f32 1.1283791, %v3881_v5  ;;  %v3920_v13 = vadd.f32 0.18741608, %v3919_v3  ;;  %10069 = vrcp.f32 %v12760_v6  ;;  %vm12777_vm5 = vmor %vm3859_vm4, %vm3860_vm3  ;;  %v3959_v50 = vmul.f32 %v3958_v30, %v12590_v42 }
 0x461   : > { %v3996_v25 = vadd.f32 0.0036580483, %v3995_v37  ;;  %v4050_v14 = vmul.f32 %v4049_v35, %v12640_v39  ;;  %v4090_v0 = vmul.f32 %v4089_v12, %v12695_v21  ;;  %v12785_v7 = vmul.f32 %v3827_v54, %v12711_v49 }
 0x462   : > { %v3862_v60 = vsel %vm12777_vm5, %v12679_v32, %v3858_v19  ;;  %v12790_v61 = vadd.f32 1.0, %v3972_v27  ;;  %v4011_v15 = vadd.f32 0.4994258, %v4010_v18  ;;  %vm3864_vm6 = vcmp.eq.f32.partialorder %v3863_v36, 8.507059e+37 }
 0x463   : > { %v3866_v43 = vor.u32 1.1754944e-38, %v3865_v63  ;;  %v3896_v5 = vsub.f32 1.0, %v3895_v59  ;;  %v4035_v4 = vmul.f32 %v4034_v41, %v12640_v39  ;;  %v12794_v1 = vmul.f32 %v3882_v62, %v11832_v34 }
 0x464   : > { %v3921_v3 = vmul.f32 %v3920_v13, %v12556_v29  ;;  %v4073_v49 = vmul.f32 2.1237322e-06, %v12695_v21  ;;  %v4091_v26 = vadd.f32 0.4994258, %v4090_v0  ;;  %v3960_v37 = vadd.f32 0.18741608, %v3959_v50 }
 0x465   : > { %v3867_v30 = vsel %vm3864_vm6, %v3866_v43, %v3862_v60  ;;  %v3997_v32 = vmul.f32 %v3996_v25, %v12629_v22  ;;  %v4051_v35 = vadd.f32 0.4994258, %v4050_v14  ;;  %v8696_v36 = vclamps-f32 %v12785_v7, 1.0  ;;  %v4201_v7 = vld [vmem:[%s15671_s7 + $0x40] sm:$0xff] }
 0x466   : > { %v12799_v19 = vpop.eup %10069  ;;  %v3903_v27 = vand.u32 2147483647, %v12706_v53  ;;  %10071 = vrcp.f32 %v12790_v61  ;;  %v4012_v34 = vmul.f32 %v4011_v15, %v12629_v22  ;;  %v3897_v29 = vmul.f32 %v12754_v46, %v3896_v5 }
 0x467   : > { %vm3899_vm7 = vweird.f32 %v12706_v53  ;;  %v3905_v18 = vand.u32 2147483648, %v12706_v53  ;;  %v4036_v12 = vadd.f32 0.0036580483, %v4035_v4  ;;  %v12809_v54 = vmul.f32 %v3867_v30, %v12737_v52 }
 0x468   : > { %v3922_v63 = vadd.f32 1.1283791, %v3921_v3  ;;  %v4074_v59 = vadd.f32 0.00028619796, %v4073_v49  ;;  %v4092_v41 = vmul.f32 %v4091_v26, %v12695_v21  ;;  %v3935_v62 = vmul.f32 %v12799_v19, %v12760_v6 }
 0x469   : > { %v3961_v13 = vmul.f32 %v3960_v37, %v12590_v42  ;;  %v3998_v11 = vadd.f32 0.05243302, %v3997_v32  ;;  %v4052_v50 = vmul.f32 %v4051_v35, %v12640_v39  ;;  %vm12816_vm8 = vcmp.eq.f32.partialorder %v3903_v27, 8.507059e+37 }
 0x46a   : > { %v12820_v14 = vadd.f32 1.0, %v4012_v34  ;;  %v15867_v52 = vclamps-f32 %v12017_v51, 1.0  ;;  %v15868_v60 = vclamps-f32 %v12041_v8, 1.0  ;;  %v3898_v43 = vadd.f32 %v12754_v46, %v3897_v29  ;;  %v15872_v34 = vld [vmem:[#allocation12_spill] sm:$0xff] }
 0x46b   : > { %vm3900_vm9 = vweird.f32 %v12754_v46  ;;  %v3906_v42 = vor.u32 1.1754944e-38, %v3905_v18  ;;  %v4037_v5 = vmul.f32 %v4036_v12, %v12640_v39  ;;  %v8697_v3 = vclamps-f32 %v12809_v54, 1.0  ;;  %v15873_v18 = vld [vmem:[#allocation13_spill] sm:$0xff]  ;;  %v4200_v54 = vld [vmem:[%s15671_s7 + $0x38] sm:$0xff] }
 0x46c   : > { %v4111_v0 = vadd.f32 1.0, %v15867_v52  ;;  %v4112_v15 = vadd.f32 1.0, %v15868_v60  ;;  %v12829_v4 = vpop.eup %10071  ;;  %v12833_v49 = vmul.f32 %v3922_v63, %v11839_v47  ;;  %v4075_v51 = vmul.f32 %v4074_v59, %v12695_v21  ;;  %vm12843_vm10 = vmor %vm3899_vm7, %vm3900_vm9 }
 0x46d   : > { %v12836_v26 = vadd.f32 1.0, %v4092_v41  ;;  %v3936_v8 = vsub.f32 1.0, %v3935_v62  ;;  %v3962_v30 = vadd.f32 1.1283791, %v3961_v13  ;;  %v3999_v37 = vmul.f32 %v3998_v11, %v12629_v22 }
 0x46e   : > { %v12839_v32 = vadd.f32 1.0, %v4052_v50  ;;  %10073 = vrcp.f32 %v12820_v14  ;;  %v15871_v47 = vclamps-f32 %v12052_v17, 1.0  ;;  %v12851_v29 = vmul.f32 %v4111_v0, %v15872_v34 }
 0x46f   : > { %v12854_v12 = vmul.f32 %v4112_v15, %v15873_v18  ;;  %v3902_v63 = vsel %vm12843_vm10, %v12754_v46, %v3898_v43  ;;  %vm3939_vm11 = vweird.f32 %v12760_v6  ;;  %v3945_v53 = vand.u32 2147483648, %v12760_v6  ;;  %v15876_v43 = vld [vmem:[#allocation14_spill] sm:$0xff] }
 0x470   : > { %v4113_v27 = vadd.f32 1.0, %v15871_v47  ;;  %v3975_v59 = vmul.f32 %v12829_v4, %v12790_v61  ;;  %v4038_v41 = vadd.f32 0.05243302, %v4037_v5  ;;  %v3943_v17 = vand.u32 2147483647, %v12760_v6  ;;  %v15880_v47 = vld [vmem:[#allocation15_spill] sm:$0xff] }
 0x471   : > { %v4076_v62 = vadd.f32 0.0036580483, %v4075_v51  ;;  %10075 = vrcp.f32 %v12836_v26  ;;  %v15874_v13 = vclamps-f32 %v12069_v55, 1.0  ;;  %v3937_v50 = vmul.f32 %v12799_v19, %v3936_v8 }
 0x472   : > { %v12869_v46 = vmul.f32 %v3962_v30, %v11842_v23  ;;  %v4000_v52 = vadd.f32 0.18741608, %v3999_v37  ;;  %10077 = vrcp.f32 %v12839_v32  ;;  %v3907_v0 = vsel %vm12816_vm8, %v3906_v42, %v3902_v63 }
 0x473   : > { %v4114_v11 = vadd.f32 1.0, %v15874_v13  ;;  %v15875_v60 = vclamps-f32 %v12147_v48, 1.0  ;;  %v12877_v5 = vmul.f32 %v4113_v27, %v15876_v43  ;;  %v4161_v55 = vadd.f32 %v12854_v12, %v12851_v29 }
 0x474   : > { %v3946_v51 = vor.u32 1.1754944e-38, %v3945_v53  ;;  %v3976_v8 = vsub.f32 1.0, %v3975_v59  ;;  %v3985_v23 = vand.u32 2147483648, %v12790_v61  ;;  %v4039_v30 = vmul.f32 %v4038_v41, %v12640_v39  ;;  %v12883_v37 = vpop.eup %10073 }
 0x475   : > { %v4115_v15 = vadd.f32 1.0, %v15875_v60  ;;  %vm12885_vm12 = vcmp.eq.f32.partialorder %v3943_v17, 8.507059e+37  ;;  %v4077_v48 = vmul.f32 %v4076_v62, %v12695_v21  ;;  %v15879_v42 = vclamps-f32 %v12235_v10, 1.0  ;;  %v15882_v62 = vld [vmem:[#allocation16_spill] sm:$0xff] }
 0x476   : > { %v12893_v27 = vmul.f32 %v4114_v11, %v15880_v47  ;;  %v4162_v34 = vadd.f32 %v4161_v55, %v12877_v5  ;;  %v12897_v18 = vmul.f32 %v3907_v0, %v12794_v1  ;;  %v3938_v63 = vadd.f32 %v12799_v19, %v3937_v50  ;;  %v15886_v55 = vld [vmem:[#allocation17_spill] sm:$0xff] }
 0x477   : > { %v4116_v35 = vadd.f32 1.0, %v15879_v42  ;;  %vm3940_vm13 = vweird.f32 %v12799_v19  ;;  %vm3979_vm14 = vweird.f32 %v12790_v61  ;;  %v4001_v53 = vmul.f32 %v4000_v52, %v12629_v22  ;;  %v12903_v59 = vpop.eup %10075 }
 0x478   : > { %v3983_v10 = vand.u32 2147483647, %v12790_v61  ;;  %v15881_v41 = vclamps-f32 %v12244_v45, 1.0  ;;  %v12909_v13 = vmul.f32 %v4115_v15, %v15882_v62  ;;  %v4163_v1 = vadd.f32 %v4162_v34, %v12893_v27  ;;  %v12912_v11 = vpop.eup %10077  ;;  %vm12919_vm15 = vmor %vm3939_vm11, %vm3940_vm13 }
 0x479   : > { %v3977_v50 = vmul.f32 %v12829_v4, %v3976_v8  ;;  %v3986_v0 = vor.u32 1.1754944e-38, %v3985_v23  ;;  %v4015_v22 = vmul.f32 %v12883_v37, %v12820_v14  ;;  %v4040_v52 = vadd.f32 0.18741608, %v4039_v30 }
 0x47a   : > { %v4117_v17 = vadd.f32 1.0, %v15881_v41  ;;  %v4078_v45 = vadd.f32 0.05243302, %v4077_v48  ;;  %v15885_v15 = vclamps-f32 %v12295_v38, 1.0  ;;  %v12926_v42 = vmul.f32 %v4116_v35, %v15886_v55  ;;  %v15890_v41 = vld [vmem:[#allocation25_spill] sm:$0xff]  ;;  %v15892_v55 = vld [vmem:[#allocation27_spill] sm:$0xff] }
 0x47b   : > { %v4164_v8 = vadd.f32 %v4163_v1, %v12909_v13  ;;  %v8698_v23 = vclamps-f32 %v12897_v18, 1.0  ;;  %v3942_v30 = vsel %vm12919_vm15, %v12799_v19, %v3938_v63  ;;  %v4002_v6 = vadd.f32 1.1283791, %v4001_v53 }
 0x47c   : > { %v4118_v43 = vadd.f32 1.0, %v15885_v15  ;;  %v4095_v47 = vmul.f32 %v12903_v59, %v12836_v26  ;;  %vm12935_vm0 = vcmp.eq.f32.partialorder %v3983_v10, 8.507059e+37  ;;  %v4055_v38 = vmul.f32 %v12912_v11, %v12839_v32 }
 0x47d   : > { %v15889_v35 = vclamps-f32 %v12348_v57, 1.0  ;;  %v12944_v62 = vmul.f32 %v4117_v17, %v15890_v41  ;;  %v4165_v1 = vadd.f32 %v4164_v8, %v12926_v42  ;;  %v3978_v19 = vadd.f32 %v12829_v4, %v3977_v50 }
 0x47e   : > { %vm3980_vm2 = vweird.f32 %v12829_v4  ;;  %v4016_v63 = vsub.f32 1.0, %v4015_v22  ;;  %v4041_v53 = vmul.f32 %v4040_v52, %v12640_v39  ;;  %v4079_v10 = vmul.f32 %v4078_v45, %v12695_v21 }
 0x47f   : > { %v4119_v34 = vadd.f32 1.0, %v15889_v35  ;;  %v15891_v60 = vclamps-f32 %v12393_v58, 1.0  ;;  %v12954_v57 = vmul.f32 %v4118_v43, %v15892_v55  ;;  %v4166_v17 = vadd.f32 %v4165_v1, %v12944_v62  ;;  %vm12963_vm3 = vmor %vm3979_vm14, %vm3980_vm2  ;;  %v15896_v43 = vld [vmem:[#allocation18_spill] sm:$0xff] }
 0x480   : > { %v3947_v8 = vsel %vm12885_vm12, %v3946_v51, %v3942_v30  ;;  %v4023_v50 = vand.u32 2147483647, %v12820_v14  ;;  %v4025_v35 = vand.u32 2147483648, %v12820_v14  ;;  %v4096_v22 = vsub.f32 1.0, %v4095_v47 }
 0x481   : > { %v4120_v15 = vadd.f32 1.0, %v15891_v60  ;;  %v4056_v58 = vsub.f32 1.0, %v4055_v38  ;;  %v15895_v52 = vclamps-f32 %v12464_v2, 1.0  ;;  %v12970_v41 = vmul.f32 %v4119_v34, %v15896_v43  ;;  %v15898_v60 = vld [vmem:[#allocation28_spill] sm:$0xff] }
 0x482   : > { %v4167_v51 = vadd.f32 %v4166_v17, %v12954_v57  ;;  %v3982_v25 = vsel %vm12963_vm3, %v12829_v4, %v3978_v19  ;;  %v12977_v30 = vmul.f32 %v4002_v6, %v15848_v28  ;;  %v4017_v61 = vmul.f32 %v12883_v37, %v4016_v63  ;;  %v4208_v6 = vld [vmem:[%s15671_s7 + $0x78] sm:$0xff] }
 0x483   : > { %v4121_v45 = vadd.f32 1.0, %v15895_v52  ;;  %v12980_v47 = vadd.f32 1.1283791, %v4041_v53  ;;  %v4080_v38 = vadd.f32 0.18741608, %v4079_v10  ;;  %v15897_v2 = vclamps-f32 %v12482_v40, 1.0  ;;  %4210 = vmatpush.msra.mxu2 %v4208_v6 }
 0x484   : > { %v12985_v34 = vmul.f32 %v4120_v15, %v15898_v60  ;;  %v4168_v55 = vadd.f32 %v4167_v51, %v12970_v41  ;;  %v12989_v17 = vmul.f32 %v3947_v8, %v12833_v49  ;;  %vm4019_vm4 = vweird.f32 %v12820_v14  ;;  %v15902_v49 = vld [vmem:[#allocation19_spill] sm:$0xff] }
 0x485   : > { %v4122_v1 = vadd.f32 1.0, %v15897_v2  ;;  %v4026_v28 = vor.u32 1.1754944e-38, %v4025_v35  ;;  %v4097_v4 = vmul.f32 %v12903_v59, %v4096_v22  ;;  %vm12996_vm5 = vcmp.eq.f32.partialorder %v4023_v50, 8.507059e+37  ;;  %v4205_v2 = vld [vmem:[%s15671_s7 + $0x60] sm:$0xff] }
 0x486   : > { %v4057_v19 = vmul.f32 %v12912_v11, %v4056_v58  ;;  %v15901_v63 = vclamps-f32 %v12517_v44, 1.0  ;;  %v13004_v10 = vmul.f32 %v4121_v45, %v15902_v49  ;;  %v4169_v15 = vadd.f32 %v4168_v55, %v12985_v34  ;;  %v4207_v44 = vld [vmem:[%s15671_s7 + $0x70] sm:$0xff]  ;;  %v15904_v58 = vld [vmem:[#allocation20_spill] sm:$0xff] }
 0x487   : > { %v3987_v8 = vsel %vm12935_vm0, %v3986_v0, %v3982_v25  ;;  %v4018_v35 = vadd.f32 %v12883_v37, %v4017_v61  ;;  %vm4020_vm6 = vweird.f32 %v12883_v37  ;;  %vm4059_vm7 = vweird.f32 %v12839_v32  ;;  %4211 = vmatpush.msra.mxu2 %v4207_v44  ;;  %v15906_v25 = vld [vmem:[#allocation22_spill] sm:$0xff]  ;;  %v4246_v49 = vld [vmem:[%s15673_s9 + $0x78] sm:$0xff] }
 0x488   : > { %v4123_v53 = vadd.f32 1.0, %v15901_v63  ;;  %v4081_v50 = vmul.f32 %v4080_v38, %v12695_v21  ;;  %v15903_v22 = vclamps-f32 %v12571_v20, 1.0  ;;  %v13019_v52 = vmul.f32 %v4122_v1, %v15904_v58  ;;  %v4206_v20 = vld [vmem:[%s15671_s7 + $0x68] sm:$0xff]  ;;  %vm13043_vm10 = vmor %vm4019_vm4, %vm4020_vm6  ;;  %v15911_v63 = vld [vmem:[#allocation29_spill] sm:$0xff]  ;;  %4248 = vmatpush.msra.mxu3 %v4246_v49 }
 0x489   : > { %v4170_v0 = vadd.f32 %v4169_v15, %v13004_v10  ;;  %vm4060_vm8 = vweird.f32 %v12912_v11  ;;  %v4098_v48 = vadd.f32 %v12903_v59, %v4097_v4  ;;  %vm4100_vm9 = vweird.f32 %v12903_v59  ;;  %4212 = vmatpush.msra.mxu2 %v4206_v20  ;;  %v4204_v4 = vld [vmem:[%s15671_s7 + $0x58] sm:$0xff]  ;;  %v4199_v49 = vld [vmem:[%s15671_s7 + $0x30] sm:$0xff] }
 0x48a   : > { %v4124_v39 = vadd.f32 1.0, %v15903_v22  ;;  %v15905_v45 = vclamps-f32 %v12623_v9, 1.0  ;;  %v4058_v21 = vadd.f32 %v12912_v11, %v4057_v19  ;;  %v4105_v51 = vand.u32 2147483648, %v12836_v26  ;;  %vm13079_vm13 = vmor %vm4059_vm7, %vm4060_vm8 }
 0x48b   : > { %v13033_v61 = vmul.f32 %v4123_v53, %v15906_v25  ;;  %v4171_v38 = vadd.f32 %v4170_v0, %v13019_v52  ;;  %v4063_v1 = vand.u32 2147483647, %v12839_v32  ;;  %v4065_v60 = vand.u32 2147483648, %v12839_v32  ;;  %4213 = vmatpush.msra.mxu2 %v4205_v2  ;;  %v4245_v32 = vld [vmem:[%s15673_s9 + $0x70] sm:$0xff]  ;;  %v15917_v2 = vld [vmem:[#allocation32_spill] sm:$0xff] }
 0x48c   : > { %v4125_v43 = vadd.f32 1.0, %v15905_v45  ;;  %vm4099_vm11 = vweird.f32 %v12836_v26  ;;  %v4103_v55 = vand.u32 2147483647, %v12836_v26  ;;  %v4022_v14 = vsel %vm13043_vm10, %v12883_v37, %v4018_v35  ;;  %4249 = vmatpush.msra.mxu3 %v4245_v32  ;;  %v4198_v32 = vld [vmem:[%s15671_s7 + $0x28] sm:$0xff] }
 0x48d   : > { %vm13059_vm12 = vmor %vm4099_vm11, %vm4100_vm9  ;;  %v4126_v19 = vadd.f32 1.0, %v8694_v33  ;;  %v13066_v53 = vmul.f32 %v4124_v39, %v15911_v63  ;;  %v4172_v26 = vadd.f32 %v4171_v38, %v13033_v61  ;;  %v13073_v37 = vmul.f32 %v3987_v8, %v12869_v46  ;;  %v4203_v46 = vld [vmem:[%s15671_s7 + $0x50] sm:$0xff]  ;;  %4214 = vmatpush.msra.mxu2 %v4204_v4  ;;  %v15919_v4 = vld [vmem:[#allocation33_spill] sm:$0xff] }
 0x48e   : > { %v4082_v33 = vadd.f32 1.1283791, %v4081_v50  ;;  %v4102_v15 = vsel %vm13059_vm12, %v12903_v59, %v4098_v48  ;;  %v4127_v35 = vadd.f32 1.0, %v8695_v24  ;;  %v4062_v8 = vsel %vm13079_vm13, %v12912_v11, %v4058_v21  ;;  %v15914_v50 = vld [vmem:[#allocation30_spill] sm:$0xff]  ;;  %v15915_v48 = vld [vmem:[#allocation31_spill] sm:$0xff] }
 0x48f   : > { %v4106_v44 = vor.u32 1.1754944e-38, %v4105_v51  ;;  %v13098_v22 = vmul.f32 %v4125_v43, %v15914_v50  ;;  %v4173_v31 = vadd.f32 %v4172_v26, %v13066_v53  ;;  %v4244_v24 = vld [vmem:[%s15673_s9 + $0x68] sm:$0xff]  ;;  %v4027_v59 = vsel %vm12996_vm5, %v4026_v28, %v4022_v14  ;;  %4215 = vmatpush.msra.mxu2 %v4203_v46  ;;  %v4243_v28 = vld [vmem:[%s15673_s9 + $0x60] sm:$0xff]  ;;  %v15916_v51 = vld [vmem:[#allocation36_spill] sm:$0xff] }
 0x490   : > { %vm4064_vm14 = vcmp.eq.f32.partialorder %v4063_v1, 8.507059e+37  ;;  %v4066_v39 = vor.u32 1.1754944e-38, %v4065_v60  ;;  %vm4104_vm15 = vcmp.eq.f32.partialorder %v4103_v55, 8.507059e+37  ;;  %v4202_v11 = vld [vmem:[%s15671_s7 + $0x48] sm:$0xff]  ;;  %v4128_v0 = vadd.f32 1.0, %v8696_v36  ;;  %4250 = vmatpush.msra.mxu3 %v4244_v24  ;;  %v4239_v24 = vld [vmem:[%s15673_s9 + $0x40] sm:$0xff] }
 0x491   : > { %v4107_v58 = vsel %vm4104_vm15, %v4106_v44, %v4102_v15  ;;  %v13112_v45 = vmul.f32 %v4126_v19, %v15915_v48  ;;  %v4174_v43 = vadd.f32 %v4173_v31, %v13098_v22  ;;  %v8699_v40 = vclamps-f32 %v12989_v17, 1.0  ;;  %4216 = vmatpush.msra.mxu2 %v4202_v11  ;;  %v4241_v19 = vld [vmem:[%s15673_s9 + $0x50] sm:$0xff]  ;;  %v15920_v63 = vld [vmem:[#allocation26_spill] sm:$0xff]  ;;  %v15921_v15 = vld [vmem:[#allocation8_spill] sm:$0xff] }
 0x492   : > { %v4043_v20 = vmul.f32 %v12980_v47, %v15849_v56  ;;  %v4067_v21 = vsel %vm4064_vm14, %v4066_v39, %v4062_v8  ;;  %v4083_v25 = vmul.f32 %v4082_v33, %v15916_v51  ;;  %v4028_v36 = vmul.f32 %v4027_v59, %v12977_v30  ;;  %v4242_v56 = vld [vmem:[%s15673_s9 + $0x58] sm:$0xff]  ;;  %4251 = vmatpush.msra.mxu3 %v4243_v28  ;;  %v4240_v33 = vld [vmem:[%s15673_s9 + $0x48] sm:$0xff]  ;;  %v4197_v59 = vld [vmem:[%s15671_s7 + $0x20] sm:$0xff] }
 0x493   : > { %v4129_v38 = vadd.f32 1.0, %v8697_v3  ;;  %v13129_v9 = vmul.f32 %v4127_v35, %v15917_v2  ;;  %v4175_v17 = vadd.f32 %v4174_v43, %v13112_v45  ;;  %v15918_v47 = vld [vmem:[#allocation24_spill] sm:$0xff]  ;;  %v8700_v60 = vclamps-f32 %v13073_v37, 1.0  ;;  %4217 = vmatpush.msra.mxu2 %v4201_v7  ;;  %v15922_v39 = vld [vmem:[#allocation9_spill] sm:$0xff] }
 0x494   : > { %v3079_v1 = vmul.f32 0.5, %v15918_v47  ;;  %v4108_v55 = vmul.f32 %v4107_v58, %v4083_v25  ;;  %v4068_v3 = vmul.f32 %v4067_v21, %v4043_v20  ;;  %v4130_v30 = vadd.f32 1.0, %v8698_v23  ;;  %4252 = vmatpush.msra.mxu3 %v4242_v56  ;;  %v4238_v43 = vld [vmem:[%s15673_s9 + $0x38] sm:$0xff]  ;;  %v15923_v20 = vld [vmem:[#allocation10_spill] sm:$0xff]  ;;  %v15925_v56 = vld [vmem:[#allocation11_spill] sm:$0xff] }
 0x495   : > { %v13143_v14 = vmul.f32 %v4128_v0, %v15919_v4  ;;  %v4176_v6 = vadd.f32 %v4175_v17, %v13129_v9  ;;  %v3080_v26 = vmul.f32 0.5, %v15920_v63  ;;  %v8701_v37 = vclamps-f32 %v4028_v36, 1.0  ;;  %4218 = vmatpush.msra.mxu2 %v4200_v54  ;;  %v4237_v36 = vld [vmem:[%s15673_s9 + $0x30] sm:$0xff] }
 0x496   : > { %v4131_v18 = vadd.f32 1.0, %v8699_v40  ;;  %v13153_v23 = vmul.f32 %v4129_v38, %v3079_v1  ;;  %v3081_v35 = vmul.f32 0.5, %v15921_v15  ;;  %v8703_v46 = vclamps-f32 %v4108_v55, 1.0  ;;  %4253 = vmatpush.msra.mxu3 %v4241_v19  ;;  %v4196_v40 = vld [vmem:[%s15671_s7 + $0x18] sm:$0xff]  ;;  %v15924_v38 = vld [vmem:[#allocation21_spill] sm:$0xff]  ;;  %v4195_v17 = vld [vmem:[%s15671_s7 + $0x10] sm:$0xff] }
 0x497   : > { %v4177_v16 = vadd.f32 %v4176_v6, %v13143_v14  ;;  %v8702_v8 = vclamps-f32 %v4068_v3, 1.0  ;;  %v4132_v44 = vadd.f32 1.0, %v8700_v60  ;;  %v13163_v50 = vmul.f32 %v4130_v30, %v3080_v26  ;;  %4219 = vmatpush.msra.mxu2 %v4199_v49  ;;  %v4236_v55 = vld [vmem:[%s15673_s9 + $0x28] sm:$0xff]  ;;  %v4235_v6 = vld [vmem:[%s15673_s9 + $0x20] sm:$0xff]  ;;  %v4234_v26 = vld [vmem:[%s15673_s9 + $0x18] sm:$0xff] }
 0x498   : > { %4254 = vmatpush.msra.mxu3 %v4240_v33  ;;  %v3082_v11 = vmul.f32 0.5, %v15922_v39  ;;  %v4133_v58 = vadd.f32 1.0, %v8701_v37  ;;  %v13173_v0 = vmul.f32 %v4131_v18, %v3081_v35  ;;  %v4135_v28 = vadd.f32 1.0, %v8703_v46  ;;  %v4194_v3 = vld [vmem:[%s15671_s7 + $0x8] sm:$0xff]  ;;  %v4193_v19 = vld [vmem:[%s15671_s7] sm:$0xff]  ;;  %v4233_v18 = vld [vmem:[%s15673_s9 + $0x10] sm:$0xff] }
 0x499   : > { %v4178_v31 = vadd.f32 %v4177_v16, %v13153_v23  ;;  %4220 = vmatpush.msra.mxu2 %v4198_v32  ;;  %v3083_v21 = vmul.f32 0.5, %v15923_v20  ;;  %v4134_v51 = vadd.f32 1.0, %v8702_v8  ;;  %v3085_v2 = vmul.f32 0.5, %v15924_v38  ;;  %v4232_v33 = vld [vmem:[%s15673_s9 + $0x8] sm:$0xff]  ;;  %v4231_v35 = vld [vmem:[%s15673_s9] sm:$0xff]  ;;  %v9862_v20 = vld [vmem:[%s15667_s3 + $0x30] sm:$0xff] }
 0x49a   : > { %4255 = vmatpush.msra.mxu3 %v4239_v24  ;;  %v13183_v25 = vmul.f32 %v4132_v44, %v3082_v11  ;;  %v3084_v47 = vmul.f32 0.5, %v15925_v56  ;;  %v9861_v38 = vld [vmem:[%s15667_s3 + $0x28] sm:$0xff] }
 0x49b   : > { %v4179_v48 = vadd.f32 %v4178_v31, %v13163_v50  ;;  %4221 = vmatpush.msra.mxu2 %v4197_v59  ;;  %v13194_v1 = vmul.f32 %v4133_v58, %v3083_v21  ;;  %v13200_v54 = vmul.f32 %v4135_v28, %v3085_v2  ;;  %v15926_v31 = vld [vmem:[#allocation23_spill] sm:$0xff]  ;;  %v4209_v59 = vld [vmem:[%s15672_s8] sm:$0x1] }
 0x49c   : > { %4256 = vmatpush.msra.mxu3 %v4238_v43  ;;  %v13205_v30 = vmul.f32 %v4134_v51, %v3084_v47  ;;  %v9863_v43 = vld [vmem:[%s15667_s3 + $0x38] sm:$0xff]  ;;  %v4247_v28 = vld [vmem:[%s15674_s10] sm:$0x1] }
 0x49d   : > { %v4180_v7 = vadd.f32 %v4179_v48, %v13173_v0  ;;  %4222 = vmatpush.msra.mxu2 %v4196_v40  ;;  %v4184_v49 = vsel %vm2872_vm1, %v13200_v54, 0.0  ;;  %v9871_v48 = vld [vmem:[%s15667_s3 + $0x78] sm:$0xff]  ;;  %v9870_v40 = vld [vmem:[%s15667_s3 + $0x70] sm:$0xff]  ;;  %v9868_v2 = vld [vmem:[%s15667_s3 + $0x60] sm:$0xff] }
 0x49e   : > { %4257 = vmatpush.msra.mxu3 %v4237_v36  ;;  %v9869_v36 = vld [vmem:[%s15667_s3 + $0x68] sm:$0xff]  ;;  %v9867_v47 = vld [vmem:[%s15667_s3 + $0x58] sm:$0xff] }
 0x49f   : > { %v4181_v60 = vadd.f32 %v4180_v7, %v13183_v25  ;;  %4223 = vmatpush.msra.mxu2 %v4195_v17  ;;  %v9860_v17 = vld [vmem:[%s15667_s3 + $0x20] sm:$0xff] }
 0x4a0   : > { %4258 = vmatpush.msra.mxu3 %v4236_v55 }
 0x4a1   : > { %v4182_v4 = vadd.f32 %v4181_v60, %v13194_v1  ;;  %4224 = vmatpush.msra.mxu2 %v4194_v3  ;;  %v9859_v60 = vld [vmem:[%s15667_s3 + $0x18] sm:$0xff]  ;;  %v9866_v3 = vld [vmem:[%s15667_s3 + $0x50] sm:$0xff] }
 0x4a2   : > { %4259 = vmatpush.msra.mxu3 %v4235_v6  ;;  %v9865_v6 = vld [vmem:[%s15667_s3 + $0x48] sm:$0xff] }
 0x4a3   : > { %v4183_v63 = vadd.f32 %v4182_v4, %v13205_v30  ;;  %4225 = vmatpush.msra.mxu2 %v4193_v19  ;;  %v9858_v4 = vld [vmem:[%s15667_s3 + $0x10] sm:$0xff]  ;;  %v9857_v19 = vld [vmem:[%s15667_s3 + $0x8] sm:$0xff] }
 0x4a4   : > { %4260 = vmatpush.msra.mxu3 %v4234_v26 }
 0x4a5   : > { %v4185_v37 = vadd.f32 %v4184_v49, %v4183_v63  ;;  %4484 = vmatpush.bf16.msrb.mxu2 %v9871_v48 }
 0x4a6   : > { %4261 = vmatpush.msra.mxu3 %v4233_v18  ;;  %v9856_v18 = vld [vmem:[%s15667_s3] sm:$0xff] }
 0x4a7   : > { %v4186_v16 = vrot.slane %v4185_v37, 4 }
 0x4a8   : > { %4262 = vmatpush.msra.mxu3 %v4232_v33  ;;  %v9879_v33 = vld [vmem:[%s15667_s3 + $0xb8] sm:$0xff] }
 0x4a9   : > { %v4187_v15 = vadd.f32 %v4186_v16, %v4185_v37  ;;  %4485 = vmatpush.bf16.msrb.mxu2 %v9870_v40  ;;  %v9864_v37 = vld [vmem:[%s15667_s3 + $0x40] sm:$0xff] }
 0x4aa   : > { %4263 = vmatpush.msra.mxu3 %v4231_v35 }
 0x4ab   : > { %v4188_v46 = vrot.slane %v4187_v15, 2 }
 0x4ac   : > { %4575 = vmatpush.bf16.msrb.mxu3 %v9863_v43 }
 0x4ad   : > { %v4189_v32 = vadd.f32 %v4188_v46, %v4187_v15  ;;  %4486 = vmatpush.bf16.msrb.mxu2 %v9869_v36 }
 0x4af   : > { %v4190_v8 = vrot.slane %v4189_v32, 1 }
 0x4b0   : > { %4576 = vmatpush.bf16.msrb.mxu3 %v9862_v20 }
 0x4b1   : > { %v4191_v44 = vadd.f32 %v4190_v8, %v4189_v32  ;;  %4487 = vmatpush.bf16.msrb.mxu2 %v9868_v2  ;;  %v9878_v8 = vld [vmem:[%s15667_s3 + $0xb0] sm:$0xff] }
 0x4b3   : > { %v4192_v24 = vmul.f32 %v4191_v44, %v15926_v31 }
 0x4b4   : > { %4577 = vmatpush.bf16.msrb.mxu3 %v9861_v38 }
 0x4b5   : > { %4226 = vmatmul.f32.vlgmr.msra.gmra.mxu2 %v4192_v24 }
 0x4b6   : > { %4488 = vmatpush.bf16.msrb.mxu2 %v9867_v47 }
 0x4b8   : > { %4578 = vmatpush.bf16.msrb.mxu3 %v9860_v17 }
 0x4ba   : > { %4489 = vmatpush.bf16.msrb.mxu2 %v9866_v3 }
 0x4bc   : > { %4579 = vmatpush.bf16.msrb.mxu3 %v9859_v60 }
 0x4be   : > { %4490 = vmatpush.bf16.msrb.mxu2 %v9865_v6 }
 0x4c0   : > { %4580 = vmatpush.bf16.msrb.mxu3 %v9858_v4  ;;  %v9874_v4 = vld [vmem:[%s15667_s3 + $0x90] sm:$0xff] }
 0x4c2   : > { %4491 = vmatpush.bf16.msrb.mxu2 %v9864_v37 }
 0x4c4   : > { %4581 = vmatpush.bf16.msrb.mxu3 %v9857_v19 }
 0x4c6   : > { %4716 = vmatpush.bf16.msra.mxu2 %v9879_v33 }
 0x4c8   : > { %4582 = vmatpush.bf16.msrb.mxu3 %v9856_v18  ;;  %v9873_v18 = vld [vmem:[%s15667_s3 + $0x88] sm:$0xff] }
 0x4ca   : > { %4717 = vmatpush.bf16.msra.mxu2 %v9878_v8  ;;  %v9872_v8 = vld [vmem:[%s15667_s3 + $0x80] sm:$0xff] }
 0x538   : > { %v4227_v39 = vpop.f32.mrf.mxu2 }
 0x539   : > { %v4228_v11 = vadd.f32 %v4227_v39, %v4209_v59  ;;  %v9877_v59 = vld [vmem:[%s15667_s3 + $0xa8] sm:$0xff] }
 0x53a   : > { %4718 = vmatpush.bf16.msra.mxu2 %v9877_v59 }
 0x53b   : > { %v4230_v58 = vmax.f32 %v4228_v11, 0.0 }
 0x53d   : > { %4264 = vmatmul.f32.vlgmr.msra.gmra.mxu3 %v4230_v58 }
 0x5c0   : > { %v4265_v21 = vpop.f32.mrf.mxu3 }
 0x5c1   : > { %v4266_v51 = vadd.f32 %v4265_v21, %v4247_v28 }
 0x5c3   : > { %v8704_v7 = vmul.f32 -1.442695, %v4266_v51 }
 0x5c5   : > { %10079 = vpow2.f32 %v8704_v7 }
 0x5cb   : > { %v10080_v56 = vpop.eup %10079 }
 0x5cc   : > { %v4271_v55 = vadd.f32 1.0, %v10080_v56 }
 0x5ce   : > { %10081 = vrcp.f32 %v4271_v55  ;;  %v4283_v16 = vand.u32 2147483648, %v4271_v55  ;;  %v4281_v35 = vand.u32 2147483647, %v4271_v55  ;;  %vm4277_vm0 = vweird.f32 %v4271_v55 }
 0x5d0   : > { %v4284_v32 = vor.u32 1.1754944e-38, %v4283_v16  ;;  %vm4282_vm3 = vcmp.eq.f32.partialorder %v4281_v35, 8.507059e+37 }
 0x5d4   : > { %v10082_v63 = vpop.eup %10081 }
 0x5d5   : > { %v4273_v26 = vmul.f32 %v10082_v63, %v4271_v55  ;;  %vm4278_vm1 = vweird.f32 %v10082_v63 }
 0x5d6   : > { %vm4279_vm2 = vmor %vm4277_vm0, %vm4278_vm1 }
 0x5d7   : > { %v4274_v49 = vsub.f32 1.0, %v4273_v26 }
 0x5d9   : > { %v4275_v15 = vmul.f32 %v10082_v63, %v4274_v49 }
 0x5db   : > { %v4276_v46 = vadd.f32 %v10082_v63, %v4275_v15 }
 0x5dd   : > { %v4280_v44 = vsel %vm4279_vm2, %v10082_v63, %v4276_v46 }
 0x5de   : > { %v4285_v31 = vsel %vm4282_vm3, %v4284_v32, %v4280_v44 }
 0x5df   : > { %v4287_v24 = vperm.slane %v4285_v31, 0 }
 0x5e1   : > { %v4288_v39 = vmul.f32 %v4287_v24, %v12851_v29  ;;  %v4289_v11 = vmul.f32 %v4287_v24, %v12854_v12  ;;  %v4290_v58 = vmul.f32 %v4287_v24, %v12877_v5  ;;  %v4291_v48 = vmul.f32 %v4287_v24, %v12893_v27 }
 0x5e2   : > { %v4292_v43 = vmul.f32 %v4287_v24, %v12909_v13  ;;  %v4293_v28 = vmul.f32 %v4287_v24, %v12926_v42  ;;  %v4294_v40 = vmul.f32 %v4287_v24, %v12944_v62  ;;  %v4295_v20 = vmul.f32 %v4287_v24, %v12954_v57 }
 0x5e3   : > { %4313 = vst [vmem:[#allocation2] sm:$0xff] %v4288_v39  ;;  %v4296_v29 = vmul.f32 %v4287_v24, %v12970_v41  ;;  %v4297_v12 = vmul.f32 %v4287_v24, %v12985_v34  ;;  %v4298_v5 = vmul.f32 %v4287_v24, %v13004_v10  ;;  %v4299_v27 = vmul.f32 %v4287_v24, %v13019_v52 }
 0x5e4   : > { %4314 = vst [vmem:[#allocation2 + $0x8] sm:$0xff] %v4289_v11  ;;  %v4300_v62 = vmul.f32 %v4287_v24, %v13033_v61  ;;  %v4301_v57 = vmul.f32 %v4287_v24, %v13066_v53  ;;  %v4302_v41 = vmul.f32 %v4287_v24, %v13098_v22  ;;  %v4303_v10 = vmul.f32 %v4287_v24, %v13112_v45  ;;  %v9876_v61 = vld [vmem:[%s15667_s3 + $0xa0] sm:$0xff] }
 0x5e5   : > { %4315 = vst [vmem:[#allocation2 + $0x10] sm:$0xff] %v4290_v58  ;;  %v4304_v52 = vmul.f32 %v4287_v24, %v13129_v9  ;;  %v4305_v53 = vmul.f32 %v4287_v24, %v13143_v14  ;;  %v4306_v22 = vmul.f32 %v4287_v24, %v13153_v23  ;;  %4719 = vmatpush.bf16.msra.mxu2 %v9876_v61 }
 0x5e6   : > { %4316 = vst [vmem:[#allocation2 + $0x18] sm:$0xff] %v4291_v48  ;;  %v4307_v36 = vmul.f32 %v4287_v24, %v13163_v50  ;;  %v4308_v45 = vmul.f32 %v4287_v24, %v13173_v0  ;;  %v4309_v9 = vmul.f32 %v4287_v24, %v13183_v25  ;;  %v4310_v38 = vmul.f32 %v4287_v24, %v13194_v1  ;;  %v9875_v25 = vld [vmem:[%s15667_s3 + $0x98] sm:$0xff] }
 0x5e7   : > { %4317 = vst [vmem:[#allocation2 + $0x20] sm:$0xff] %v4292_v43  ;;  %v4311_v2 = vmul.f32 %v4287_v24, %v13205_v30  ;;  %v4312_v14 = vmul.f32 %v4287_v24, %v13200_v54 }
 0x5e8   : > { %4318 = vst [vmem:[#allocation2 + $0x28] sm:$0xff] %v4293_v28 }
 0x5e9   : > { %4319 = vst [vmem:[#allocation2 + $0x30] sm:$0xff] %v4294_v40  ;;  %4720 = vmatpush.bf16.msra.mxu2 %v9875_v25 }
 0x5ea   : > { %4320 = vst [vmem:[#allocation2 + $0x38] sm:$0xff] %v4295_v20 }
 0x5eb   : > { %v4387_v13 = vld [vmem:[#allocation2 + $0x1] ss:$2 sm:$0xff]  ;;  %v4338_v42 = vld [vmem:[#allocation2] ss:$2 sm:$0xff]  ;;  %4321 = vst [vmem:[#allocation2 + $0x40] sm:$0xff] %v4296_v29 }
 0x5ec   : > { %4322 = vst [vmem:[#allocation2 + $0x48] sm:$0xff] %v4297_v12  ;;  %v4619_v40 = vld [vmem:[#allocation2 + $0x2] ss:$2 sm:$0xff] }
 0x5ed   : > { %v4389_v21 = vld [vmem:[#allocation2 + $0x11] ss:$2 sm:$0xff]  ;;  %v4340_v51 = vld [vmem:[#allocation2 + $0x10] ss:$2 sm:$0xff]  ;;  %4323 = vst [vmem:[#allocation2 + $0x50] sm:$0xff] %v4298_v5  ;;  %4721 = vmatpush.bf16.msra.mxu2 %v9874_v4 }
 0x5ee   : > { %v4412_v34 = vpack.c.bf16 %v4389_v21, %v4387_v13  ;;  %v4363_v7 = vpack.c.bf16 %v4340_v51, %v4338_v42  ;;  %4324 = vst [vmem:[#allocation2 + $0x58] sm:$0xff] %v4299_v27  ;;  %v4621_v20 = vld [vmem:[#allocation2 + $0x12] ss:$2 sm:$0xff] }
 0x5ef   : > { %4325 = vst [vmem:[#allocation2 + $0x60] sm:$0xff] %v4300_v62  ;;  %v4391_v23 = vld [vmem:[#allocation2 + $0x21] ss:$2 sm:$0xff]  ;;  %v4342_v17 = vld [vmem:[#allocation2 + $0x20] ss:$2 sm:$0xff]  ;;  %v4644_v29 = vpack.c.bf16 %v4621_v20, %v4619_v40 }
 0x5f0   : > { %4492 = vmatmul.bf16.vlgmr.msrb.gmra.mxu2 %v4412_v34  ;;  %4583 = vmatmul.bf16.vlgmr.msrb.gmra.mxu3 %v4363_v7  ;;  %4326 = vst [vmem:[#allocation2 + $0x68] sm:$0xff] %v4301_v57  ;;  %v4623_v12 = vld [vmem:[#allocation2 + $0x22] ss:$2 sm:$0xff] }
 0x5f1   : > { %4327 = vst [vmem:[#allocation2 + $0x70] sm:$0xff] %v4302_v41  ;;  %v4393_v50 = vld [vmem:[#allocation2 + $0x31] ss:$2 sm:$0xff]  ;;  %v4344_v56 = vld [vmem:[#allocation2 + $0x30] ss:$2 sm:$0xff]  ;;  %4722 = vmatpush.bf16.msra.mxu2 %v9873_v18 }
 0x5f2   : > { %4328 = vst [vmem:[#allocation2 + $0x78] sm:$0xff] %v4303_v10  ;;  %v4413_v0 = vpack.c.bf16 %v4393_v50, %v4391_v23  ;;  %v4364_v47 = vpack.c.bf16 %v4344_v56, %v4342_v17  ;;  %v4625_v5 = vld [vmem:[#allocation2 + $0x32] ss:$2 sm:$0xff] }
 0x5f3   : > { %4329 = vst [vmem:[#allocation2 + $0x80] sm:$0xff] %v4304_v52  ;;  %v4395_v1 = vld [vmem:[#allocation2 + $0x41] ss:$2 sm:$0xff]  ;;  %v4346_v54 = vld [vmem:[#allocation2 + $0x40] ss:$2 sm:$0xff]  ;;  %v4645_v27 = vpack.c.bf16 %v4625_v5, %v4623_v12 }
 0x5f4   : > { %4330 = vst [vmem:[#allocation2 + $0x88] sm:$0xff] %v4305_v53  ;;  %v4627_v51 = vld [vmem:[#allocation2 + $0x42] ss:$2 sm:$0xff] }
 0x5f5   : > { %4331 = vst [vmem:[#allocation2 + $0x90] sm:$0xff] %v4306_v22  ;;  %v4397_v30 = vld [vmem:[#allocation2 + $0x51] ss:$2 sm:$0xff]  ;;  %v4348_v60 = vld [vmem:[#allocation2 + $0x50] ss:$2 sm:$0xff]  ;;  %4723 = vmatpush.bf16.msra.mxu2 %v9872_v8 }
 0x5f6   : > { %4332 = vst [vmem:[#allocation2 + $0x98] sm:$0xff] %v4307_v36  ;;  %v4414_v55 = vpack.c.bf16 %v4397_v30, %v4395_v1  ;;  %v4365_v3 = vpack.c.bf16 %v4348_v60, %v4346_v54  ;;  %v4629_v41 = vld [vmem:[#allocation2 + $0x52] ss:$2 sm:$0xff] }
 0x5f7   : > { %4333 = vst [vmem:[#allocation2 + $0xa0] sm:$0xff] %v4308_v45  ;;  %v4399_v6 = vld [vmem:[#allocation2 + $0x61] ss:$2 sm:$0xff]  ;;  %v4350_v63 = vld [vmem:[#allocation2 + $0x60] ss:$2 sm:$0xff]  ;;  %v4646_v34 = vpack.c.bf16 %v4629_v41, %v4627_v51 }
 0x5f8   : > { %4334 = vst [vmem:[#allocation2 + $0xa8] sm:$0xff] %v4309_v9  ;;  %v4631_v22 = vld [vmem:[#allocation2 + $0x62] ss:$2 sm:$0xff] }
 0x5f9   : > { %4335 = vst [vmem:[#allocation2 + $0xb0] sm:$0xff] %v4310_v38  ;;  %v4401_v19 = vld [vmem:[#allocation2 + $0x71] ss:$2 sm:$0xff]  ;;  %v4352_v26 = vld [vmem:[#allocation2 + $0x70] ss:$2 sm:$0xff] }
 0x5fa   : > { %4336 = vst [vmem:[#allocation2 + $0xb8] sm:$0xff] %v4311_v2  ;;  %v4415_v49 = vpack.c.bf16 %v4401_v19, %v4399_v6  ;;  %v4366_v37 = vpack.c.bf16 %v4352_v26, %v4350_v63  ;;  %v4633_v36 = vld [vmem:[#allocation2 + $0x72] ss:$2 sm:$0xff] }
 0x5fb   : > { %4337 = vst [vmem:[#allocation2 + $0xc0] sm:$0x7f] %v4312_v14  ;;  %v4403_v16 = vld [vmem:[#allocation2 + $0x81] ss:$2 sm:$0xff]  ;;  %v4354_v15 = vld [vmem:[#allocation2 + $0x80] ss:$2 sm:$0xff]  ;;  %v4647_v45 = vpack.c.bf16 %v4633_v36, %v4631_v22 }
 0x5fc   : > { %v4635_v23 = vld [vmem:[#allocation2 + $0x82] ss:$2 sm:$0xff] }
 0x5fd   : > { %v4405_v33 = vld [vmem:[#allocation2 + $0x91] ss:$2 sm:$0xff]  ;;  %v4356_v35 = vld [vmem:[#allocation2 + $0x90] ss:$2 sm:$0xff] }
 0x5fe   : > { %v4416_v46 = vpack.c.bf16 %v4405_v33, %v4403_v16  ;;  %v4367_v32 = vpack.c.bf16 %v4356_v35, %v4354_v15  ;;  %v4637_v17 = vld [vmem:[#allocation2 + $0x92] ss:$2 sm:$0xff] }
 0x5ff   : > { %v4407_v44 = vld [vmem:[#allocation2 + $0xa1] ss:$2 sm:$0xff]  ;;  %v4358_v24 = vld [vmem:[#allocation2 + $0xa0] ss:$2 sm:$0xff]  ;;  %v4648_v50 = vpack.c.bf16 %v4637_v17, %v4635_v23 }
 0x600   : > { %4497 = vmatmul.bf16.gmra.mxu2 %v4413_v0  ;;  %4588 = vmatmul.bf16.gmra.mxu3 %v4364_v47  ;;  %v4639_v1 = vld [vmem:[#allocation2 + $0xa2] ss:$2 sm:$0xff] }
 0x601   : > { %v4409_v31 = vld [vmem:[#allocation2 + $0xb1] ss:$2 sm:$0xff]  ;;  %v4360_v59 = vld [vmem:[#allocation2 + $0xb0] ss:$2 sm:$0xff] }
 0x602   : > { %v4417_v39 = vpack.c.bf16 %v4409_v31, %v4407_v44  ;;  %v4368_v11 = vpack.c.bf16 %v4360_v59, %v4358_v24  ;;  %v4411_v58 = vld [vmem:[#allocation2 + $0xc1] ss:$2 sm:$0x7]  ;;  %v4362_v48 = vld [vmem:[#allocation2 + $0xc0] ss:$2 sm:$0x7] }
 0x603   : > { %v4418_v43 = vpack.c.bf16 %v4411_v58, %v4411_v58  ;;  %v4369_v28 = vpack.c.bf16 %v4362_v48, %v4362_v48  ;;  %v4641_v30 = vld [vmem:[#allocation2 + $0xb2] ss:$2 sm:$0xff]  ;;  %v4643_v6 = vld [vmem:[#allocation2 + $0xc2] ss:$2 sm:$0x7] }
 0x604   : > { %v4649_v54 = vpack.c.bf16 %v4641_v30, %v4639_v1  ;;  %v4650_v63 = vpack.c.bf16 %v4643_v6, %v4643_v6  ;;  %v13377_v31 = vld [vmem:[%s15669_s5 + $0x1] ss:$0 sm:$0xff] }
 0x610   : > { %4502 = vmatmul.bf16.gmra.mxu2 %v4414_v55  ;;  %4593 = vmatmul.bf16.gmra.mxu3 %v4365_v3 }
 0x620   : > { %4507 = vmatmul.bf16.gmra.mxu2 %v4415_v49  ;;  %4598 = vmatmul.bf16.gmra.mxu3 %v4366_v37 }
 0x630   : > { %4512 = vmatmul.bf16.gmra.mxu2 %v4416_v46  ;;  %4603 = vmatmul.bf16.gmra.mxu3 %v4367_v32  ;;  %v13372_v32 = vld [vmem:[%s15668_s4 + $0x1] ss:$0 sm:$0xff] }
 0x640   : > { %4517 = vmatmul.bf16.gmra.mxu2 %v4417_v39  ;;  %4608 = vmatmul.bf16.gmra.mxu3 %v4368_v11 }
 0x650   : > { %4522 = vmatmul.bf16.gmra.mxu2 %v4418_v43  ;;  %4613 = vmatmul.bf16.gmra.mxu3 %v4369_v28 }
 0x660   : > { %4724 = vmatmul.bf16.vlgmr.msra.gmra.mxu2 %v4644_v29 }
 0x670   : > { %4729 = vmatmul.bf16.gmra.mxu2 %v4645_v27 }
 0x673   : > { %v4493_v13 = vpop.f32.mrf.mxu2  ;;  %v4584_v42 = vpop.f32.mrf.mxu3 }
 0x674   : > { %v4585_v62 = vadd.f32 %v4584_v42, %v4493_v13 }
 0x67b   : > { %v4495_v57 = vpop.f32.mrf.mxu2  ;;  %v4586_v21 = vpop.f32.mrf.mxu3 }
 0x67c   : > { %v4587_v39 = vadd.f32 %v4586_v21, %v4495_v57 }
 0x680   : > { %4734 = vmatmul.bf16.gmra.mxu2 %v4646_v34 }
 0x683   : > { %v4498_v7 = vpop.f32.mrf.mxu2  ;;  %v4589_v10 = vpop.f32.mrf.mxu3 }
 0x684   : > { %v4590_v52 = vadd.f32 %v4589_v10, %v4498_v7 }
 0x68b   : > { %v13333_v61 = vpop.f32.mrf.mxu2  ;;  %v13335_v53 = vpop.f32.mrf.mxu3 }
 0x68c   : > { %v4592_v10 = vadd.f32 %v13335_v53, %v13333_v61 }
 0x690   : > { %4739 = vmatmul.bf16.gmra.mxu2 %v4647_v45 }
 0x693   : > { %v13337_v9 = vpop.f32.mrf.mxu2  ;;  %v13339_v38 = vpop.f32.mrf.mxu3 }
 0x694   : > { %v4595_v6 = vadd.f32 %v13339_v38, %v13337_v9 }
 0x69b   : > { %v13341_v2 = vpop.f32.mrf.mxu2  ;;  %v13343_v14 = vpop.f32.mrf.mxu3 }
 0x6a0   : > { %4744 = vmatmul.bf16.gmra.mxu2 %v4648_v50 }
 0x6a3   : > { %v13345_v56 = vpop.f32.mrf.mxu2  ;;  %v13347_v0 = vpop.f32.mrf.mxu3 }
 0x6ab   : > { %v13349_v47 = vpop.f32.mrf.mxu2  ;;  %v13351_v25 = vpop.f32.mrf.mxu3 }
 0x6b0   : > { %4749 = vmatmul.bf16.gmra.mxu2 %v4649_v54 }
 0x6b3   : > { %v13353_v60 = vpop.f32.mrf.mxu2  ;;  %v13355_v55 = vpop.f32.mrf.mxu3 }
 0x6bb   : > { %v4515_v3 = vpop.f32.mrf.mxu2  ;;  %v4606_v4 = vpop.f32.mrf.mxu3 }
 0x6bc   : > { %v13357_v19 = vadd.f32 %v4606_v4, %v4515_v3 }
 0x6c0   : > { %4754 = vmatmul.bf16.gmra.mxu2 %v4650_v63 }
 0x6c3   : > { %v13359_v26 = vpop.f32.mrf.mxu2  ;;  %v13361_v49 = vpop.f32.mrf.mxu3 }
 0x6cb   : > { %v4520_v37 = vpop.f32.mrf.mxu2  ;;  %v4611_v18 = vpop.f32.mrf.mxu3 }
 0x6cc   : > { %v13363_v16 = vadd.f32 %v4611_v18, %v4520_v37 }
 0x6d3   : > { %v13365_v33 = vpop.f32.mrf.mxu2  ;;  %v13367_v15 = vpop.f32.mrf.mxu3 }
 0x6db   : > { %v4525_v35 = vpop.f32.mrf.mxu2  ;;  %v4616_v46 = vpop.f32.mrf.mxu3 }
 0x6e3   : > { %v4725_v8 = vpop.f32.mrf.mxu2 }
 0x6e4   : > { %v4759_v44 = vadd.f32 %v4725_v8, %v4585_v62 }
 0x6e6   : > { %v4774_v24 = vmul.f32 %v13372_v32, %v4759_v44 }
 0x6e8   : > { %v13381_v59 = vadd.f32 %v13377_v31, %v4774_v24 }
 0x6ea   : > { %v13384_v11 = vmul.f32 0.70710677, %v13381_v59 }
 0x6eb   : > { %v4727_v58 = vpop.f32.mrf.mxu2 }
 0x6ec   : > { %v4828_v48 = vmul.f32 %v13384_v11, %v13384_v11  ;;  %v4760_v43 = vadd.f32 %v4727_v58, %v4587_v39 }
 0x6ee   : > { %v13388_v28 = vmin.f32 %v4828_v48, 16.0  ;;  %v4775_v40 = vmul.f32 %v13372_v32, %v4760_v43 }
 0x6f0   : > { %v4841_v20 = vmul.f32 3.8918573e-05, %v13388_v28  ;;  %v13393_v29 = vadd.f32 %v13377_v31, %v4775_v40  ;;  %v4830_v63 = vmul.f32 2.1237322e-06, %v13388_v28 }
 0x6f2   : > { %v4842_v12 = vadd.f32 0.001143296, %v4841_v20  ;;  %v13396_v5 = vmul.f32 0.70710677, %v13393_v29  ;;  %v4831_v44 = vadd.f32 0.00028619796, %v4830_v63 }
 0x6f3   : > { %v4730_v27 = vpop.f32.mrf.mxu2 }
 0x6f4   : > { %v4843_v13 = vmul.f32 %v4842_v12, %v13388_v28  ;;  %v4761_v42 = vadd.f32 %v4730_v27, %v4590_v52  ;;  %v4868_v62 = vmul.f32 %v13396_v5, %v13396_v5  ;;  %v4832_v27 = vmul.f32 %v4831_v44, %v13388_v28 }
 0x6f6   : > { %v4844_v57 = vadd.f32 0.014752088, %v4843_v13  ;;  %v4776_v21 = vmul.f32 %v13372_v32, %v4761_v42  ;;  %v13402_v51 = vmin.f32 %v4868_v62, 16.0 }
 0x6f8   : > { %v13405_v41 = vadd.f32 %v13377_v31, %v4776_v21  ;;  %v4845_v34 = vmul.f32 %v4844_v57, %v13388_v28  ;;  %v4881_v7 = vmul.f32 3.8918573e-05, %v13402_v51  ;;  %v4870_v9 = vmul.f32 2.1237322e-06, %v13402_v51 }
 0x6fa   : > { %v13412_v52 = vmul.f32 0.70710677, %v13405_v41  ;;  %v4882_v36 = vadd.f32 0.001143296, %v4881_v7  ;;  %v4846_v23 = vadd.f32 0.112945676, %v4845_v34 }
 0x6fb   : > { %v4732_v22 = vpop.f32.mrf.mxu2  ;;  %v4871_v21 = vadd.f32 0.00028619796, %v4870_v9 }
 0x6fc   : > { %v4762_v45 = vadd.f32 %v4732_v22, %v4592_v10  ;;  %v4908_v17 = vmul.f32 %v13412_v52, %v13412_v52  ;;  %v4883_v30 = vmul.f32 %v4882_v36, %v13402_v51  ;;  %v4847_v61 = vmul.f32 %v4846_v23, %v13388_v28 }
 0x6fd   : > { %v4597_v36 = vadd.f32 %v13343_v14, %v13341_v2 }
 0x6fe   : > { %v4777_v50 = vmul.f32 %v13372_v32, %v4762_v45  ;;  %v13417_v1 = vmin.f32 %v4908_v17, 16.0  ;;  %v4884_v37 = vadd.f32 0.014752088, %v4883_v30  ;;  %v4848_v18 = vadd.f32 0.4994258, %v4847_v61 }
 0x6ff   : > { %v4833_v45 = vadd.f32 0.0036580483, %v4832_v27  ;;  %v4872_v17 = vmul.f32 %v4871_v21, %v13402_v51 }
 0x700   : > { %v13421_v54 = vadd.f32 %v13377_v31, %v4777_v50  ;;  %v4921_v53 = vmul.f32 3.8918573e-05, %v13417_v1  ;;  %v4885_v24 = vmul.f32 %v4884_v37, %v13402_v51  ;;  %v4849_v48 = vmul.f32 %v4848_v18, %v13388_v28 }
 0x701   : > { %v4910_v38 = vmul.f32 2.1237322e-06, %v13417_v1  ;;  %v4834_v2 = vmul.f32 %v4833_v45, %v13388_v28  ;;  %v4873_v37 = vadd.f32 0.0036580483, %v4872_v17 }
 0x702   : > { %v13426_v3 = vmul.f32 0.70710677, %v13421_v54  ;;  %v4922_v35 = vadd.f32 0.001143296, %v4921_v53  ;;  %v4886_v13 = vadd.f32 0.112945676, %v4885_v24 }
 0x703   : > { %v4735_v4 = vpop.f32.mrf.mxu2  ;;  %v13444_v57 = vadd.f32 1.0, %v4849_v48  ;;  %v4911_v34 = vadd.f32 0.00028619796, %v4910_v38 }
 0x704   : > { %v4948_v46 = vmul.f32 %v13426_v3, %v13426_v3  ;;  %v4763_v8 = vadd.f32 %v4735_v4, %v4595_v6  ;;  %v4923_v39 = vmul.f32 %v4922_v35, %v13417_v1  ;;  %v4887_v23 = vmul.f32 %v4886_v13, %v13402_v51 }
 0x705   : > { %10083 = vrcp.f32 %v13444_v57  ;;  %v4912_v30 = vmul.f32 %v4911_v34, %v13417_v1  ;;  %vm4856_vm4 = vweird.f32 %v13444_v57 }
 0x706   : > { %v13435_v58 = vmin.f32 %v4948_v46, 16.0  ;;  %v4924_v43 = vadd.f32 0.014752088, %v4923_v39  ;;  %v4778_v20 = vmul.f32 %v13372_v32, %v4763_v8  ;;  %v4888_v14 = vadd.f32 0.4994258, %v4887_v23 }
 0x707   : > { %v4913_v35 = vadd.f32 0.0036580483, %v4912_v30  ;;  %v4835_v39 = vadd.f32 0.05243302, %v4834_v2 }
 0x708   : > { %v4961_v40 = vmul.f32 3.8918573e-05, %v13435_v58  ;;  %v4925_v42 = vmul.f32 %v4924_v43, %v13417_v1  ;;  %v13448_v22 = vadd.f32 %v13377_v31, %v4778_v20  ;;  %v4889_v48 = vmul.f32 %v4888_v14, %v13402_v51 }
 0x709   : > { %v4950_v9 = vmul.f32 2.1237322e-06, %v13435_v58  ;;  %v4600_v43 = vadd.f32 %v13347_v0, %v13345_v56  ;;  %v4914_v27 = vmul.f32 %v4913_v35, %v13417_v1  ;;  %v4836_v56 = vmul.f32 %v4835_v39, %v13388_v28 }
 0x70a   : > { %v4962_v62 = vadd.f32 0.001143296, %v4961_v40  ;;  %v4926_v7 = vadd.f32 0.112945676, %v4925_v42  ;;  %v13457_v61 = vmul.f32 0.70710677, %v13448_v22  ;;  %v4874_v40 = vmul.f32 %v4873_v37, %v13402_v51 }
 0x70b   : > { %v4737_v12 = vpop.f32.mrf.mxu2  ;;  %v13464_v8 = vpop.eup %10083  ;;  %v13484_v0 = vadd.f32 1.0, %v4889_v48  ;;  %v4915_v45 = vadd.f32 0.05243302, %v4914_v27  ;;  %v4602_v14 = vadd.f32 %v13351_v25, %v13349_v47  ;;  %v13511_v39 = vadd.f32 %v13355_v55, %v13353_v60 }
 0x70c   : > { %v4963_v10 = vmul.f32 %v4962_v62, %v13435_v58  ;;  %v4764_v53 = vadd.f32 %v4737_v12, %v4597_v36  ;;  %v4927_v4 = vmul.f32 %v4926_v7, %v13417_v1  ;;  %v4988_v46 = vmul.f32 %v13457_v61, %v13457_v61 }
 0x70d   : > { %v4852_v12 = vmul.f32 %v13464_v8, %v13444_v57  ;;  %v4951_v7 = vadd.f32 0.00028619796, %v4950_v9  ;;  %10085 = vrcp.f32 %v13484_v0  ;;  %v4916_v37 = vmul.f32 %v4915_v45, %v13417_v1 }
 0x70e   : > { %v4964_v50 = vadd.f32 0.014752088, %v4963_v10  ;;  %v4928_v44 = vadd.f32 0.4994258, %v4927_v4  ;;  %v4779_v24 = vmul.f32 %v13372_v32, %v4764_v53  ;;  %v13469_v38 = vmin.f32 %v4988_v46, 16.0 }
 0x70f   : > { %v4875_v10 = vadd.f32 0.05243302, %v4874_v40  ;;  %v4853_v17 = vsub.f32 1.0, %v4852_v12  ;;  %v4837_v4 = vadd.f32 0.18741608, %v4836_v56  ;;  %v13515_v47 = vadd.f32 %v13361_v49, %v13359_v26 }
 0x710   : > { %v4965_v6 = vmul.f32 %v4964_v50, %v13435_v58  ;;  %v4929_v13 = vmul.f32 %v4928_v44, %v13417_v1  ;;  %v5001_v42 = vmul.f32 3.8918573e-05, %v13469_v38  ;;  %v13481_v62 = vadd.f32 %v13377_v31, %v4779_v24 }
 0x711   : > { %v4854_v35 = vmul.f32 %v13464_v8, %v4853_v17  ;;  %v4838_v25 = vmul.f32 %v4837_v4, %v13388_v28  ;;  %vm4857_vm5 = vweird.f32 %v13464_v8  ;;  %v4862_v60 = vand.u32 2147483648, %v13444_v57 }
 0x712   : > { %v4966_v18 = vadd.f32 0.112945676, %v4965_v6  ;;  %v5002_v23 = vadd.f32 0.001143296, %v5001_v42  ;;  %v13486_v50 = vadd.f32 1.0, %v4929_v13  ;;  %v4952_v6 = vmul.f32 %v4951_v7, %v13435_v58  ;;  %vm13551_vm6 = vmor %vm4856_vm4, %vm4857_vm5 }
 0x713   : > { %v4740_v63 = vpop.f32.mrf.mxu2  ;;  %v13489_v30 = vmul.f32 0.70710677, %v13481_v62  ;;  %v13525_v12 = vpop.eup %10085  ;;  %v4855_v26 = vadd.f32 %v13464_v8, %v4854_v35  ;;  %v4917_v49 = vadd.f32 0.18741608, %v4916_v37  ;;  %v4860_v13 = vand.u32 2147483647, %v13444_v57 }
 0x714   : > { %v4967_v20 = vmul.f32 %v4966_v18, %v13435_v58  ;;  %v4765_v21 = vadd.f32 %v4740_v63, %v4600_v43  ;;  %v4876_v63 = vmul.f32 %v4875_v10, %v13402_v51  ;;  %v5003_v18 = vmul.f32 %v5002_v23, %v13469_v38 }
 0x715   : > { %10087 = vrcp.f32 %v13486_v50  ;;  %v5028_v46 = vmul.f32 %v13489_v30, %v13489_v30  ;;  %v4953_v48 = vadd.f32 0.0036580483, %v4952_v6  ;;  %v13545_v23 = vadd.f32 %v13367_v15, %v13365_v33 }
 0x716   : > { %v4968_v36 = vadd.f32 0.4994258, %v4967_v20  ;;  %v4780_v53 = vmul.f32 %v13372_v32, %v4765_v21  ;;  %v4877_v9 = vadd.f32 0.18741608, %v4876_v63  ;;  %v5004_v55 = vadd.f32 0.014752088, %v5003_v18 }
 0x717   : > { %v13520_v40 = vmin.f32 %v5028_v46, 16.0  ;;  %v4954_v42 = vmul.f32 %v4953_v48, %v13435_v58  ;;  %v4990_v21 = vmul.f32 2.1237322e-06, %v13469_v38  ;;  %v4839_v17 = vadd.f32 1.1283791, %v4838_v25 }
 0x718   : > { %v4969_v2 = vmul.f32 %v4968_v36, %v13435_v58  ;;  %v13505_v44 = vadd.f32 %v13377_v31, %v4780_v53  ;;  %v4878_v10 = vmul.f32 %v4877_v9, %v13402_v51  ;;  %v4892_v36 = vmul.f32 %v13525_v12, %v13484_v0 }
 0x719   : > { %v5041_v28 = vmul.f32 3.8918573e-05, %v13520_v40  ;;  %v5005_v51 = vmul.f32 %v5004_v55, %v13469_v38  ;;  %v4859_v4 = vsel %vm13551_vm6, %v13464_v8, %v4855_v26  ;;  %v4863_v6 = vor.u32 1.1754944e-38, %v4862_v60 }
 0x71a   : > { %v13518_v43 = vadd.f32 1.0, %v4969_v2  ;;  %v13523_v20 = vmul.f32 0.70710677, %v13505_v44  ;;  %v4918_v33 = vmul.f32 %v4917_v49, %v13417_v1  ;;  %v4955_v2 = vadd.f32 0.05243302, %v4954_v42 }
 0x71b   : > { %v4742_v34 = vpop.f32.mrf.mxu2  ;;  %v13537_v7 = vpop.eup %10087  ;;  %v5042_v45 = vadd.f32 0.001143296, %v5041_v28  ;;  %v13569_v18 = vmul.f32 0.5, %v13381_v59  ;;  %vm4861_vm7 = vcmp.eq.f32.partialorder %v4860_v13, 8.507059e+37  ;;  %v4879_v35 = vadd.f32 1.1283791, %v4878_v10 }
 0x71c   : > { %v5068_v27 = vmul.f32 %v13523_v20, %v13523_v20  ;;  %v4766_v56 = vadd.f32 %v4742_v34, %v4602_v14  ;;  %10089 = vrcp.f32 %v13518_v43  ;;  %v4932_v57 = vmul.f32 %v13537_v7, %v13486_v50 }
 0x71d   : > { %v5043_v15 = vmul.f32 %v5042_v45, %v13520_v40  ;;  %v4991_v14 = vadd.f32 0.00028619796, %v4990_v21  ;;  %v4893_v8 = vsub.f32 1.0, %v4892_v36  ;;  %v4864_v46 = vsel %vm4861_vm7, %v4863_v6, %v4859_v4 }
 0x71e   : > { %v13556_v53 = vmin.f32 %v5068_v27, 16.0  ;;  %v4781_v37 = vmul.f32 %v13372_v32, %v4766_v56  ;;  %v4900_v1 = vand.u32 2147483647, %v13484_v0  ;;  %v5006_v25 = vadd.f32 0.112945676, %v5005_v51 }
 0x71f   : > { %v4840_v60 = vmul.f32 %v4839_v17, %v13384_v11  ;;  %v4902_v55 = vand.u32 2147483648, %v13484_v0  ;;  %v4919_v26 = vadd.f32 1.1283791, %v4918_v33  ;;  %v5044_v49 = vadd.f32 0.014752088, %v5043_v15 }
 0x720   : > { %v5081_v48 = vmul.f32 3.8918573e-05, %v13556_v53  ;;  %v4933_v28 = vsub.f32 1.0, %v4932_v57  ;;  %v4956_v59 = vmul.f32 %v4955_v2, %v13435_v58  ;;  %v4992_v27 = vmul.f32 %v4991_v14, %v13469_v38 }
 0x721   : > { %v13580_v13 = vadd.f32 %v13377_v31, %v4781_v37  ;;  %v13582_v42 = vmul.f32 %v4864_v46, %v4840_v60  ;;  %v4880_v21 = vmul.f32 %v4879_v35, %v13396_v5  ;;  %v4894_v56 = vmul.f32 %v13525_v12, %v4893_v8 }
 0x722   : > { %v13573_v9 = vpop.eup %10089  ;;  %v5030_v11 = vmul.f32 2.1237322e-06, %v13520_v40  ;;  %vm4896_vm8 = vweird.f32 %v13484_v0  ;;  %v5007_v36 = vmul.f32 %v5006_v25, %v13469_v38  ;;  %v5082_v45 = vadd.f32 0.001143296, %v5081_v48 }
 0x723   : > { %v13507_v24 = vpop.f32.mrf.mxu2  ;;  %v4972_v10 = vmul.f32 %v13573_v9, %v13518_v43  ;;  %vm4897_vm9 = vweird.f32 %v13525_v12  ;;  %vm13592_vm10 = vcmp.eq.f32.partialorder %v4900_v1, 8.507059e+37  ;;  %v4903_v34 = vor.u32 1.1754944e-38, %v4902_v55 }
 0x724   : > { %v13597_v5 = vmul.f32 %v4919_v26, %v13412_v52  ;;  %v5045_v51 = vmul.f32 %v5044_v49, %v13520_v40  ;;  %v4934_v4 = vmul.f32 %v13537_v7, %v4933_v28  ;;  %v4957_v6 = vadd.f32 0.18741608, %v4956_v59  ;;  %vm13620_vm11 = vmor %vm4896_vm8, %vm4897_vm9 }
 0x725   : > { %v4993_v33 = vadd.f32 0.0036580483, %v4992_v27  ;;  %v13602_v15 = vmul.f32 0.70710677, %v13580_v13  ;;  %v8833_v57 = vclamps-f32 %v13582_v42, 1.0  ;;  %v4895_v2 = vadd.f32 %v13525_v12, %v4894_v56 }
 0x726   : > { %v5031_v14 = vadd.f32 0.00028619796, %v5030_v11  ;;  %v4767_v37 = vadd.f32 %v13507_v24, %v13511_v39  ;;  %v4973_v52 = vsub.f32 1.0, %v4972_v10  ;;  %v5008_v8 = vadd.f32 0.4994258, %v5007_v36 }
 0x727   : > { %v5083_v46 = vmul.f32 %v5082_v45, %v13556_v53  ;;  %v5108_v1 = vmul.f32 %v13602_v15, %v13602_v15  ;;  %v4940_v25 = vand.u32 2147483647, %v13486_v50  ;;  %v4942_v48 = vand.u32 2147483648, %v13486_v50 }
 0x728   : > { %v5046_v60 = vadd.f32 0.112945676, %v5045_v51  ;;  %v4782_v55 = vmul.f32 %v13372_v32, %v4767_v37  ;;  %v4935_v39 = vadd.f32 %v13537_v7, %v4934_v4  ;;  %vm4937_vm12 = vweird.f32 %v13537_v7 }
 0x729   : > { %v4958_v26 = vmul.f32 %v4957_v6, %v13435_v58  ;;  %v4994_v49 = vmul.f32 %v4993_v33, %v13469_v38  ;;  %v4899_v28 = vsel %vm13620_vm11, %v13525_v12, %v4895_v2  ;;  %vm4936_vm13 = vweird.f32 %v13486_v50 }
 0x72a   : > { %v5070_v0 = vmul.f32 2.1237322e-06, %v13556_v53  ;;  %v13633_v59 = vmin.f32 %v5108_v1, 16.0  ;;  %v4974_v27 = vmul.f32 %v13573_v9, %v4973_v52  ;;  %v5009_v56 = vmul.f32 %v5008_v8, %v13469_v38  ;;  %vm13638_vm14 = vmor %vm4936_vm13, %vm4937_vm12 }
 0x72b   : > { %v13563_v63 = vpop.f32.mrf.mxu2  ;;  %v5032_v11 = vmul.f32 %v5031_v14, %v13520_v40  ;;  %v5084_v10 = vadd.f32 0.014752088, %v5083_v46  ;;  %vm13642_vm15 = vcmp.eq.f32.partialorder %v4940_v25, 8.507059e+37  ;;  %v4943_v50 = vor.u32 1.1754944e-38, %v4942_v48 }
 0x72c   : > { %v5047_v12 = vmul.f32 %v5046_v60, %v13520_v40  ;;  %v13648_v45 = vadd.f32 %v13377_v31, %v4782_v55  ;;  %v4904_v51 = vsel %vm13592_vm10, %v4903_v34, %v4899_v28  ;;  %v4939_v4 = vsel %vm13638_vm14, %v13537_v7, %v4935_v39 }
 0x72d   : > { %v4959_v6 = vadd.f32 1.1283791, %v4958_v26  ;;  %v4995_v33 = vadd.f32 0.05243302, %v4994_v49  ;;  %vm4977_vm1 = vweird.f32 %v13573_v9  ;;  %v5071_v2 = vadd.f32 0.00028619796, %v5070_v0 }
 0x72e   : > { %v5121_v14 = vmul.f32 3.8918573e-05, %v13633_v59  ;;  %v4768_v37 = vadd.f32 %v13563_v63, %v13357_v19  ;;  %v4975_v52 = vadd.f32 %v13573_v9, %v4974_v27  ;;  %v13660_v8 = vadd.f32 1.0, %v5009_v56 }
 0x72f   : > { %v5033_v17 = vadd.f32 0.0036580483, %v5032_v11  ;;  %v5085_v34 = vmul.f32 %v5084_v10, %v13556_v53  ;;  %v4905_v46 = vmul.f32 %v4904_v51, %v4880_v21  ;;  %v4982_v7 = vand.u32 2147483648, %v13518_v43 }
 0x730   : > { %v5048_v1 = vadd.f32 0.4994258, %v5047_v12  ;;  %v13665_v25 = vmul.f32 0.70710677, %v13648_v45  ;;  %v4944_v60 = vsel %vm13642_vm15, %v4943_v50, %v4939_v4  ;;  %vm4976_vm0 = vweird.f32 %v13518_v43 }
 0x731   : > { %v4980_v19 = vand.u32 2147483647, %v13518_v43  ;;  %v4996_v63 = vmul.f32 %v4995_v33, %v13469_v38  ;;  %vm13676_vm2 = vmor %vm4976_vm0, %vm4977_vm1  ;;  %v5072_v55 = vmul.f32 %v5071_v2, %v13556_v53  ;;  %v5122_v24 = vadd.f32 0.001143296, %v5121_v14 }
 0x732   : > { %v5148_v39 = vmul.f32 %v13665_v25, %v13665_v25  ;;  %v4783_v26 = vmul.f32 %v13372_v32, %v4768_v37  ;;  %v4979_v43 = vsel %vm13676_vm2, %v13573_v9, %v4975_v52  ;;  %10091 = vrcp.f32 %v13660_v8 }
 0x733   : > { %v13608_v35 = vpop.f32.mrf.mxu2  ;;  %v5034_v49 = vmul.f32 %v5033_v17, %v13520_v40  ;;  %v5086_v28 = vadd.f32 0.112945676, %v5085_v34  ;;  %v4803_v0 = vmul.f32 0.5, %v13393_v29  ;;  %v4983_v27 = vor.u32 1.1754944e-38, %v4982_v7 }
 0x734   : > { %v5049_v56 = vmul.f32 %v5048_v1, %v13520_v40  ;;  %v13691_v11 = vmin.f32 %v5148_v39, 16.0  ;;  %v5348_v10 = vadd.f32 1.0, %v8833_v57  ;;  %v8834_v58 = vclamps-f32 %v4905_v46, 1.0  ;;  %v8861_v39 = vld [vmem:[%s15671_s7 + $0xf8] sm:$0xff] }
 0x735   : > { %v4945_v36 = vmul.f32 %v4944_v60, %v13597_v5  ;;  %vm4981_vm3 = vcmp.eq.f32.partialorder %v4980_v19, 8.507059e+37  ;;  %v5073_v50 = vadd.f32 0.0036580483, %v5072_v55  ;;  %v5123_v12 = vmul.f32 %v5122_v24, %v13633_v59  ;;  %5420 = vmatpush.msra.mxu3 %v8861_v39 }
 0x736   : > { %v4984_v9 = vsel %vm4981_vm3, %v4983_v27, %v4979_v43  ;;  %v13698_v51 = vadd.f32 %v13377_v31, %v4783_v26  ;;  %v4960_v29 = vmul.f32 %v4959_v6, %v13426_v3  ;;  %v4997_v4 = vadd.f32 0.18741608, %v4996_v63 }
 0x737   : > { %v5035_v33 = vadd.f32 0.05243302, %v5034_v49  ;;  %v5087_v2 = vmul.f32 %v5086_v28, %v13556_v53  ;;  %v4804_v42 = vmul.f32 0.5, %v13405_v41  ;;  %v13703_v57 = vadd.f32 1.0, %v5049_v56 }
 0x738   : > { %v5110_v5 = vmul.f32 2.1237322e-06, %v13633_v59  ;;  %v5161_v14 = vmul.f32 3.8918573e-05, %v13691_v11  ;;  %v13707_v37 = vpop.eup %10091  ;;  %v5349_v52 = vadd.f32 1.0, %v8834_v58  ;;  %v8835_v17 = vclamps-f32 %v4945_v36, 1.0 }
 0x739   : > { %v4805_v34 = vmul.f32 0.5, %v13421_v54  ;;  %v4985_v46 = vmul.f32 %v4984_v9, %v4960_v29  ;;  %v5074_v3 = vmul.f32 %v5073_v50, %v13556_v53  ;;  %v5124_v6 = vadd.f32 0.014752088, %v5123_v12 }
 0x73a   : > { %v5162_v7 = vadd.f32 0.001143296, %v5161_v14  ;;  %v13712_v1 = vmul.f32 0.70710677, %v13698_v51  ;;  %v13717_v60 = vmul.f32 %v5348_v10, %v13569_v18  ;;  %v13720_v19 = vmul.f32 0.5, %v13448_v22 }
 0x73b   : > { %v13667_v48 = vpop.f32.mrf.mxu2  ;;  %v5036_v63 = vmul.f32 %v5035_v33, %v13520_v40  ;;  %v5088_v21 = vadd.f32 0.4994258, %v5087_v2  ;;  %v4998_v54 = vmul.f32 %v4997_v4, %v13469_v38  ;;  %v5012_v55 = vmul.f32 %v13707_v37, %v13660_v8 }
 0x73c   : > { %10093 = vrcp.f32 %v13703_v57  ;;  %v5111_v24 = vadd.f32 0.00028619796, %v5110_v5  ;;  %v13730_v18 = vmul.f32 %v5349_v52, %v4803_v0  ;;  %v5350_v26 = vadd.f32 1.0, %v8835_v17 }
 0x73d   : > { %v13733_v22 = vmul.f32 0.5, %v13481_v62  ;;  %v5188_v38 = vmul.f32 %v13712_v1, %v13712_v1  ;;  %v8836_v43 = vclamps-f32 %v4985_v46, 1.0  ;;  %v5075_v49 = vadd.f32 0.05243302, %v5074_v3 }
 0x73e   : > { %v5125_v28 = vmul.f32 %v5124_v6, %v13633_v59  ;;  %v5163_v27 = vmul.f32 %v5162_v7, %v13691_v11  ;;  %v5037_v56 = vadd.f32 0.18741608, %v5036_v63  ;;  %v5089_v10 = vmul.f32 %v5088_v21, %v13556_v53 }
 0x73f   : > { %v13740_v58 = vmin.f32 %v5188_v38, 16.0  ;;  %v4769_v0 = vadd.f32 %v13608_v35, %v13515_v47  ;;  %v4999_v62 = vadd.f32 1.1283791, %v4998_v54  ;;  %v5013_v36 = vsub.f32 1.0, %v5012_v55 }
 0x740   : > { %v13745_v9 = vmul.f32 0.5, %v13505_v44  ;;  %v5112_v50 = vmul.f32 %v5111_v24, %v13633_v59  ;;  %v5374_v12 = vadd.f32 %v13730_v18, %v13717_v60  ;;  %v13750_v29 = vmul.f32 %v5350_v26, %v4804_v42  ;;  %v8860_v26 = vld [vmem:[%s15671_s7 + $0xf0] sm:$0xff] }
 0x741   : > { %v5020_v4 = vand.u32 2147483647, %v13660_v8  ;;  %v13754_v33 = vmul.f32 0.5, %v13580_v13  ;;  %v5351_v47 = vadd.f32 1.0, %v8836_v43  ;;  %v5076_v35 = vmul.f32 %v5075_v49, %v13556_v53  ;;  %5421 = vmatpush.msra.mxu3 %v8860_v26 }
 0x742   : > { %v13756_v2 = vpop.eup %10093  ;;  %v5126_v5 = vadd.f32 0.112945676, %v5125_v28  ;;  %v5164_v44 = vadd.f32 0.014752088, %v5163_v27  ;;  %v5038_v52 = vmul.f32 %v5037_v56, %v13520_v40  ;;  %v13760_v17 = vadd.f32 1.0, %v5089_v10 }
 0x743   : > { %v13714_v41 = vpop.f32.mrf.mxu2  ;;  %v5201_v42 = vmul.f32 3.8918573e-05, %v13740_v58  ;;  %v4784_v46 = vmul.f32 %v13372_v32, %v4769_v0  ;;  %v13765_v3 = vmul.f32 %v4999_v62, %v13457_v61  ;;  %v5014_v13 = vmul.f32 %v13707_v37, %v5013_v36 }
 0x744   : > { %vm5016_vm4 = vweird.f32 %v13660_v8  ;;  %v5113_v6 = vadd.f32 0.0036580483, %v5112_v50  ;;  %v5375_v7 = vadd.f32 %v5374_v12, %v13750_v29  ;;  %v5022_v63 = vand.u32 2147483648, %v13660_v8 }
 0x745   : > { %v5052_v40 = vmul.f32 %v13756_v2, %v13703_v57  ;;  %v5150_v21 = vmul.f32 2.1237322e-06, %v13691_v11  ;;  %v13774_v54 = vmul.f32 %v5351_v47, %v4805_v34  ;;  %vm13776_vm5 = vcmp.eq.f32.partialorder %v5020_v4, 8.507059e+37 }
 0x746   : > { %v5077_v61 = vadd.f32 0.18741608, %v5076_v35  ;;  %v5127_v24 = vmul.f32 %v5126_v5, %v13633_v59  ;;  %v5165_v39 = vmul.f32 %v5164_v44, %v13691_v11  ;;  %v5039_v38 = vadd.f32 1.1283791, %v5038_v52 }
 0x747   : > { %10095 = vrcp.f32 %v13760_v17  ;;  %v5202_v43 = vadd.f32 0.001143296, %v5201_v42  ;;  %v13787_v34 = vadd.f32 %v13377_v31, %v4784_v46  ;;  %v5015_v49 = vadd.f32 %v13707_v37, %v5014_v13 }
 0x748   : > { %vm5017_vm6 = vweird.f32 %v13707_v37  ;;  %v5114_v28 = vmul.f32 %v5113_v6, %v13633_v59  ;;  %v4770_v27 = vadd.f32 %v13667_v48, %v13363_v16  ;;  %v5053_v56 = vsub.f32 1.0, %v5052_v40 }
 0x749   : > { %v5151_v10 = vadd.f32 0.00028619796, %v5150_v21  ;;  %v5203_v0 = vmul.f32 %v5202_v43, %v13740_v58  ;;  %v13796_v62 = vmul.f32 0.70710677, %v13787_v34  ;;  %v5023_v36 = vor.u32 1.1754944e-38, %v5022_v63  ;;  %vm13804_vm7 = vmor %vm5016_vm4, %vm5017_vm6 }
 0x74a   : > { %v5078_v50 = vmul.f32 %v5077_v61, %v13556_v53  ;;  %v5128_v12 = vadd.f32 0.4994258, %v5127_v24  ;;  %v5166_v4 = vadd.f32 0.112945676, %v5165_v39  ;;  %v13800_v47 = vadd.f32 %v5375_v7, %v13774_v54 }
 0x74b   : > { %v4757_v14 = vpop.f32.mrf.mxu2  ;;  %v13809_v16 = vmul.f32 %v5039_v38, %v13489_v30  ;;  %v5204_v48 = vadd.f32 0.014752088, %v5203_v0  ;;  %v5228_v5 = vmul.f32 %v13796_v62, %v13796_v62  ;;  %v5019_v53 = vsel %vm13804_vm7, %v13707_v37, %v5015_v49 }
 0x74c   : > { %vm5056_vm8 = vweird.f32 %v13703_v57  ;;  %v5115_v44 = vadd.f32 0.05243302, %v5114_v28  ;;  %v4785_v8 = vmul.f32 %v13372_v32, %v4770_v27  ;;  %v5054_v52 = vmul.f32 %v13756_v2, %v5053_v56 }
 0x74d   : > { %v13818_v14 = vpop.eup %10095  ;;  %v5060_v30 = vand.u32 2147483647, %v13703_v57  ;;  %v5062_v42 = vand.u32 2147483648, %v13703_v57  ;;  %v5152_v46 = vmul.f32 %v5151_v10, %v13691_v11  ;;  %v5079_v13 = vadd.f32 1.1283791, %v5078_v50 }
 0x74e   : > { %v5129_v6 = vmul.f32 %v5128_v12, %v13633_v59  ;;  %v5167_v37 = vmul.f32 %v5166_v4, %v13691_v11  ;;  %v5205_v7 = vmul.f32 %v5204_v48, %v13740_v58  ;;  %v5024_v63 = vsel %vm13776_vm5, %v5023_v36, %v5019_v53  ;;  %v8859_v48 = vld [vmem:[%s15671_s7 + $0xe8] sm:$0xff] }
 0x74f   : > { %vm5057_vm9 = vweird.f32 %v13756_v2  ;;  %v13830_v40 = vmin.f32 %v5228_v5, 16.0  ;;  %v13833_v21 = vadd.f32 %v13377_v31, %v4785_v8  ;;  %v5092_v61 = vmul.f32 %v13818_v14, %v13760_v17  ;;  %5422 = vmatpush.msra.mxu3 %v8859_v48 }
 0x750   : > { %v5116_v24 = vmul.f32 %v5115_v44, %v13633_v59  ;;  %v5206_v39 = vadd.f32 0.112945676, %v5205_v7  ;;  %v4771_v26 = vadd.f32 %v13714_v41, %v13545_v23  ;;  %v5055_v38 = vadd.f32 %v13756_v2, %v5054_v52  ;;  %vm13865_vm11 = vmor %vm5056_vm8, %vm5057_vm9 }
 0x751   : > { %v5153_v55 = vadd.f32 0.0036580483, %v5152_v46  ;;  %v5190_v43 = vmul.f32 2.1237322e-06, %v13740_v58  ;;  %v5241_v49 = vmul.f32 3.8918573e-05, %v13830_v40  ;;  %v5025_v50 = vmul.f32 %v5024_v63, %v13765_v3 }
 0x752   : > { %v13843_v28 = vadd.f32 1.0, %v5129_v6  ;;  %v5168_v27 = vadd.f32 0.4994258, %v5167_v37  ;;  %v5207_v56 = vmul.f32 %v5206_v39, %v13740_v58  ;;  %v13847_v10 = vmul.f32 0.70710677, %v13833_v21 }
 0x753   : > { %vm13849_vm10 = vcmp.eq.f32.partialorder %v5060_v30, 8.507059e+37  ;;  %v5063_v23 = vor.u32 1.1754944e-38, %v5062_v42  ;;  %v5242_v41 = vadd.f32 0.001143296, %v5241_v49  ;;  %v4786_v36 = vmul.f32 %v13372_v32, %v4771_v26 }
 0x754   : > { %v13856_v12 = vmul.f32 %v5079_v13, %v13523_v20  ;;  %v5093_v4 = vsub.f32 1.0, %v5092_v61  ;;  %v5117_v35 = vadd.f32 0.18741608, %v5116_v24  ;;  %v5191_v32 = vadd.f32 0.00028619796, %v5190_v43 }
 0x755   : > { %v5208_v53 = vadd.f32 0.4994258, %v5207_v56  ;;  %v5243_v20 = vmul.f32 %v5242_v41, %v13830_v40  ;;  %v5268_v3 = vmul.f32 %v13847_v10, %v13847_v10  ;;  %v5059_v44 = vsel %vm13865_vm11, %v13756_v2, %v5055_v38 }
 0x756   : > { %10097 = vrcp.f32 %v13843_v28  ;;  %v5154_v57 = vmul.f32 %v5153_v55, %v13691_v11  ;;  %v5169_v8 = vmul.f32 %v5168_v27, %v13691_v11  ;;  %v5230_v52 = vmul.f32 2.1237322e-06, %v13830_v40 }
 0x757   : > { %v5244_v30 = vadd.f32 0.014752088, %v5243_v20  ;;  %v13879_v42 = vmin.f32 %v5268_v3, 16.0  ;;  %v13882_v46 = vadd.f32 %v13377_v31, %v4786_v36  ;;  %v8837_v13 = vclamps-f32 %v5025_v50, 1.0  ;;  %v8858_v3 = vld [vmem:[%s15671_s7 + $0xe0] sm:$0xff] }
 0x758   : > { %vm5096_vm12 = vweird.f32 %v13760_v17  ;;  %v5100_v6 = vand.u32 2147483647, %v13760_v17  ;;  %v5209_v2 = vmul.f32 %v5208_v53, %v13740_v58  ;;  %v5094_v37 = vmul.f32 %v13818_v14, %v5093_v4  ;;  %5423 = vmatpush.msra.mxu3 %v8858_v3 }
 0x759   : > { %v5192_v7 = vmul.f32 %v5191_v32, %v13740_v58  ;;  %v5245_v63 = vmul.f32 %v5244_v30, %v13830_v40  ;;  %v5270_v61 = vmul.f32 2.1237322e-06, %v13879_v42  ;;  %v5064_v24 = vsel %vm13849_vm10, %v5063_v23, %v5059_v44 }
 0x75a   : > { %v5155_v31 = vadd.f32 0.05243302, %v5154_v57  ;;  %v13893_v39 = vadd.f32 1.0, %v5169_v8  ;;  %v5281_v26 = vmul.f32 3.8918573e-05, %v13879_v42  ;;  %v5102_v38 = vand.u32 2147483648, %v13760_v17 }
 0x75b   : > { %v5118_v55 = vmul.f32 %v5117_v35, %v13633_v59  ;;  %v5231_v43 = vadd.f32 0.00028619796, %v5230_v52  ;;  %v13899_v49 = vmul.f32 0.70710677, %v13882_v46  ;;  %v5352_v56 = vadd.f32 1.0, %v8837_v13 }
 0x75c   : > { %v13901_v27 = vpop.eup %10097  ;;  %vm5097_vm13 = vweird.f32 %v13818_v14  ;;  %v13904_v0 = vadd.f32 1.0, %v5209_v2  ;;  %v5246_v23 = vadd.f32 0.112945676, %v5245_v63  ;;  %v5065_v41 = vmul.f32 %v5064_v24, %v13809_v16  ;;  %v8857_v2 = vld [vmem:[%s15671_s7 + $0xd8] sm:$0xff] }
 0x75d   : > { %v5095_v36 = vadd.f32 %v13818_v14, %v5094_v37  ;;  %v5193_v50 = vadd.f32 0.0036580483, %v5192_v7  ;;  %v5271_v4 = vadd.f32 0.00028619796, %v5270_v61  ;;  %v5156_v59 = vmul.f32 %v5155_v31, %v13691_v11  ;;  %vm13926_vm14 = vmor %vm5096_vm12, %vm5097_vm13  ;;  %5424 = vmatpush.msra.mxu3 %v8857_v2 }
 0x75e   : > { %10099 = vrcp.f32 %v13893_v39  ;;  %v5247_v35 = vmul.f32 %v5246_v23, %v13830_v40  ;;  %v5282_v48 = vadd.f32 0.001143296, %v5281_v26  ;;  %v5119_v5 = vadd.f32 1.1283791, %v5118_v55 }
 0x75f   : > { %v5132_v32 = vmul.f32 %v13901_v27, %v13843_v28  ;;  %v5232_v53 = vmul.f32 %v5231_v43, %v13830_v40  ;;  %v5308_v16 = vmul.f32 %v13899_v49, %v13899_v49  ;;  %10101 = vrcp.f32 %v13904_v0 }
 0x760   : > { %v5248_v20 = vadd.f32 0.4994258, %v5247_v35  ;;  %v5272_v44 = vmul.f32 %v5271_v4, %v13879_v42  ;;  %v5283_v57 = vmul.f32 %v5282_v48, %v13879_v42  ;;  %vm13930_vm15 = vcmp.eq.f32.partialorder %v5100_v6, 8.507059e+37 }
 0x761   : > { %v5103_v30 = vor.u32 1.1754944e-38, %v5102_v38  ;;  %v5194_v13 = vmul.f32 %v5193_v50, %v13740_v58  ;;  %v13938_v37 = vmin.f32 %v5308_v16, 16.0  ;;  %v13941_v17 = vmul.f32 %v5352_v56, %v13720_v19 }
 0x762   : > { %v8838_v7 = vclamps-f32 %v5065_v41, 1.0  ;;  %v5099_v6 = vsel %vm13926_vm14, %v13818_v14, %v5095_v36  ;;  %v5157_v63 = vadd.f32 0.18741608, %v5156_v59  ;;  %v5233_v61 = vadd.f32 0.0036580483, %v5232_v53 }
 0x763   : > { %v5249_v24 = vmul.f32 %v5248_v20, %v13830_v40  ;;  %v5284_v31 = vadd.f32 0.014752088, %v5283_v57  ;;  %v5310_v26 = vmul.f32 2.1237322e-06, %v13938_v37  ;;  %v13951_v55 = vmul.f32 %v5119_v5, %v13602_v15 }
 0x764   : > { %v13948_v38 = vpop.eup %10099  ;;  %v5133_v19 = vsub.f32 1.0, %v5132_v32  ;;  %v5273_v43 = vadd.f32 0.0036580483, %v5272_v44  ;;  %v5321_v56 = vmul.f32 3.8918573e-05, %v13938_v37  ;;  %v5104_v4 = vsel %vm13930_vm15, %v5103_v30, %v5099_v6 }
 0x765   : > { %v5140_v23 = vand.u32 2147483647, %v13843_v28  ;;  %v5195_v14 = vadd.f32 0.05243302, %v5194_v13  ;;  %v13955_v41 = vadd.f32 1.0, %v5249_v24  ;;  %v5285_v36 = vmul.f32 %v5284_v31, %v13879_v42  ;;  %v13958_v50 = vpop.eup %10101 }
 0x766   : > { %v5158_v59 = vmul.f32 %v5157_v63, %v13691_v11  ;;  %v5311_v15 = vadd.f32 0.00028619796, %v5310_v26  ;;  %v5322_v35 = vadd.f32 0.001143296, %v5321_v56  ;;  %v5142_v48 = vand.u32 2147483648, %v13843_v28  ;;  %v8856_v26 = vld [vmem:[%s15671_s7 + $0xd0] sm:$0xff] }
 0x767   : > { %v5172_v5 = vmul.f32 %v13948_v38, %v13893_v39  ;;  %v5234_v32 = vmul.f32 %v5233_v61, %v13830_v40  ;;  %10103 = vrcp.f32 %v13955_v41  ;;  %v13968_v53 = vadd.f32 1.0, %v8838_v7  ;;  %5425 = vmatpush.msra.mxu3 %v8856_v26 }
 0x768   : > { %v5134_v16 = vmul.f32 %v13901_v27, %v5133_v19  ;;  %v5274_v20 = vmul.f32 %v5273_v43, %v13879_v42  ;;  %v5286_v3 = vadd.f32 0.112945676, %v5285_v36  ;;  %v13973_v11 = vmul.f32 %v5104_v4, %v13856_v12 }
 0x769   : > { %v5196_v44 = vmul.f32 %v5195_v14, %v13740_v58  ;;  %v5212_v57 = vmul.f32 %v13958_v50, %v13904_v0  ;;  %v5323_v8 = vmul.f32 %v5322_v35, %v13938_v37  ;;  %vm5136_vm1 = vweird.f32 %v13843_v28 }
 0x76a   : > { %v5159_v52 = vadd.f32 1.1283791, %v5158_v59  ;;  %v5287_v30 = vmul.f32 %v5286_v3, %v13879_v42  ;;  %v5312_v13 = vmul.f32 %v5311_v15, %v13938_v37  ;;  %vm13982_vm0 = vcmp.eq.f32.partialorder %v5140_v23, 8.507059e+37 }
 0x76b   : > { %v5143_v12 = vor.u32 1.1754944e-38, %v5142_v48  ;;  %v5173_v7 = vsub.f32 1.0, %v5172_v5  ;;  %v5235_v6 = vadd.f32 0.05243302, %v5234_v32  ;;  %v5324_v63 = vadd.f32 0.014752088, %v5323_v8 }
 0x76c   : > { %v5135_v61 = vadd.f32 %v13901_v27, %v5134_v16  ;;  %vm5137_vm2 = vweird.f32 %v13901_v27  ;;  %v5275_v24 = vadd.f32 0.05243302, %v5274_v20  ;;  %v5288_v31 = vadd.f32 0.4994258, %v5287_v30  ;;  %v8855_v30 = vld [vmem:[%s15671_s7 + $0xc8] sm:$0xff] }
 0x76d   : > { %v13991_v19 = vpop.eup %10103  ;;  %v8839_v43 = vclamps-f32 %v13973_v11, 1.0  ;;  %v5197_v56 = vadd.f32 0.18741608, %v5196_v44  ;;  %v5213_v23 = vsub.f32 1.0, %v5212_v57  ;;  %v5325_v14 = vmul.f32 %v5324_v63, %v13938_v37  ;;  %vm14003_vm3 = vmor %vm5136_vm1, %vm5137_vm2  ;;  %5426 = vmatpush.msra.mxu3 %v8855_v30  ;;  %v8854_v63 = vld [vmem:[%s15671_s7 + $0xc0] sm:$0xff] }
 0x76e   : > { %v13996_v36 = vmul.f32 %v5159_v52, %v13665_v25  ;;  %v5180_v4 = vand.u32 2147483647, %v13893_v39  ;;  %v5252_v59 = vmul.f32 %v13991_v19, %v13955_v41  ;;  %v5313_v15 = vadd.f32 0.0036580483, %v5312_v13  ;;  %v8850_v30 = vld [vmem:[%s15671_s7 + $0xa0] sm:$0xff] }
 0x76f   : > { %v5174_v48 = vmul.f32 %v13948_v38, %v5173_v7  ;;  %v5236_v5 = vmul.f32 %v5235_v6, %v13830_v40  ;;  %v5289_v32 = vmul.f32 %v5288_v31, %v13879_v42  ;;  %v5326_v25 = vadd.f32 0.112945676, %v5325_v14  ;;  %5427 = vmatpush.msra.mxu3 %v8854_v63  ;;  %v8853_v14 = vld [vmem:[%s15671_s7 + $0xb8] sm:$0xff] }
 0x770   : > { %v5139_v16 = vsel %vm14003_vm3, %v13901_v27, %v5135_v61  ;;  %v5182_v20 = vand.u32 2147483648, %v13893_v39  ;;  %v5253_v3 = vsub.f32 1.0, %v5252_v59  ;;  %v5276_v28 = vmul.f32 %v5275_v24, %v13879_v42 }
 0x771   : > { %v5198_v44 = vmul.f32 %v5197_v56, %v13740_v58  ;;  %v5214_v57 = vmul.f32 %v13958_v50, %v5213_v23  ;;  %v14017_v8 = vadd.f32 1.0, %v5289_v32  ;;  %v5327_v52 = vmul.f32 %v5326_v25, %v13938_v37  ;;  %5428 = vmatpush.msra.mxu3 %v8853_v14 }
 0x772   : > { %vm5176_vm4 = vweird.f32 %v13893_v39  ;;  %vm5177_vm5 = vweird.f32 %v13948_v38  ;;  %vm14025_vm6 = vcmp.eq.f32.partialorder %v5180_v4, 8.507059e+37  ;;  %v5314_v58 = vmul.f32 %v5313_v15, %v13938_v37 }
 0x773   : > { %v5175_v13 = vadd.f32 %v13948_v38, %v5174_v48  ;;  %v5237_v7 = vadd.f32 0.18741608, %v5236_v5  ;;  %v5254_v6 = vmul.f32 %v13991_v19, %v5253_v3  ;;  %10105 = vrcp.f32 %v14017_v8  ;;  %vm14048_vm9 = vmor %vm5176_vm4, %vm5177_vm5  ;;  %v8852_v5 = vld [vmem:[%s15671_s7 + $0xb0] sm:$0xff] }
 0x774   : > { %v5144_v61 = vsel %vm13982_vm0, %v5143_v12, %v5139_v16  ;;  %v5183_v24 = vor.u32 1.1754944e-38, %v5182_v20  ;;  %v5277_v31 = vadd.f32 0.18741608, %v5276_v28  ;;  %v5328_v26 = vadd.f32 0.4994258, %v5327_v52  ;;  %5429 = vmatpush.msra.mxu3 %v8852_v5  ;;  %v8851_v28 = vld [vmem:[%s15671_s7 + $0xa8] sm:$0xff] }
 0x775   : > { %v5199_v56 = vadd.f32 1.1283791, %v5198_v44  ;;  %v5215_v23 = vadd.f32 %v13958_v50, %v5214_v57  ;;  %vm5216_vm7 = vweird.f32 %v13904_v0  ;;  %vm5217_vm8 = vweird.f32 %v13958_v50 }
 0x776   : > { %v5220_v12 = vand.u32 2147483647, %v13904_v0  ;;  %v5222_v4 = vand.u32 2147483648, %v13904_v0  ;;  %v5315_v59 = vadd.f32 0.05243302, %v5314_v58  ;;  %v5329_v15 = vmul.f32 %v5328_v26, %v13938_v37  ;;  %vm14067_vm11 = vmor %vm5216_vm7, %vm5217_vm8  ;;  %5430 = vmatpush.msra.mxu3 %v8851_v28  ;;  %v9895_v28 = vld [vmem:[%s15667_s3 + $0x138] sm:$0xff] }
 0x777   : > { %v5179_v35 = vsel %vm14048_vm9, %v13948_v38, %v5175_v13  ;;  %v5238_v48 = vmul.f32 %v5237_v7, %v13830_v40  ;;  %v5255_v39 = vadd.f32 %v13991_v19, %v5254_v6  ;;  %vm5257_vm10 = vweird.f32 %v13991_v19  ;;  %5642 = vmatpush.bf16.msrb.mxu0 %v9895_v28 }
 0x778   : > { %v5145_v32 = vmul.f32 %v5144_v61, %v13951_v55  ;;  %v5262_v38 = vand.u32 2147483648, %v13955_v41  ;;  %v5278_v40 = vmul.f32 %v5277_v31, %v13879_v42  ;;  %v14073_v16 = vadd.f32 1.0, %v5329_v15  ;;  %5431 = vmatpush.msra.mxu3 %v8850_v30  ;;  %v8875_v30 = vld [vmem:[%s15673_s9 + $0xe8] sm:$0xff] }
 0x779   : > { %v10106_v20 = vpop.eup %10105  ;;  %v5200_v3 = vmul.f32 %v5199_v56, %v13712_v1  ;;  %v5219_v55 = vsel %vm14067_vm11, %v13958_v50, %v5215_v23  ;;  %vm5256_vm12 = vweird.f32 %v13955_v41  ;;  %v5260_v0 = vand.u32 2147483647, %v13955_v41  ;;  %v9887_v1 = vld [vmem:[%s15667_s3 + $0xf8] sm:$0xff] }
 0x77a   : > { %v5184_v42 = vsel %vm14025_vm6, %v5183_v24, %v5179_v35  ;;  %v5223_v44 = vor.u32 1.1754944e-38, %v5222_v4  ;;  %vm14088_vm13 = vmor %vm5256_vm12, %vm5257_vm10  ;;  %v5292_v50 = vmul.f32 %v10106_v20, %v14017_v8  ;;  %v5316_v57 = vmul.f32 %v5315_v59, %v13938_v37  ;;  %v8848_v24 = vld [vmem:[%s15671_s7 + $0x90] sm:$0xff]  ;;  %5718 = vmatpush.bf16.msrb.mxu1 %v9887_v1  ;;  %v8863_v1 = vld [vmem:[%s15673_s9 + $0x88] sm:$0xff] }
 0x77b   : > { %vm5221_vm14 = vcmp.eq.f32.partialorder %v5220_v12, 8.507059e+37  ;;  %v5239_v41 = vadd.f32 1.1283791, %v5238_v48  ;;  %v5259_v52 = vsel %vm14088_vm13, %v13991_v19, %v5255_v39  ;;  %10107 = vrcp.f32 %v14073_v16  ;;  %v8849_v19 = vld [vmem:[%s15671_s7 + $0x98] sm:$0xff]  ;;  %v8847_v12 = vld [vmem:[%s15671_s7 + $0x88] sm:$0xff] }
 0x77c   : > { %v5224_v27 = vsel %vm5221_vm14, %v5223_v44, %v5219_v55  ;;  %v5263_v58 = vor.u32 1.1754944e-38, %v5262_v38  ;;  %v5279_v13 = vadd.f32 1.1283791, %v5278_v40  ;;  %v5293_v7 = vsub.f32 1.0, %v5292_v50  ;;  %5432 = vmatpush.msra.mxu3 %v8849_v19 }
 0x77d   : > { %v5185_v6 = vmul.f32 %v5184_v42, %v13996_v36  ;;  %vm5261_vm15 = vcmp.eq.f32.partialorder %v5260_v0, 8.507059e+37  ;;  %v5300_v63 = vand.u32 2147483647, %v14017_v8  ;;  %v5302_v61 = vand.u32 2147483648, %v14017_v8  ;;  %v8877_v0 = vld [vmem:[%s15673_s9 + $0xf8] sm:$0xff] }
 0x77e   : > { %v5264_v31 = vsel %vm5261_vm15, %v5263_v58, %v5259_v52  ;;  %v5294_v26 = vmul.f32 %v10106_v20, %v5293_v7  ;;  %vm5297_vm1 = vweird.f32 %v10106_v20  ;;  %v5317_v56 = vadd.f32 0.18741608, %v5316_v57  ;;  %5433 = vmatpush.msra.mxu3 %v8848_v24 }
 0x77f   : > { %v5377_v36 = vadd.f32 %v13800_v47, %v13941_v17  ;;  %v8840_v23 = vclamps-f32 %v5145_v32, 1.0  ;;  %v5225_v14 = vmul.f32 %v5224_v27, %v5200_v3  ;;  %v5240_v2 = vmul.f32 %v5239_v41, %v13796_v62 }
 0x780   : > { %v14118_v4 = vmul.f32 %v13968_v53, %v13733_v22  ;;  %v5354_v59 = vadd.f32 1.0, %v8839_v43  ;;  %v5295_v15 = vadd.f32 %v10106_v20, %v5294_v26  ;;  %vm5296_vm0 = vweird.f32 %v14017_v8  ;;  %v8846_v22 = vld [vmem:[%s15671_s7 + $0x80] sm:$0xff]  ;;  %5434 = vmatpush.msra.mxu3 %v8847_v12 }
 0x781   : > { %v10108_v47 = vpop.eup %10107  ;;  %v8841_v35 = vclamps-f32 %v5185_v6, 1.0  ;;  %v5265_v48 = vmul.f32 %v5264_v31, %v5240_v2  ;;  %v5280_v62 = vmul.f32 %v5279_v13, %v13847_v10  ;;  %vm5298_vm2 = vmor %vm5296_vm0, %vm5297_vm1  ;;  %v5303_v39 = vor.u32 1.1754944e-38, %v5302_v61  ;;  %v8872_v2 = vld [vmem:[%s15673_s9 + $0xd0] sm:$0xff] }
 0x782   : > { %v5299_v53 = vsel %vm5298_vm2, %v10106_v20, %v5295_v15  ;;  %vm5301_vm3 = vcmp.eq.f32.partialorder %v5300_v63, 8.507059e+37  ;;  %v5318_v11 = vmul.f32 %v5317_v56, %v13938_v37  ;;  %v5332_v43 = vmul.f32 %v10108_v47, %v14073_v16  ;;  %5435 = vmatpush.msra.mxu3 %v8846_v22  ;;  %v8874_v63 = vld [vmem:[%s15673_s9 + $0xe0] sm:$0xff]  ;;  %v8873_v56 = vld [vmem:[%s15673_s9 + $0xd8] sm:$0xff] }
 0x783   : > { %v5355_v8 = vadd.f32 1.0, %v8840_v23  ;;  %v4810_v5 = vmul.f32 0.5, %v13648_v45  ;;  %v8842_v32 = vclamps-f32 %v5225_v14, 1.0  ;;  %v5304_v25 = vsel %vm5301_vm3, %v5303_v39, %v5299_v53  ;;  %v8876_v45 = vld [vmem:[%s15673_s9 + $0xf0] sm:$0xff]  ;;  %v8870_v39 = vld [vmem:[%s15673_s9 + $0xc0] sm:$0xff] }
 0x784   : > { %v5378_v10 = vadd.f32 %v5377_v36, %v14118_v4  ;;  %v5305_v38 = vmul.f32 %v5304_v25, %v5280_v62  ;;  %v5333_v40 = vsub.f32 1.0, %v5332_v43  ;;  %v14133_v3 = vmul.f32 %v5354_v59, %v13745_v9  ;;  %5459 = vmatpush.msrb.mxu3 %v8877_v0  ;;  %v8867_v25 = vld [vmem:[%s15673_s9 + $0xa8] sm:$0xff] }
 0x785   : > { %v5356_v20 = vadd.f32 1.0, %v8841_v35  ;;  %v8843_v55 = vclamps-f32 %v5265_v48, 1.0  ;;  %v5342_v37 = vand.u32 2147483648, %v14073_v16  ;;  %v5319_v42 = vadd.f32 1.1283791, %v5318_v11  ;;  %v8869_v11 = vld [vmem:[%s15673_s9 + $0xb8] sm:$0xff] }
 0x786   : > { %v5334_v44 = vmul.f32 %v10108_v47, %v5333_v40  ;;  %vm5337_vm4 = vweird.f32 %v10108_v47  ;;  %v5340_v9 = vand.u32 2147483647, %v14073_v16  ;;  %v14150_v50 = vmul.f32 %v5355_v8, %v13754_v33  ;;  %5460 = vmatpush.msrb.mxu3 %v8876_v45  ;;  %v8866_v40 = vld [vmem:[%s15673_s9 + $0xa0] sm:$0xff] }
 0x787   : > { %v5357_v57 = vadd.f32 1.0, %v8842_v32  ;;  %v8844_v41 = vclamps-f32 %v5305_v38, 1.0  ;;  %v10182_v52 = vmov 99.0   ;;  %v4811_v27 = vmul.f32 0.5, %v13698_v51 }
 0x788   : > { %10109 = vrcp.f32 %v10182_v52  ;;  %v5335_v58 = vadd.f32 %v10108_v47, %v5334_v44  ;;  %vm5336_vm5 = vweird.f32 %v14073_v16  ;;  %v5379_v13 = vadd.f32 %v5378_v10, %v14133_v3  ;;  %5461 = vmatpush.msrb.mxu3 %v8875_v30  ;;  %v8862_v52 = vld [vmem:[%s15673_s9 + $0x80] sm:$0xff]  ;;  %v9893_v30 = vld [vmem:[%s15667_s3 + $0x128] sm:$0xff] }
 0x789   : > { %v14158_v33 = vmul.f32 %v5356_v20, %v4810_v5  ;;  %v5358_v7 = vadd.f32 1.0, %v8843_v55  ;;  %vm5338_vm6 = vmor %vm5336_vm5, %vm5337_vm4  ;;  %v5343_v6 = vor.u32 1.1754944e-38, %v5342_v37  ;;  %v4812_v61 = vmul.f32 0.5, %v13787_v34  ;;  %v8868_v5 = vld [vmem:[%s15673_s9 + $0xb0] sm:$0xff]  ;;  %v8865_v55 = vld [vmem:[%s15673_s9 + $0x98] sm:$0xff] }
 0x78a   : > { %v5320_v51 = vmul.f32 %v5319_v42, %v13899_v49  ;;  %v5339_v19 = vsel %vm5338_vm6, %v10108_v47, %v5335_v58  ;;  %vm5341_vm7 = vcmp.eq.f32.partialorder %v5340_v9, 8.507059e+37  ;;  %v5380_v16 = vadd.f32 %v5379_v13, %v14150_v50  ;;  %5462 = vmatpush.msrb.mxu3 %v8874_v63  ;;  %v8871_v47 = vld [vmem:[%s15673_s9 + $0xc8] sm:$0xff]  ;;  %v8864_v9 = vld [vmem:[%s15673_s9 + $0x90] sm:$0xff]  ;;  %v9892_v58 = vld [vmem:[%s15667_s3 + $0x120] sm:$0xff] }
 0x78b   : > { %v14167_v24 = vmul.f32 %v5357_v57, %v4811_v27  ;;  %v5359_v31 = vadd.f32 1.0, %v8844_v41  ;;  %v5344_v26 = vsel %vm5341_vm7, %v5343_v6, %v5339_v19  ;;  %v14173_v14 = vmul.f32 %v5358_v7, %v4812_v61  ;;  %v9894_v57 = vld [vmem:[%s15667_s3 + $0x130] sm:$0xff]  ;;  %v9885_v27 = vld [vmem:[%s15667_s3 + $0xe8] sm:$0xff]  ;;  %v9884_v13 = vld [vmem:[%s15667_s3 + $0xe0] sm:$0xff] }
 0x78c   : > { %v5345_v36 = vmul.f32 %v5344_v26, %v5320_v51  ;;  %v5381_v34 = vadd.f32 %v5380_v16, %v14158_v33  ;;  %v4813_v49 = vmul.f32 0.5, %v13833_v21  ;;  %5463 = vmatpush.msrb.mxu3 %v8873_v56  ;;  %v4814_v35 = vmul.f32 0.5, %v13882_v46  ;;  %v9886_v41 = vld [vmem:[%s15667_s3 + $0xf0] sm:$0xff]  ;;  %5643 = vmatpush.bf16.msrb.mxu0 %v9894_v57  ;;  %v9891_v7 = vld [vmem:[%s15667_s3 + $0x118] sm:$0xff]  ;;  %v9889_v51 = vld [vmem:[%s15667_s3 + $0x108] sm:$0xff] }
 0x78d   : > { %vm5385_vm8 = vcmask 1042432   ;;  %5719 = vmatpush.bf16.msrb.mxu1 %v9886_v41  ;;  %v9883_v6 = vld [vmem:[%s15667_s3 + $0xd8] sm:$0xff]  ;;  %v9890_v63 = vld [vmem:[%s15667_s3 + $0x110] sm:$0xff]  ;;  %v9881_v19 = vld [vmem:[%s15667_s3 + $0xc8] sm:$0xff] }
 0x78e   : > { %v10110_v23 = vpop.eup %10109  ;;  %v8845_v12 = vclamps-f32 %v5345_v36, 1.0  ;;  %v5382_v59 = vadd.f32 %v5381_v34, %v14167_v24  ;;  %v14180_v15 = vmul.f32 %v5359_v31, %v4813_v49  ;;  %5464 = vmatpush.msrb.mxu3 %v8872_v2  ;;  %v9882_v61 = vld [vmem:[%s15667_s3 + $0xd0] sm:$0xff]  ;;  %v5419_v16 = vld [vmem:[%s15672_s8 + $0x1] sm:$0x1]  ;;  %v9903_v36 = vld [vmem:[%s15667_s3 + $0x178] sm:$0xff] }
 0x78f   : > { %v5395_v62 = vmul.f32 99.0, %v10110_v23  ;;  %vm5399_vm9 = vweird.f32 %v10110_v23  ;;  %v9901_v34 = vld [vmem:[%s15667_s3 + $0x168] sm:$0xff]  ;;  %v9900_v49 = vld [vmem:[%s15667_s3 + $0x160] sm:$0xff]  ;;  %v9899_v2 = vld [vmem:[%s15667_s3 + $0x158] sm:$0xff] }
 0x790   : > { %v5360_v48 = vadd.f32 1.0, %v8845_v12  ;;  %v5383_v21 = vadd.f32 %v5382_v59, %v14173_v14  ;;  %5465 = vmatpush.msrb.mxu3 %v8871_v47  ;;  %5644 = vmatpush.bf16.msrb.mxu0 %v9893_v30  ;;  %v5458_v12 = vld [vmem:[%s15674_s10 + $0x1] sm:$0x1] }
 0x791   : > { %v5396_v43 = vsub.f32 1.0, %v5395_v62  ;;  %5720 = vmatpush.bf16.msrb.mxu1 %v9885_v27  ;;  %v9888_v59 = vld [vmem:[%s15667_s3 + $0x100] sm:$0xff] }
 0x792   : > { %v14190_v22 = vmul.f32 %v5360_v48, %v4814_v35  ;;  %v5384_v53 = vadd.f32 %v5383_v21, %v14180_v15  ;;  %5466 = vmatpush.msrb.mxu3 %v8870_v39  ;;  %v9880_v47 = vld [vmem:[%s15667_s3 + $0xc0] sm:$0xff]  ;;  %v9898_v35 = vld [vmem:[%s15667_s3 + $0x150] sm:$0xff]  ;;  %v9897_v21 = vld [vmem:[%s15667_s3 + $0x148] sm:$0xff] }
 0x793   : > { %v5397_v10 = vmul.f32 %v10110_v23, %v5396_v43 }
 0x794   : > { %v5386_v46 = vsel %vm5385_vm8, %v14190_v22, 0.0  ;;  %5467 = vmatpush.msrb.mxu3 %v8869_v11  ;;  %5645 = vmatpush.bf16.msrb.mxu0 %v9892_v58 }
 0x795   : > { %v5387_v8 = vadd.f32 %v5386_v46, %v5384_v53  ;;  %v5398_v37 = vadd.f32 %v10110_v23, %v5397_v10  ;;  %5721 = vmatpush.bf16.msrb.mxu1 %v9884_v13  ;;  %v9896_v53 = vld [vmem:[%s15667_s3 + $0x140] sm:$0xff] }
 0x796   : > { %5468 = vmatpush.msrb.mxu3 %v8868_v5 }
 0x797   : > { %v5388_v32 = vrot.slane %v5387_v8, 4  ;;  %v5400_v28 = vsel %vm5399_vm9, %v10110_v23, %v5398_v37  ;;  %v9902_v23 = vld [vmem:[%s15667_s3 + $0x170] sm:$0xff] }
 0x798   : > { %5469 = vmatpush.msrb.mxu3 %v8867_v25  ;;  %5646 = vmatpush.bf16.msrb.mxu0 %v9891_v7 }
 0x799   : > { %v5389_v38 = vadd.f32 %v5388_v32, %v5387_v8  ;;  %5722 = vmatpush.bf16.msrb.mxu1 %v9883_v6 }
 0x79a   : > { %5470 = vmatpush.msrb.mxu3 %v8866_v40 }
 0x79b   : > { %v5390_v20 = vrot.slane %v5389_v38, 2 }
 0x79c   : > { %5471 = vmatpush.msrb.mxu3 %v8865_v55  ;;  %5647 = vmatpush.bf16.msrb.mxu0 %v9890_v63 }
 0x79d   : > { %v5391_v0 = vadd.f32 %v5390_v20, %v5389_v38  ;;  %5723 = vmatpush.bf16.msrb.mxu1 %v9882_v61 }
 0x79e   : > { %5472 = vmatpush.msrb.mxu3 %v8864_v9 }
 0x79f   : > { %v5392_v45 = vrot.slane %v5391_v0, 1 }
 0x7a0   : > { %5473 = vmatpush.msrb.mxu3 %v8863_v1  ;;  %5648 = vmatpush.bf16.msrb.mxu0 %v9889_v51 }
 0x7a1   : > { %v5393_v42 = vadd.f32 %v5392_v45, %v5391_v0  ;;  %5724 = vmatpush.bf16.msrb.mxu1 %v9881_v19 }
 0x7a2   : > { %5474 = vmatpush.msrb.mxu3 %v8862_v52 }
 0x7a3   : > { %v5401_v44 = vmul.f32 %v5400_v28, %v5393_v42 }
 0x7a4   : > { %5649 = vmatpush.bf16.msrb.mxu0 %v9888_v59 }
 0x7a5   : > { %5436 = vmatmul.f32.vlgmr.msra.gmra.mxu3 %v5401_v44  ;;  %5725 = vmatpush.bf16.msrb.mxu1 %v9880_v47 }
 0x7a6   : > { %5829 = vmatpush.bf16.msra.mxu3 %v9903_v36 }
 0x7aa   : > { %5830 = vmatpush.bf16.msra.mxu3 %v9902_v23 }
 0x7ae   : > { %5831 = vmatpush.bf16.msra.mxu3 %v9901_v34 }
 0x7b2   : > { %5832 = vmatpush.bf16.msra.mxu3 %v9900_v49 }
 0x7b6   : > { %5833 = vmatpush.bf16.msra.mxu3 %v9899_v2 }
 0x7ba   : > { %5834 = vmatpush.bf16.msra.mxu3 %v9898_v35 }
 0x7be   : > { %5835 = vmatpush.bf16.msra.mxu3 %v9897_v21 }
 0x7c2   : > { %5836 = vmatpush.bf16.msra.mxu3 %v9896_v53 }
 0x828   : > { %v5437_v31 = vpop.f32.mrf.mxu3 }
 0x829   : > { %v5438_v26 = vadd.f32 %v5437_v31, %v5419_v16 }
 0x82b   : > { %v5440_v56 = vmax.f32 %v5438_v26, 0.0 }
 0x82d   : > { %5475 = vmatmul.f32.vlgmr.msrb.gmra.mxu3 %v5440_v56 }
 0x8b0   : > { %v5476_v48 = vpop.f32.mrf.mxu3 }
 0x8b1   : > { %v5477_v62 = vadd.f32 %v5476_v48, %v5458_v12 }
 0x8b3   : > { %v8878_v39 = vmul.f32 -1.442695, %v5477_v62 }
 0x8b5   : > { %10111 = vpow2.f32 %v8878_v39  ;;  %v14307_v39 = vld [vmem:[%s15668_s4 + $0x2] ss:$0 sm:$0xff] }
 0x8bb   : > { %v10112_v11 = vpop.eup %10111 }
 0x8bc   : > { %v5482_v46 = vadd.f32 1.0, %v10112_v11 }
 0x8be   : > { %10113 = vrcp.f32 %v5482_v46  ;;  %v5494_v32 = vand.u32 2147483648, %v5482_v46  ;;  %v5492_v10 = vand.u32 2147483647, %v5482_v46  ;;  %vm5488_vm11 = vweird.f32 %v5482_v46 }
 0x8c0   : > { %v5495_v40 = vor.u32 1.1754944e-38, %v5494_v32  ;;  %vm5493_vm13 = vcmp.eq.f32.partialorder %v5492_v10, 8.507059e+37 }
 0x8c4   : > { %v10114_v43 = vpop.eup %10113 }
 0x8c5   : > { %v5484_v8 = vmul.f32 %v10114_v43, %v5482_v46  ;;  %vm5489_vm10 = vweird.f32 %v10114_v43  ;;  %v14312_v46 = vld [vmem:[%s15669_s5 + $0x2] ss:$0 sm:$0xff] }
 0x8c6   : > { %vm5490_vm12 = vmor %vm5488_vm11, %vm5489_vm10 }
 0x8c7   : > { %v5485_v5 = vsub.f32 1.0, %v5484_v8 }
 0x8c9   : > { %v5486_v25 = vmul.f32 %v10114_v43, %v5485_v5 }
 0x8cb   : > { %v5487_v38 = vadd.f32 %v10114_v43, %v5486_v25 }
 0x8cd   : > { %v5491_v20 = vsel %vm5490_vm12, %v10114_v43, %v5487_v38 }
 0x8ce   : > { %v5496_v55 = vsel %vm5493_vm13, %v5495_v40, %v5491_v20 }
 0x8cf   : > { %v5498_v37 = vperm.slane %v5496_v55, 0 }
 0x8d1   : > { %v5499_v0 = vmul.f32 %v5498_v37, %v13717_v60  ;;  %v5500_v45 = vmul.f32 %v5498_v37, %v13730_v18  ;;  %v5501_v28 = vmul.f32 %v5498_v37, %v13750_v29  ;;  %v5502_v42 = vmul.f32 %v5498_v37, %v13774_v54 }
 0x8d2   : > { %v5503_v44 = vmul.f32 %v5498_v37, %v13941_v17  ;;  %v5504_v9 = vmul.f32 %v5498_v37, %v14118_v4  ;;  %v5505_v1 = vmul.f32 %v5498_v37, %v14133_v3  ;;  %v5506_v57 = vmul.f32 %v5498_v37, %v14150_v50 }
 0x8d3   : > { %5512 = vst [vmem:[#allocation3] sm:$0xff] %v5499_v0  ;;  %v5507_v60 = vmul.f32 %v5498_v37, %v14158_v33  ;;  %v5508_v18 = vmul.f32 %v5498_v37, %v14167_v24  ;;  %v5509_v29 = vmul.f32 %v5498_v37, %v14173_v14  ;;  %v5510_v54 = vmul.f32 %v5498_v37, %v14180_v15 }
 0x8d4   : > { %5513 = vst [vmem:[#allocation3 + $0x8] sm:$0xff] %v5500_v45  ;;  %v5511_v3 = vmul.f32 %v5498_v37, %v14190_v22 }
 0x8d5   : > { %5514 = vst [vmem:[#allocation3 + $0x10] sm:$0xff] %v5501_v28 }
 0x8d6   : > { %5515 = vst [vmem:[#allocation3 + $0x18] sm:$0xff] %v5502_v42 }
 0x8d7   : > { %5516 = vst [vmem:[#allocation3 + $0x20] sm:$0xff] %v5503_v44 }
 0x8d8   : > { %5517 = vst [vmem:[#allocation3 + $0x28] sm:$0xff] %v5504_v9 }
 0x8d9   : > { %5518 = vst [vmem:[#allocation3 + $0x30] sm:$0xff] %v5505_v1 }
 0x8da   : > { %5519 = vst [vmem:[#allocation3 + $0x38] sm:$0xff] %v5506_v57 }
 0x8db   : > { %v5560_v17 = vld [vmem:[#allocation3 + $0x1] ss:$2 sm:$0xff]  ;;  %v5525_v4 = vld [vmem:[#allocation3] ss:$2 sm:$0xff]  ;;  %5520 = vst [vmem:[#allocation3 + $0x40] sm:$0xff] %v5507_v60 }
 0x8dc   : > { %v5747_v41 = vld [vmem:[#allocation3 + $0x2] ss:$2 sm:$0xff]  ;;  %5521 = vst [vmem:[#allocation3 + $0x48] sm:$0xff] %v5508_v18 }
 0x8dd   : > { %v5562_v50 = vld [vmem:[#allocation3 + $0x11] ss:$2 sm:$0xff]  ;;  %v5527_v52 = vld [vmem:[#allocation3 + $0x10] ss:$2 sm:$0xff]  ;;  %5522 = vst [vmem:[#allocation3 + $0x50] sm:$0xff] %v5509_v29 }
 0x8de   : > { %v5573_v33 = vpack.c.bf16 %v5562_v50, %v5560_v17  ;;  %v5538_v30 = vpack.c.bf16 %v5527_v52, %v5525_v4  ;;  %v5749_v27 = vld [vmem:[#allocation3 + $0x12] ss:$2 sm:$0xff]  ;;  %5523 = vst [vmem:[#allocation3 + $0x58] sm:$0xff] %v5510_v54 }
 0x8df   : > { %v5760_v24 = vpack.c.bf16 %v5749_v27, %v5747_v41  ;;  %5524 = vst [vmem:[#allocation3 + $0x60] sm:$0x7] %v5511_v3  ;;  %v5564_v14 = vld [vmem:[#allocation3 + $0x21] ss:$2 sm:$0xff]  ;;  %v5529_v58 = vld [vmem:[#allocation3 + $0x20] ss:$2 sm:$0xff] }
 0x8e0   : > { %5650 = vmatmul.bf16.vlgmr.msrb.gmra.mxu0 %v5573_v33  ;;  %5726 = vmatmul.bf16.vlgmr.msrb.gmra.mxu1 %v5538_v30  ;;  %v5751_v7 = vld [vmem:[#allocation3 + $0x22] ss:$2 sm:$0xff] }
 0x8e1   : > { %5837 = vmatmul.bf16.vlgmr.msra.gmra.mxu3 %v5760_v24  ;;  %v5566_v15 = vld [vmem:[#allocation3 + $0x31] ss:$2 sm:$0xff]  ;;  %v5531_v13 = vld [vmem:[#allocation3 + $0x30] ss:$2 sm:$0xff] }
 0x8e2   : > { %v5753_v22 = vld [vmem:[#allocation3 + $0x32] ss:$2 sm:$0xff]  ;;  %v5574_v6 = vpack.c.bf16 %v5566_v15, %v5564_v14  ;;  %v5539_v63 = vpack.c.bf16 %v5531_v13, %v5529_v58 }
 0x8e3   : > { %v5761_v61 = vpack.c.bf16 %v5753_v22, %v5751_v7  ;;  %v5568_v51 = vld [vmem:[#allocation3 + $0x41] ss:$2 sm:$0xff]  ;;  %v5533_v16 = vld [vmem:[#allocation3 + $0x40] ss:$2 sm:$0xff] }
 0x8e4   : > { %v5755_v26 = vld [vmem:[#allocation3 + $0x42] ss:$2 sm:$0xff] }
 0x8e5   : > { %v5570_v19 = vld [vmem:[#allocation3 + $0x51] ss:$2 sm:$0xff]  ;;  %v5535_v31 = vld [vmem:[#allocation3 + $0x50] ss:$2 sm:$0xff] }
 0x8e6   : > { %v5757_v56 = vld [vmem:[#allocation3 + $0x52] ss:$2 sm:$0xff]  ;;  %v5575_v36 = vpack.c.bf16 %v5570_v19, %v5568_v51  ;;  %v5540_v23 = vpack.c.bf16 %v5535_v31, %v5533_v16  ;;  %v5572_v49 = vld [vmem:[#allocation3 + $0x61] ss:$2 sm:$0x1] }
 0x8e7   : > { %v5762_v34 = vpack.c.bf16 %v5757_v56, %v5755_v26  ;;  %v5537_v2 = vld [vmem:[#allocation3 + $0x60] ss:$2 sm:$0x1]  ;;  %v5759_v12 = vld [vmem:[#allocation3 + $0x62] ss:$2 sm:$0x1]  ;;  %v5576_v59 = vpack.c.bf16 %v5572_v49, %v5572_v49 }
 0x8e8   : > { %v5541_v47 = vpack.c.bf16 %v5537_v2, %v5537_v2  ;;  %v5763_v35 = vpack.c.bf16 %v5759_v12, %v5759_v12 }
 0x8f0   : > { %5655 = vmatmul.bf16.gmra.mxu0 %v5574_v6  ;;  %5731 = vmatmul.bf16.gmra.mxu1 %v5539_v63 }
 0x8f1   : > { %5842 = vmatmul.bf16.gmra.mxu3 %v5761_v61 }
 0x900   : > { %5660 = vmatmul.bf16.gmra.mxu0 %v5575_v36  ;;  %5736 = vmatmul.bf16.gmra.mxu1 %v5540_v23 }
 0x901   : > { %5847 = vmatmul.bf16.gmra.mxu3 %v5762_v34 }
 0x910   : > { %5665 = vmatmul.bf16.gmra.mxu0 %v5576_v59  ;;  %5741 = vmatmul.bf16.gmra.mxu1 %v5541_v47  ;;  %v9045_v47 = vld [vmem:[%s15671_s7 + $0x178] sm:$0xff] }
 0x911   : > { %5852 = vmatmul.bf16.gmra.mxu3 %v5763_v35  ;;  %6230 = vmatpush.msrb.mxu2 %v9045_v47 }
 0x95d   : > { %v5651_v48 = vpop.f32.mrf.mxu0  ;;  %v5727_v62 = vpop.f32.mrf.mxu1 }
 0x95e   : > { %v5728_v21 = vadd.f32 %v5727_v62, %v5651_v48 }
 0x964   : > { %v5838_v53 = vpop.f32.mrf.mxu3 }
 0x965   : > { %v5857_v11 = vadd.f32 %v5838_v53, %v5728_v21  ;;  %v5653_v43 = vpop.f32.mrf.mxu0  ;;  %v5729_v8 = vpop.f32.mrf.mxu1 }
 0x966   : > { %v5730_v10 = vadd.f32 %v5729_v8, %v5653_v43 }
 0x967   : > { %v5866_v5 = vmul.f32 %v14307_v39, %v5857_v11 }
 0x969   : > { %v14316_v32 = vadd.f32 %v14312_v46, %v5866_v5 }
 0x96b   : > { %v14319_v25 = vmul.f32 0.70710677, %v14316_v32 }
 0x96c   : > { %v5840_v38 = vpop.f32.mrf.mxu3 }
 0x96d   : > { %v5896_v40 = vmul.f32 %v14319_v25, %v14319_v25  ;;  %v5858_v20 = vadd.f32 %v5840_v38, %v5730_v10  ;;  %v5656_v55 = vpop.f32.mrf.mxu0  ;;  %v5732_v37 = vpop.f32.mrf.mxu1 }
 0x96e   : > { %v5733_v44 = vadd.f32 %v5732_v37, %v5656_v55 }
 0x96f   : > { %v14323_v0 = vmin.f32 %v5896_v40, 16.0  ;;  %v5867_v45 = vmul.f32 %v14307_v39, %v5858_v20 }
 0x971   : > { %v5909_v28 = vmul.f32 3.8918573e-05, %v14323_v0  ;;  %v14328_v42 = vadd.f32 %v14312_v46, %v5867_v45  ;;  %v5898_v13 = vmul.f32 2.1237322e-06, %v14323_v0 }
 0x973   : > { %v5910_v9 = vadd.f32 0.001143296, %v5909_v28  ;;  %v14331_v1 = vmul.f32 0.70710677, %v14328_v42  ;;  %v5899_v19 = vadd.f32 0.00028619796, %v5898_v13 }
 0x974   : > { %v5843_v57 = vpop.f32.mrf.mxu3 }
 0x975   : > { %v5859_v60 = vadd.f32 %v5843_v57, %v5733_v44  ;;  %v5658_v18 = vpop.f32.mrf.mxu0  ;;  %v5734_v29 = vpop.f32.mrf.mxu1  ;;  %v5936_v54 = vmul.f32 %v14331_v1, %v14331_v1  ;;  %v5911_v4 = vmul.f32 %v5910_v9, %v14323_v0  ;;  %v5900_v12 = vmul.f32 %v5899_v19, %v14323_v0 }
 0x976   : > { %v5735_v52 = vadd.f32 %v5734_v29, %v5658_v18 }
 0x977   : > { %v5868_v17 = vmul.f32 %v14307_v39, %v5859_v60  ;;  %v14337_v3 = vmin.f32 %v5936_v54, 16.0  ;;  %v5912_v33 = vadd.f32 0.014752088, %v5911_v4  ;;  %v5901_v8 = vadd.f32 0.0036580483, %v5900_v12 }
 0x979   : > { %v14340_v41 = vadd.f32 %v14312_v46, %v5868_v17  ;;  %v5949_v50 = vmul.f32 3.8918573e-05, %v14337_v3  ;;  %v5913_v6 = vmul.f32 %v5912_v33, %v14323_v0  ;;  %v5938_v16 = vmul.f32 2.1237322e-06, %v14337_v3 }
 0x97a   : > { %v5902_v57 = vmul.f32 %v5901_v8, %v14323_v0 }
 0x97b   : > { %v14344_v30 = vmul.f32 0.70710677, %v14340_v41  ;;  %v5950_v24 = vadd.f32 0.001143296, %v5949_v50  ;;  %v5914_v56 = vadd.f32 0.112945676, %v5913_v6 }
 0x97c   : > { %v5845_v27 = vpop.f32.mrf.mxu3  ;;  %v5939_v59 = vadd.f32 0.00028619796, %v5938_v16 }
 0x97d   : > { %v5860_v14 = vadd.f32 %v5845_v27, %v5735_v52  ;;  %v5661_v15 = vpop.f32.mrf.mxu0  ;;  %v5737_v58 = vpop.f32.mrf.mxu1  ;;  %v5976_v7 = vmul.f32 %v14344_v30, %v14344_v30  ;;  %v5951_v61 = vmul.f32 %v5950_v24, %v14337_v3  ;;  %v5915_v62 = vmul.f32 %v5914_v56, %v14323_v0 }
 0x97e   : > { %v5738_v2 = vadd.f32 %v5737_v58, %v5661_v15  ;;  %v5940_v5 = vmul.f32 %v5939_v59, %v14337_v3  ;;  %v5903_v27 = vadd.f32 0.05243302, %v5902_v57 }
 0x97f   : > { %v5869_v22 = vmul.f32 %v14307_v39, %v5860_v14  ;;  %v14351_v63 = vmin.f32 %v5976_v7, 16.0  ;;  %v5952_v23 = vadd.f32 0.014752088, %v5951_v61  ;;  %v5916_v40 = vadd.f32 0.4994258, %v5915_v62  ;;  %v9044_v14 = vld [vmem:[%s15671_s7 + $0x170] sm:$0xff] }
 0x980   : > { %v5941_v60 = vadd.f32 0.0036580483, %v5940_v5  ;;  %6231 = vmatpush.msrb.mxu2 %v9044_v14 }
 0x981   : > { %v14355_v51 = vadd.f32 %v14312_v46, %v5869_v22  ;;  %v5989_v31 = vmul.f32 3.8918573e-05, %v14351_v63  ;;  %v5953_v53 = vmul.f32 %v5952_v23, %v14337_v3  ;;  %v5917_v18 = vmul.f32 %v5916_v40, %v14323_v0 }
 0x982   : > { %v5978_v29 = vmul.f32 2.1237322e-06, %v14351_v63  ;;  %v5942_v24 = vmul.f32 %v5941_v60, %v14337_v3 }
 0x983   : > { %v14360_v26 = vmul.f32 0.70710677, %v14355_v51  ;;  %v5990_v35 = vadd.f32 0.001143296, %v5989_v31  ;;  %v5954_v37 = vadd.f32 0.112945676, %v5953_v53 }
 0x984   : > { %v5848_v36 = vpop.f32.mrf.mxu3  ;;  %v14392_v58 = vadd.f32 1.0, %v5917_v18  ;;  %v5979_v13 = vadd.f32 0.00028619796, %v5978_v29  ;;  %v5943_v23 = vadd.f32 0.05243302, %v5942_v24 }
 0x985   : > { %v5663_v34 = vpop.f32.mrf.mxu0  ;;  %v5739_v49 = vpop.f32.mrf.mxu1  ;;  %v6016_v48 = vmul.f32 %v14360_v26, %v14360_v26  ;;  %v5861_v21 = vadd.f32 %v5848_v36, %v5738_v2  ;;  %v5991_v11 = vmul.f32 %v5990_v35, %v14351_v63  ;;  %v5955_v4 = vmul.f32 %v5954_v37, %v14337_v3 }
 0x986   : > { %v5740_v33 = vadd.f32 %v5739_v49, %v5663_v34  ;;  %v5904_v36 = vmul.f32 %v5903_v27, %v14323_v0  ;;  %10115 = vrcp.f32 %v14392_v58  ;;  %v5980_v49 = vmul.f32 %v5979_v13, %v14351_v63 }
 0x987   : > { %v14371_v43 = vmin.f32 %v6016_v48, 16.0  ;;  %v5992_v10 = vadd.f32 0.014752088, %v5991_v11  ;;  %v5870_v20 = vmul.f32 %v14307_v39, %v5861_v21  ;;  %v5956_v61 = vadd.f32 0.4994258, %v5955_v4  ;;  %v9043_v11 = vld [vmem:[%s15671_s7 + $0x168] sm:$0xff] }
 0x988   : > { %v5905_v62 = vadd.f32 0.18741608, %v5904_v36  ;;  %v5944_v21 = vmul.f32 %v5943_v23, %v14337_v3  ;;  %v5981_v8 = vadd.f32 0.0036580483, %v5980_v49  ;;  %6232 = vmatpush.msrb.mxu2 %v9043_v11  ;;  %vm5924_vm14 = vweird.f32 %v14392_v58 }
 0x989   : > { %v6029_v38 = vmul.f32 3.8918573e-05, %v14371_v43  ;;  %v5993_v45 = vmul.f32 %v5992_v10, %v14351_v63  ;;  %v14382_v17 = vadd.f32 %v14312_v46, %v5870_v20  ;;  %v5957_v59 = vmul.f32 %v5956_v61, %v14337_v3 }
 0x98a   : > { %v6018_v37 = vmul.f32 2.1237322e-06, %v14371_v43  ;;  %v5945_v57 = vadd.f32 0.18741608, %v5944_v21  ;;  %v5982_v18 = vmul.f32 %v5981_v8, %v14351_v63  ;;  %v5930_v8 = vand.u32 2147483648, %v14392_v58 }
 0x98b   : > { %v6030_v28 = vadd.f32 0.001143296, %v6029_v38  ;;  %v5994_v50 = vadd.f32 0.112945676, %v5993_v45  ;;  %v14390_v15 = vmul.f32 0.70710677, %v14382_v17 }
 0x98c   : > { %v5850_v55 = vpop.f32.mrf.mxu3  ;;  %v14414_v20 = vadd.f32 1.0, %v5957_v59  ;;  %v14418_v45 = vpop.eup %10115  ;;  %v5946_v13 = vmul.f32 %v5945_v57, %v14337_v3 }
 0x98d   : > { %v5666_v44 = vpop.f32.mrf.mxu0  ;;  %v5742_v9 = vpop.f32.mrf.mxu1  ;;  %v6031_v54 = vmul.f32 %v6030_v28, %v14371_v43  ;;  %v5862_v22 = vadd.f32 %v5850_v55, %v5740_v33  ;;  %v5995_v19 = vmul.f32 %v5994_v50, %v14351_v63  ;;  %v6056_v34 = vmul.f32 %v14390_v15, %v14390_v15 }
 0x98e   : > { %v5743_v48 = vadd.f32 %v5742_v9, %v5666_v44  ;;  %v5906_v9 = vmul.f32 %v5905_v62, %v14323_v0  ;;  %v5920_v50 = vmul.f32 %v14418_v45, %v14392_v58  ;;  %10117 = vrcp.f32 %v14414_v20 }
 0x98f   : > { %v6032_v52 = vadd.f32 0.014752088, %v6031_v54  ;;  %v5871_v12 = vmul.f32 %v14307_v39, %v5862_v22  ;;  %v5996_v47 = vadd.f32 0.4994258, %v5995_v19  ;;  %v14404_v35 = vmin.f32 %v6056_v34, 16.0 }
 0x990   : > { %v6019_v0 = vadd.f32 0.00028619796, %v6018_v37  ;;  %v5907_v27 = vadd.f32 1.1283791, %v5906_v9  ;;  %vm5925_vm15 = vweird.f32 %v14418_v45  ;;  %vm5964_vm2 = vweird.f32 %v14414_v20 }
 0x991   : > { %v6033_v7 = vmul.f32 %v6032_v52, %v14371_v43  ;;  %v6069_v5 = vmul.f32 3.8918573e-05, %v14404_v35  ;;  %v14412_v10 = vadd.f32 %v14312_v46, %v5871_v12  ;;  %v5997_v55 = vmul.f32 %v5996_v47, %v14351_v63  ;;  %vm14507_vm0 = vmor %vm5924_vm14, %vm5925_vm15 }
 0x992   : > { %v6058_v60 = vmul.f32 2.1237322e-06, %v14404_v35  ;;  %v6020_v61 = vmul.f32 %v6019_v0, %v14371_v43 }
 0x993   : > { %v6034_v56 = vadd.f32 0.112945676, %v6033_v7  ;;  %v6070_v44 = vadd.f32 0.001143296, %v6069_v5  ;;  %v14426_v54 = vmul.f32 0.70710677, %v14412_v10 }
 0x994   : > { %v5853_v6 = vpop.f32.mrf.mxu3  ;;  %v14432_v52 = vadd.f32 1.0, %v5997_v55  ;;  %v6059_v24 = vadd.f32 0.00028619796, %v6058_v60  ;;  %v5983_v7 = vadd.f32 0.05243302, %v5982_v18 }
 0x995   : > { %v5668_v16 = vpop.f32.mrf.mxu0  ;;  %v5744_v31 = vpop.f32.mrf.mxu1  ;;  %v6035_v2 = vmul.f32 %v6034_v56, %v14371_v43  ;;  %v5863_v38 = vadd.f32 %v5853_v6, %v5743_v48  ;;  %v6071_v29 = vmul.f32 %v6070_v44, %v14404_v35  ;;  %v6096_v22 = vmul.f32 %v14426_v54, %v14426_v54 }
 0x996   : > { %v5921_v6 = vsub.f32 1.0, %v5920_v50  ;;  %10119 = vrcp.f32 %v14432_v52  ;;  %v14451_v31 = vpop.eup %10117  ;;  %v14454_v56 = vmul.f32 %v5907_v27, %v14319_v25  ;;  %v6060_v36 = vmul.f32 %v6059_v24, %v14404_v35 }
 0x997   : > { %v6036_v53 = vadd.f32 0.4994258, %v6035_v2  ;;  %v5872_v4 = vmul.f32 %v14307_v39, %v5863_v38  ;;  %v6072_v14 = vadd.f32 0.014752088, %v6071_v29  ;;  %v14446_v16 = vmin.f32 %v6096_v22, 16.0  ;;  %v9042_v38 = vld [vmem:[%s15671_s7 + $0x160] sm:$0xff] }
 0x998   : > { %v5984_v34 = vmul.f32 %v5983_v7, %v14351_v63  ;;  %v5922_v59 = vmul.f32 %v14418_v45, %v5921_v6  ;;  %v5947_v25 = vadd.f32 1.1283791, %v5946_v13  ;;  %v6021_v47 = vadd.f32 0.0036580483, %v6020_v61  ;;  %6233 = vmatpush.msrb.mxu2 %v9042_v38 }
 0x999   : > { %v6037_v28 = vmul.f32 %v6036_v53, %v14371_v43  ;;  %v14440_v39 = vadd.f32 %v14312_v46, %v5872_v4  ;;  %v6073_v19 = vmul.f32 %v6072_v14, %v14404_v35  ;;  %v5928_v46 = vand.u32 2147483647, %v14392_v58 }
 0x99a   : > { %v6098_v49 = vmul.f32 2.1237322e-06, %v14446_v16  ;;  %v6109_v2 = vmul.f32 3.8918573e-05, %v14446_v16  ;;  %v5960_v48 = vmul.f32 %v14451_v31, %v14414_v20  ;;  %v6061_v5 = vadd.f32 0.0036580483, %v6060_v36 }
 0x99b   : > { %v14434_v33 = vadd.f32 1.0, %v6037_v28  ;;  %v14449_v3 = vmul.f32 0.70710677, %v14440_v39  ;;  %v6074_v23 = vadd.f32 0.112945676, %v6073_v19  ;;  %vm14482_vm1 = vcmp.eq.f32.partialorder %v5928_v46, 8.507059e+37 }
 0x99c   : > { %v5855_v40 = vpop.f32.mrf.mxu3  ;;  %v6099_v21 = vadd.f32 0.00028619796, %v6098_v49  ;;  %v6110_v53 = vadd.f32 0.001143296, %v6109_v2  ;;  %v14468_v11 = vpop.eup %10119  ;;  %v5968_v44 = vand.u32 2147483647, %v14414_v20  ;;  %v5923_v18 = vadd.f32 %v14418_v45, %v5922_v59 }
 0x99d   : > { %10121 = vrcp.f32 %v14434_v33  ;;  %v6136_v12 = vmul.f32 %v14449_v3, %v14449_v3  ;;  %v6075_v62 = vmul.f32 %v6074_v23, %v14404_v35  ;;  %v9041_v40 = vld [vmem:[%s15671_s7 + $0x158] sm:$0xff]  ;;  %v5985_v9 = vadd.f32 0.18741608, %v5984_v34 }
 0x99e   : > { %v6111_v60 = vmul.f32 %v6110_v53, %v14446_v16  ;;  %v6022_v29 = vmul.f32 %v6021_v47, %v14371_v43  ;;  %v6100_v4 = vmul.f32 %v6099_v21, %v14446_v16  ;;  %v5961_v0 = vsub.f32 1.0, %v5960_v48  ;;  %6234 = vmatpush.msrb.mxu2 %v9041_v40 }
 0x99f   : > { %v14478_v55 = vmin.f32 %v6136_v12, 16.0  ;;  %v6076_v57 = vadd.f32 0.4994258, %v6075_v62  ;;  %v5970_v13 = vand.u32 2147483648, %v14414_v20  ;;  %v6000_v7 = vmul.f32 %v14468_v11, %v14432_v52 }
 0x9a0   : > { %v6112_v24 = vadd.f32 0.014752088, %v6111_v60  ;;  %v6062_v6 = vmul.f32 %v6061_v5, %v14404_v35  ;;  %v5931_v34 = vor.u32 1.1754944e-38, %v5930_v8  ;;  %v14512_v49 = vmul.f32 %v5947_v25, %v14331_v1 }
 0x9a1   : > { %v6138_v50 = vmul.f32 2.1237322e-06, %v14478_v55  ;;  %v6077_v27 = vmul.f32 %v6076_v57, %v14404_v35  ;;  %v6149_v14 = vmul.f32 3.8918573e-05, %v14478_v55  ;;  %v6023_v2 = vadd.f32 0.05243302, %v6022_v29 }
 0x9a2   : > { %v6113_v19 = vmul.f32 %v6112_v24, %v14446_v16  ;;  %v6101_v12 = vadd.f32 0.0036580483, %v6100_v4  ;;  %v5927_v59 = vsel %vm14507_vm0, %v14418_v45, %v5923_v18  ;;  %v5962_v47 = vmul.f32 %v14451_v31, %v5961_v0  ;;  %v9040_v29 = vld [vmem:[%s15671_s7 + $0x150] sm:$0xff] }
 0x9a3   : > { %v14480_v37 = vpop.eup %10121  ;;  %v14500_v61 = vadd.f32 1.0, %v6077_v27  ;;  %v6139_v46 = vadd.f32 0.00028619796, %v6138_v50  ;;  %v6150_v36 = vadd.f32 0.001143296, %v6149_v14  ;;  %v5986_v48 = vmul.f32 %v5985_v9, %v14351_v63  ;;  %6235 = vmatpush.msrb.mxu2 %v9040_v29 }
 0x9a4   : > { %v6040_v22 = vmul.f32 %v14480_v37, %v14434_v33  ;;  %v5971_v58 = vor.u32 1.1754944e-38, %v5970_v13  ;;  %v6001_v62 = vsub.f32 1.0, %v6000_v7  ;;  %v6063_v21 = vadd.f32 0.05243302, %v6062_v6 }
 0x9a5   : > { %10123 = vrcp.f32 %v14500_v61  ;;  %vm14521_vm3 = vcmp.eq.f32.partialorder %v5968_v44, 8.507059e+37  ;;  %v6114_v53 = vadd.f32 0.112945676, %v6113_v19  ;;  %v6140_v8 = vmul.f32 %v6139_v46, %v14478_v55 }
 0x9a6   : > { %v6041_v25 = vsub.f32 1.0, %v6040_v22  ;;  %v6151_v45 = vmul.f32 %v6150_v36, %v14478_v55  ;;  %v14529_v63 = vsel %vm14482_vm1, %v5931_v34, %v5927_v59  ;;  %vm5965_vm4 = vweird.f32 %v14451_v31 }
 0x9a7   : > { %v6024_v5 = vmul.f32 %v6023_v2, %v14371_v43  ;;  %v6102_v38 = vmul.f32 %v6101_v12, %v14446_v16  ;;  %v5963_v40 = vadd.f32 %v14451_v31, %v5962_v47  ;;  %v14535_v44 = vadd.f32 1.1283791, %v5986_v48  ;;  %vm14553_vm6 = vmor %vm5964_vm2, %vm5965_vm4 }
 0x9a8   : > { %v6115_v9 = vmul.f32 %v6114_v53, %v14446_v16  ;;  %v6152_v57 = vadd.f32 0.014752088, %v6151_v45  ;;  %v6002_v60 = vmul.f32 %v14468_v11, %v6001_v62  ;;  %vm6004_vm5 = vweird.f32 %v14432_v52 }
 0x9a9   : > { %v6008_v28 = vand.u32 2147483647, %v14432_v52  ;;  %v6064_v18 = vmul.f32 %v6063_v21, %v14404_v35  ;;  %v6042_v50 = vmul.f32 %v14480_v37, %v6041_v25  ;;  %v6141_v27 = vadd.f32 0.0036580483, %v6140_v8 }
 0x9aa   : > { %v6116_v0 = vadd.f32 0.4994258, %v6115_v9  ;;  %v6153_v24 = vmul.f32 %v6152_v57, %v14478_v55  ;;  %v6010_v13 = vand.u32 2147483648, %v14432_v52  ;;  %v6025_v7 = vadd.f32 0.18741608, %v6024_v5 }
 0x9ab   : > { %v14545_v4 = vpop.eup %10123  ;;  %v6103_v6 = vadd.f32 0.05243302, %v6102_v38  ;;  %v5967_v19 = vsel %vm14553_vm6, %v14451_v31, %v5963_v40  ;;  %vm6005_vm7 = vweird.f32 %v14468_v11  ;;  %v6003_v36 = vadd.f32 %v14468_v11, %v6002_v60  ;;  %v9039_v31 = vld [vmem:[%s15671_s7 + $0x148] sm:$0xff]  ;;  %v9037_v60 = vld [vmem:[%s15671_s7 + $0x138] sm:$0xff] }
 0x9ac   : > { %v6080_v22 = vmul.f32 %v14545_v4, %v14500_v61  ;;  %v6117_v46 = vmul.f32 %v6116_v0, %v14446_v16  ;;  %v6154_v20 = vadd.f32 0.112945676, %v6153_v24  ;;  %vm6045_vm9 = vweird.f32 %v14480_v37  ;;  %6236 = vmatpush.msrb.mxu2 %v9039_v31  ;;  %vm14584_vm10 = vmor %vm6004_vm5, %vm6005_vm7  ;;  %v9032_v31 = vld [vmem:[%s15671_s7 + $0x110] sm:$0xff] }
 0x9ad   : > { %v6065_v23 = vadd.f32 0.18741608, %v6064_v18  ;;  %v6043_v2 = vadd.f32 %v14480_v37, %v6042_v50  ;;  %v6142_v59 = vmul.f32 %v6141_v27, %v14478_v55  ;;  %v5972_v48 = vsel %vm14521_vm3, %v5971_v58, %v5967_v19 }
 0x9ae   : > { %v6081_v34 = vsub.f32 1.0, %v6080_v22  ;;  %v14568_v12 = vadd.f32 1.0, %v6117_v46  ;;  %v6155_v47 = vmul.f32 %v6154_v20, %v14478_v55  ;;  %v6026_v62 = vmul.f32 %v6025_v7, %v14371_v43  ;;  %v9038_v43 = vld [vmem:[%s15671_s7 + $0x140] sm:$0xff] }
 0x9af   : > { %v6104_v25 = vmul.f32 %v6103_v6, %v14446_v16  ;;  %vm6044_vm11 = vweird.f32 %v14434_v33  ;;  %v6048_v1 = vand.u32 2147483647, %v14434_v33  ;;  %v6050_v58 = vand.u32 2147483648, %v14434_v33  ;;  %6237 = vmatpush.msrb.mxu2 %v9038_v43 }
 0x9b0   : > { %v6082_v21 = vmul.f32 %v14545_v4, %v6081_v34  ;;  %10125 = vrcp.f32 %v14568_v12  ;;  %vm14595_vm12 = vcmp.eq.f32.partialorder %v6008_v28, 8.507059e+37  ;;  %v6011_v52 = vor.u32 1.1754944e-38, %v6010_v13  ;;  %vm14601_vm13 = vmor %vm6044_vm11, %vm6045_vm9  ;;  %v9034_v34 = vld [vmem:[%s15671_s7 + $0x120] sm:$0xff] }
 0x9b1   : > { %v6066_v5 = vmul.f32 %v6065_v23, %v14404_v35  ;;  %v6156_v33 = vadd.f32 0.4994258, %v6155_v47  ;;  %v14607_v38 = vmul.f32 %v5972_v48, %v14512_v49  ;;  %v6007_v40 = vsel %vm14584_vm10, %v14468_v11, %v6003_v36  ;;  %6238 = vmatpush.msrb.mxu2 %v9037_v60 }
 0x9b2   : > { %v6047_v9 = vsel %vm14601_vm13, %v14480_v37, %v6043_v2  ;;  %v6143_v57 = vadd.f32 0.05243302, %v6142_v59  ;;  %v6083_v35 = vadd.f32 %v14545_v4, %v6082_v21  ;;  %vm6085_vm14 = vweird.f32 %v14545_v4  ;;  %v9036_v37 = vld [vmem:[%s15671_s7 + $0x130] sm:$0xff]  ;;  %v9033_v59 = vld [vmem:[%s15671_s7 + $0x118] sm:$0xff] }
 0x9b3   : > { %v6105_v28 = vadd.f32 0.18741608, %v6104_v25  ;;  %v6157_v49 = vmul.f32 %v6156_v33, %v14478_v55  ;;  %v6027_v18 = vadd.f32 1.1283791, %v6026_v62  ;;  %vm6049_vm15 = vcmp.eq.f32.partialorder %v6048_v1, 8.507059e+37  ;;  %6239 = vmatpush.msrb.mxu2 %v9036_v37 }
 0x9b4   : > { %v6051_v11 = vor.u32 1.1754944e-38, %v6050_v58  ;;  %v6090_v29 = vand.u32 2147483648, %v14500_v61  ;;  %v6067_v50 = vadd.f32 1.1283791, %v6066_v5  ;;  %vm6084_vm1 = vweird.f32 %v14500_v61  ;;  %v9031_v58 = vld [vmem:[%s15671_s7 + $0x108] sm:$0xff] }
 0x9b5   : > { %v6088_v0 = vand.u32 2147483647, %v14500_v61  ;;  %v14627_v27 = vadd.f32 1.0, %v6157_v49  ;;  %v5988_v14 = vmul.f32 %v14535_v44, %v14344_v30  ;;  %v6012_v13 = vsel %vm14595_vm12, %v6011_v52, %v6007_v40  ;;  %vm14635_vm0 = vmor %vm6084_vm1, %vm6085_vm14  ;;  %v9035_v61 = vld [vmem:[%s15671_s7 + $0x128] sm:$0xff] }
 0x9b6   : > { %v10126_v24 = vpop.eup %10125  ;;  %v6052_v7 = vsel %vm6049_vm15, %v6051_v11, %v6047_v9  ;;  %v6144_v6 = vmul.f32 %v6143_v57, %v14478_v55  ;;  %v6087_v30 = vsel %vm14635_vm0, %v14545_v4, %v6083_v35  ;;  %v6106_v44 = vmul.f32 %v6105_v28, %v14446_v16  ;;  %6240 = vmatpush.msrb.mxu2 %v9035_v61 }
 0x9b7   : > { %v6120_v19 = vmul.f32 %v10126_v24, %v14568_v12  ;;  %10127 = vrcp.f32 %v14627_v27  ;;  %v5933_v46 = vmul.f32 %v14529_v63, %v14454_v56  ;;  %v9024_v20 = vclamps-f32 %v14607_v38, 1.0 }
 0x9b8   : > { %v6028_v36 = vmul.f32 %v6027_v18, %v14360_v26  ;;  %v6091_v23 = vor.u32 1.1754944e-38, %v6090_v29  ;;  %v6013_v4 = vmul.f32 %v6012_v13, %v5988_v14  ;;  %v6068_v16 = vmul.f32 %v6067_v50, %v14390_v15  ;;  %6241 = vmatpush.msrb.mxu2 %v9034_v34  ;;  %v9061_v18 = vld [vmem:[%s15673_s9 + $0x178] sm:$0xff]  ;;  %v9059_v13 = vld [vmem:[%s15673_s9 + $0x168] sm:$0xff] }
 0x9b9   : > { %vm6089_vm2 = vcmp.eq.f32.partialorder %v6088_v0, 8.507059e+37  ;;  %v6121_v2 = vsub.f32 1.0, %v6120_v19  ;;  %v6130_v47 = vand.u32 2147483648, %v14568_v12  ;;  %v6145_v26 = vadd.f32 0.18741608, %v6144_v6  ;;  %6269 = vmatpush.msra.mxu0 %v9061_v18  ;;  %v9058_v19 = vld [vmem:[%s15673_s9 + $0x160] sm:$0xff] }
 0x9ba   : > { %v6053_v56 = vmul.f32 %v6052_v7, %v6028_v36  ;;  %v6092_v63 = vsel %vm6089_vm2, %v6091_v23, %v6087_v30  ;;  %v6107_v48 = vadd.f32 1.1283791, %v6106_v44  ;;  %vm6125_vm3 = vweird.f32 %v10126_v24  ;;  %6242 = vmatpush.msrb.mxu2 %v9033_v59  ;;  %v9919_v18 = vld [vmem:[%s15667_s3 + $0x1f8] sm:$0xff] }
 0x9bb   : > { %v6122_v62 = vmul.f32 %v10126_v24, %v6121_v2  ;;  %v6128_v15 = vand.u32 2147483647, %v14568_v12  ;;  %v5882_v21 = vmul.f32 0.5, %v14316_v32  ;;  %v9023_v25 = vclamps-f32 %v5933_v46, 1.0  ;;  %6420 = vmatpush.bf16.msra.mxu1 %v9919_v18 }
 0x9bc   : > { %v5883_v53 = vmul.f32 0.5, %v14328_v42  ;;  %v5884_v1 = vmul.f32 0.5, %v14340_v41  ;;  %v9025_v8 = vclamps-f32 %v6013_v4, 1.0  ;;  %v6093_v52 = vmul.f32 %v6092_v63, %v6068_v16  ;;  %6243 = vmatpush.msrb.mxu2 %v9032_v31  ;;  %v9030_v41 = vld [vmem:[%s15671_s7 + $0x100] sm:$0xff]  ;;  %v9057_v4 = vld [vmem:[%s15673_s9 + $0x158] sm:$0xff]  ;;  %v9055_v31 = vld [vmem:[%s15673_s9 + $0x148] sm:$0xff] }
 0x9bd   : > { %v10128_v43 = vpop.eup %10127  ;;  %v6123_v45 = vadd.f32 %v10126_v24, %v6122_v62  ;;  %vm6124_vm4 = vweird.f32 %v14568_v12  ;;  %v6177_v5 = vadd.f32 1.0, %v9024_v20  ;;  %v6131_v32 = vor.u32 1.1754944e-38, %v6130_v47 }
 0x9be   : > { %vm6126_vm5 = vmor %vm6124_vm4, %vm6125_vm3  ;;  %v6146_v33 = vmul.f32 %v6145_v26, %v14478_v55  ;;  %v6160_v42 = vmul.f32 %v10128_v43, %v14627_v27  ;;  %v9026_v38 = vclamps-f32 %v6053_v56, 1.0  ;;  %v6108_v40 = vmul.f32 %v6107_v48, %v14426_v54  ;;  %6244 = vmatpush.msrb.mxu2 %v9031_v58  ;;  %v9060_v54 = vld [vmem:[%s15673_s9 + $0x170] sm:$0xff] }
 0x9bf   : > { %v6127_v9 = vsel %vm6126_vm5, %v10126_v24, %v6123_v45  ;;  %vm6129_vm6 = vcmp.eq.f32.partialorder %v6128_v15, 8.507059e+37  ;;  %v6176_v12 = vadd.f32 1.0, %v9023_v25  ;;  %v6178_v35 = vadd.f32 1.0, %v9025_v8  ;;  %6270 = vmatpush.msra.mxu0 %v9060_v54  ;;  %v9056_v56 = vld [vmem:[%s15673_s9 + $0x150] sm:$0xff]  ;;  %v9051_v45 = vld [vmem:[%s15673_s9 + $0x128] sm:$0xff] }
 0x9c0   : > { %v6132_v57 = vsel %vm6129_vm6, %v6131_v32, %v6127_v9  ;;  %v6161_v60 = vsub.f32 1.0, %v6160_v42  ;;  %v9027_v28 = vclamps-f32 %v6093_v52, 1.0  ;;  %v6170_v55 = vand.u32 2147483648, %v14627_v27  ;;  %6245 = vmatpush.msrb.mxu2 %v9030_v41  ;;  %v9052_v8 = vld [vmem:[%s15673_s9 + $0x130] sm:$0xff]  ;;  %v9049_v41 = vld [vmem:[%s15673_s9 + $0x118] sm:$0xff] }
 0x9c1   : > { %v6133_v49 = vmul.f32 %v6132_v57, %v6108_v40  ;;  %v6147_v11 = vadd.f32 1.1283791, %v6146_v33  ;;  %vm6165_vm7 = vweird.f32 %v10128_v43  ;;  %v6168_v37 = vand.u32 2147483647, %v14627_v27  ;;  %6271 = vmatpush.msra.mxu0 %v9059_v13  ;;  %v9050_v33 = vld [vmem:[%s15673_s9 + $0x120] sm:$0xff]  ;;  %v9048_v9 = vld [vmem:[%s15673_s9 + $0x110] sm:$0xff] }
 0x9c2   : > { %v6162_v29 = vmul.f32 %v10128_v43, %v6161_v60  ;;  %v14687_v50 = vmul.f32 %v6177_v5, %v5883_v53  ;;  %v6179_v0 = vadd.f32 1.0, %v9026_v38  ;;  %v10183_v14 = vmov 49.0   ;;  %v9047_v57 = vld [vmem:[%s15673_s9 + $0x108] sm:$0xff]  ;;  %v9910_v54 = vld [vmem:[%s15667_s3 + $0x1b0] sm:$0xff]  ;;  %v9927_v13 = vld [vmem:[%s15667_s3 + $0x238] sm:$0xff] }
 0x9c3   : > { %v9028_v24 = vclamps-f32 %v6133_v49, 1.0  ;;  %10129 = vrcp.f32 %v10183_v14  ;;  %v5885_v7 = vmul.f32 0.5, %v14355_v51  ;;  %vm6164_vm9 = vweird.f32 %v14627_v27  ;;  %6272 = vmatpush.msra.mxu0 %v9058_v19  ;;  %v9046_v49 = vld [vmem:[%s15673_s9 + $0x100] sm:$0xff]  ;;  %6577 = vmatpush.bf16.msra.mxu2 %v9927_v13 }
 0x9c4   : > { %v6163_v22 = vadd.f32 %v10128_v43, %v6162_v29  ;;  %v14694_v6 = vmul.f32 %v6176_v12, %v5882_v21  ;;  %v14696_v61 = vmul.f32 %v6178_v35, %v5884_v1  ;;  %v6180_v30 = vadd.f32 1.0, %v9027_v28  ;;  %vm6166_vm10 = vmor %vm6164_vm9, %vm6165_vm7  ;;  %v9054_v21 = vld [vmem:[%s15673_s9 + $0x140] sm:$0xff]  ;;  %v9053_v1 = vld [vmem:[%s15673_s9 + $0x138] sm:$0xff] }
 0x9c5   : > { %v6171_v44 = vor.u32 1.1754944e-38, %v6170_v55  ;;  %v5886_v46 = vmul.f32 0.5, %v14382_v17  ;;  %v6148_v51 = vmul.f32 %v6147_v11, %v14449_v3  ;;  %vm6169_vm11 = vcmp.eq.f32.partialorder %v6168_v37, 8.507059e+37  ;;  %6273 = vmatpush.msra.mxu0 %v9057_v4  ;;  %v9911_v55 = vld [vmem:[%s15667_s3 + $0x1b8] sm:$0xff]  ;;  %v9918_v11 = vld [vmem:[%s15667_s3 + $0x1f0] sm:$0xff]  ;;  %v9909_v29 = vld [vmem:[%s15667_s3 + $0x1a8] sm:$0xff] }
 0x9c6   : > { %v6167_v20 = vsel %vm6166_vm10, %v10128_v43, %v6163_v22  ;;  %v6190_v27 = vadd.f32 %v14687_v50, %v14694_v6  ;;  %v14706_v36 = vmul.f32 %v6179_v0, %v5885_v7  ;;  %v6181_v23 = vadd.f32 1.0, %v9028_v24  ;;  %6486 = vmatpush.bf16.msrb.mxu3 %v9911_v55  ;;  %6421 = vmatpush.bf16.msra.mxu1 %v9918_v11  ;;  %v6229_v37 = vld [vmem:[%s15672_s8 + $0x2] sm:$0x1]  ;;  %v9926_v7 = vld [vmem:[%s15667_s3 + $0x230] sm:$0xff]  ;;  %v9917_v22 = vld [vmem:[%s15667_s3 + $0x1e8] sm:$0xff] }
 0x9c7   : > { %v6172_v34 = vsel %vm6169_vm11, %v6171_v44, %v6167_v20  ;;  %v14712_v3 = vmul.f32 %v6180_v30, %v5886_v46  ;;  %v5887_v59 = vmul.f32 0.5, %v14412_v10  ;;  %v5888_v48 = vmul.f32 0.5, %v14440_v39  ;;  %6274 = vmatpush.msra.mxu0 %v9056_v56  ;;  %6578 = vmatpush.bf16.msra.mxu2 %v9926_v7  ;;  %v9925_v30 = vld [vmem:[%s15667_s3 + $0x228] sm:$0xff]  ;;  %v9908_v44 = vld [vmem:[%s15667_s3 + $0x1a0] sm:$0xff] }
 0x9c8   : > { %v6173_v16 = vmul.f32 %v6172_v34, %v6148_v51  ;;  %v6191_v17 = vadd.f32 %v6190_v27, %v14696_v61  ;;  %vm6195_vm12 = vcmask 1040384   ;;  %v9916_v19 = vld [vmem:[%s15667_s3 + $0x1e0] sm:$0xff]  ;;  %v9907_v27 = vld [vmem:[%s15667_s3 + $0x198] sm:$0xff]  ;;  %v9905_v56 = vld [vmem:[%s15667_s3 + $0x188] sm:$0xff] }
 0x9c9   : > { %v10130_v2 = vpop.eup %10129  ;;  %v14719_v26 = vmul.f32 %v6181_v23, %v5887_v59  ;;  %6275 = vmatpush.msra.mxu0 %v9055_v31  ;;  %v9924_v46 = vld [vmem:[%s15667_s3 + $0x220] sm:$0xff]  ;;  %v9915_v23 = vld [vmem:[%s15667_s3 + $0x1d8] sm:$0xff]  ;;  %v9922_v59 = vld [vmem:[%s15667_s3 + $0x210] sm:$0xff] }
 0x9ca   : > { %v9029_v63 = vclamps-f32 %v6173_v16, 1.0  ;;  %v6192_v47 = vadd.f32 %v6191_v17, %v14706_v36  ;;  %v6205_v15 = vmul.f32 49.0, %v10130_v2  ;;  %vm6209_vm13 = vweird.f32 %v10130_v2  ;;  %6487 = vmatpush.bf16.msrb.mxu3 %v9910_v54  ;;  %6422 = vmatpush.bf16.msra.mxu1 %v9917_v22  ;;  %v6268_v51 = vld [vmem:[%s15674_s10 + $0x2] sm:$0x1]  ;;  %v9923_v34 = vld [vmem:[%s15667_s3 + $0x218] sm:$0xff]  ;;  %v9914_v17 = vld [vmem:[%s15667_s3 + $0x1d0] sm:$0xff] }
 0x9cb   : > { %6276 = vmatpush.msra.mxu0 %v9054_v21  ;;  %6579 = vmatpush.bf16.msra.mxu2 %v9925_v30  ;;  %v9904_v31 = vld [vmem:[%s15667_s3 + $0x180] sm:$0xff] }
 0x9cc   : > { %v6182_v62 = vadd.f32 1.0, %v9029_v63  ;;  %v6193_v10 = vadd.f32 %v6192_v47, %v14712_v3  ;;  %v6206_v58 = vsub.f32 1.0, %v6205_v15  ;;  %v9913_v63 = vld [vmem:[%s15667_s3 + $0x1c8] sm:$0xff]  ;;  %v9920_v15 = vld [vmem:[%s15667_s3 + $0x200] sm:$0xff] }
 0x9cd   : > { %6277 = vmatpush.msra.mxu0 %v9053_v1  ;;  %v9921_v47 = vld [vmem:[%s15667_s3 + $0x208] sm:$0xff]  ;;  %v10017_v7 = vld [vmem:[%s15669_s5 + $0x3] ss:$0 sm:$0xff] }
 0x9ce   : > { %v14729_v25 = vmul.f32 %v6182_v62, %v5888_v48  ;;  %v6194_v53 = vadd.f32 %v6193_v10, %v14719_v26  ;;  %v6207_v5 = vmul.f32 %v10130_v2, %v6206_v58  ;;  %6488 = vmatpush.bf16.msrb.mxu3 %v9909_v29  ;;  %6423 = vmatpush.bf16.msra.mxu1 %v9916_v19  ;;  %v9912_v48 = vld [vmem:[%s15667_s3 + $0x1c0] sm:$0xff] }
 0x9cf   : > { %6278 = vmatpush.msra.mxu0 %v9052_v8  ;;  %6580 = vmatpush.bf16.msra.mxu2 %v9924_v46 }
 0x9d0   : > { %v6196_v39 = vsel %vm6195_vm12, %v14729_v25, 0.0  ;;  %v6208_v38 = vadd.f32 %v10130_v2, %v6207_v5 }
 0x9d1   : > { %v6197_v43 = vadd.f32 %v6196_v39, %v6194_v53  ;;  %6279 = vmatpush.msra.mxu0 %v9051_v45 }
 0x9d2   : > { %v6210_v60 = vsel %vm6209_vm13, %v10130_v2, %v6208_v38  ;;  %6489 = vmatpush.bf16.msrb.mxu3 %v9908_v44  ;;  %6424 = vmatpush.bf16.msra.mxu1 %v9915_v23  ;;  %v9906_v2 = vld [vmem:[%s15667_s3 + $0x190] sm:$0xff] }
 0x9d3   : > { %v6198_v52 = vrot.slane %v6197_v43, 4  ;;  %6280 = vmatpush.msra.mxu0 %v9050_v33  ;;  %6581 = vmatpush.bf16.msra.mxu2 %v9923_v34 }
 0x9d5   : > { %v6199_v32 = vadd.f32 %v6198_v52, %v6197_v43  ;;  %6281 = vmatpush.msra.mxu0 %v9049_v41 }
 0x9d6   : > { %6490 = vmatpush.bf16.msrb.mxu3 %v9907_v27  ;;  %6425 = vmatpush.bf16.msra.mxu1 %v9914_v17 }
 0x9d7   : > { %v6200_v42 = vrot.slane %v6199_v32, 2  ;;  %6282 = vmatpush.msra.mxu0 %v9048_v9  ;;  %6582 = vmatpush.bf16.msra.mxu2 %v9922_v59 }
 0x9d9   : > { %v6201_v40 = vadd.f32 %v6200_v42, %v6199_v32  ;;  %6283 = vmatpush.msra.mxu0 %v9047_v57 }
 0x9da   : > { %6491 = vmatpush.bf16.msrb.mxu3 %v9906_v2  ;;  %6426 = vmatpush.bf16.msra.mxu1 %v9913_v63 }
 0x9db   : > { %v6202_v12 = vrot.slane %v6201_v40, 1  ;;  %6284 = vmatpush.msra.mxu0 %v9046_v49  ;;  %6583 = vmatpush.bf16.msra.mxu2 %v9921_v47 }
 0x9dd   : > { %v6203_v35 = vadd.f32 %v6202_v12, %v6201_v40 }
 0x9de   : > { %6492 = vmatpush.bf16.msrb.mxu3 %v9905_v56  ;;  %6427 = vmatpush.bf16.msra.mxu1 %v9912_v48 }
 0x9df   : > { %v6211_v28 = vmul.f32 %v6210_v60, %v6203_v35  ;;  %6584 = vmatpush.bf16.msra.mxu2 %v9920_v15 }
 0x9e1   : > { %6246 = vmatmul.f32.vlgmr.msrb.gmra.mxu2 %v6211_v28 }
 0x9e2   : > { %6493 = vmatpush.bf16.msrb.mxu3 %v9904_v31 }
 0xa64   : > { %v6247_v0 = vpop.f32.mrf.mxu2 }
 0xa65   : > { %v6248_v24 = vadd.f32 %v6247_v0, %v6229_v37 }
 0xa67   : > { %v6250_v14 = vmax.f32 %v6248_v24, 0.0  ;;  %v10016_v24 = vld [vmem:[%s15668_s4 + $0x3] ss:$0 sm:$0xff] }
 0xa69   : > { %6285 = vmatmul.f32.vlgmr.msra.gmra.mxu0 %v6250_v14 }
 0xae6   : > { %v6286_v20 = vpop.f32.mrf.mxu0 }
 0xae7   : > { %v6287_v4 = vadd.f32 %v6286_v20, %v6268_v51 }
 0xae9   : > { %v9062_v16 = vmul.f32 -1.442695, %v6287_v4 }
 0xaeb   : > { %10131 = vpow2.f32 %v9062_v16 }
 0xaf1   : > { %v10132_v62 = vpop.eup %10131 }
 0xaf2   : > { %v6292_v10 = vadd.f32 1.0, %v10132_v62 }
 0xaf4   : > { %10133 = vrcp.f32 %v6292_v10  ;;  %v6304_v39 = vand.u32 2147483648, %v6292_v10  ;;  %v6302_v43 = vand.u32 2147483647, %v6292_v10  ;;  %vm6298_vm15 = vweird.f32 %v6292_v10 }
 0xaf6   : > { %v6305_v52 = vor.u32 1.1754944e-38, %v6304_v39  ;;  %vm6303_vm0 = vcmp.eq.f32.partialorder %v6302_v43, 8.507059e+37 }
 0xafa   : > { %v10134_v21 = vpop.eup %10133 }
 0xafb   : > { %v6294_v53 = vmul.f32 %v10134_v21, %v6292_v10  ;;  %vm6299_vm14 = vweird.f32 %v10134_v21 }
 0xafc   : > { %vm6300_vm1 = vmor %vm6298_vm15, %vm6299_vm14 }
 0xafd   : > { %v6295_v1 = vsub.f32 1.0, %v6294_v53 }
 0xaff   : > { %v6296_v58 = vmul.f32 %v10134_v21, %v6295_v1 }
 0xb01   : > { %v6297_v8 = vadd.f32 %v10134_v21, %v6296_v58 }
 0xb03   : > { %v6301_v45 = vsel %vm6300_vm1, %v10134_v21, %v6297_v8 }
 0xb04   : > { %v6306_v5 = vsel %vm6303_vm0, %v6305_v52, %v6301_v45 }
 0xb05   : > { %v6308_v32 = vperm.slane %v6306_v5, 0 }
 0xb07   : > { %v6309_v33 = vmul.f32 %v6308_v32, %v14694_v6  ;;  %v6310_v42 = vmul.f32 %v6308_v32, %v14687_v50  ;;  %v6311_v41 = vmul.f32 %v6308_v32, %v14696_v61  ;;  %v6312_v38 = vmul.f32 %v6308_v32, %v14706_v36 }
 0xb08   : > { %v6313_v40 = vmul.f32 %v6308_v32, %v14712_v3  ;;  %v6314_v9 = vmul.f32 %v6308_v32, %v14719_v26  ;;  %v6315_v12 = vmul.f32 %v6308_v32, %v14729_v25 }
 0xb09   : > { %6316 = vst [vmem:[#allocation4] sm:$0xff] %v6309_v33 }
 0xb0a   : > { %6317 = vst [vmem:[#allocation4 + $0x8] sm:$0xff] %v6310_v42 }
 0xb0b   : > { %6318 = vst [vmem:[#allocation4 + $0x10] sm:$0xff] %v6311_v41 }
 0xb0c   : > { %6319 = vst [vmem:[#allocation4 + $0x18] sm:$0xff] %v6312_v38 }
 0xb0d   : > { %6320 = vst [vmem:[#allocation4 + $0x20] sm:$0xff] %v6313_v40 }
 0xb0e   : > { %6321 = vst [vmem:[#allocation4 + $0x28] sm:$0xff] %v6314_v9 }
 0xb0f   : > { %6322 = vst [vmem:[#allocation4 + $0x30] sm:$0x1] %v6315_v12 }
 0xb11   : > { %v6348_v6 = vld [vmem:[#allocation4 + $0x1] ss:$2 sm:$0xff]  ;;  %v6323_v57 = vld [vmem:[#allocation4] ss:$2 sm:$0xff] }
 0xb12   : > { %v6505_v50 = vld [vmem:[#allocation4 + $0x2] ss:$2 sm:$0xff] }
 0xb13   : > { %v6350_v60 = vld [vmem:[#allocation4 + $0x11] ss:$2 sm:$0xff]  ;;  %v6325_v61 = vld [vmem:[#allocation4 + $0x10] ss:$2 sm:$0xff] }
 0xb14   : > { %v6353_v35 = vpack.c.bf16 %v6350_v60, %v6348_v6  ;;  %v6328_v36 = vpack.c.bf16 %v6325_v61, %v6323_v57  ;;  %v6507_v28 = vld [vmem:[#allocation4 + $0x12] ss:$2 sm:$0xff] }
 0xb15   : > { %v6510_v3 = vpack.c.bf16 %v6507_v28, %v6505_v50  ;;  %v6352_v26 = vld [vmem:[#allocation4 + $0x21] ss:$2 sm:$0xff]  ;;  %v6327_v49 = vld [vmem:[#allocation4 + $0x20] ss:$2 sm:$0xff] }
 0xb16   : > { %6428 = vmatmul.bf16.vlgmr.msra.gmra.mxu1 %v6353_v35  ;;  %6494 = vmatmul.bf16.vlgmr.msrb.gmra.mxu3 %v6328_v36  ;;  %v6509_v55 = vld [vmem:[#allocation4 + $0x22] ss:$2 sm:$0xff]  ;;  %v6354_v25 = vpack.c.bf16 %v6352_v26, %v6352_v26  ;;  %v6329_v18 = vpack.c.bf16 %v6327_v49, %v6327_v49 }
 0xb17   : > { %6585 = vmatmul.bf16.vlgmr.msra.gmra.mxu2 %v6510_v3  ;;  %v6511_v54 = vpack.c.bf16 %v6509_v55, %v6509_v55 }
 0xb26   : > { %6433 = vmatmul.bf16.gmra.mxu1 %v6354_v25  ;;  %6499 = vmatmul.bf16.gmra.mxu3 %v6329_v18  ;;  %v9225_v18 = vld [vmem:[%s15671_s7 + $0x1f8] sm:$0xff] }
 0xb27   : > { %6590 = vmatmul.bf16.gmra.mxu2 %v6511_v54  ;;  %6774 = vmatpush.msrb.mxu0 %v9225_v18  ;;  %v9213_v18 = vld [vmem:[%s15671_s7 + $0x198] sm:$0xff] }
 0xb93   : > { %v6429_v11 = vpop.f32.mrf.mxu1 }
 0xb99   : > { %v6495_v29 = vpop.f32.mrf.mxu3 }
 0xb9a   : > { %v6496_v37 = vadd.f32 %v6495_v29, %v6429_v11  ;;  %v6586_v0 = vpop.f32.mrf.mxu2  ;;  %v9224_v11 = vld [vmem:[%s15671_s7 + $0x1f0] sm:$0xff] }
 0xb9b   : > { %v6431_v14 = vpop.f32.mrf.mxu1  ;;  %6775 = vmatpush.msrb.mxu0 %v9224_v11 }
 0xb9c   : > { %v6595_v13 = vadd.f32 %v6586_v0, %v6496_v37 }
 0xb9e   : > { %v6600_v22 = vmul.f32 %v10016_v24, %v6595_v13  ;;  %v9223_v13 = vld [vmem:[%s15671_s7 + $0x1e8] sm:$0xff] }
 0xb9f   : > { %6776 = vmatpush.msrb.mxu0 %v9223_v13 }
 0xba0   : > { %v14848_v30 = vadd.f32 %v10017_v7, %v6600_v22 }
 0xba1   : > { %v6497_v44 = vpop.f32.mrf.mxu3 }
 0xba2   : > { %v14851_v19 = vmul.f32 0.70710677, %v14848_v30  ;;  %v6498_v46 = vadd.f32 %v6497_v44, %v6431_v14  ;;  %v6588_v51 = vpop.f32.mrf.mxu2  ;;  %v9222_v44 = vld [vmem:[%s15671_s7 + $0x1e0] sm:$0xff] }
 0xba3   : > { %v6434_v20 = vpop.f32.mrf.mxu1  ;;  %6777 = vmatpush.msrb.mxu0 %v9222_v44 }
 0xba4   : > { %v6614_v27 = vmul.f32 %v14851_v19, %v14851_v19  ;;  %v6596_v23 = vadd.f32 %v6588_v51, %v6498_v46 }
 0xba6   : > { %v14855_v34 = vmin.f32 %v6614_v27, 16.0  ;;  %v6601_v4 = vmul.f32 %v10016_v24, %v6596_v23 }
 0xba8   : > { %v6627_v16 = vmul.f32 3.8918573e-05, %v14855_v34  ;;  %v14858_v2 = vadd.f32 %v10017_v7, %v6601_v4  ;;  %v6616_v15 = vmul.f32 2.1237322e-06, %v14855_v34 }
 0xba9   : > { %v6500_v17 = vpop.f32.mrf.mxu3 }
 0xbaa   : > { %v6628_v59 = vadd.f32 0.001143296, %v6627_v16  ;;  %v6501_v56 = vadd.f32 %v6500_v17, %v6434_v20  ;;  %v6591_v63 = vpop.f32.mrf.mxu2  ;;  %v14861_v47 = vmul.f32 0.70710677, %v14858_v2  ;;  %v6617_v43 = vadd.f32 0.00028619796, %v6616_v15 }
 0xbab   : > { %v6436_v31 = vpop.f32.mrf.mxu1  ;;  %v9221_v16 = vld [vmem:[%s15671_s7 + $0x1d8] sm:$0xff]  ;;  %v9219_v15 = vld [vmem:[%s15671_s7 + $0x1c8] sm:$0xff] }
 0xbac   : > { %v6629_v48 = vmul.f32 %v6628_v59, %v14855_v34  ;;  %v6597_v62 = vadd.f32 %v6591_v63, %v6501_v56  ;;  %v6654_v10 = vmul.f32 %v14861_v47, %v14861_v47  ;;  %v6618_v40 = vmul.f32 %v6617_v43, %v14855_v34  ;;  %6778 = vmatpush.msrb.mxu0 %v9221_v16  ;;  %v9220_v56 = vld [vmem:[%s15671_s7 + $0x1d0] sm:$0xff]  ;;  %v9241_v16 = vld [vmem:[%s15673_s9 + $0x1f8] sm:$0xff] }
 0xbad   : > { %6813 = vmatpush.msrb.mxu1 %v9241_v16  ;;  %v9941_v16 = vld [vmem:[%s15667_s3 + $0x2a8] sm:$0xff] }
 0xbae   : > { %v6630_v21 = vadd.f32 0.014752088, %v6629_v48  ;;  %v6602_v53 = vmul.f32 %v10016_v24, %v6597_v62  ;;  %v14867_v1 = vmin.f32 %v6654_v10, 16.0  ;;  %v6619_v35 = vadd.f32 0.0036580483, %v6618_v40  ;;  %6779 = vmatpush.msrb.mxu0 %v9220_v56 }
 0xbb0   : > { %v6631_v39 = vmul.f32 %v6630_v21, %v14855_v34  ;;  %v14870_v58 = vadd.f32 %v10017_v7, %v6602_v53  ;;  %v6656_v8 = vmul.f32 2.1237322e-06, %v14867_v1  ;;  %v6667_v52 = vmul.f32 3.8918573e-05, %v14867_v1  ;;  %6780 = vmatpush.msrb.mxu0 %v9219_v15  ;;  %v9218_v53 = vld [vmem:[%s15671_s7 + $0x1c0] sm:$0xff] }
 0xbb1   : > { %v6502_v45 = vpop.f32.mrf.mxu3  ;;  %v6620_v29 = vmul.f32 %v6619_v35, %v14855_v34 }
 0xbb2   : > { %v6632_v5 = vadd.f32 0.112945676, %v6631_v39  ;;  %v6593_v32 = vpop.f32.mrf.mxu2  ;;  %v6657_v33 = vadd.f32 0.00028619796, %v6656_v8  ;;  %v6668_v42 = vadd.f32 0.001143296, %v6667_v52  ;;  %6781 = vmatpush.msrb.mxu0 %v9218_v53 }
 0xbb3   : > { %v14875_v41 = vmul.f32 0.70710677, %v14870_v58  ;;  %v6621_v51 = vadd.f32 0.05243302, %v6620_v29 }
 0xbb4   : > { %v6633_v38 = vmul.f32 %v6632_v5, %v14855_v34  ;;  %v6669_v9 = vmul.f32 %v6668_v42, %v14867_v1  ;;  %v6658_v57 = vmul.f32 %v6657_v33, %v14867_v1  ;;  %v9217_v5 = vld [vmem:[%s15671_s7 + $0x1b8] sm:$0xff] }
 0xbb5   : > { %v6694_v12 = vmul.f32 %v14875_v41, %v14875_v41  ;;  %v6622_v63 = vmul.f32 %v6621_v51, %v14855_v34  ;;  %6782 = vmatpush.msrb.mxu0 %v9217_v5 }
 0xbb6   : > { %v6634_v6 = vadd.f32 0.4994258, %v6633_v38  ;;  %v6670_v50 = vadd.f32 0.014752088, %v6669_v9  ;;  %v6659_v26 = vadd.f32 0.0036580483, %v6658_v57 }
 0xbb7   : > { %v14883_v60 = vmin.f32 %v6694_v12, 16.0  ;;  %v6623_v39 = vadd.f32 0.18741608, %v6622_v63  ;;  %v9216_v38 = vld [vmem:[%s15671_s7 + $0x1b0] sm:$0xff] }
 0xbb8   : > { %v6635_v61 = vmul.f32 %v6634_v6, %v14855_v34  ;;  %v6671_v36 = vmul.f32 %v6670_v50, %v14867_v1  ;;  %v6660_v37 = vmul.f32 %v6659_v26, %v14867_v1  ;;  %6783 = vmatpush.msrb.mxu0 %v9216_v38 }
 0xbb9   : > { %v6696_v28 = vmul.f32 2.1237322e-06, %v14883_v60  ;;  %v6707_v49 = vmul.f32 3.8918573e-05, %v14883_v60  ;;  %v6624_v40 = vmul.f32 %v6623_v39, %v14855_v34 }
 0xbba   : > { %v14888_v3 = vadd.f32 1.0, %v6635_v61  ;;  %v6672_v55 = vadd.f32 0.112945676, %v6671_v36  ;;  %v6661_v20 = vadd.f32 0.05243302, %v6660_v37  ;;  %v9215_v61 = vld [vmem:[%s15671_s7 + $0x1a8] sm:$0xff] }
 0xbbb   : > { %v6697_v25 = vadd.f32 0.00028619796, %v6696_v28  ;;  %v6708_v0 = vadd.f32 0.001143296, %v6707_v49  ;;  %6784 = vmatpush.msrb.mxu0 %v9215_v61  ;;  %v9214_v28 = vld [vmem:[%s15671_s7 + $0x1a0] sm:$0xff] }
 0xbbc   : > { %10135 = vrcp.f32 %v14888_v3  ;;  %v6673_v54 = vmul.f32 %v6672_v55, %v14867_v1  ;;  %v6662_v31 = vmul.f32 %v6661_v20, %v14867_v1  ;;  %vm6642_vm4 = vweird.f32 %v14888_v3 }
 0xbbd   : > { %v6698_v14 = vmul.f32 %v6697_v25, %v14883_v60  ;;  %v6709_v7 = vmul.f32 %v6708_v0, %v14883_v60  ;;  %v6646_v49 = vand.u32 2147483647, %v14888_v3  ;;  %6785 = vmatpush.msrb.mxu0 %v9214_v28  ;;  %v6625_v29 = vadd.f32 1.1283791, %v6624_v40  ;;  %v9231_v28 = vld [vmem:[%s15673_s9 + $0x1a8] sm:$0xff] }
 0xbbe   : > { %v6674_v24 = vadd.f32 0.4994258, %v6673_v54  ;;  %v6663_v43 = vadd.f32 0.18741608, %v6662_v31 }
 0xbbf   : > { %v6710_v27 = vadd.f32 0.014752088, %v6709_v7  ;;  %v6699_v4 = vadd.f32 0.0036580483, %v6698_v14  ;;  %6786 = vmatpush.msrb.mxu0 %v9213_v18  ;;  %vm6647_vm10 = vcmp.eq.f32.partialorder %v6646_v49, 8.507059e+37  ;;  %v9211_v7 = vld [vmem:[%s15671_s7 + $0x188] sm:$0xff]  ;;  %v6626_v51 = vmul.f32 %v6625_v29, %v14851_v19 }
 0xbc0   : > { %v6675_v22 = vmul.f32 %v6674_v24, %v14867_v1  ;;  %v6664_v9 = vmul.f32 %v6663_v43, %v14867_v1  ;;  %v6648_v1 = vand.u32 2147483648, %v14888_v3  ;;  %v9229_v18 = vld [vmem:[%s15673_s9 + $0x198] sm:$0xff]  ;;  %v9228_v29 = vld [vmem:[%s15673_s9 + $0x190] sm:$0xff] }
 0xbc1   : > { %v6711_v59 = vmul.f32 %v6710_v27, %v14883_v60  ;;  %v6700_v62 = vmul.f32 %v6699_v4, %v14883_v60 }
 0xbc2   : > { %v14910_v46 = vpop.eup %10135  ;;  %v14912_v23 = vadd.f32 1.0, %v6675_v22  ;;  %v6665_v55 = vadd.f32 1.1283791, %v6664_v9  ;;  %v6649_v24 = vor.u32 1.1754944e-38, %v6648_v1  ;;  %v9235_v9 = vld [vmem:[%s15673_s9 + $0x1c8] sm:$0xff] }
 0xbc3   : > { %v6638_v17 = vmul.f32 %v14910_v46, %v14888_v3  ;;  %v6712_v48 = vadd.f32 0.112945676, %v6711_v59  ;;  %v6701_v45 = vadd.f32 0.05243302, %v6700_v62  ;;  %vm6643_vm2 = vweird.f32 %v14910_v46  ;;  %v9212_v3 = vld [vmem:[%s15671_s7 + $0x190] sm:$0xff] }
 0xbc4   : > { %10137 = vrcp.f32 %v14912_v23  ;;  %v6688_v6 = vand.u32 2147483648, %v14912_v23  ;;  %v6686_v34 = vand.u32 2147483647, %v14912_v23  ;;  %vm14963_vm5 = vmor %vm6642_vm4, %vm6643_vm2  ;;  %vm6682_vm6 = vweird.f32 %v14912_v23  ;;  %6787 = vmatpush.msrb.mxu0 %v9212_v3 }
 0xbc5   : > { %v6639_v10 = vsub.f32 1.0, %v6638_v17  ;;  %v6713_v21 = vmul.f32 %v6712_v48, %v14883_v60  ;;  %v6702_v57 = vmul.f32 %v6701_v45, %v14883_v60  ;;  %v6666_v13 = vmul.f32 %v6665_v55, %v14861_v47  ;;  %v9239_v48 = vld [vmem:[%s15673_s9 + $0x1e8] sm:$0xff]  ;;  %v9230_v55 = vld [vmem:[%s15673_s9 + $0x1a0] sm:$0xff] }
 0xbc6   : > { %v6689_v54 = vor.u32 1.1754944e-38, %v6688_v6  ;;  %vm6687_vm9 = vcmp.eq.f32.partialorder %v6686_v34, 8.507059e+37  ;;  %6788 = vmatpush.msrb.mxu0 %v9211_v7  ;;  %v10184_v59 = vmov 24.0   ;;  %v6773_v7 = vld [vmem:[%s15672_s8 + $0x3] sm:$0x1] }
 0xbc7   : > { %v6714_v8 = vadd.f32 0.4994258, %v6713_v21  ;;  %v6640_v32 = vmul.f32 %v14910_v46, %v6639_v10  ;;  %v6703_v11 = vadd.f32 0.18741608, %v6702_v57  ;;  %v9238_v10 = vld [vmem:[%s15673_s9 + $0x1e0] sm:$0xff] }
 0xbc9   : > { %v6715_v42 = vmul.f32 %v6714_v8, %v14883_v60  ;;  %v6641_v35 = vadd.f32 %v14910_v46, %v6640_v32  ;;  %v9237_v8 = vld [vmem:[%s15673_s9 + $0x1d8] sm:$0xff]  ;;  %v6609_v32 = vmul.f32 0.5, %v14858_v2  ;;  %v6610_v2 = vmul.f32 0.5, %v14870_v58  ;;  %v9232_v58 = vld [vmem:[%s15673_s9 + $0x1b0] sm:$0xff] }
 0xbca   : > { %v10138_v52 = vpop.eup %10137 }
 0xbcb   : > { %v6678_v33 = vmul.f32 %v10138_v52, %v14912_v23  ;;  %v14948_v50 = vadd.f32 1.0, %v6715_v42  ;;  %vm6683_vm3 = vweird.f32 %v10138_v52  ;;  %v6645_v37 = vsel %vm14963_vm5, %v14910_v46, %v6641_v35  ;;  %v9210_v23 = vld [vmem:[%s15671_s7 + $0x180] sm:$0xff]  ;;  %v9236_v42 = vld [vmem:[%s15673_s9 + $0x1d0] sm:$0xff]  ;;  %v9233_v35 = vld [vmem:[%s15673_s9 + $0x1b8] sm:$0xff] }
 0xbcc   : > { %vm6684_vm7 = vmor %vm6682_vm6, %vm6683_vm3  ;;  %v6650_v44 = vsel %vm6647_vm10, %v6649_v24, %v6645_v37  ;;  %v6704_v46 = vmul.f32 %v6703_v11, %v14883_v60  ;;  %v9240_v60 = vld [vmem:[%s15673_s9 + $0x1f0] sm:$0xff]  ;;  %6789 = vmatpush.msrb.mxu0 %v9210_v23 }
 0xbcd   : > { %v6679_v12 = vsub.f32 1.0, %v6678_v33  ;;  %10139 = vrcp.f32 %v14948_v50  ;;  %v6651_v47 = vmul.f32 %v6650_v44, %v6626_v51  ;;  %v6728_v19 = vand.u32 2147483648, %v14948_v50  ;;  %6814 = vmatpush.msrb.mxu1 %v9240_v60  ;;  %v9943_v51 = vld [vmem:[%s15667_s3 + $0x2b8] sm:$0xff]  ;;  %v9942_v23 = vld [vmem:[%s15667_s3 + $0x2b0] sm:$0xff]  ;;  %v9933_v60 = vld [vmem:[%s15667_s3 + $0x268] sm:$0xff] }
 0xbce   : > { %v6705_v17 = vadd.f32 1.1283791, %v6704_v46  ;;  %10141 = vrcp.f32 %v10184_v59  ;;  %v6726_v31 = vand.u32 2147483647, %v14948_v50  ;;  %vm6722_vm12 = vweird.f32 %v14948_v50  ;;  %6950 = vmatpush.bf16.msra.mxu3 %v9943_v51  ;;  %v9932_v59 = vld [vmem:[%s15667_s3 + $0x260] sm:$0xff] }
 0xbcf   : > { %v6680_v36 = vmul.f32 %v10138_v52, %v6679_v12  ;;  %v9207_v62 = vclamps-f32 %v6651_v47, 1.0  ;;  %v6729_v21 = vor.u32 1.1754944e-38, %v6728_v19  ;;  %6815 = vmatpush.msrb.mxu1 %v9239_v48  ;;  %v9934_v47 = vld [vmem:[%s15667_s3 + $0x270] sm:$0xff]  ;;  %v9940_v19 = vld [vmem:[%s15667_s3 + $0x2a0] sm:$0xff]  ;;  %v9931_v48 = vld [vmem:[%s15667_s3 + $0x258] sm:$0xff] }
 0xbd0   : > { %v6706_v39 = vmul.f32 %v6705_v17, %v14875_v41  ;;  %vm6727_vm14 = vcmp.eq.f32.partialorder %v6726_v31, 8.507059e+37  ;;  %v6608_v41 = vmul.f32 0.5, %v14848_v30  ;;  %v9949_v17 = vld [vmem:[%s15667_s3 + $0x2e8] sm:$0xff]  ;;  %v9939_v31 = vld [vmem:[%s15667_s3 + $0x298] sm:$0xff] }
 0xbd1   : > { %v6681_v25 = vadd.f32 %v10138_v52, %v6680_v36  ;;  %6816 = vmatpush.msrb.mxu1 %v9238_v10  ;;  %v6734_v5 = vadd.f32 1.0, %v9207_v62  ;;  %v9947_v62 = vld [vmem:[%s15667_s3 + $0x2d8] sm:$0xff] }
 0xbd2   : > { %6951 = vmatpush.bf16.msra.mxu3 %v9942_v23 }
 0xbd3   : > { %v6685_v0 = vsel %vm6684_vm7, %v10138_v52, %v6681_v25  ;;  %v10140_v22 = vpop.eup %10139  ;;  %6817 = vmatpush.msrb.mxu1 %v9237_v8  ;;  %v15017_v6 = vmul.f32 %v6734_v5, %v6608_v41  ;;  %v9937_v8 = vld [vmem:[%s15667_s3 + $0x288] sm:$0xff]  ;;  %v9936_v5 = vld [vmem:[%s15667_s3 + $0x280] sm:$0xff] }
 0xbd4   : > { %v6690_v14 = vsel %vm6687_vm9, %v6689_v54, %v6685_v0  ;;  %v6718_v27 = vmul.f32 %v10140_v22, %v14948_v50  ;;  %vm6723_vm11 = vweird.f32 %v10140_v22  ;;  %v10142_v52 = vpop.eup %10141  ;;  %v9234_v50 = vld [vmem:[%s15673_s9 + $0x1c0] sm:$0xff] }
 0xbd5   : > { %v6691_v20 = vmul.f32 %v6690_v14, %v6666_v13  ;;  %vm6724_vm13 = vmor %vm6722_vm12, %vm6723_vm11  ;;  %v6749_v12 = vmul.f32 24.0, %v10142_v52  ;;  %6818 = vmatpush.msrb.mxu1 %v9236_v42  ;;  %vm6753_vm15 = vweird.f32 %v10142_v52  ;;  %v9227_v14 = vld [vmem:[%s15673_s9 + $0x188] sm:$0xff]  ;;  %v9226_v13 = vld [vmem:[%s15673_s9 + $0x180] sm:$0xff] }
 0xbd6   : > { %v6719_v4 = vsub.f32 1.0, %v6718_v27  ;;  %v9951_v27 = vld [vmem:[%s15667_s3 + $0x2f8] sm:$0xff]  ;;  %6952 = vmatpush.bf16.msra.mxu3 %v9941_v16 }
 0xbd7   : > { %v9208_v56 = vclamps-f32 %v6691_v20, 1.0  ;;  %6819 = vmatpush.msrb.mxu1 %v9235_v9  ;;  %v6750_v36 = vsub.f32 1.0, %v6749_v12  ;;  %v9935_v20 = vld [vmem:[%s15667_s3 + $0x278] sm:$0xff]  ;;  %7096 = vmatpush.bf16.msra.mxu0 %v9951_v27 }
 0xbd8   : > { %v6720_v63 = vmul.f32 %v10140_v22, %v6719_v4  ;;  %7012 = vmatpush.bf16.msrb.mxu2 %v9935_v20  ;;  %v9950_v4 = vld [vmem:[%s15667_s3 + $0x2f0] sm:$0xff] }
 0xbd9   : > { %v6735_v53 = vadd.f32 1.0, %v9208_v56  ;;  %6820 = vmatpush.msrb.mxu1 %v9234_v50  ;;  %v6751_v26 = vmul.f32 %v10142_v52, %v6750_v36  ;;  %v9948_v56 = vld [vmem:[%s15667_s3 + $0x2e0] sm:$0xff] }
 0xbda   : > { %v6721_v15 = vadd.f32 %v10140_v22, %v6720_v63  ;;  %6953 = vmatpush.bf16.msra.mxu3 %v9940_v19  ;;  %v6812_v63 = vld [vmem:[%s15674_s10 + $0x3] sm:$0x1] }
 0xbdb   : > { %v15012_v38 = vmul.f32 %v6735_v53, %v6609_v32  ;;  %6821 = vmatpush.msrb.mxu1 %v9233_v35  ;;  %v6752_v54 = vadd.f32 %v10142_v52, %v6751_v26  ;;  %7097 = vmatpush.bf16.msra.mxu0 %v9950_v4  ;;  %v9930_v53 = vld [vmem:[%s15667_s3 + $0x250] sm:$0xff]  ;;  %v9928_v32 = vld [vmem:[%s15667_s3 + $0x240] sm:$0xff] }
 0xbdc   : > { %v6725_v43 = vsel %vm6724_vm13, %v10140_v22, %v6721_v15  ;;  %7013 = vmatpush.bf16.msrb.mxu2 %v9934_v47 }
 0xbdd   : > { %v6730_v45 = vsel %vm6727_vm14, %v6729_v21, %v6725_v43  ;;  %v6740_v30 = vadd.f32 %v15012_v38, %v15017_v6  ;;  %6822 = vmatpush.msrb.mxu1 %v9232_v58  ;;  %v6754_v0 = vsel %vm6753_vm15, %v10142_v52, %v6752_v54  ;;  %v9938_v21 = vld [vmem:[%s15667_s3 + $0x290] sm:$0xff]  ;;  %v9929_v52 = vld [vmem:[%s15667_s3 + $0x248] sm:$0xff] }
 0xbde   : > { %v6731_v33 = vmul.f32 %v6730_v45, %v6706_v39  ;;  %6954 = vmatpush.bf16.msra.mxu3 %v9939_v31  ;;  %v9946_v39 = vld [vmem:[%s15667_s3 + $0x2d0] sm:$0xff]  ;;  %v9945_v45 = vld [vmem:[%s15667_s3 + $0x2c8] sm:$0xff] }
 0xbdf   : > { %6823 = vmatpush.msrb.mxu1 %v9231_v28  ;;  %7098 = vmatpush.bf16.msra.mxu0 %v9949_v17 }
 0xbe0   : > { %v9209_v40 = vclamps-f32 %v6731_v33, 1.0  ;;  %7014 = vmatpush.bf16.msrb.mxu2 %v9933_v60  ;;  %v9944_v33 = vld [vmem:[%s15667_s3 + $0x2c0] sm:$0xff] }
 0xbe1   : > { %6824 = vmatpush.msrb.mxu1 %v9230_v55 }
 0xbe2   : > { %v6736_v57 = vadd.f32 1.0, %v9209_v40  ;;  %6955 = vmatpush.bf16.msra.mxu3 %v9938_v21 }
 0xbe3   : > { %6825 = vmatpush.msrb.mxu1 %v9229_v18  ;;  %7099 = vmatpush.bf16.msra.mxu0 %v9948_v56 }
 0xbe4   : > { %v15025_v61 = vmul.f32 %v6736_v57, %v6610_v2  ;;  %7015 = vmatpush.bf16.msrb.mxu2 %v9932_v59 }
 0xbe5   : > { %6826 = vmatpush.msrb.mxu1 %v9228_v29 }
 0xbe6   : > { %v6741_v34 = vadd.f32 %v6740_v30, %v15025_v61  ;;  %6956 = vmatpush.bf16.msra.mxu3 %v9937_v8 }
 0xbe7   : > { %6827 = vmatpush.msrb.mxu1 %v9227_v14  ;;  %7100 = vmatpush.bf16.msra.mxu0 %v9947_v62 }
 0xbe8   : > { %v6742_v1 = vrot.slane %v6741_v34, 4  ;;  %7016 = vmatpush.bf16.msrb.mxu2 %v9931_v48 }
 0xbe9   : > { %6828 = vmatpush.msrb.mxu1 %v9226_v13  ;;  %v10019_v13 = vld [vmem:[%s15669_s5 + $0x4] ss:$0 sm:$0xff] }
 0xbea   : > { %v6743_v49 = vadd.f32 %v6742_v1, %v6741_v34  ;;  %6957 = vmatpush.bf16.msra.mxu3 %v9936_v5 }
 0xbeb   : > { %7101 = vmatpush.bf16.msra.mxu0 %v9946_v39 }
 0xbec   : > { %v6744_v25 = vrot.slane %v6743_v49, 2  ;;  %7017 = vmatpush.bf16.msrb.mxu2 %v9930_v53  ;;  %v9404_v53 = vld [vmem:[%s15671_s7 + $0x278] sm:$0xff] }
 0xbed   : > { %7242 = vmatpush.msra.mxu1 %v9404_v53 }
 0xbee   : > { %v6745_v11 = vadd.f32 %v6744_v25, %v6743_v49 }
 0xbef   : > { %7102 = vmatpush.bf16.msra.mxu0 %v9945_v45 }
 0xbf0   : > { %v6746_v37 = vrot.slane %v6745_v11, 1  ;;  %7018 = vmatpush.bf16.msrb.mxu2 %v9929_v52  ;;  %v9403_v52 = vld [vmem:[%s15671_s7 + $0x270] sm:$0xff] }
 0xbf1   : > { %7243 = vmatpush.msra.mxu1 %v9403_v52 }
 0xbf2   : > { %v6747_v3 = vadd.f32 %v6746_v37, %v6745_v11 }
 0xbf3   : > { %7103 = vmatpush.bf16.msra.mxu0 %v9944_v33 }
 0xbf4   : > { %v6755_v24 = vmul.f32 %v6754_v0, %v6747_v3  ;;  %7019 = vmatpush.bf16.msrb.mxu2 %v9928_v32 }
 0xbf6   : > { %6790 = vmatmul.f32.vlgmr.msrb.gmra.mxu0 %v6755_v24 }
 0xc73   : > { %v6791_v22 = vpop.f32.mrf.mxu0 }
 0xc74   : > { %v6792_v44 = vadd.f32 %v6791_v22, %v6773_v7 }
 0xc76   : > { %v6794_v46 = vmax.f32 %v6792_v44, 0.0 }
 0xc78   : > { %6829 = vmatmul.f32.vlgmr.msrb.gmra.mxu1 %v6794_v46 }
 0xcf5   : > { %v6830_v15 = vpop.f32.mrf.mxu1 }
 0xcf6   : > { %v6831_v10 = vadd.f32 %v6830_v15, %v6812_v63 }
 0xcf8   : > { %v9242_v43 = vmul.f32 -1.442695, %v6831_v10 }
 0xcfa   : > { %10143 = vpow2.f32 %v9242_v43 }
 0xd00   : > { %v10144_v42 = vpop.eup %10143 }
 0xd01   : > { %v6836_v41 = vadd.f32 1.0, %v10144_v42  ;;  %v9402_v42 = vld [vmem:[%s15671_s7 + $0x268] sm:$0xff] }
 0xd02   : > { %7244 = vmatpush.msra.mxu1 %v9402_v42 }
 0xd03   : > { %10145 = vrcp.f32 %v6836_v41  ;;  %v6848_v2 = vand.u32 2147483648, %v6836_v41  ;;  %v6846_v50 = vand.u32 2147483647, %v6836_v41  ;;  %vm6842_vm0 = vweird.f32 %v6836_v41 }
 0xd05   : > { %v6849_v35 = vor.u32 1.1754944e-38, %v6848_v2  ;;  %vm6847_vm3 = vcmp.eq.f32.partialorder %v6846_v50, 8.507059e+37 }
 0xd09   : > { %v10146_v40 = vpop.eup %10145 }
 0xd0a   : > { %v6838_v9 = vmul.f32 %v10146_v40, %v6836_v41  ;;  %vm6843_vm1 = vweird.f32 %v10146_v40 }
 0xd0b   : > { %vm6844_vm2 = vmor %vm6842_vm0, %vm6843_vm1 }
 0xd0c   : > { %v6839_v12 = vsub.f32 1.0, %v6838_v9 }
 0xd0e   : > { %v6840_v57 = vmul.f32 %v10146_v40, %v6839_v12  ;;  %v9401_v12 = vld [vmem:[%s15671_s7 + $0x260] sm:$0xff] }
 0xd0f   : > { %7245 = vmatpush.msra.mxu1 %v9401_v12 }
 0xd10   : > { %v6841_v30 = vadd.f32 %v10146_v40, %v6840_v57 }
 0xd12   : > { %v6845_v36 = vsel %vm6844_vm2, %v10146_v40, %v6841_v30 }
 0xd13   : > { %v6850_v34 = vsel %vm6847_vm3, %v6849_v35, %v6845_v36  ;;  %v9400_v35 = vld [vmem:[%s15671_s7 + $0x258] sm:$0xff] }
 0xd14   : > { %v6852_v58 = vperm.slane %v6850_v34, 0  ;;  %7246 = vmatpush.msra.mxu1 %v9400_v35 }
 0xd16   : > { %v6853_v1 = vmul.f32 %v6852_v58, %v15017_v6  ;;  %v6854_v28 = vmul.f32 %v6852_v58, %v15012_v38  ;;  %v6855_v26 = vmul.f32 %v6852_v58, %v15025_v61  ;;  %v10018_v61 = vld [vmem:[%s15668_s4 + $0x4] ss:$0 sm:$0xff]  ;;  %v9399_v58 = vld [vmem:[%s15671_s7 + $0x250] sm:$0xff] }
 0xd17   : > { %7247 = vmatpush.msra.mxu1 %v9399_v58 }
 0xd18   : > { %6856 = vst [vmem:[#allocation5] sm:$0xff] %v6853_v1 }
 0xd19   : > { %6857 = vst [vmem:[#allocation5 + $0x8] sm:$0xff] %v6854_v28 }
 0xd1a   : > { %6858 = vst [vmem:[#allocation5 + $0x10] sm:$0xff] %v6855_v26 }
 0xd20   : > { %v6881_v49 = vld [vmem:[#allocation5 + $0x1] ss:$2 sm:$0xff]  ;;  %v6859_v55 = vld [vmem:[#allocation5] ss:$2 sm:$0xff] }
 0xd21   : > { %v6883_v25 = vld [vmem:[#allocation5 + $0x11] ss:$2 sm:$0x7]  ;;  %v6861_v18 = vld [vmem:[#allocation5 + $0x10] ss:$2 sm:$0x7] }
 0xd22   : > { %v6884_v54 = vpack.c.bf16 %v6883_v25, %v6881_v49  ;;  %v6862_v11 = vpack.c.bf16 %v6861_v18, %v6859_v55  ;;  %v7027_v29 = vld [vmem:[#allocation5 + $0x2] ss:$2 sm:$0xff]  ;;  %v7029_v37 = vld [vmem:[#allocation5 + $0x12] ss:$2 sm:$0x7]  ;;  %v9397_v25 = vld [vmem:[%s15671_s7 + $0x240] sm:$0xff] }
 0xd23   : > { %v7030_v0 = vpack.c.bf16 %v7029_v37, %v7027_v29  ;;  %v9398_v49 = vld [vmem:[%s15671_s7 + $0x248] sm:$0xff]  ;;  %v9396_v29 = vld [vmem:[%s15671_s7 + $0x238] sm:$0xff] }
 0xd24   : > { %6958 = vmatmul.bf16.vlgmr.msra.gmra.mxu3 %v6884_v54  ;;  %7020 = vmatmul.bf16.vlgmr.msrb.gmra.mxu2 %v6862_v11 }
 0xd25   : > { %7104 = vmatmul.bf16.vlgmr.msra.gmra.mxu0 %v7030_v0  ;;  %7248 = vmatpush.msra.mxu1 %v9398_v49 }
 0xd27   : > { %7249 = vmatpush.msra.mxu1 %v9397_v25 }
 0xd29   : > { %7250 = vmatpush.msra.mxu1 %v9396_v29  ;;  %v9411_v29 = vld [vmem:[%s15673_s9 + $0x230] sm:$0xff] }
 0xda2   : > { %v7105_v6 = vpop.f32.mrf.mxu0 }
 0xda7   : > { %v6959_v3 = vpop.f32.mrf.mxu3  ;;  %v7021_v38 = vpop.f32.mrf.mxu2 }
 0xda8   : > { %v7022_v24 = vadd.f32 %v7021_v38, %v6959_v3 }
 0xdaa   : > { %v7110_v14 = vadd.f32 %v7105_v6, %v7022_v24  ;;  %v7107_v27 = vpop.f32.mrf.mxu0  ;;  %v9395_v6 = vld [vmem:[%s15671_s7 + $0x230] sm:$0xff] }
 0xdab   : > { %7251 = vmatpush.msra.mxu1 %v9395_v6 }
 0xdac   : > { %v7114_v7 = vmul.f32 %v10018_v61, %v7110_v14  ;;  %v9394_v14 = vld [vmem:[%s15671_s7 + $0x228] sm:$0xff] }
 0xdad   : > { %7252 = vmatpush.msra.mxu1 %v9394_v14 }
 0xdae   : > { %v15139_v22 = vadd.f32 %v10019_v13, %v7114_v7  ;;  %v9393_v7 = vld [vmem:[%s15671_s7 + $0x220] sm:$0xff] }
 0xdaf   : > { %v6961_v44 = vpop.f32.mrf.mxu3  ;;  %v7023_v46 = vpop.f32.mrf.mxu2  ;;  %7253 = vmatpush.msra.mxu1 %v9393_v7 }
 0xdb0   : > { %v15142_v51 = vmul.f32 0.70710677, %v15139_v22  ;;  %v7024_v20 = vadd.f32 %v7023_v46, %v6961_v44  ;;  %v9392_v44 = vld [vmem:[%s15671_s7 + $0x218] sm:$0xff]  ;;  %v7120_v49 = vmul.f32 0.5, %v15139_v22 }
 0xdb1   : > { %7254 = vmatpush.msra.mxu1 %v9392_v44 }
 0xdb2   : > { %v7124_v23 = vmul.f32 %v15142_v51, %v15142_v51  ;;  %v7111_v47 = vadd.f32 %v7107_v27, %v7024_v20 }
 0xdb4   : > { %v15146_v4 = vmin.f32 %v7124_v23, 16.0  ;;  %v7115_v16 = vmul.f32 %v10018_v61, %v7111_v47  ;;  %v9391_v47 = vld [vmem:[%s15671_s7 + $0x210] sm:$0xff] }
 0xdb5   : > { %7255 = vmatpush.msra.mxu1 %v9391_v47  ;;  %v9405_v47 = vld [vmem:[%s15673_s9 + $0x200] sm:$0xff] }
 0xdb6   : > { %v7126_v60 = vmul.f32 2.1237322e-06, %v15146_v4  ;;  %v7137_v17 = vmul.f32 3.8918573e-05, %v15146_v4  ;;  %v15150_v19 = vadd.f32 %v10019_v13, %v7115_v16 }
 0xdb8   : > { %v7138_v59 = vadd.f32 0.001143296, %v7137_v17  ;;  %v7127_v56 = vadd.f32 0.00028619796, %v7126_v60  ;;  %v15153_v63 = vmul.f32 0.70710677, %v15150_v19 }
 0xdb9   : > { %v9390_v17 = vld [vmem:[%s15671_s7 + $0x208] sm:$0xff] }
 0xdba   : > { %v7139_v31 = vmul.f32 %v7138_v59, %v15146_v4  ;;  %v7164_v48 = vmul.f32 %v15153_v63, %v15153_v63  ;;  %v7128_v15 = vmul.f32 %v7127_v56, %v15146_v4  ;;  %7256 = vmatpush.msra.mxu1 %v9390_v17 }
 0xdbc   : > { %v7140_v62 = vadd.f32 0.014752088, %v7139_v31  ;;  %v15159_v10 = vmin.f32 %v7164_v48, 16.0  ;;  %v7129_v45 = vadd.f32 0.0036580483, %v7128_v15  ;;  %v9389_v15 = vld [vmem:[%s15671_s7 + $0x200] sm:$0xff] }
 0xdbd   : > { %7257 = vmatpush.msra.mxu1 %v9389_v15  ;;  %v9957_v15 = vld [vmem:[%s15667_s3 + $0x328] sm:$0xff] }
 0xdbe   : > { %v7141_v21 = vmul.f32 %v7140_v62, %v15146_v4  ;;  %v7166_v39 = vmul.f32 2.1237322e-06, %v15159_v10  ;;  %v7177_v43 = vmul.f32 3.8918573e-05, %v15159_v10  ;;  %v7130_v2 = vmul.f32 %v7129_v45, %v15146_v4 }
 0xdc0   : > { %v7142_v8 = vadd.f32 0.112945676, %v7141_v21  ;;  %v7167_v5 = vadd.f32 0.00028619796, %v7166_v39  ;;  %v7178_v32 = vadd.f32 0.001143296, %v7177_v43 }
 0xdc1   : > { %v7131_v1 = vadd.f32 0.05243302, %v7130_v2 }
 0xdc2   : > { %v7143_v33 = vmul.f32 %v7142_v8, %v15146_v4  ;;  %v7168_v41 = vmul.f32 %v7167_v5, %v15159_v10  ;;  %v7179_v40 = vmul.f32 %v7178_v32, %v15159_v10  ;;  %v9420_v8 = vld [vmem:[%s15673_s9 + $0x278] sm:$0xff] }
 0xdc3   : > { %v7132_v18 = vmul.f32 %v7131_v1, %v15146_v4  ;;  %7281 = vmatpush.msrb.mxu3 %v9420_v8  ;;  %v7121_v1 = vmul.f32 0.5, %v15150_v19  ;;  %v7280_v8 = vld [vmem:[%s15674_s10 + $0x4] sm:$0x1] }
 0xdc4   : > { %v7144_v9 = vadd.f32 0.4994258, %v7143_v33  ;;  %v7180_v57 = vadd.f32 0.014752088, %v7179_v40  ;;  %v7169_v30 = vadd.f32 0.0036580483, %v7168_v41 }
 0xdc5   : > { %v7133_v3 = vadd.f32 0.18741608, %v7132_v18  ;;  %v10185_v33 = vmov 11.0   ;;  %v9417_v40 = vld [vmem:[%s15673_s9 + $0x260] sm:$0xff] }
 0xdc6   : > { %v7145_v50 = vmul.f32 %v7144_v9, %v15146_v4  ;;  %v7181_v36 = vmul.f32 %v7180_v57, %v15159_v10  ;;  %v7170_v26 = vmul.f32 %v7169_v30, %v15159_v10 }
 0xdc7   : > { %v7134_v46 = vmul.f32 %v7133_v3, %v15146_v4 }
 0xdc8   : > { %v7146_v34 = vadd.f32 1.0, %v7145_v50  ;;  %v7182_v28 = vadd.f32 0.112945676, %v7181_v36  ;;  %v7171_v11 = vadd.f32 0.05243302, %v7170_v26  ;;  %v9416_v50 = vld [vmem:[%s15673_s9 + $0x258] sm:$0xff] }
 0xdc9   : > { %v7135_v4 = vadd.f32 1.1283791, %v7134_v46  ;;  %v9415_v36 = vld [vmem:[%s15673_s9 + $0x250] sm:$0xff] }
 0xdca   : > { %10147 = vrcp.f32 %v7146_v34  ;;  %v7183_v55 = vmul.f32 %v7182_v28, %v15159_v10  ;;  %v7172_v61 = vmul.f32 %v7171_v11, %v15159_v10  ;;  %v7158_v27 = vand.u32 2147483648, %v7146_v34 }
 0xdcb   : > { %vm7152_vm5 = vweird.f32 %v7146_v34  ;;  %v7156_v60 = vand.u32 2147483647, %v7146_v34  ;;  %v7136_v39 = vmul.f32 %v7135_v4, %v15142_v51  ;;  %v9418_v51 = vld [vmem:[%s15673_s9 + $0x268] sm:$0xff]  ;;  %v9967_v4 = vld [vmem:[%s15667_s3 + $0x378] sm:$0xff] }
 0xdcc   : > { %v7184_v54 = vadd.f32 0.4994258, %v7183_v55  ;;  %v7173_v23 = vadd.f32 0.18741608, %v7172_v61  ;;  %v7159_v31 = vor.u32 1.1754944e-38, %v7158_v27  ;;  %v9413_v55 = vld [vmem:[%s15673_s9 + $0x240] sm:$0xff]  ;;  %7412 = vmatpush.bf16.msra.mxu2 %v9967_v4 }
 0xdcd   : > { %vm7157_vm7 = vcmp.eq.f32.partialorder %v7156_v60, 8.507059e+37  ;;  %v9408_v61 = vld [vmem:[%s15673_s9 + $0x218] sm:$0xff]  ;;  %v9407_v27 = vld [vmem:[%s15673_s9 + $0x210] sm:$0xff] }
 0xdce   : > { %v7185_v37 = vmul.f32 %v7184_v54, %v15159_v10  ;;  %v7174_v48 = vmul.f32 %v7173_v23, %v15159_v10  ;;  %v9419_v10 = vld [vmem:[%s15673_s9 + $0x270] sm:$0xff]  ;;  %v9412_v54 = vld [vmem:[%s15673_s9 + $0x238] sm:$0xff]  ;;  %v9406_v23 = vld [vmem:[%s15673_s9 + $0x208] sm:$0xff] }
 0xdcf   : > { %7282 = vmatpush.msrb.mxu3 %v9419_v10  ;;  %v9529_v4 = vld [vmem:[%s15671_s7 + $0x2d0] sm:$0xff] }
 0xdd0   : > { %v10148_v0 = vpop.eup %10147  ;;  %v7186_v24 = vadd.f32 1.0, %v7185_v37  ;;  %v7175_v52 = vadd.f32 1.1283791, %v7174_v48  ;;  %v9958_v48 = vld [vmem:[%s15667_s3 + $0x330] sm:$0xff] }
 0xdd1   : > { %v7148_v38 = vmul.f32 %v10148_v0, %v7146_v34  ;;  %vm7153_vm4 = vweird.f32 %v10148_v0  ;;  %7283 = vmatpush.msrb.mxu3 %v9418_v51  ;;  %v9953_v51 = vld [vmem:[%s15667_s3 + $0x308] sm:$0xff] }
 0xdd2   : > { %10149 = vrcp.f32 %v7186_v24  ;;  %vm7154_vm6 = vmor %vm7152_vm5, %vm7153_vm4  ;;  %v7198_v43 = vand.u32 2147483648, %v7186_v24  ;;  %v7196_v5 = vand.u32 2147483647, %v7186_v24  ;;  %vm7192_vm10 = vweird.f32 %v7186_v24 }
 0xdd3   : > { %v7149_v13 = vsub.f32 1.0, %v7148_v38  ;;  %10151 = vrcp.f32 %v10185_v33  ;;  %v7176_v9 = vmul.f32 %v7175_v52, %v15153_v63  ;;  %7284 = vmatpush.msrb.mxu3 %v9417_v40  ;;  %v9414_v63 = vld [vmem:[%s15673_s9 + $0x248] sm:$0xff]  ;;  %v9409_v38 = vld [vmem:[%s15673_s9 + $0x220] sm:$0xff]  ;;  %vm7536_vm5 = vcmask 1044480  }
 0xdd4   : > { %v7199_v41 = vor.u32 1.1754944e-38, %v7198_v43  ;;  %vm7197_vm12 = vcmp.eq.f32.partialorder %v7196_v5, 8.507059e+37  ;;  %v9955_v43 = vld [vmem:[%s15667_s3 + $0x318] sm:$0xff]  ;;  %v9954_v5 = vld [vmem:[%s15667_s3 + $0x310] sm:$0xff]  ;;  %v9961_v33 = vld [vmem:[%s15667_s3 + $0x348] sm:$0xff] }
 0xdd5   : > { %v7150_v20 = vmul.f32 %v10148_v0, %v7149_v13  ;;  %7285 = vmatpush.msrb.mxu3 %v9416_v50 }
 0xdd7   : > { %v7151_v16 = vadd.f32 %v10148_v0, %v7150_v20  ;;  %7286 = vmatpush.msrb.mxu3 %v9415_v36 }
 0xdd8   : > { %v10150_v59 = vpop.eup %10149 }
 0xdd9   : > { %v7155_v56 = vsel %vm7154_vm6, %v10148_v0, %v7151_v16  ;;  %v7188_v62 = vmul.f32 %v10150_v59, %v7186_v24  ;;  %vm7193_vm9 = vweird.f32 %v10150_v59  ;;  %v10152_v35 = vpop.eup %10151  ;;  %7287 = vmatpush.msrb.mxu3 %v9414_v63  ;;  %v9410_v0 = vld [vmem:[%s15673_s9 + $0x228] sm:$0xff]  ;;  %v7241_v16 = vld [vmem:[%s15672_s8 + $0x4] sm:$0x1] }
 0xdda   : > { %v7160_v21 = vsel %vm7157_vm7, %v7159_v31, %v7155_v56  ;;  %vm7194_vm11 = vmor %vm7192_vm10, %vm7193_vm9  ;;  %v7217_v26 = vmul.f32 11.0, %v10152_v35  ;;  %v9959_v56 = vld [vmem:[%s15667_s3 + $0x338] sm:$0xff]  ;;  %v9966_v31 = vld [vmem:[%s15667_s3 + $0x370] sm:$0xff] }
 0xddb   : > { %v7189_v53 = vsub.f32 1.0, %v7188_v62  ;;  %v7161_v32 = vmul.f32 %v7160_v21, %v7136_v39  ;;  %7288 = vmatpush.msrb.mxu3 %v9413_v55  ;;  %7473 = vmatpush.bf16.msrb.mxu0 %v9959_v56  ;;  %v9965_v62 = vld [vmem:[%s15667_s3 + $0x368] sm:$0xff]  ;;  %v9964_v21 = vld [vmem:[%s15667_s3 + $0x360] sm:$0xff]  ;;  %v9963_v39 = vld [vmem:[%s15667_s3 + $0x358] sm:$0xff] }
 0xddc   : > { %v7218_v11 = vsub.f32 1.0, %v7217_v26  ;;  %7413 = vmatpush.bf16.msra.mxu2 %v9966_v31  ;;  %v9528_v31 = vld [vmem:[%s15671_s7 + $0x2c8] sm:$0xff] }
 0xddd   : > { %v7190_v45 = vmul.f32 %v10150_v59, %v7189_v53  ;;  %v9387_v2 = vclamps-f32 %v7161_v32, 1.0  ;;  %7289 = vmatpush.msrb.mxu3 %v9412_v54  ;;  %v9956_v53 = vld [vmem:[%s15667_s3 + $0x320] sm:$0xff] }
 0xdde   : > { %v7219_v6 = vmul.f32 %v10152_v35, %v7218_v11 }
 0xddf   : > { %v7191_v42 = vadd.f32 %v10150_v59, %v7190_v45  ;;  %v7204_v58 = vadd.f32 1.0, %v9387_v2  ;;  %7290 = vmatpush.msrb.mxu3 %v9411_v29  ;;  %7474 = vmatpush.bf16.msrb.mxu0 %v9958_v48  ;;  %v9962_v45 = vld [vmem:[%s15667_s3 + $0x350] sm:$0xff] }
 0xde0   : > { %v7220_v14 = vadd.f32 %v10152_v35, %v7219_v6  ;;  %7414 = vmatpush.bf16.msra.mxu2 %v9965_v62 }
 0xde1   : > { %v7195_v12 = vsel %vm7194_vm11, %v10150_v59, %v7191_v42  ;;  %v15255_v18 = vmul.f32 %v7204_v58, %v7120_v49  ;;  %7291 = vmatpush.msrb.mxu3 %v9410_v0  ;;  %v9960_v42 = vld [vmem:[%s15667_s3 + $0x340] sm:$0xff] }
 0xde2   : > { %v7200_v57 = vsel %vm7197_vm12, %v7199_v41, %v7195_v12  ;;  %v9952_v41 = vld [vmem:[%s15667_s3 + $0x300] sm:$0xff] }
 0xde3   : > { %v7201_v30 = vmul.f32 %v7200_v57, %v7176_v9  ;;  %7292 = vmatpush.msrb.mxu3 %v9409_v38  ;;  %7475 = vmatpush.bf16.msrb.mxu0 %v9957_v15  ;;  %v9527_v15 = vld [vmem:[%s15671_s7 + $0x2c0] sm:$0xff] }
 0xde4   : > { %7415 = vmatpush.bf16.msra.mxu2 %v9964_v21 }
 0xde5   : > { %v9388_v34 = vclamps-f32 %v7201_v30, 1.0  ;;  %7293 = vmatpush.msrb.mxu3 %v9408_v61  ;;  %v9534_v61 = vld [vmem:[%s15671_s7 + $0x2f8] sm:$0xff] }
 0xde6   : > { %7570 = vmatpush.msrb.mxu1 %v9534_v61  ;;  %v9542_v61 = vld [vmem:[%s15673_s9 + $0x2b8] sm:$0xff] }
 0xde7   : > { %v7205_v28 = vadd.f32 1.0, %v9388_v34  ;;  %7294 = vmatpush.msrb.mxu3 %v9407_v27  ;;  %7476 = vmatpush.bf16.msrb.mxu0 %v9956_v53  ;;  %v9526_v53 = vld [vmem:[%s15671_s7 + $0x2b8] sm:$0xff] }
 0xde8   : > { %7416 = vmatpush.bf16.msra.mxu2 %v9963_v39 }
 0xde9   : > { %v15253_v25 = vmul.f32 %v7205_v28, %v7121_v1  ;;  %7295 = vmatpush.msrb.mxu3 %v9406_v23  ;;  %v9531_v23 = vld [vmem:[%s15671_s7 + $0x2e0] sm:$0xff] }
 0xdeb   : > { %v7208_v19 = vsel %vm5385_vm8, %v15253_v25, 0.0  ;;  %vm7221_vm8 = vweird.f32 %v10152_v35  ;;  %7296 = vmatpush.msrb.mxu3 %v9405_v47  ;;  %7477 = vmatpush.bf16.msrb.mxu0 %v9955_v43 }
 0xdec   : > { %v7209_v22 = vadd.f32 %v7208_v19, %v15255_v18  ;;  %v7222_v44 = vsel %vm7221_vm8, %v10152_v35, %v7220_v14  ;;  %7417 = vmatpush.bf16.msra.mxu2 %v9962_v45 }
 0xdee   : > { %v7210_v37 = vrot.slane %v7209_v22, 4 }
 0xdef   : > { %7478 = vmatpush.bf16.msrb.mxu0 %v9954_v5 }
 0xdf0   : > { %v7211_v3 = vadd.f32 %v7210_v37, %v7209_v22  ;;  %7418 = vmatpush.bf16.msra.mxu2 %v9961_v33  ;;  %v10020_v22 = vld [vmem:[%s15668_s4 + $0x5] ss:$0 sm:$0xff]  ;;  %v9522_v33 = vld [vmem:[%s15671_s7 + $0x298] sm:$0xff] }
 0xdf2   : > { %v7212_v24 = vrot.slane %v7211_v3, 2 }
 0xdf3   : > { %7479 = vmatpush.bf16.msrb.mxu0 %v9953_v51  ;;  %v9521_v51 = vld [vmem:[%s15671_s7 + $0x290] sm:$0xff] }
 0xdf4   : > { %v7213_v13 = vadd.f32 %v7212_v24, %v7211_v3  ;;  %7419 = vmatpush.bf16.msra.mxu2 %v9960_v42 }
 0xdf6   : > { %v7214_v7 = vrot.slane %v7213_v13, 1 }
 0xdf7   : > { %7480 = vmatpush.bf16.msrb.mxu0 %v9952_v41  ;;  %v9520_v41 = vld [vmem:[%s15671_s7 + $0x288] sm:$0xff] }
 0xdf8   : > { %v7215_v46 = vadd.f32 %v7214_v7, %v7213_v13  ;;  %v9533_v13 = vld [vmem:[%s15671_s7 + $0x2f0] sm:$0xff] }
 0xdf9   : > { %7571 = vmatpush.msrb.mxu1 %v9533_v13 }
 0xdfa   : > { %v7223_v20 = vmul.f32 %v7222_v44, %v7215_v46  ;;  %v9532_v46 = vld [vmem:[%s15671_s7 + $0x2e8] sm:$0xff] }
 0xdfb   : > { %7572 = vmatpush.msrb.mxu1 %v9532_v46 }
 0xdfc   : > { %7258 = vmatmul.f32.vlgmr.msra.gmra.mxu1 %v7223_v20 }
 0xdfd   : > { %7573 = vmatpush.msrb.mxu1 %v9531_v23  ;;  %v9539_v23 = vld [vmem:[%s15673_s9 + $0x2a0] sm:$0xff] }
 0xe79   : > { %v7259_v60 = vpop.f32.mrf.mxu1 }
 0xe7a   : > { %v7260_v17 = vadd.f32 %v7259_v60, %v7241_v16  ;;  %v9530_v60 = vld [vmem:[%s15671_s7 + $0x2d8] sm:$0xff] }
 0xe7b   : > { %7574 = vmatpush.msrb.mxu1 %v9530_v60 }
 0xe7c   : > { %v7262_v59 = vmax.f32 %v7260_v17, 0.0 }
 0xe7d   : > { %7575 = vmatpush.msrb.mxu1 %v9529_v4 }
 0xe7e   : > { %7297 = vmatmul.f32.vlgmr.msrb.gmra.mxu3 %v7262_v59 }
 0xe7f   : > { %7576 = vmatpush.msrb.mxu1 %v9528_v31 }
 0xe81   : > { %7577 = vmatpush.msrb.mxu1 %v9527_v15  ;;  %v9535_v15 = vld [vmem:[%s15673_s9 + $0x280] sm:$0xff] }
 0xe83   : > { %7578 = vmatpush.msrb.mxu1 %v9526_v53 }
 0xf01   : > { %v7298_v10 = vpop.f32.mrf.mxu3 }
 0xf02   : > { %v7299_v52 = vadd.f32 %v7298_v10, %v7280_v8  ;;  %v9525_v8 = vld [vmem:[%s15671_s7 + $0x2b0] sm:$0xff] }
 0xf03   : > { %7579 = vmatpush.msrb.mxu1 %v9525_v8  ;;  %v9983_v8 = vld [vmem:[%s15667_s3 + $0x3f8] sm:$0xff] }
 0xf04   : > { %v9421_v32 = vmul.f32 -1.442695, %v7299_v52  ;;  %v9524_v52 = vld [vmem:[%s15671_s7 + $0x2a8] sm:$0xff]  ;;  %7738 = vmatpush.bf16.msrb.mxu2 %v9983_v8 }
 0xf05   : > { %7580 = vmatpush.msrb.mxu1 %v9524_v52  ;;  %v9982_v52 = vld [vmem:[%s15667_s3 + $0x3f0] sm:$0xff] }
 0xf06   : > { %10153 = vpow2.f32 %v9421_v32  ;;  %v9523_v32 = vld [vmem:[%s15671_s7 + $0x2a0] sm:$0xff] }
 0xf07   : > { %7581 = vmatpush.msrb.mxu1 %v9523_v32  ;;  %v9973_v32 = vld [vmem:[%s15667_s3 + $0x3a8] sm:$0xff] }
 0xf08   : > { %7739 = vmatpush.bf16.msrb.mxu2 %v9982_v52 }
 0xf09   : > { %7582 = vmatpush.msrb.mxu1 %v9522_v33  ;;  %v9980_v33 = vld [vmem:[%s15667_s3 + $0x3e0] sm:$0xff] }
 0xf0b   : > { %7583 = vmatpush.msrb.mxu1 %v9521_v51  ;;  %v9972_v51 = vld [vmem:[%s15667_s3 + $0x3a0] sm:$0xff] }
 0xf0c   : > { %v10154_v40 = vpop.eup %10153 }
 0xf0d   : > { %v7304_v9 = vadd.f32 1.0, %v10154_v40  ;;  %v9519_v40 = vld [vmem:[%s15671_s7 + $0x280] sm:$0xff]  ;;  %7584 = vmatpush.msrb.mxu1 %v9520_v41  ;;  %v9971_v41 = vld [vmem:[%s15667_s3 + $0x398] sm:$0xff] }
 0xf0f   : > { %10155 = vrcp.f32 %v7304_v9  ;;  %v7316_v50 = vand.u32 2147483648, %v7304_v9  ;;  %v7314_v35 = vand.u32 2147483647, %v7304_v9  ;;  %vm7310_vm14 = vweird.f32 %v7304_v9  ;;  %7585 = vmatpush.msrb.mxu1 %v9519_v40  ;;  %v7608_v40 = vld [vmem:[%s15674_s10 + $0x5] sm:$0x1] }
 0xf11   : > { %v7317_v34 = vor.u32 1.1754944e-38, %v7316_v50  ;;  %vm7315_vm1 = vcmp.eq.f32.partialorder %v7314_v35, 8.507059e+37  ;;  %v9549_v50 = vld [vmem:[%s15673_s9 + $0x2f0] sm:$0xff] }
 0xf15   : > { %v10156_v12 = vpop.eup %10155 }
 0xf16   : > { %v7306_v2 = vmul.f32 %v10156_v12, %v7304_v9  ;;  %vm7311_vm13 = vweird.f32 %v10156_v12 }
 0xf17   : > { %vm7312_vm15 = vmor %vm7310_vm14, %vm7311_vm13 }
 0xf18   : > { %v7307_v57 = vsub.f32 1.0, %v7306_v2 }
 0xf1a   : > { %v7308_v30 = vmul.f32 %v10156_v12, %v7307_v57  ;;  %v9550_v57 = vld [vmem:[%s15673_s9 + $0x2f8] sm:$0xff] }
 0xf1b   : > { %7609 = vmatpush.msra.mxu3 %v9550_v57  ;;  %v9970_v57 = vld [vmem:[%s15667_s3 + $0x390] sm:$0xff] }
 0xf1c   : > { %v7309_v36 = vadd.f32 %v10156_v12, %v7308_v30 }
 0xf1d   : > { %7610 = vmatpush.msra.mxu3 %v9549_v50 }
 0xf1e   : > { %v7313_v58 = vsel %vm7312_vm15, %v10156_v12, %v7309_v36  ;;  %v10186_v36 = vmov 5.0   ;;  %vm7862_vm15 = vcmask 1041408  }
 0xf1f   : > { %v7318_v63 = vsel %vm7315_vm1, %v7317_v34, %v7313_v58  ;;  %v9548_v34 = vld [vmem:[%s15673_s9 + $0x2e8] sm:$0xff] }
 0xf20   : > { %v7320_v1 = vperm.slane %v7318_v63, 0  ;;  %7611 = vmatpush.msra.mxu3 %v9548_v34  ;;  %v9968_v34 = vld [vmem:[%s15667_s3 + $0x380] sm:$0xff] }
 0xf22   : > { %v7321_v28 = vmul.f32 %v7320_v1, %v15255_v18  ;;  %v7322_v26 = vmul.f32 %v7320_v1, %v15253_v25  ;;  %v10021_v18 = vld [vmem:[%s15669_s5 + $0x5] ss:$0 sm:$0xff] }
 0xf24   : > { %7323 = vst [vmem:[#allocation6] sm:$0xff] %v7321_v28  ;;  %v9547_v28 = vld [vmem:[%s15673_s9 + $0x2e0] sm:$0xff] }
 0xf25   : > { %7324 = vst [vmem:[#allocation6 + $0x8] sm:$0x7] %v7322_v26  ;;  %7612 = vmatpush.msra.mxu3 %v9547_v28 }
 0xf2c   : > { %v7345_v49 = vld [vmem:[#allocation6 + $0x1] ss:$2 sm:$0x1f]  ;;  %v7325_v55 = vld [vmem:[#allocation6] ss:$2 sm:$0x1f] }
 0xf2d   : > { %v7346_v54 = vpack.c.bf16 %v7345_v49, %v7345_v49  ;;  %v7326_v19 = vpack.c.bf16 %v7325_v55, %v7325_v55  ;;  %v9546_v55 = vld [vmem:[%s15673_s9 + $0x2d8] sm:$0xff] }
 0xf2e   : > { %7613 = vmatpush.msra.mxu3 %v9546_v55 }
 0xf2f   : > { %7420 = vmatmul.bf16.vlgmr.msra.gmra.mxu2 %v7346_v54  ;;  %7481 = vmatmul.bf16.vlgmr.msrb.gmra.mxu0 %v7326_v19 }
 0xfac   : > { %v7482_v11 = vpop.f32.mrf.mxu0 }
 0xfb2   : > { %v7421_v29 = vpop.f32.mrf.mxu2 }
 0xfb3   : > { %v7483_v37 = vadd.f32 %v7482_v11, %v7421_v29  ;;  %v9545_v29 = vld [vmem:[%s15673_s9 + $0x2d0] sm:$0xff] }
 0xfb4   : > { %v7484_v25 = vpop.f32.mrf.mxu0  ;;  %7614 = vmatpush.msra.mxu3 %v9545_v29 }
 0xfb5   : > { %v7488_v0 = vmul.f32 %v10020_v22, %v7483_v37 }
 0xfb7   : > { %v15346_v6 = vadd.f32 %v10021_v18, %v7488_v0  ;;  %v9544_v18 = vld [vmem:[%s15673_s9 + $0x2c8] sm:$0xff] }
 0xfb8   : > { %7615 = vmatpush.msra.mxu3 %v9544_v18 }
 0xfb9   : > { %v15349_v3 = vmul.f32 0.70710677, %v15346_v6 }
 0xfba   : > { %v7423_v38 = vpop.f32.mrf.mxu2 }
 0xfbb   : > { %v7494_v24 = vmul.f32 %v15349_v3, %v15349_v3  ;;  %v7492_v38 = vmul.f32 0.5, %v15346_v6  ;;  %v9540_v6 = vld [vmem:[%s15673_s9 + $0x2a8] sm:$0xff] }
 0xfbd   : > { %v7495_v14 = vmin.f32 %v7494_v24, 16.0 }
 0xfbf   : > { %v7496_v7 = vmul.f32 2.1237322e-06, %v7495_v14  ;;  %v7507_v44 = vmul.f32 3.8918573e-05, %v7495_v14 }
 0xfc1   : > { %v7497_v20 = vadd.f32 0.00028619796, %v7496_v7  ;;  %v7508_v27 = vadd.f32 0.001143296, %v7507_v44  ;;  %v9541_v7 = vld [vmem:[%s15673_s9 + $0x2b0] sm:$0xff] }
 0xfc3   : > { %v7498_v47 = vmul.f32 %v7497_v20, %v7495_v14  ;;  %v7509_v16 = vmul.f32 %v7508_v27, %v7495_v14 }
 0xfc5   : > { %v7510_v17 = vadd.f32 0.014752088, %v7509_v16  ;;  %v7499_v59 = vadd.f32 0.0036580483, %v7498_v47  ;;  %v9538_v16 = vld [vmem:[%s15673_s9 + $0x298] sm:$0xff] }
 0xfc7   : > { %v7511_v56 = vmul.f32 %v7510_v17, %v7495_v14  ;;  %v7500_v62 = vmul.f32 %v7499_v59, %v7495_v14 }
 0xfc9   : > { %v7512_v48 = vadd.f32 0.112945676, %v7511_v56  ;;  %v7501_v43 = vadd.f32 0.05243302, %v7500_v62  ;;  %v9536_v62 = vld [vmem:[%s15673_s9 + $0x288] sm:$0xff] }
 0xfcb   : > { %v7513_v21 = vmul.f32 %v7512_v48, %v7495_v14  ;;  %v7502_v5 = vmul.f32 %v7501_v43, %v7495_v14  ;;  %v9537_v48 = vld [vmem:[%s15673_s9 + $0x290] sm:$0xff] }
 0xfcd   : > { %v7514_v39 = vadd.f32 0.4994258, %v7513_v21  ;;  %v7503_v42 = vadd.f32 0.18741608, %v7502_v5  ;;  %v7569_v21 = vld [vmem:[%s15672_s8 + $0x5] sm:$0x1] }
 0xfce   : > { %v9981_v5 = vld [vmem:[%s15667_s3 + $0x3e8] sm:$0xff] }
 0xfcf   : > { %v7515_v10 = vmul.f32 %v7514_v39, %v7495_v14  ;;  %v7504_v12 = vmul.f32 %v7503_v42, %v7495_v14  ;;  %7740 = vmatpush.bf16.msrb.mxu2 %v9981_v5  ;;  %v9979_v42 = vld [vmem:[%s15667_s3 + $0x3d8] sm:$0xff]  ;;  %v9657_v5 = vld [vmem:[%s15671_s7 + $0x340] sm:$0xff] }
 0xfd1   : > { %v7516_v45 = vadd.f32 1.0, %v7515_v10  ;;  %v7505_v58 = vadd.f32 1.1283791, %v7504_v12  ;;  %v9975_v10 = vld [vmem:[%s15667_s3 + $0x3b8] sm:$0xff] }
 0xfd2   : > { %7799 = vmatpush.bf16.msra.mxu0 %v9975_v10  ;;  %v9658_v10 = vld [vmem:[%s15671_s7 + $0x348] sm:$0xff] }
 0xfd3   : > { %10157 = vrcp.f32 %v7516_v45  ;;  %v7528_v35 = vand.u32 2147483648, %v7516_v45  ;;  %v7526_v1 = vand.u32 2147483647, %v7516_v45  ;;  %vm7522_vm2 = vweird.f32 %v7516_v45  ;;  %7741 = vmatpush.bf16.msrb.mxu2 %v9980_v33  ;;  %v9656_v33 = vld [vmem:[%s15671_s7 + $0x338] sm:$0xff] }
 0xfd4   : > { %10159 = vrcp.f32 %v10186_v36  ;;  %v7506_v54 = vmul.f32 %v7505_v58, %v15349_v3  ;;  %v9543_v3 = vld [vmem:[%s15673_s9 + $0x2c0] sm:$0xff] }
 0xfd5   : > { %v7529_v49 = vor.u32 1.1754944e-38, %v7528_v35  ;;  %vm7527_vm4 = vcmp.eq.f32.partialorder %v7526_v1, 8.507059e+37  ;;  %7616 = vmatpush.msra.mxu3 %v9543_v3  ;;  %v9969_v35 = vld [vmem:[%s15667_s3 + $0x388] sm:$0xff]  ;;  %v9976_v36 = vld [vmem:[%s15667_s3 + $0x3c0] sm:$0xff] }
 0xfd7   : > { %7617 = vmatpush.msra.mxu3 %v9542_v61  ;;  %7742 = vmatpush.bf16.msrb.mxu2 %v9979_v42  ;;  %v10022_v61 = vld [vmem:[%s15668_s4 + $0x6] ss:$0 sm:$0xff] }
 0xfd9   : > { %v10158_v9 = vpop.eup %10157  ;;  %7618 = vmatpush.msra.mxu3 %v9541_v7 }
 0xfda   : > { %v7518_v2 = vmul.f32 %v10158_v9, %v7516_v45  ;;  %vm7523_vm0 = vweird.f32 %v10158_v9  ;;  %v10160_v11 = vpop.eup %10159  ;;  %v9974_v45 = vld [vmem:[%s15667_s3 + $0x3b0] sm:$0xff] }
 0xfdb   : > { %vm7524_vm3 = vmor %vm7522_vm2, %vm7523_vm0  ;;  %v7545_v0 = vmul.f32 5.0, %v10160_v11  ;;  %7619 = vmatpush.msra.mxu3 %v9540_v6  ;;  %vm7549_vm6 = vweird.f32 %v10160_v11  ;;  %7800 = vmatpush.bf16.msra.mxu0 %v9974_v45 }
 0xfdc   : > { %v7519_v30 = vsub.f32 1.0, %v7518_v2  ;;  %v9978_v2 = vld [vmem:[%s15667_s3 + $0x3d0] sm:$0xff] }
 0xfdd   : > { %v7546_v13 = vsub.f32 1.0, %v7545_v0  ;;  %7620 = vmatpush.msra.mxu3 %v9539_v23  ;;  %7743 = vmatpush.bf16.msrb.mxu2 %v9978_v2 }
 0xfde   : > { %v7520_v63 = vmul.f32 %v10158_v9, %v7519_v30  ;;  %v9977_v30 = vld [vmem:[%s15667_s3 + $0x3c8] sm:$0xff] }
 0xfdf   : > { %v7547_v20 = vmul.f32 %v10160_v11, %v7546_v13  ;;  %7621 = vmatpush.msra.mxu3 %v9538_v16  ;;  %7801 = vmatpush.bf16.msra.mxu0 %v9973_v32 }
 0xfe0   : > { %v7521_v26 = vadd.f32 %v10158_v9, %v7520_v63 }
 0xfe1   : > { %v7548_v60 = vadd.f32 %v10160_v11, %v7547_v20  ;;  %7622 = vmatpush.msra.mxu3 %v9537_v48  ;;  %7744 = vmatpush.bf16.msrb.mxu2 %v9977_v30  ;;  %v9661_v48 = vld [vmem:[%s15671_s7 + $0x360] sm:$0xff]  ;;  %v9651_v30 = vld [vmem:[%s15671_s7 + $0x310] sm:$0xff] }
 0xfe2   : > { %v7525_v19 = vsel %vm7524_vm3, %v10158_v9, %v7521_v26 }
 0xfe3   : > { %v7530_v22 = vsel %vm7527_vm4, %v7529_v49, %v7525_v19  ;;  %v7550_v4 = vsel %vm7549_vm6, %v10160_v11, %v7548_v60  ;;  %7623 = vmatpush.msra.mxu3 %v9536_v62  ;;  %7802 = vmatpush.bf16.msra.mxu0 %v9972_v51  ;;  %v9663_v60 = vld [vmem:[%s15671_s7 + $0x370] sm:$0xff] }
 0xfe4   : > { %v7531_v37 = vmul.f32 %v7530_v22, %v7506_v54 }
 0xfe5   : > { %7624 = vmatpush.msra.mxu3 %v9535_v15  ;;  %7745 = vmatpush.bf16.msrb.mxu2 %v9976_v36  ;;  %v9650_v36 = vld [vmem:[%s15671_s7 + $0x308] sm:$0xff] }
 0xfe6   : > { %v9518_v25 = vclamps-f32 %v7531_v37, 1.0 }
 0xfe7   : > { %7803 = vmatpush.bf16.msra.mxu0 %v9971_v41  ;;  %v9655_v41 = vld [vmem:[%s15671_s7 + $0x330] sm:$0xff] }
 0xfe8   : > { %v7534_v24 = vadd.f32 1.0, %v9518_v25 }
 0xfea   : > { %v15430_v14 = vmul.f32 %v7534_v24, %v7492_v38 }
 0xfeb   : > { %7804 = vmatpush.bf16.msra.mxu0 %v9970_v57  ;;  %v9653_v57 = vld [vmem:[%s15671_s7 + $0x320] sm:$0xff] }
 0xfec   : > { %v7537_v44 = vsel %vm7536_vm5, %v15430_v14, 0.0 }
 0xfed   : > { %v7538_v46 = vrot.slane %v7537_v44, 4 }
 0xfef   : > { %v7539_v27 = vadd.f32 %v7538_v46, %v7537_v44  ;;  %7805 = vmatpush.bf16.msra.mxu0 %v9969_v35  ;;  %v10023_v44 = vld [vmem:[%s15669_s5 + $0x6] ss:$0 sm:$0xff] }
 0xff1   : > { %v7540_v47 = vrot.slane %v7539_v27, 2 }
 0xff3   : > { %v7541_v17 = vadd.f32 %v7540_v47, %v7539_v27  ;;  %7806 = vmatpush.bf16.msra.mxu0 %v9968_v34  ;;  %v9664_v47 = vld [vmem:[%s15671_s7 + $0x378] sm:$0xff]  ;;  %v9649_v34 = vld [vmem:[%s15671_s7 + $0x300] sm:$0xff] }
 0xff4   : > { %7896 = vmatpush.msra.mxu1 %v9664_v47  ;;  %v9672_v47 = vld [vmem:[%s15673_s9 + $0x338] sm:$0xff] }
 0xff5   : > { %v7542_v59 = vrot.slane %v7541_v17, 1 }
 0xff6   : > { %7897 = vmatpush.msra.mxu1 %v9663_v60 }
 0xff7   : > { %v7543_v56 = vadd.f32 %v7542_v59, %v7541_v17 }
 0xff9   : > { %v7551_v31 = vmul.f32 %v7550_v4, %v7543_v56  ;;  %v9662_v4 = vld [vmem:[%s15671_s7 + $0x368] sm:$0xff] }
 0xffa   : > { %7898 = vmatpush.msra.mxu1 %v9662_v4 }
 0xffb   : > { %7586 = vmatmul.f32.vlgmr.msrb.gmra.mxu1 %v7551_v31 }
 0xffc   : > { %7899 = vmatpush.msra.mxu1 %v9661_v48  ;;  %v9669_v48 = vld [vmem:[%s15673_s9 + $0x320] sm:$0xff] }
0x1078   : > { %v7587_v53 = vpop.f32.mrf.mxu1 }
0x1079   : > { %v7588_v39 = vadd.f32 %v7587_v53, %v7569_v21  ;;  %v9660_v21 = vld [vmem:[%s15671_s7 + $0x358] sm:$0xff] }
0x107a   : > { %7900 = vmatpush.msra.mxu1 %v9660_v21 }
0x107b   : > { %v7590_v43 = vmax.f32 %v7588_v39, 0.0 }
0x107d   : > { %7625 = vmatmul.f32.vlgmr.msra.gmra.mxu3 %v7590_v43  ;;  %v9659_v43 = vld [vmem:[%s15671_s7 + $0x350] sm:$0xff] }
0x107e   : > { %7901 = vmatpush.msra.mxu1 %v9659_v43 }
0x1080   : > { %7902 = vmatpush.msra.mxu1 %v9658_v10 }
0x1082   : > { %7903 = vmatpush.msra.mxu1 %v9657_v5  ;;  %v9665_v5 = vld [vmem:[%s15673_s9 + $0x300] sm:$0xff] }
0x1084   : > { %7904 = vmatpush.msra.mxu1 %v9656_v33 }
0x1086   : > { %7905 = vmatpush.msra.mxu1 %v9655_v41  ;;  %v9991_v41 = vld [vmem:[%s15675_s11 + $0x38] sm:$0xff] }
0x1087   : > { %8045 = vmatpush.bf16.msra.mxu2 %v9991_v41 }
0x1100   : > { %v7626_v9 = vpop.f32.mrf.mxu3 }
0x1101   : > { %v7627_v12 = vadd.f32 %v7626_v9, %v7608_v40  ;;  %v9654_v9 = vld [vmem:[%s15671_s7 + $0x328] sm:$0xff] }
0x1102   : > { %7906 = vmatpush.msra.mxu1 %v9654_v9  ;;  %v9989_v9 = vld [vmem:[%s15675_s11 + $0x28] sm:$0xff] }
0x1103   : > { %v9551_v50 = vmul.f32 -1.442695, %v7627_v12 }
0x1104   : > { %7907 = vmatpush.msra.mxu1 %v9653_v57  ;;  %v9986_v57 = vld [vmem:[%s15675_s11 + $0x10] sm:$0xff] }
0x1105   : > { %10161 = vpow2.f32 %v9551_v50  ;;  %v9652_v50 = vld [vmem:[%s15671_s7 + $0x318] sm:$0xff] }
0x1106   : > { %7908 = vmatpush.msra.mxu1 %v9652_v50  ;;  %v9985_v50 = vld [vmem:[%s15675_s11 + $0x8] sm:$0xff] }
0x1108   : > { %7909 = vmatpush.msra.mxu1 %v9651_v30  ;;  %v7934_v30 = vld [vmem:[%s15674_s10 + $0x6] sm:$0x1] }
0x110a   : > { %7910 = vmatpush.msra.mxu1 %v9650_v36 }
0x110b   : > { %v10162_v58 = vpop.eup %10161 }
0x110c   : > { %v7632_v63 = vadd.f32 1.0, %v10162_v58  ;;  %7911 = vmatpush.msra.mxu1 %v9649_v34 }
0x110e   : > { %10163 = vrcp.f32 %v7632_v63  ;;  %v7644_v49 = vand.u32 2147483648, %v7632_v63  ;;  %v7642_v54 = vand.u32 2147483647, %v7632_v63  ;;  %vm7638_vm9 = vweird.f32 %v7632_v63 }
0x1110   : > { %v7645_v11 = vor.u32 1.1754944e-38, %v7644_v49  ;;  %vm7643_vm11 = vcmp.eq.f32.partialorder %v7642_v54, 8.507059e+37  ;;  %v10187_v54 = vmov 2.0  }
0x1114   : > { %v10164_v1 = vpop.eup %10163 }
0x1115   : > { %v7634_v28 = vmul.f32 %v10164_v1, %v7632_v63  ;;  %vm7639_vm7 = vweird.f32 %v10164_v1 }
0x1116   : > { %vm7640_vm10 = vmor %vm7638_vm9, %vm7639_vm7 }
0x1117   : > { %v7635_v26 = vsub.f32 1.0, %v7634_v28  ;;  %v9680_v28 = vld [vmem:[%s15673_s9 + $0x378] sm:$0xff] }
0x1118   : > { %7935 = vmatpush.msrb.mxu3 %v9680_v28 }
0x1119   : > { %v7636_v55 = vmul.f32 %v10164_v1, %v7635_v26  ;;  %v9679_v26 = vld [vmem:[%s15673_s9 + $0x370] sm:$0xff] }
0x111a   : > { %7936 = vmatpush.msrb.mxu3 %v9679_v26 }
0x111b   : > { %v7637_v19 = vadd.f32 %v10164_v1, %v7636_v55 }
0x111d   : > { %v7641_v22 = vsel %vm7640_vm10, %v10164_v1, %v7637_v19  ;;  %v9678_v19 = vld [vmem:[%s15673_s9 + $0x368] sm:$0xff] }
0x111e   : > { %v7646_v29 = vsel %vm7643_vm11, %v7645_v11, %v7641_v22  ;;  %7937 = vmatpush.msrb.mxu3 %v9678_v19 }
0x111f   : > { %v7648_v37 = vperm.slane %v7646_v29, 0 }
0x1121   : > { %v7649_v18 = vmul.f32 %v7648_v37, %v15430_v14  ;;  %v9677_v37 = vld [vmem:[%s15673_s9 + $0x360] sm:$0xff] }
0x1122   : > { %7938 = vmatpush.msrb.mxu3 %v9677_v37 }
0x1123   : > { %7650 = vst [vmem:[#allocation7] sm:$0x1f] %v7649_v18 }
0x112a   : > { %v7671_v25 = vld [vmem:[#allocation7 + $0x1] ss:$2 sm:$0x3]  ;;  %v7651_v0 = vld [vmem:[#allocation7] ss:$2 sm:$0x3] }
0x112b   : > { %v7672_v3 = vpack.c.bf16 %v7671_v25, %v7671_v25  ;;  %v7652_v38 = vpack.c.bf16 %v7651_v0, %v7651_v0  ;;  %v9676_v0 = vld [vmem:[%s15673_s9 + $0x358] sm:$0xff] }
0x112c   : > { %7939 = vmatpush.msrb.mxu3 %v9676_v0 }
0x112d   : > { %7746 = vmatmul.bf16.vlgmr.msrb.gmra.mxu2 %v7672_v3  ;;  %7807 = vmatmul.bf16.vlgmr.msra.gmra.mxu0 %v7652_v38 }
0x11aa   : > { %v7808_v24 = vpop.f32.mrf.mxu0 }
0x11b0   : > { %v7747_v13 = vpop.f32.mrf.mxu2 }
0x11b1   : > { %v7809_v7 = vadd.f32 %v7808_v24, %v7747_v13  ;;  %v9675_v13 = vld [vmem:[%s15673_s9 + $0x350] sm:$0xff] }
0x11b2   : > { %v7810_v46 = vpop.f32.mrf.mxu0  ;;  %7940 = vmatpush.msrb.mxu3 %v9675_v13 }
0x11b3   : > { %v7814_v14 = vmul.f32 %v10022_v61, %v7809_v7 }
0x11b5   : > { %v15515_v6 = vadd.f32 %v10023_v44, %v7814_v14  ;;  %v9674_v44 = vld [vmem:[%s15673_s9 + $0x348] sm:$0xff] }
0x11b6   : > { %7941 = vmatpush.msrb.mxu3 %v9674_v44 }
0x11b7   : > { %v15518_v20 = vmul.f32 0.70710677, %v15515_v6 }
0x11b8   : > { %v7749_v27 = vpop.f32.mrf.mxu2 }
0x11b9   : > { %v7820_v23 = vmul.f32 %v15518_v20, %v15518_v20  ;;  %v7818_v27 = vmul.f32 0.5, %v15515_v6  ;;  %v9670_v6 = vld [vmem:[%s15673_s9 + $0x328] sm:$0xff] }
0x11bb   : > { %v7821_v16 = vmin.f32 %v7820_v23, 16.0 }
0x11bd   : > { %v7822_v17 = vmul.f32 2.1237322e-06, %v7821_v16  ;;  %v7833_v59 = vmul.f32 3.8918573e-05, %v7821_v16 }
0x11bf   : > { %v7823_v56 = vadd.f32 0.00028619796, %v7822_v17  ;;  %v7834_v31 = vadd.f32 0.001143296, %v7833_v59  ;;  %v9671_v17 = vld [vmem:[%s15673_s9 + $0x330] sm:$0xff] }
0x11c1   : > { %v7824_v62 = vmul.f32 %v7823_v56, %v7821_v16  ;;  %v7835_v15 = vmul.f32 %v7834_v31, %v7821_v16 }
0x11c3   : > { %v7836_v53 = vadd.f32 0.014752088, %v7835_v15  ;;  %v7825_v39 = vadd.f32 0.0036580483, %v7824_v62  ;;  %v9668_v15 = vld [vmem:[%s15673_s9 + $0x318] sm:$0xff] }
0x11c5   : > { %v7837_v8 = vmul.f32 %v7836_v53, %v7821_v16  ;;  %v7826_v45 = vmul.f32 %v7825_v39, %v7821_v16 }
0x11c7   : > { %v7838_v52 = vadd.f32 0.112945676, %v7837_v8  ;;  %v7827_v42 = vadd.f32 0.05243302, %v7826_v45  ;;  %v9666_v45 = vld [vmem:[%s15673_s9 + $0x308] sm:$0xff] }
0x11c9   : > { %v7839_v32 = vmul.f32 %v7838_v52, %v7821_v16  ;;  %v7828_v2 = vmul.f32 %v7827_v42, %v7821_v16  ;;  %v9667_v52 = vld [vmem:[%s15673_s9 + $0x310] sm:$0xff] }
0x11cb   : > { %v7840_v51 = vadd.f32 0.4994258, %v7839_v32  ;;  %v7829_v35 = vadd.f32 0.18741608, %v7828_v2  ;;  %v7895_v32 = vld [vmem:[%s15672_s8 + $0x6] sm:$0x1] }
0x11cc   : > { %v9987_v2 = vld [vmem:[%s15675_s11 + $0x18] sm:$0xff] }
0x11cd   : > { %v7841_v40 = vmul.f32 %v7840_v51, %v7821_v16  ;;  %v7830_v63 = vmul.f32 %v7829_v35, %v7821_v16  ;;  %v9984_v35 = vld [vmem:[%s15675_s11] sm:$0xff] }
0x11cf   : > { %v7842_v12 = vadd.f32 1.0, %v7841_v40  ;;  %v7831_v11 = vadd.f32 1.1283791, %v7830_v63  ;;  %v9990_v40 = vld [vmem:[%s15675_s11 + $0x30] sm:$0xff] }
0x11d0   : > { %8046 = vmatpush.bf16.msra.mxu2 %v9990_v40 }
0x11d1   : > { %10165 = vrcp.f32 %v7842_v12  ;;  %v7854_v55 = vand.u32 2147483648, %v7842_v12  ;;  %v7852_v29 = vand.u32 2147483647, %v7842_v12  ;;  %vm7848_vm8 = vweird.f32 %v7842_v12 }
0x11d2   : > { %10167 = vrcp.f32 %v10187_v54  ;;  %v7832_v3 = vmul.f32 %v7831_v11, %v15518_v20  ;;  %v9673_v20 = vld [vmem:[%s15673_s9 + $0x340] sm:$0xff] }
0x11d3   : > { %v7855_v25 = vor.u32 1.1754944e-38, %v7854_v55  ;;  %vm7853_vm14 = vcmp.eq.f32.partialorder %v7852_v29, 8.507059e+37  ;;  %7942 = vmatpush.msrb.mxu3 %v9673_v20 }
0x11d4   : > { %8047 = vmatpush.bf16.msra.mxu2 %v9989_v9 }
0x11d5   : > { %7943 = vmatpush.msrb.mxu3 %v9672_v47 }
0x11d7   : > { %v10166_v58 = vpop.eup %10165  ;;  %7944 = vmatpush.msrb.mxu3 %v9671_v17 }
0x11d8   : > { %v7844_v1 = vmul.f32 %v10166_v58, %v7842_v12  ;;  %vm7849_vm12 = vweird.f32 %v10166_v58  ;;  %v10168_v24 = vpop.eup %10167  ;;  %v9988_v12 = vld [vmem:[%s15675_s11 + $0x20] sm:$0xff] }
0x11d9   : > { %vm7850_vm13 = vmor %vm7848_vm8, %vm7849_vm12  ;;  %v7871_v14 = vmul.f32 2.0, %v10168_v24  ;;  %7945 = vmatpush.msrb.mxu3 %v9670_v6  ;;  %vm7875_vm1 = vweird.f32 %v10168_v24  ;;  %8048 = vmatpush.bf16.msra.mxu2 %v9988_v12 }
0x11da   : > { %v7845_v49 = vsub.f32 1.0, %v7844_v1 }
0x11db   : > { %v7872_v60 = vsub.f32 1.0, %v7871_v14  ;;  %7946 = vmatpush.msrb.mxu3 %v9669_v48 }
0x11dc   : > { %v7846_v22 = vmul.f32 %v10166_v58, %v7845_v49 }
0x11dd   : > { %v7873_v56 = vmul.f32 %v10168_v24, %v7872_v60  ;;  %7947 = vmatpush.msrb.mxu3 %v9668_v15  ;;  %8049 = vmatpush.bf16.msra.mxu2 %v9987_v2 }
0x11de   : > { %v7847_v18 = vadd.f32 %v10166_v58, %v7846_v22 }
0x11df   : > { %v7874_v21 = vadd.f32 %v10168_v24, %v7873_v56  ;;  %7948 = vmatpush.msrb.mxu3 %v9667_v52 }
0x11e0   : > { %v7851_v38 = vsel %vm7850_vm13, %v10166_v58, %v7847_v18 }
0x11e1   : > { %v7856_v61 = vsel %vm7853_vm14, %v7855_v25, %v7851_v38  ;;  %v7876_v43 = vsel %vm7875_vm1, %v10168_v24, %v7874_v21  ;;  %7949 = vmatpush.msrb.mxu3 %v9666_v45  ;;  %8050 = vmatpush.bf16.msra.mxu2 %v9986_v57 }
0x11e2   : > { %v7857_v7 = vmul.f32 %v7856_v61, %v7832_v3  ;;  %v10024_v3 = vld [vmem:[%s15676_s12] ss:$0 sm:$0xff] }
0x11e3   : > { %7950 = vmatpush.msrb.mxu3 %v9665_v5 }
0x11e4   : > { %v9648_v46 = vclamps-f32 %v7857_v7, 1.0 }
0x11e5   : > { %8051 = vmatpush.bf16.msra.mxu2 %v9985_v50 }
0x11e6   : > { %v7860_v23 = vadd.f32 1.0, %v9648_v46 }
0x11e8   : > { %v15599_v16 = vmul.f32 %v7860_v23, %v7818_v27 }
0x11e9   : > { %8052 = vmatpush.bf16.msra.mxu2 %v9984_v35 }
0x11ea   : > { %v7863_v59 = vsel %vm7862_vm15, %v15599_v16, 0.0 }
0x11eb   : > { %v7864_v4 = vrot.slane %v7863_v59, 4 }
0x11ed   : > { %v7865_v31 = vadd.f32 %v7864_v4, %v7863_v59 }
0x11ef   : > { %v7866_v62 = vrot.slane %v7865_v31, 2 }
0x11f1   : > { %v7867_v53 = vadd.f32 %v7866_v62, %v7865_v31 }
0x11f3   : > { %v7868_v39 = vrot.slane %v7867_v53, 1 }
0x11f5   : > { %v7869_v8 = vadd.f32 %v7868_v39, %v7867_v53 }
0x11f7   : > { %v7877_v10 = vmul.f32 %v7876_v43, %v7869_v8 }
0x11f9   : > { %7912 = vmatmul.f32.vlgmr.msra.gmra.mxu1 %v7877_v10 }
0x1276   : > { %v7913_v33 = vpop.f32.mrf.mxu1 }
0x1277   : > { %v7914_v51 = vadd.f32 %v7913_v33, %v7895_v32 }
0x1279   : > { %v7916_v42 = vmax.f32 %v7914_v51, 0.0 }
0x127b   : > { %7951 = vmatmul.f32.vlgmr.msrb.gmra.mxu3 %v7916_v42 }
0x12fe   : > { %v7952_v36 = vpop.f32.mrf.mxu3 }
0x12ff   : > { %v7953_v34 = vadd.f32 %v7952_v36, %v7934_v30 }
0x1301   : > { %v9681_v58 = vmul.f32 -1.442695, %v7953_v34 }
0x1303   : > { %10169 = vpow2.f32 %v9681_v58 }
0x1309   : > { %v10170_v63 = vpop.eup %10169 }
0x130a   : > { %v7958_v1 = vadd.f32 1.0, %v10170_v63 }
0x130c   : > { %10171 = vrcp.f32 %v7958_v1  ;;  %v7970_v55 = vand.u32 2147483648, %v7958_v1  ;;  %v7968_v19 = vand.u32 2147483647, %v7958_v1  ;;  %vm7964_vm2 = vweird.f32 %v7958_v1 }
0x130e   : > { %v7971_v22 = vor.u32 1.1754944e-38, %v7970_v55  ;;  %vm7969_vm4 = vcmp.eq.f32.partialorder %v7968_v19, 8.507059e+37 }
0x1312   : > { %v10172_v28 = vpop.eup %10171 }
0x1313   : > { %v7960_v26 = vmul.f32 %v10172_v28, %v7958_v1  ;;  %vm7965_vm0 = vweird.f32 %v10172_v28 }
0x1314   : > { %vm7966_vm3 = vmor %vm7964_vm2, %vm7965_vm0 }
0x1315   : > { %v7961_v49 = vsub.f32 1.0, %v7960_v26 }
0x1317   : > { %v7962_v54 = vmul.f32 %v10172_v28, %v7961_v49 }
0x1319   : > { %v7963_v11 = vadd.f32 %v10172_v28, %v7962_v54 }
0x131b   : > { %v7967_v29 = vsel %vm7966_vm3, %v10172_v28, %v7963_v11 }
0x131c   : > { %v7972_v37 = vsel %vm7969_vm4, %v7971_v22, %v7967_v29 }
0x131d   : > { %v7974_v18 = vperm.slane %v7972_v37, 0 }
0x131f   : > { %v7975_v25 = vmul.f32 %v7974_v18, %v15599_v16 }
0x1321   : > { %v7976_v0 = vpack.c.bf16 %v7975_v25, %v7975_v25 }
0x1323   : > { %8053 = vmatmul.bf16.vlgmr.msra.gmra.mxu2 %v7976_v0 }
0x13a6   : > { %v8054_v38 = vpop.f32.mrf.mxu2 }
0x13a7   : > { %v8055_v24 = vadd.f32 %v10024_v3, %v8054_v38 }
0x13a9   : > { %8058 = vst [vmem:[%s438_s23] sm:$0x3] %v8055_v24 }
0x13ae   : > { %v8056_v61 = vpop.f32.mrf.mxu2 }
0x13af PF: > { %s23_s25 = sadd.s32 1, %s10179_s25  }
0x13b0   : > { %p20_p4 = scmp.ge.s32.totalorder %s23_s25, 4  }
0x13b2   :  { %22 = sbr.rel (!%p20_p4) target bundleno = 1 (0x1), region = 202 }

</bundles_post_ra>
